<compile_context>
chip_gen: v7x
topology: tpu7x:2x2x1
jax: 0.10.0
libtpu: 0.0.40
codegen_flags: <defaults>
</compile_context>

<pallas_src>
import jax
import jax.numpy as jnp
from jax import lax
from jax.experimental import pallas as pl
from jax.experimental.pallas import tpu as pltpu

# ----- small synthetic CLIP text-encoder config (lane-dense: last dims multiples of 128) -----
VOCAB = 64        # vocab size (last id = EOT, highest token value)
CTX = 8           # context length (sequence length)
WIDTH = 128       # transformer width (d_model)  -> lane-dense activations
HEADS = 4         # attention heads
LAYERS = 2        # transformer layers
EMBED = 128       # output text-feature dim      -> lane-dense kernel output
HEAD_DIM = WIDTH // HEADS
LN_EPS = 1e-5

# Sequences per grid step.  M = SEQ_TILE * CTX = 128 MXU rows (>=128 fills v5e's
# 4x128^2 MXU; bump to 32 for M=256 on v6e/v7x).  VMEM use per step here is ~2 MB,
# far under the default scoped limit; at production widths size TB + set
# pltpu.CompilerParams(vmem_limit_bytes=...) to stay under ~48 MiB for v7x.
SEQ_TILE = 16


def _layernorm(x, g, b):
    mu = jnp.mean(x, axis=-1, keepdims=True)
    var = jnp.mean((x - mu) ** 2, axis=-1, keepdims=True)
    return (x - mu) * lax.rsqrt(var + LN_EPS) * g + b


# ---------------------------------------------------------------------------
# Fused Pallas kernel: whole transformer stack + ln_final + text_projection.
# grid = (B//TB, LAYERS); TB sequences per batch-tile, activations carried in a
# VMEM scratch across the layer axis; per-layer weights streamed by BlockSpec.
# ---------------------------------------------------------------------------
def clip_text_stack_kernel(
    x_ref,                           # [TB, CTX, D] f32   token+pos embeddings (this tile)
    mask_ref,                        # [CTX, CTX]   f32   additive causal mask (0 / -1e30)
    ln1_g_ref, ln1_b_ref,            # [1, D]       f32   (per layer)
    wqkv_ref, bqkv_ref,              # [D, 3D] bf16, [1, 3D] f32
    wo_ref, bo_ref,                  # [D, D]  bf16, [1, D]  f32
    ln2_g_ref, ln2_b_ref,            # [1, D]       f32
    wfc_ref, bfc_ref,                # [D, 4D] bf16, [1, 4D] f32
    wpr_ref, bpr_ref,                # [4D, D] bf16, [1, D]  f32
    lnf_g_ref, lnf_b_ref,            # [1, D]       f32   (shared)
    proj_ref,                        # [D, E]  bf16       (shared)
    o_ref,                           # [TB, CTX, E] bf16  output (written on last layer)
    x_sc,                            # VMEM [M, D]  f32   resident activations
    qkv_sc,                          # VMEM [M, 3D] bf16  staged qkv (ref-sliced per head)
    ctx_sc,                          # VMEM [M, D]  bf16  per-head context, column slots
):
    layer = pl.program_id(1)
    TB, L, D = x_ref.shape
    M = TB * L

    @pl.when(layer == 0)
    def _():                          # load this tile's activations once
        x_sc[...] = x_ref[...].reshape(M, D)

    x = x_sc[...]                     # [M, D] f32

    # ---------------- multi-head self-attention (pre-LN, causal) -------------
    h = _layernorm(x, ln1_g_ref[...], ln1_b_ref[...]).astype(jnp.bfloat16)
    # one big lane-dense QKV matmul (1/sqrt(head_dim) folded into W_q/b_q at init)
    qkv = jnp.dot(h, wqkv_ref[...], preferred_element_type=jnp.float32) + bqkv_ref[...]
    qkv_sc[...] = qkv.astype(jnp.bfloat16)          # stage -> per-head slices are ref slices

    mask = mask_ref[...][None]                      # [1, CTX, CTX] additive, fp32

    for hh in range(HEADS):                         # static unroll (HEADS small)
        lo = hh * HEAD_DIM
        q = qkv_sc[:, lo:lo + HEAD_DIM].reshape(TB, L, HEAD_DIM)                      # bf16
        k = qkv_sc[:, WIDTH + lo:WIDTH + lo + HEAD_DIM].reshape(TB, L, HEAD_DIM)
        v = qkv_sc[:, 2 * WIDTH + lo:2 * WIDTH + lo + HEAD_DIM].reshape(TB, L, HEAD_DIM)
        # per-sequence logits, contraction over head_dim (no materialized k.T)
        logits = jnp.einsum('bqd,bkd->bqk', q, k,
                            preferred_element_type=jnp.float32)                       # [TB,L,L]
        logits = logits + mask                      # fp32 mask add (keep -1e30 in fp32)
        logits = logits - jnp.max(logits, axis=-1, keepdims=True)
        p = jnp.exp(logits)
        # approx reciprocal on the EUP: ~1e-3 relative deviation vs exact softmax
        p = p * pl.reciprocal(jnp.sum(p, axis=-1, keepdims=True), approx=True)
        ctx_h = jnp.einsum('bqk,bkd->bqd', p.astype(jnp.bfloat16), v,
                           preferred_element_type=jnp.float32)                        # [TB,L,Hd]
        # drop this head's context into its 32-lane column slot of the scratch
        ctx_sc[:, lo:lo + HEAD_DIM] = ctx_h.reshape(M, HEAD_DIM).astype(jnp.bfloat16)

    # single full-depth output projection: [M,128] x [128,128]
    attn = jnp.dot(ctx_sc[...], wo_ref[...],
                   preferred_element_type=jnp.float32) + bo_ref[...]
    x = x + attn

    # ---------------- MLP (QuickGELU) ----------------------------------------
    h = _layernorm(x, ln2_g_ref[...], ln2_b_ref[...]).astype(jnp.bfloat16)
    h = jnp.dot(h, wfc_ref[...], preferred_element_type=jnp.float32) + bfc_ref[...]
    h = h * jax.nn.sigmoid(1.702 * h)               # QuickGELU (fp32)
    h = jnp.dot(h.astype(jnp.bfloat16), wpr_ref[...],
                preferred_element_type=jnp.float32) + bpr_ref[...]
    x = x + h

    x_sc[...] = x                                    # carry to next layer

    # ---------------- last layer: ln_final + text projection -----------------
    @pl.when(layer == pl.num_programs(1) - 1)
    def _():
        hf = _layernorm(x, lnf_g_ref[...], lnf_b_ref[...]).astype(jnp.bfloat16)
        out = jnp.dot(hf, proj_ref[...], preferred_element_type=jnp.float32)
        o_ref[...] = out.reshape(TB, L, EMBED).astype(o_ref.dtype)


# ---------------------------------------------------------------------------
# Wrapper: one pallas_call for the whole stack.
# ---------------------------------------------------------------------------
def _run_stack(x, mask, params):
    B, L, D = x.shape
    num_layers = params["wqkv"].shape[0]
    TB = SEQ_TILE
    assert B % TB == 0, "batch must be padded to a multiple of SEQ_TILE"
    M = TB * L

    def wspec(shape):   # per-layer (stacked) weight: leading layer axis squeezed
        return pl.BlockSpec((None,) + shape, lambda b, l: (l,) + (0,) * len(shape))

    def cspec(shape):   # shared (layer-independent) param
        return pl.BlockSpec(shape, lambda b, l: (0,) * len(shape))

    in_specs = [
        pl.BlockSpec((TB, L, D), lambda b, l: (b, 0, 0)),     # x: TB sequences per tile
        cspec((L, L)),                                        # causal mask (precomputed)
        wspec((1, D)), wspec((1, D)),                         # ln_1
        wspec((D, 3 * D)), wspec((1, 3 * D)),                 # attn in_proj (qkv)
        wspec((D, D)), wspec((1, D)),                         # attn out_proj
        wspec((1, D)), wspec((1, D)),                         # ln_2
        wspec((D, 4 * D)), wspec((1, 4 * D)),                 # mlp c_fc
        wspec((4 * D, D)), wspec((1, D)),                     # mlp c_proj
        cspec((1, D)), cspec((1, D)),                         # ln_final
        cspec((D, EMBED)),                                    # text_projection
    ]
    out_spec = pl.BlockSpec((TB, L, EMBED), lambda b, l: (b, 0, 0))

    return pl.pallas_call(
        clip_text_stack_kernel,
        out_shape=jax.ShapeDtypeStruct((B, L, EMBED), jnp.bfloat16),   # bf16 writeback
        grid=(B // TB, num_layers),
        in_specs=in_specs,
        out_specs=out_spec,
        scratch_shapes=[
            pltpu.VMEM((M, D), jnp.float32),        # resident activations
            pltpu.VMEM((M, 3 * D), jnp.bfloat16),   # staged qkv
            pltpu.VMEM((M, D), jnp.bfloat16),       # per-head context slab
        ],
        compiler_params=pltpu.CompilerParams(
            dimension_semantics=("parallel", "arbitrary")),
    )(x, mask,
      params["ln1_g"], params["ln1_b"],
      params["wqkv"], params["bqkv"],
      params["wo"], params["bo"],
      params["ln2_g"], params["ln2_b"],
      params["wfc"], params["bfc"],
      params["wpr"], params["bpr"],
      params["lnf_g"], params["lnf_b"],
      params["text_projection"])


def encode_text(params, text):
    """TextCLIP.forward(text) == model.encode_text(text). text: int32 [B, L]."""
    B, L = text.shape
    # token embedding gather + positional embedding (XLA glue)
    x = params["token_embedding"][text] + params["positional_embedding"][None]  # [B, L, D]
    # pad batch up to a multiple of the sequence tile (sliced off after the kernel)
    Bp = ((B + SEQ_TILE - 1) // SEQ_TILE) * SEQ_TILE
    if Bp != B:
        x = jnp.pad(x, ((0, Bp - B), (0, 0), (0, 0)))
    # precomputed additive causal mask (0 / -1e30), fp32
    row = jnp.arange(L)[:, None]
    col = jnp.arange(L)[None, :]
    mask = jnp.where(col <= row, 0.0, -1e30).astype(jnp.float32)                 # [L, L]
    # fused transformer stack + ln_final + text_projection (single Pallas kernel)
    feats_all = _run_stack(x, mask, params)[:B]                                  # [B, L, E] bf16
    # EOT token = highest token id in each sequence (CLIP convention); gather in XLA.
    eot = jnp.argmax(text, axis=-1)                                              # [B]
    return feats_all[jnp.arange(B), eot].astype(jnp.float32)                     # [B, E] f32


# ---------------------------------------------------------------------------
# Deterministic parameter init (synthetic, shapes implied by CLIP encode_text).
# Per-layer weights are stacked along a leading layer axis; large matmul
# weights are stored bf16 (f32 accumulation in-kernel), LN params / biases f32.
# ---------------------------------------------------------------------------
def init_params(key):
    ks = iter(jax.random.split(key, 16))

    def dense(shape, scale, dtype=jnp.float32):
        return (scale * jax.random.normal(next(ks), shape)).astype(dtype)

    # fold the attention scale 1/sqrt(head_dim) into W_q (and b_q; zeros here but the
    # fold must be kept when loading real checkpoints)
    q_scale = HEAD_DIM ** -0.5
    wqkv = dense((LAYERS, WIDTH, 3 * WIDTH), WIDTH ** -0.5)
    wqkv = wqkv.at[:, :, :WIDTH].multiply(q_scale)
    bqkv = jnp.zeros((LAYERS, 1, 3 * WIDTH), jnp.float32)
    bqkv = bqkv.at[:, :, :WIDTH].multiply(q_scale)      # no-op for zeros; kept for clarity

    params = {
        "token_embedding": dense((VOCAB, WIDTH), 0.02),
        "positional_embedding": dense((CTX, WIDTH), 0.01),
        "ln1_g": jnp.ones((LAYERS, 1, WIDTH), jnp.float32),
        "ln1_b": jnp.zeros((LAYERS, 1, WIDTH), jnp.float32),
        "wqkv": wqkv.astype(jnp.bfloat16),
        "bqkv": bqkv,
        "wo": dense((LAYERS, WIDTH, WIDTH), WIDTH ** -0.5, jnp.bfloat16),
        "bo": jnp.zeros((LAYERS, 1, WIDTH), jnp.float32),
        "ln2_g": jnp.ones((LAYERS, 1, WIDTH), jnp.float32),
        "ln2_b": jnp.zeros((LAYERS, 1, WIDTH), jnp.float32),
        "wfc": dense((LAYERS, WIDTH, 4 * WIDTH), WIDTH ** -0.5, jnp.bfloat16),
        "bfc": jnp.zeros((LAYERS, 1, 4 * WIDTH), jnp.float32),
        "wpr": dense((LAYERS, 4 * WIDTH, WIDTH), (4 * WIDTH) ** -0.5, jnp.bfloat16),
        "bpr": jnp.zeros((LAYERS, 1, WIDTH), jnp.float32),
        "lnf_g": jnp.ones((1, WIDTH), jnp.float32),
        "lnf_b": jnp.zeros((1, WIDTH), jnp.float32),
        "text_projection": dense((WIDTH, EMBED), WIDTH ** -0.5, jnp.bfloat16),
    }
    return params


if __name__ == "__main__":
    key = jax.random.PRNGKey(0)
    pkey, tkey = jax.random.split(key)
    params = init_params(pkey)

    # synthetic "tokenized" text: [B, L] int32, SOT at position 0, EOT (= highest
    # token id, VOCAB-1) at the last position so argmax picks it, as in CLIP.
    B = 32                                            # 2 batch tiles of SEQ_TILE=16
    body = jax.random.randint(tkey, (B, CTX), 1, VOCAB - 2)
    text = body.at[:, 0].set(VOCAB - 2).at[:, -1].set(VOCAB - 1).astype(jnp.int32)

    feats = jax.jit(encode_text)(params, text)
    feats = jax.block_until_ready(feats)
    assert feats.shape == (B, EMBED) and feats.dtype == jnp.float32
    assert bool(jnp.all(jnp.isfinite(feats)))
    print("KERNEL_OK")
</pallas_src>

<mosaic_0001>
module attributes {stable_mosaic.version = 11 : i64} {
  func.func @clip_text_stack_kernel(%arg0: i32, %arg1: i32, %arg2: memref<16x8x128xf32, #tpu.memory_space<vmem>>, %arg3: memref<8x8xf32, #tpu.memory_space<vmem>>, %arg4: memref<1x1x128xf32, #tpu.memory_space<vmem>>, %arg5: memref<1x1x128xf32, #tpu.memory_space<vmem>>, %arg6: memref<1x128x384xbf16, #tpu.memory_space<vmem>>, %arg7: memref<1x1x384xf32, #tpu.memory_space<vmem>>, %arg8: memref<1x128x128xbf16, #tpu.memory_space<vmem>>, %arg9: memref<1x1x128xf32, #tpu.memory_space<vmem>>, %arg10: memref<1x1x128xf32, #tpu.memory_space<vmem>>, %arg11: memref<1x1x128xf32, #tpu.memory_space<vmem>>, %arg12: memref<1x128x512xbf16, #tpu.memory_space<vmem>>, %arg13: memref<1x1x512xf32, #tpu.memory_space<vmem>>, %arg14: memref<1x512x128xbf16, #tpu.memory_space<vmem>>, %arg15: memref<1x1x128xf32, #tpu.memory_space<vmem>>, %arg16: memref<1x128xf32, #tpu.memory_space<vmem>>, %arg17: memref<1x128xf32, #tpu.memory_space<vmem>>, %arg18: memref<128x128xbf16, #tpu.memory_space<vmem>>, %arg19: memref<16x8x128xbf16, #tpu.memory_space<vmem>>, %arg20: memref<128x128xf32, #tpu.memory_space<vmem>>, %arg21: memref<128x384xbf16, #tpu.memory_space<vmem>>, %arg22: memref<128x128xbf16, #tpu.memory_space<vmem>>) attributes {dimension_semantics = [#tpu.dimension_semantics<parallel>, #tpu.dimension_semantics<arbitrary>], iteration_bounds = array<i64: 2, 2>, scalar_prefetch = 0 : i64, scratch_operands = 3 : i64, tpu.core_type = #tpu.core_type<tc>, window_params = [{transform_indices = @transform_0, window_bounds = array<i64: 16, 8, 128>}, {pipeline_mode = #tpu.pipeline_mode<synchronous>, transform_indices = @transform_1, window_bounds = array<i64: 8, 8>}, {transform_indices = @transform_2, window_bounds = array<i64: 1, 1, 128>}, {transform_indices = @transform_3, window_bounds = array<i64: 1, 1, 128>}, {transform_indices = @transform_4, window_bounds = array<i64: 1, 128, 384>}, {transform_indices = @transform_5, window_bounds = array<i64: 1, 1, 384>}, {transform_indices = @transform_6, window_bounds = array<i64: 1, 128, 128>}, {transform_indices = @transform_7, window_bounds = array<i64: 1, 1, 128>}, {transform_indices = @transform_8, window_bounds = array<i64: 1, 1, 128>}, {transform_indices = @transform_9, window_bounds = array<i64: 1, 1, 128>}, {transform_indices = @transform_10, window_bounds = array<i64: 1, 128, 512>}, {transform_indices = @transform_11, window_bounds = array<i64: 1, 1, 512>}, {transform_indices = @transform_12, window_bounds = array<i64: 1, 512, 128>}, {transform_indices = @transform_13, window_bounds = array<i64: 1, 1, 128>}, {pipeline_mode = #tpu.pipeline_mode<synchronous>, transform_indices = @transform_14, window_bounds = array<i64: 1, 128>}, {pipeline_mode = #tpu.pipeline_mode<synchronous>, transform_indices = @transform_15, window_bounds = array<i64: 1, 128>}, {pipeline_mode = #tpu.pipeline_mode<synchronous>, transform_indices = @transform_16, window_bounds = array<i64: 128, 128>}, {transform_indices = @transform_17, window_bounds = array<i64: 16, 8, 128>}]} {
    %c0_i32 = arith.constant 0 : i32
    %0 = arith.cmpi eq, %arg1, %c0_i32 : i32
    %1 = arith.extui %0 : i1 to i32
    %c0_i32_0 = arith.constant 0 : i32
    %2 = arith.cmpi ne, %1, %c0_i32_0 : i32
    scf.if %2 {
      %c0_99 = arith.constant 0 : index
      %c0_100 = arith.constant 0 : index
      %c0_101 = arith.constant 0 : index
      %202 = vector.load %arg2[%c0_99, %c0_100, %c0_101] : memref<16x8x128xf32, #tpu.memory_space<vmem>>, vector<16x8x128xf32>
      %203 = vector.shape_cast %202 : vector<16x8x128xf32> to vector<128x128xf32>
      %c0_102 = arith.constant 0 : index
      %c0_103 = arith.constant 0 : index
      %204 = vector.load %arg20[%c0_102, %c0_103] : memref<128x128xf32, #tpu.memory_space<vmem>>, vector<128x128xf32>
      tpu.vector_store %arg20[%c0_102, %c0_103], %203 {strides = array<i32>} : memref<128x128xf32, #tpu.memory_space<vmem>>, vector<128x128xf32>,
    } else {
    }
    %c0 = arith.constant 0 : index
    %c0_1 = arith.constant 0 : index
    %3 = vector.load %arg20[%c0, %c0_1] : memref<128x128xf32, #tpu.memory_space<vmem>>, vector<128x128xf32>
    %c0_2 = arith.constant 0 : index
    %c0_3 = arith.constant 0 : index
    %c0_4 = arith.constant 0 : index
    %4 = vector.load %arg4[%c0_2, %c0_3, %c0_4] : memref<1x1x128xf32, #tpu.memory_space<vmem>>, vector<1x1x128xf32>
    %5 = vector.shape_cast %4 : vector<1x1x128xf32> to vector<1x128xf32>
    %c0_5 = arith.constant 0 : index
    %c0_6 = arith.constant 0 : index
    %c0_7 = arith.constant 0 : index
    %6 = vector.load %arg5[%c0_5, %c0_6, %c0_7] : memref<1x1x128xf32, #tpu.memory_space<vmem>>, vector<1x1x128xf32>
    %7 = vector.shape_cast %6 : vector<1x1x128xf32> to vector<1x128xf32>
    %cst = arith.constant dense<0.000000e+00> : vector<128xf32>
    %8 = vector.multi_reduction <add>, %3, %cst [1] : vector<128x128xf32> to vector<128xf32>
    %9 = vector.shape_cast %8 : vector<128xf32> to vector<128x1xf32>
    %cst_8 = arith.constant 1.280000e+02 : f32
    %10 = vector.broadcast %cst_8 : f32 to vector<128x1xf32>
    %11 = arith.divf %9, %10 : vector<128x1xf32>
    %12 = vector.broadcast %11 : vector<128x1xf32> to vector<128x128xf32>
    %13 = arith.subf %3, %12 : vector<128x128xf32>
    %14 = arith.mulf %13, %13 : vector<128x128xf32>
    %cst_9 = arith.constant dense<0.000000e+00> : vector<128xf32>
    %15 = vector.multi_reduction <add>, %14, %cst_9 [1] : vector<128x128xf32> to vector<128xf32>
    %16 = vector.shape_cast %15 : vector<128xf32> to vector<128x1xf32>
    %cst_10 = arith.constant 1.280000e+02 : f32
    %17 = vector.broadcast %cst_10 : f32 to vector<128x1xf32>
    %18 = arith.divf %16, %17 : vector<128x1xf32>
    %19 = vector.broadcast %11 : vector<128x1xf32> to vector<128x128xf32>
    %20 = arith.subf %3, %19 : vector<128x128xf32>
    %cst_11 = arith.constant 9.99999974E-6 : f32
    %21 = vector.broadcast %cst_11 : f32 to vector<128x1xf32>
    %22 = arith.addf %18, %21 : vector<128x1xf32>
    %23 = math.rsqrt %22 : vector<128x1xf32>
    %24 = vector.broadcast %23 : vector<128x1xf32> to vector<128x128xf32>
    %25 = arith.mulf %20, %24 : vector<128x128xf32>
    %26 = vector.broadcast %5 : vector<1x128xf32> to vector<128x128xf32>
    %27 = arith.mulf %25, %26 : vector<128x128xf32>
    %28 = vector.broadcast %7 : vector<1x128xf32> to vector<128x128xf32>
    %29 = arith.addf %27, %28 : vector<128x128xf32>
    %30 = arith.truncf %29 : vector<128x128xf32> to vector<128x128xbf16>
    %c0_12 = arith.constant 0 : index
    %c0_13 = arith.constant 0 : index
    %c0_14 = arith.constant 0 : index
    %31 = vector.load %arg6[%c0_12, %c0_13, %c0_14] : memref<1x128x384xbf16, #tpu.memory_space<vmem>>, vector<1x128x384xbf16>
    %32 = vector.shape_cast %31 : vector<1x128x384xbf16> to vector<128x384xbf16>
    %cst_15 = arith.constant dense<0.000000e+00> : vector<128x384xf32>
    %33 = tpu.matmul %30, %32, %cst_15 {dimension_numbers = #tpu.dot_dimension_numbers<[1], [0], [0], [1], [0, 0, 1, 1], [], []>} : vector<128x128xbf16>, vector<128x384xbf16>, vector<128x384xf32> -> vector<128x384xf32>
    %c0_16 = arith.constant 0 : index
    %c0_17 = arith.constant 0 : index
    %c0_18 = arith.constant 0 : index
    %34 = vector.load %arg7[%c0_16, %c0_17, %c0_18] : memref<1x1x384xf32, #tpu.memory_space<vmem>>, vector<1x1x384xf32>
    %35 = vector.shape_cast %34 : vector<1x1x384xf32> to vector<1x384xf32>
    %36 = vector.broadcast %35 : vector<1x384xf32> to vector<128x384xf32>
    %37 = arith.addf %33, %36 : vector<128x384xf32>
    %38 = arith.truncf %37 : vector<128x384xf32> to vector<128x384xbf16>
    %c0_19 = arith.constant 0 : index
    %c0_20 = arith.constant 0 : index
    %39 = vector.load %arg21[%c0_19, %c0_20] : memref<128x384xbf16, #tpu.memory_space<vmem>>, vector<128x384xbf16>
    tpu.vector_store %arg21[%c0_19, %c0_20], %38 {strides = array<i32>} : memref<128x384xbf16, #tpu.memory_space<vmem>>, vector<128x384xbf16>,
    %c0_21 = arith.constant 0 : index
    %c0_22 = arith.constant 0 : index
    %40 = vector.load %arg3[%c0_21, %c0_22] : memref<8x8xf32, #tpu.memory_space<vmem>>, vector<8x8xf32>
    %41 = vector.shape_cast %40 : vector<8x8xf32> to vector<1x8x8xf32>
    %c0_23 = arith.constant 0 : index
    %c0_24 = arith.constant 0 : index
    %42 = vector.load %arg21[%c0_23, %c0_24] : memref<128x384xbf16, #tpu.memory_space<vmem>>, vector<128x32xbf16>
    %43 = vector.shape_cast %42 : vector<128x32xbf16> to vector<16x8x32xbf16>
    %c0_25 = arith.constant 0 : index
    %c128 = arith.constant 128 : index
    %44 = vector.load %arg21[%c0_25, %c128] : memref<128x384xbf16, #tpu.memory_space<vmem>>, vector<128x32xbf16>
    %45 = vector.shape_cast %44 : vector<128x32xbf16> to vector<16x8x32xbf16>
    %c0_26 = arith.constant 0 : index
    %c256 = arith.constant 256 : index
    %46 = vector.load %arg21[%c0_26, %c256] : memref<128x384xbf16, #tpu.memory_space<vmem>>, vector<128x32xbf16>
    %47 = vector.shape_cast %46 : vector<128x32xbf16> to vector<16x8x32xbf16>
    "tpu.trace_start"() <{level = 10 : i32, message = "bqd,bkd->bqk"}> : () -> ()
    %cst_27 = arith.constant dense<0.000000e+00> : vector<16x8x8xf32>
    %48 = tpu.matmul %43, %45, %cst_27 {dimension_numbers = #tpu.dot_dimension_numbers<[2], [2], [1], [1], [0, 0, 0, 1, 1, 1], [0], [0]>} : vector<16x8x32xbf16>, vector<16x8x32xbf16>, vector<16x8x8xf32> -> vector<16x8x8xf32>
    "tpu.trace_stop"() : () -> ()
    %49 = vector.broadcast %41 : vector<1x8x8xf32> to vector<16x8x8xf32>
    %50 = arith.addf %48, %49 : vector<16x8x8xf32>
    %cst_28 = arith.constant dense<0xFF800000> : vector<16x8xf32>
    %51 = vector.multi_reduction <maximumf>, %50, %cst_28 [2] : vector<16x8x8xf32> to vector<16x8xf32>
    %52 = vector.shape_cast %51 : vector<16x8xf32> to vector<16x8x1xf32>
    %53 = vector.broadcast %52 : vector<16x8x1xf32> to vector<16x8x8xf32>
    %54 = arith.subf %50, %53 : vector<16x8x8xf32>
    %55 = math.exp %54 : vector<16x8x8xf32>
    %cst_29 = arith.constant dense<0.000000e+00> : vector<16x8xf32>
    %56 = vector.multi_reduction <add>, %55, %cst_29 [2] : vector<16x8x8xf32> to vector<16x8xf32>
    %57 = vector.shape_cast %56 : vector<16x8xf32> to vector<16x8x1xf32>
    %58 = tpu.reciprocal %57 {approx = true} : vector<16x8x1xf32> -> vector<16x8x1xf32>
    %59 = vector.broadcast %58 : vector<16x8x1xf32> to vector<16x8x8xf32>
    %60 = arith.mulf %55, %59 : vector<16x8x8xf32>
    %61 = arith.truncf %60 : vector<16x8x8xf32> to vector<16x8x8xbf16>
    "tpu.trace_start"() <{level = 10 : i32, message = "bqk,bkd->bqd"}> : () -> ()
    %cst_30 = arith.constant dense<0.000000e+00> : vector<16x8x32xf32>
    %62 = tpu.matmul %61, %47, %cst_30 {dimension_numbers = #tpu.dot_dimension_numbers<[2], [1], [1], [2], [0, 0, 0, 1, 1, 2], [0], [0]>} : vector<16x8x8xbf16>, vector<16x8x32xbf16>, vector<16x8x32xf32> -> vector<16x8x32xf32>
    "tpu.trace_stop"() : () -> ()
    %63 = vector.shape_cast %62 : vector<16x8x32xf32> to vector<128x32xf32>
    %64 = arith.truncf %63 : vector<128x32xf32> to vector<128x32xbf16>
    %c0_31 = arith.constant 0 : index
    %c0_32 = arith.constant 0 : index
    %65 = vector.load %arg22[%c0_31, %c0_32] : memref<128x128xbf16, #tpu.memory_space<vmem>>, vector<128x32xbf16>
    tpu.vector_store %arg22[%c0_31, %c0_32], %64 {strides = array<i32>} : memref<128x128xbf16, #tpu.memory_space<vmem>>, vector<128x32xbf16>,
    %c0_33 = arith.constant 0 : index
    %c32 = arith.constant 32 : index
    %66 = vector.load %arg21[%c0_33, %c32] : memref<128x384xbf16, #tpu.memory_space<vmem>>, vector<128x32xbf16>
    %67 = vector.shape_cast %66 : vector<128x32xbf16> to vector<16x8x32xbf16>
    %c0_34 = arith.constant 0 : index
    %c160 = arith.constant 160 : index
    %68 = vector.load %arg21[%c0_34, %c160] : memref<128x384xbf16, #tpu.memory_space<vmem>>, vector<128x32xbf16>
    %69 = vector.shape_cast %68 : vector<128x32xbf16> to vector<16x8x32xbf16>
    %c0_35 = arith.constant 0 : index
    %c288 = arith.constant 288 : index
    %70 = vector.load %arg21[%c0_35, %c288] : memref<128x384xbf16, #tpu.memory_space<vmem>>, vector<128x32xbf16>
    %71 = vector.shape_cast %70 : vector<128x32xbf16> to vector<16x8x32xbf16>
    "tpu.trace_start"() <{level = 10 : i32, message = "bqd,bkd->bqk"}> : () -> ()
    %cst_36 = arith.constant dense<0.000000e+00> : vector<16x8x8xf32>
    %72 = tpu.matmul %67, %69, %cst_36 {dimension_numbers = #tpu.dot_dimension_numbers<[2], [2], [1], [1], [0, 0, 0, 1, 1, 1], [0], [0]>} : vector<16x8x32xbf16>, vector<16x8x32xbf16>, vector<16x8x8xf32> -> vector<16x8x8xf32>
    "tpu.trace_stop"() : () -> ()
    %73 = vector.broadcast %41 : vector<1x8x8xf32> to vector<16x8x8xf32>
    %74 = arith.addf %72, %73 : vector<16x8x8xf32>
    %cst_37 = arith.constant dense<0xFF800000> : vector<16x8xf32>
    %75 = vector.multi_reduction <maximumf>, %74, %cst_37 [2] : vector<16x8x8xf32> to vector<16x8xf32>
    %76 = vector.shape_cast %75 : vector<16x8xf32> to vector<16x8x1xf32>
    %77 = vector.broadcast %76 : vector<16x8x1xf32> to vector<16x8x8xf32>
    %78 = arith.subf %74, %77 : vector<16x8x8xf32>
    %79 = math.exp %78 : vector<16x8x8xf32>
    %cst_38 = arith.constant dense<0.000000e+00> : vector<16x8xf32>
    %80 = vector.multi_reduction <add>, %79, %cst_38 [2] : vector<16x8x8xf32> to vector<16x8xf32>
    %81 = vector.shape_cast %80 : vector<16x8xf32> to vector<16x8x1xf32>
    %82 = tpu.reciprocal %81 {approx = true} : vector<16x8x1xf32> -> vector<16x8x1xf32>
    %83 = vector.broadcast %82 : vector<16x8x1xf32> to vector<16x8x8xf32>
    %84 = arith.mulf %79, %83 : vector<16x8x8xf32>
    %85 = arith.truncf %84 : vector<16x8x8xf32> to vector<16x8x8xbf16>
    "tpu.trace_start"() <{level = 10 : i32, message = "bqk,bkd->bqd"}> : () -> ()
    %cst_39 = arith.constant dense<0.000000e+00> : vector<16x8x32xf32>
    %86 = tpu.matmul %85, %71, %cst_39 {dimension_numbers = #tpu.dot_dimension_numbers<[2], [1], [1], [2], [0, 0, 0, 1, 1, 2], [0], [0]>} : vector<16x8x8xbf16>, vector<16x8x32xbf16>, vector<16x8x32xf32> -> vector<16x8x32xf32>
    "tpu.trace_stop"() : () -> ()
    %87 = vector.shape_cast %86 : vector<16x8x32xf32> to vector<128x32xf32>
    %88 = arith.truncf %87 : vector<128x32xf32> to vector<128x32xbf16>
    %c0_40 = arith.constant 0 : index
    %c32_41 = arith.constant 32 : index
    %89 = vector.load %arg22[%c0_40, %c32_41] : memref<128x128xbf16, #tpu.memory_space<vmem>>, vector<128x32xbf16>
    tpu.vector_store %arg22[%c0_40, %c32_41], %88 {strides = array<i32>} : memref<128x128xbf16, #tpu.memory_space<vmem>>, vector<128x32xbf16>,
    %c0_42 = arith.constant 0 : index
    %c64 = arith.constant 64 : index
    %90 = vector.load %arg21[%c0_42, %c64] : memref<128x384xbf16, #tpu.memory_space<vmem>>, vector<128x32xbf16>
    %91 = vector.shape_cast %90 : vector<128x32xbf16> to vector<16x8x32xbf16>
    %c0_43 = arith.constant 0 : index
    %c192 = arith.constant 192 : index
    %92 = vector.load %arg21[%c0_43, %c192] : memref<128x384xbf16, #tpu.memory_space<vmem>>, vector<128x32xbf16>
    %93 = vector.shape_cast %92 : vector<128x32xbf16> to vector<16x8x32xbf16>
    %c0_44 = arith.constant 0 : index
    %c320 = arith.constant 320 : index
    %94 = vector.load %arg21[%c0_44, %c320] : memref<128x384xbf16, #tpu.memory_space<vmem>>, vector<128x32xbf16>
    %95 = vector.shape_cast %94 : vector<128x32xbf16> to vector<16x8x32xbf16>
    "tpu.trace_start"() <{level = 10 : i32, message = "bqd,bkd->bqk"}> : () -> ()
    %cst_45 = arith.constant dense<0.000000e+00> : vector<16x8x8xf32>
    %96 = tpu.matmul %91, %93, %cst_45 {dimension_numbers = #tpu.dot_dimension_numbers<[2], [2], [1], [1], [0, 0, 0, 1, 1, 1], [0], [0]>} : vector<16x8x32xbf16>, vector<16x8x32xbf16>, vector<16x8x8xf32> -> vector<16x8x8xf32>
    "tpu.trace_stop"() : () -> ()
    %97 = vector.broadcast %41 : vector<1x8x8xf32> to vector<16x8x8xf32>
    %98 = arith.addf %96, %97 : vector<16x8x8xf32>
    %cst_46 = arith.constant dense<0xFF800000> : vector<16x8xf32>
    %99 = vector.multi_reduction <maximumf>, %98, %cst_46 [2] : vector<16x8x8xf32> to vector<16x8xf32>
    %100 = vector.shape_cast %99 : vector<16x8xf32> to vector<16x8x1xf32>
    %101 = vector.broadcast %100 : vector<16x8x1xf32> to vector<16x8x8xf32>
    %102 = arith.subf %98, %101 : vector<16x8x8xf32>
    %103 = math.exp %102 : vector<16x8x8xf32>
    %cst_47 = arith.constant dense<0.000000e+00> : vector<16x8xf32>
    %104 = vector.multi_reduction <add>, %103, %cst_47 [2] : vector<16x8x8xf32> to vector<16x8xf32>
    %105 = vector.shape_cast %104 : vector<16x8xf32> to vector<16x8x1xf32>
    %106 = tpu.reciprocal %105 {approx = true} : vector<16x8x1xf32> -> vector<16x8x1xf32>
    %107 = vector.broadcast %106 : vector<16x8x1xf32> to vector<16x8x8xf32>
    %108 = arith.mulf %103, %107 : vector<16x8x8xf32>
    %109 = arith.truncf %108 : vector<16x8x8xf32> to vector<16x8x8xbf16>
    "tpu.trace_start"() <{level = 10 : i32, message = "bqk,bkd->bqd"}> : () -> ()
    %cst_48 = arith.constant dense<0.000000e+00> : vector<16x8x32xf32>
    %110 = tpu.matmul %109, %95, %cst_48 {dimension_numbers = #tpu.dot_dimension_numbers<[2], [1], [1], [2], [0, 0, 0, 1, 1, 2], [0], [0]>} : vector<16x8x8xbf16>, vector<16x8x32xbf16>, vector<16x8x32xf32> -> vector<16x8x32xf32>
    "tpu.trace_stop"() : () -> ()
    %111 = vector.shape_cast %110 : vector<16x8x32xf32> to vector<128x32xf32>
    %112 = arith.truncf %111 : vector<128x32xf32> to vector<128x32xbf16>
    %c0_49 = arith.constant 0 : index
    %c64_50 = arith.constant 64 : index
    %113 = vector.load %arg22[%c0_49, %c64_50] : memref<128x128xbf16, #tpu.memory_space<vmem>>, vector<128x32xbf16>
    tpu.vector_store %arg22[%c0_49, %c64_50], %112 {strides = array<i32>} : memref<128x128xbf16, #tpu.memory_space<vmem>>, vector<128x32xbf16>,
    %c0_51 = arith.constant 0 : index
    %c96 = arith.constant 96 : index
    %114 = vector.load %arg21[%c0_51, %c96] : memref<128x384xbf16, #tpu.memory_space<vmem>>, vector<128x32xbf16>
    %115 = vector.shape_cast %114 : vector<128x32xbf16> to vector<16x8x32xbf16>
    %c0_52 = arith.constant 0 : index
    %c224 = arith.constant 224 : index
    %116 = vector.load %arg21[%c0_52, %c224] : memref<128x384xbf16, #tpu.memory_space<vmem>>, vector<128x32xbf16>
    %117 = vector.shape_cast %116 : vector<128x32xbf16> to vector<16x8x32xbf16>
    %c0_53 = arith.constant 0 : index
    %c352 = arith.constant 352 : index
    %118 = vector.load %arg21[%c0_53, %c352] : memref<128x384xbf16, #tpu.memory_space<vmem>>, vector<128x32xbf16>
    %119 = vector.shape_cast %118 : vector<128x32xbf16> to vector<16x8x32xbf16>
    "tpu.trace_start"() <{level = 10 : i32, message = "bqd,bkd->bqk"}> : () -> ()
    %cst_54 = arith.constant dense<0.000000e+00> : vector<16x8x8xf32>
    %120 = tpu.matmul %115, %117, %cst_54 {dimension_numbers = #tpu.dot_dimension_numbers<[2], [2], [1], [1], [0, 0, 0, 1, 1, 1], [0], [0]>} : vector<16x8x32xbf16>, vector<16x8x32xbf16>, vector<16x8x8xf32> -> vector<16x8x8xf32>
    "tpu.trace_stop"() : () -> ()
    %121 = vector.broadcast %41 : vector<1x8x8xf32> to vector<16x8x8xf32>
    %122 = arith.addf %120, %121 : vector<16x8x8xf32>
    %cst_55 = arith.constant dense<0xFF800000> : vector<16x8xf32>
    %123 = vector.multi_reduction <maximumf>, %122, %cst_55 [2] : vector<16x8x8xf32> to vector<16x8xf32>
    %124 = vector.shape_cast %123 : vector<16x8xf32> to vector<16x8x1xf32>
    %125 = vector.broadcast %124 : vector<16x8x1xf32> to vector<16x8x8xf32>
    %126 = arith.subf %122, %125 : vector<16x8x8xf32>
    %127 = math.exp %126 : vector<16x8x8xf32>
    %cst_56 = arith.constant dense<0.000000e+00> : vector<16x8xf32>
    %128 = vector.multi_reduction <add>, %127, %cst_56 [2] : vector<16x8x8xf32> to vector<16x8xf32>
    %129 = vector.shape_cast %128 : vector<16x8xf32> to vector<16x8x1xf32>
    %130 = tpu.reciprocal %129 {approx = true} : vector<16x8x1xf32> -> vector<16x8x1xf32>
    %131 = vector.broadcast %130 : vector<16x8x1xf32> to vector<16x8x8xf32>
    %132 = arith.mulf %127, %131 : vector<16x8x8xf32>
    %133 = arith.truncf %132 : vector<16x8x8xf32> to vector<16x8x8xbf16>
    "tpu.trace_start"() <{level = 10 : i32, message = "bqk,bkd->bqd"}> : () -> ()
    %cst_57 = arith.constant dense<0.000000e+00> : vector<16x8x32xf32>
    %134 = tpu.matmul %133, %119, %cst_57 {dimension_numbers = #tpu.dot_dimension_numbers<[2], [1], [1], [2], [0, 0, 0, 1, 1, 2], [0], [0]>} : vector<16x8x8xbf16>, vector<16x8x32xbf16>, vector<16x8x32xf32> -> vector<16x8x32xf32>
    "tpu.trace_stop"() : () -> ()
    %135 = vector.shape_cast %134 : vector<16x8x32xf32> to vector<128x32xf32>
    %136 = arith.truncf %135 : vector<128x32xf32> to vector<128x32xbf16>
    %c0_58 = arith.constant 0 : index
    %c96_59 = arith.constant 96 : index
    %137 = vector.load %arg22[%c0_58, %c96_59] : memref<128x128xbf16, #tpu.memory_space<vmem>>, vector<128x32xbf16>
    tpu.vector_store %arg22[%c0_58, %c96_59], %136 {strides = array<i32>} : memref<128x128xbf16, #tpu.memory_space<vmem>>, vector<128x32xbf16>,
    %c0_60 = arith.constant 0 : index
    %c0_61 = arith.constant 0 : index
    %138 = vector.load %arg22[%c0_60, %c0_61] : memref<128x128xbf16, #tpu.memory_space<vmem>>, vector<128x128xbf16>
    %c0_62 = arith.constant 0 : index
    %c0_63 = arith.constant 0 : index
    %c0_64 = arith.constant 0 : index
    %139 = vector.load %arg8[%c0_62, %c0_63, %c0_64] : memref<1x128x128xbf16, #tpu.memory_space<vmem>>, vector<1x128x128xbf16>
    %140 = vector.shape_cast %139 : vector<1x128x128xbf16> to vector<128x128xbf16>
    %cst_65 = arith.constant dense<0.000000e+00> : vector<128x128xf32>
    %141 = tpu.matmul %138, %140, %cst_65 {dimension_numbers = #tpu.dot_dimension_numbers<[1], [0], [0], [1], [0, 0, 1, 1], [], []>} : vector<128x128xbf16>, vector<128x128xbf16>, vector<128x128xf32> -> vector<128x128xf32>
    %c0_66 = arith.constant 0 : index
    %c0_67 = arith.constant 0 : index
    %c0_68 = arith.constant 0 : index
    %142 = vector.load %arg9[%c0_66, %c0_67, %c0_68] : memref<1x1x128xf32, #tpu.memory_space<vmem>>, vector<1x1x128xf32>
    %143 = vector.shape_cast %142 : vector<1x1x128xf32> to vector<1x128xf32>
    %144 = vector.broadcast %143 : vector<1x128xf32> to vector<128x128xf32>
    %145 = arith.addf %141, %144 : vector<128x128xf32>
    %146 = arith.addf %3, %145 : vector<128x128xf32>
    %c0_69 = arith.constant 0 : index
    %c0_70 = arith.constant 0 : index
    %c0_71 = arith.constant 0 : index
    %147 = vector.load %arg10[%c0_69, %c0_70, %c0_71] : memref<1x1x128xf32, #tpu.memory_space<vmem>>, vector<1x1x128xf32>
    %148 = vector.shape_cast %147 : vector<1x1x128xf32> to vector<1x128xf32>
    %c0_72 = arith.constant 0 : index
    %c0_73 = arith.constant 0 : index
    %c0_74 = arith.constant 0 : index
    %149 = vector.load %arg11[%c0_72, %c0_73, %c0_74] : memref<1x1x128xf32, #tpu.memory_space<vmem>>, vector<1x1x128xf32>
    %150 = vector.shape_cast %149 : vector<1x1x128xf32> to vector<1x128xf32>
    %cst_75 = arith.constant dense<0.000000e+00> : vector<128xf32>
    %151 = vector.multi_reduction <add>, %146, %cst_75 [1] : vector<128x128xf32> to vector<128xf32>
    %152 = vector.shape_cast %151 : vector<128xf32> to vector<128x1xf32>
    %cst_76 = arith.constant 1.280000e+02 : f32
    %153 = vector.broadcast %cst_76 : f32 to vector<128x1xf32>
    %154 = arith.divf %152, %153 : vector<128x1xf32>
    %155 = vector.broadcast %154 : vector<128x1xf32> to vector<128x128xf32>
    %156 = arith.subf %146, %155 : vector<128x128xf32>
    %157 = arith.mulf %156, %156 : vector<128x128xf32>
    %cst_77 = arith.constant dense<0.000000e+00> : vector<128xf32>
    %158 = vector.multi_reduction <add>, %157, %cst_77 [1] : vector<128x128xf32> to vector<128xf32>
    %159 = vector.shape_cast %158 : vector<128xf32> to vector<128x1xf32>
    %cst_78 = arith.constant 1.280000e+02 : f32
    %160 = vector.broadcast %cst_78 : f32 to vector<128x1xf32>
    %161 = arith.divf %159, %160 : vector<128x1xf32>
    %162 = vector.broadcast %154 : vector<128x1xf32> to vector<128x128xf32>
    %163 = arith.subf %146, %162 : vector<128x128xf32>
    %cst_79 = arith.constant 9.99999974E-6 : f32
    %164 = vector.broadcast %cst_79 : f32 to vector<128x1xf32>
    %165 = arith.addf %161, %164 : vector<128x1xf32>
    %166 = math.rsqrt %165 : vector<128x1xf32>
    %167 = vector.broadcast %166 : vector<128x1xf32> to vector<128x128xf32>
    %168 = arith.mulf %163, %167 : vector<128x128xf32>
    %169 = vector.broadcast %148 : vector<1x128xf32> to vector<128x128xf32>
    %170 = arith.mulf %168, %169 : vector<128x128xf32>
    %171 = vector.broadcast %150 : vector<1x128xf32> to vector<128x128xf32>
    %172 = arith.addf %170, %171 : vector<128x128xf32>
    %173 = arith.truncf %172 : vector<128x128xf32> to vector<128x128xbf16>
    %c0_80 = arith.constant 0 : index
    %c0_81 = arith.constant 0 : index
    %c0_82 = arith.constant 0 : index
    %174 = vector.load %arg12[%c0_80, %c0_81, %c0_82] : memref<1x128x512xbf16, #tpu.memory_space<vmem>>, vector<1x128x512xbf16>
    %175 = vector.shape_cast %174 : vector<1x128x512xbf16> to vector<128x512xbf16>
    %cst_83 = arith.constant dense<0.000000e+00> : vector<128x512xf32>
    %176 = tpu.matmul %173, %175, %cst_83 {dimension_numbers = #tpu.dot_dimension_numbers<[1], [0], [0], [1], [0, 0, 1, 1], [], []>} : vector<128x128xbf16>, vector<128x512xbf16>, vector<128x512xf32> -> vector<128x512xf32>
    %c0_84 = arith.constant 0 : index
    %c0_85 = arith.constant 0 : index
    %c0_86 = arith.constant 0 : index
    %177 = vector.load %arg13[%c0_84, %c0_85, %c0_86] : memref<1x1x512xf32, #tpu.memory_space<vmem>>, vector<1x1x512xf32>
    %178 = vector.shape_cast %177 : vector<1x1x512xf32> to vector<1x512xf32>
    %179 = vector.broadcast %178 : vector<1x512xf32> to vector<128x512xf32>
    %180 = arith.addf %176, %179 : vector<128x512xf32>
    %cst_87 = arith.constant 1.702000e+00 : f32
    %181 = vector.broadcast %cst_87 : f32 to vector<128x512xf32>
    %182 = arith.mulf %181, %180 : vector<128x512xf32>
    %183 = arith.negf %182 : vector<128x512xf32>
    %184 = math.exp %183 : vector<128x512xf32>
    %cst_88 = arith.constant 1.000000e+00 : f32
    %185 = vector.broadcast %cst_88 : f32 to vector<128x512xf32>
    %186 = arith.addf %185, %184 : vector<128x512xf32>
    %187 = arith.divf %185, %186 : vector<128x512xf32>
    %188 = arith.mulf %180, %187 : vector<128x512xf32>
    %189 = arith.truncf %188 : vector<128x512xf32> to vector<128x512xbf16>
    %c0_89 = arith.constant 0 : index
    %c0_90 = arith.constant 0 : index
    %c0_91 = arith.constant 0 : index
    %190 = vector.load %arg14[%c0_89, %c0_90, %c0_91] : memref<1x512x128xbf16, #tpu.memory_space<vmem>>, vector<1x512x128xbf16>
    %191 = vector.shape_cast %190 : vector<1x512x128xbf16> to vector<512x128xbf16>
    %cst_92 = arith.constant dense<0.000000e+00> : vector<128x128xf32>
    %192 = tpu.matmul %189, %191, %cst_92 {dimension_numbers = #tpu.dot_dimension_numbers<[1], [0], [0], [1], [0, 0, 1, 1], [], []>} : vector<128x512xbf16>, vector<512x128xbf16>, vector<128x128xf32> -> vector<128x128xf32>
    %c0_93 = arith.constant 0 : index
    %c0_94 = arith.constant 0 : index
    %c0_95 = arith.constant 0 : index
    %193 = vector.load %arg15[%c0_93, %c0_94, %c0_95] : memref<1x1x128xf32, #tpu.memory_space<vmem>>, vector<1x1x128xf32>
    %194 = vector.shape_cast %193 : vector<1x1x128xf32> to vector<1x128xf32>
    %195 = vector.broadcast %194 : vector<1x128xf32> to vector<128x128xf32>
    %196 = arith.addf %192, %195 : vector<128x128xf32>
    %197 = arith.addf %146, %196 : vector<128x128xf32>
    %c0_96 = arith.constant 0 : index
    %c0_97 = arith.constant 0 : index
    %198 = vector.load %arg20[%c0_96, %c0_97] : memref<128x128xf32, #tpu.memory_space<vmem>>, vector<128x128xf32>
    tpu.vector_store %arg20[%c0_96, %c0_97], %197 {strides = array<i32>} : memref<128x128xf32, #tpu.memory_space<vmem>>, vector<128x128xf32>,
    %c1_i32 = arith.constant 1 : i32
    %199 = arith.cmpi eq, %arg1, %c1_i32 : i32
    %200 = arith.extui %199 : i1 to i32
    %c0_i32_98 = arith.constant 0 : i32
    %201 = arith.cmpi ne, %200, %c0_i32_98 : i32
    scf.if %201 {
      %c0_99 = arith.constant 0 : index
      %c0_100 = arith.constant 0 : index
      %202 = vector.load %arg16[%c0_99, %c0_100] : memref<1x128xf32, #tpu.memory_space<vmem>>, vector<1x128xf32>
      %c0_101 = arith.constant 0 : index
      %c0_102 = arith.constant 0 : index
      %203 = vector.load %arg17[%c0_101, %c0_102] : memref<1x128xf32, #tpu.memory_space<vmem>>, vector<1x128xf32>
      %cst_103 = arith.constant dense<0.000000e+00> : vector<128xf32>
      %204 = vector.multi_reduction <add>, %197, %cst_103 [1] : vector<128x128xf32> to vector<128xf32>
      %205 = vector.shape_cast %204 : vector<128xf32> to vector<128x1xf32>
      %cst_104 = arith.constant 1.280000e+02 : f32
      %206 = vector.broadcast %cst_104 : f32 to vector<128x1xf32>
      %207 = arith.divf %205, %206 : vector<128x1xf32>
      %208 = vector.broadcast %207 : vector<128x1xf32> to vector<128x128xf32>
      %209 = arith.subf %197, %208 : vector<128x128xf32>
      %210 = arith.mulf %209, %209 : vector<128x128xf32>
      %cst_105 = arith.constant dense<0.000000e+00> : vector<128xf32>
      %211 = vector.multi_reduction <add>, %210, %cst_105 [1] : vector<128x128xf32> to vector<128xf32>
      %212 = vector.shape_cast %211 : vector<128xf32> to vector<128x1xf32>
      %cst_106 = arith.constant 1.280000e+02 : f32
      %213 = vector.broadcast %cst_106 : f32 to vector<128x1xf32>
      %214 = arith.divf %212, %213 : vector<128x1xf32>
      %215 = vector.broadcast %207 : vector<128x1xf32> to vector<128x128xf32>
      %216 = arith.subf %197, %215 : vector<128x128xf32>
      %cst_107 = arith.constant 9.99999974E-6 : f32
      %217 = vector.broadcast %cst_107 : f32 to vector<128x1xf32>
      %218 = arith.addf %214, %217 : vector<128x1xf32>
      %219 = math.rsqrt %218 : vector<128x1xf32>
      %220 = vector.broadcast %219 : vector<128x1xf32> to vector<128x128xf32>
      %221 = arith.mulf %216, %220 : vector<128x128xf32>
      %222 = vector.broadcast %202 : vector<1x128xf32> to vector<128x128xf32>
      %223 = arith.mulf %221, %222 : vector<128x128xf32>
      %224 = vector.broadcast %203 : vector<1x128xf32> to vector<128x128xf32>
      %225 = arith.addf %223, %224 : vector<128x128xf32>
      %226 = arith.truncf %225 : vector<128x128xf32> to vector<128x128xbf16>
      %c0_108 = arith.constant 0 : index
      %c0_109 = arith.constant 0 : index
      %227 = vector.load %arg18[%c0_108, %c0_109] : memref<128x128xbf16, #tpu.memory_space<vmem>>, vector<128x128xbf16>
      %cst_110 = arith.constant dense<0.000000e+00> : vector<128x128xf32>
      %228 = tpu.matmul %226, %227, %cst_110 {dimension_numbers = #tpu.dot_dimension_numbers<[1], [0], [0], [1], [0, 0, 1, 1], [], []>} : vector<128x128xbf16>, vector<128x128xbf16>, vector<128x128xf32> -> vector<128x128xf32>
      %229 = vector.shape_cast %228 : vector<128x128xf32> to vector<16x8x128xf32>
      %230 = arith.truncf %229 : vector<16x8x128xf32> to vector<16x8x128xbf16>
      %c0_111 = arith.constant 0 : index
      %c0_112 = arith.constant 0 : index
      %c0_113 = arith.constant 0 : index
      %231 = vector.load %arg19[%c0_111, %c0_112, %c0_113] : memref<16x8x128xbf16, #tpu.memory_space<vmem>>, vector<16x8x128xbf16>
      tpu.vector_store %arg19[%c0_111, %c0_112, %c0_113], %230 {strides = array<i32>} : memref<16x8x128xbf16, #tpu.memory_space<vmem>>, vector<16x8x128xbf16>,
    } else {
    }
    return
  }
  func.func @transform_0(%arg0: i32, %arg1: i32) -> (i32, i32, i32) {
    %c0_i32 = arith.constant 0 : i32
    %c0_i32_0 = arith.constant 0 : i32
    %c0_i32_1 = arith.constant 0 : i32
    return %arg0, %c0_i32, %c0_i32_0 : i32, i32, i32
  }
  func.func @transform_1(%arg0: i32, %arg1: i32) -> (i32, i32) {
    %c0_i32 = arith.constant 0 : i32
    %c0_i32_0 = arith.constant 0 : i32
    %c0_i32_1 = arith.constant 0 : i32
    return %c0_i32, %c0_i32_0 : i32, i32
  }
  func.func @transform_2(%arg0: i32, %arg1: i32) -> (i32, i32, i32) {
    %c0_i32 = arith.constant 0 : i32
    %c0_i32_0 = arith.constant 0 : i32
    %c0_i32_1 = arith.constant 0 : i32
    return %arg1, %c0_i32, %c0_i32_0 : i32, i32, i32
  }
  func.func @transform_3(%arg0: i32, %arg1: i32) -> (i32, i32, i32) {
    %c0_i32 = arith.constant 0 : i32
    %c0_i32_0 = arith.constant 0 : i32
    %c0_i32_1 = arith.constant 0 : i32
    return %arg1, %c0_i32, %c0_i32_0 : i32, i32, i32
  }
  func.func @transform_4(%arg0: i32, %arg1: i32) -> (i32, i32, i32) {
    %c0_i32 = arith.constant 0 : i32
    %c0_i32_0 = arith.constant 0 : i32
    %c0_i32_1 = arith.constant 0 : i32
    return %arg1, %c0_i32, %c0_i32_0 : i32, i32, i32
  }
  func.func @transform_5(%arg0: i32, %arg1: i32) -> (i32, i32, i32) {
    %c0_i32 = arith.constant 0 : i32
    %c0_i32_0 = arith.constant 0 : i32
    %c0_i32_1 = arith.constant 0 : i32
    return %arg1, %c0_i32, %c0_i32_0 : i32, i32, i32
  }
  func.func @transform_6(%arg0: i32, %arg1: i32) -> (i32, i32, i32) {
    %c0_i32 = arith.constant 0 : i32
    %c0_i32_0 = arith.constant 0 : i32
    %c0_i32_1 = arith.constant 0 : i32
    return %arg1, %c0_i32, %c0_i32_0 : i32, i32, i32
  }
  func.func @transform_7(%arg0: i32, %arg1: i32) -> (i32, i32, i32) {
    %c0_i32 = arith.constant 0 : i32
    %c0_i32_0 = arith.constant 0 : i32
    %c0_i32_1 = arith.constant 0 : i32
    return %arg1, %c0_i32, %c0_i32_0 : i32, i32, i32
  }
  func.func @transform_8(%arg0: i32, %arg1: i32) -> (i32, i32, i32) {
    %c0_i32 = arith.constant 0 : i32
    %c0_i32_0 = arith.constant 0 : i32
    %c0_i32_1 = arith.constant 0 : i32
    return %arg1, %c0_i32, %c0_i32_0 : i32, i32, i32
  }
  func.func @transform_9(%arg0: i32, %arg1: i32) -> (i32, i32, i32) {
    %c0_i32 = arith.constant 0 : i32
    %c0_i32_0 = arith.constant 0 : i32
    %c0_i32_1 = arith.constant 0 : i32
    return %arg1, %c0_i32, %c0_i32_0 : i32, i32, i32
  }
  func.func @transform_10(%arg0: i32, %arg1: i32) -> (i32, i32, i32) {
    %c0_i32 = arith.constant 0 : i32
    %c0_i32_0 = arith.constant 0 : i32
    %c0_i32_1 = arith.constant 0 : i32
    return %arg1, %c0_i32, %c0_i32_0 : i32, i32, i32
  }
  func.func @transform_11(%arg0: i32, %arg1: i32) -> (i32, i32, i32) {
    %c0_i32 = arith.constant 0 : i32
    %c0_i32_0 = arith.constant 0 : i32
    %c0_i32_1 = arith.constant 0 : i32
    return %arg1, %c0_i32, %c0_i32_0 : i32, i32, i32
  }
  func.func @transform_12(%arg0: i32, %arg1: i32) -> (i32, i32, i32) {
    %c0_i32 = arith.constant 0 : i32
    %c0_i32_0 = arith.constant 0 : i32
    %c0_i32_1 = arith.constant 0 : i32
    return %arg1, %c0_i32, %c0_i32_0 : i32, i32, i32
  }
  func.func @transform_13(%arg0: i32, %arg1: i32) -> (i32, i32, i32) {
    %c0_i32 = arith.constant 0 : i32
    %c0_i32_0 = arith.constant 0 : i32
    %c0_i32_1 = arith.constant 0 : i32
    return %arg1, %c0_i32, %c0_i32_0 : i32, i32, i32
  }
  func.func @transform_14(%arg0: i32, %arg1: i32) -> (i32, i32) {
    %c0_i32 = arith.constant 0 : i32
    %c0_i32_0 = arith.constant 0 : i32
    %c0_i32_1 = arith.constant 0 : i32
    return %c0_i32, %c0_i32_0 : i32, i32
  }
  func.func @transform_15(%arg0: i32, %arg1: i32) -> (i32, i32) {
    %c0_i32 = arith.constant 0 : i32
    %c0_i32_0 = arith.constant 0 : i32
    %c0_i32_1 = arith.constant 0 : i32
    return %c0_i32, %c0_i32_0 : i32, i32
  }
  func.func @transform_16(%arg0: i32, %arg1: i32) -> (i32, i32) {
    %c0_i32 = arith.constant 0 : i32
    %c0_i32_0 = arith.constant 0 : i32
    %c0_i32_1 = arith.constant 0 : i32
    return %c0_i32, %c0_i32_0 : i32, i32
  }
  func.func @transform_17(%arg0: i32, %arg1: i32) -> (i32, i32, i32) {
    %c0_i32 = arith.constant 0 : i32
    %c0_i32_0 = arith.constant 0 : i32
    %c0_i32_1 = arith.constant 0 : i32
    return %arg0, %c0_i32, %c0_i32_0 : i32, i32, i32
  }
}

</mosaic_0001>

<bundles_post_ra>
// kernel: encode_text.1
= control target key start
LH: loop header
LB: loop body
LE: loop exit
PB: predicated region body
PF: predicated region fallthrough
CT: control target
= control target key end

     0   :  { %s14566_s24 = smov 0   ;;  %s14568_s25 = smov 0   ;;  %s18269_s0 = inlined_call_operand.vmem [shape: f32[32,8,128], index: 0, kind: input, shape index: {}]   ;;  %s18270_s1 = inlined_call_operand.vmem [shape: f32[8,8], index: 1, kind: input, shape index: {}]   ;;  %s18271_s2 = inlined_call_operand.vmem [shape: f32[2,1,128], index: 2, kind: input, shape index: {}]   ;;  %s18272_s3 = inlined_call_operand.vmem [shape: f32[2,1,128], index: 3, kind: input, shape index: {}]   ;;  %s18273_s4 = inlined_call_operand.vmem [shape: bf16[2,128,384], index: 4, kind: input, shape index: {}]   ;;  %s18274_s5 = inlined_call_operand.vmem [shape: f32[2,1,384], index: 5, kind: input, shape index: {}]   ;;  %s18275_s6 = inlined_call_operand.vmem [shape: bf16[2,128,128], index: 6, kind: input, shape index: {}]   ;;  %s18276_s7 = inlined_call_operand.vmem [shape: f32[2,1,128], index: 7, kind: input, shape index: {}]   ;;  %s18277_s8 = inlined_call_operand.vmem [shape: f32[2,1,128], index: 8, kind: input, shape index: {}]   ;;  %s18278_s9 = inlined_call_operand.vmem [shape: f32[2,1,128], index: 9, kind: input, shape index: {}]   ;;  %s18279_s10 = inlined_call_operand.vmem [shape: bf16[2,128,512], index: 10, kind: input, shape index: {}]   ;;  %s18280_s11 = inlined_call_operand.vmem [shape: f32[2,1,512], index: 11, kind: input, shape index: {}]   ;;  %s18281_s12 = inlined_call_operand.vmem [shape: bf16[2,512,128], index: 12, kind: input, shape index: {}]   ;;  %s18282_s13 = inlined_call_operand.vmem [shape: f32[2,1,128], index: 13, kind: input, shape index: {}]   ;;  %s18283_s14 = inlined_call_operand.vmem [shape: f32[1,128], index: 14, kind: input, shape index: {}]   ;;  %s18284_s15 = inlined_call_operand.vmem [shape: f32[1,128], index: 15, kind: input, shape index: {}]   ;;  %s18285_s16 = inlined_call_operand.vmem [shape: bf16[128,128], index: 16, kind: input, shape index: {}]   ;;  %s18286_s17 = inlined_call_operand.vmem [shape: bf16[32,8,128], index: 17, kind: output, shape index: {}]  }
   0x1   :  { %18405 = sst [smem:[#allocation52_spill]] %s18269_s0  ;;  %s14570_s26 = smov 0  }
   0x2   :  { %18406 = sst [smem:[#allocation53_spill]] %s18270_s1  ;;  %s14572_s27 = smov 0  }
   0x3   :  { %18407 = sst [smem:[#allocation54_spill]] %s18271_s2  ;;  %s14574_s28 = smov 0  }
   0x4   :  { %18408 = sst [smem:[#allocation55_spill]] %s18272_s3 }
   0x5   :  { %18409 = sst [smem:[#allocation56_spill]] %s18273_s4 }
   0x6   :  { %18410 = sst [smem:[#allocation57_spill]] %s18274_s5 }
   0x7   :  { %18411 = sst [smem:[#allocation58_spill]] %s18275_s6 }
   0x8   :  { %18412 = sst [smem:[#allocation59_spill]] %s18283_s14 }
   0x9   :  { %18413 = sst [smem:[#allocation60_spill]] %s18284_s15 }
   0xa   :  { %18414 = sst [smem:[#allocation61_spill]] %s18285_s16 }
   0xb LB: > { %18415 = sst [smem:[#allocation5_spill]] %s14452_s24  ;;  %s36_s29 = sadd.s32 1, %s14460_s26  ;;  %s14468_s28 = sphi %s14574_s28, %s27_s28   ;;  %s14464_s27 = sphi %s14572_s27, %s18674_s27   ;;  %s14460_s26 = sphi %s14570_s26, %s18673_s26   ;;  %s14456_s25 = sphi %s14568_s25, %s18672_s25   ;;  %s14452_s24 = sphi %s14566_s24, %s18671_s24  }
   0xc   : > { %18416 = sst [smem:[#allocation6_spill]] %s14460_s26  ;;  %s39_s0 = sadd.s32 1, %s14464_s27 }
   0xd   : > { %18417 = sst [smem:[#allocation7_spill]] %s14464_s27  ;;  %p37_p0 = scmp.ge.s32.totalorder %s36_s29, 2 }
   0xe   : > { %18418 = sst [smem:[#allocation8_spill]] %s14468_s28  ;;  %p11688_p1 = scmp.ge.s32.totalorder %s14468_s28, 1 }
   0xf   : > { %p606_p2 = scmp.lt.s32.totalorder %s14468_s28, 5  ;;  %s18676_s29 = smov (%p37_p0, %s36_s29), 0 }
  0x10   : > { %18419 = sst [smem:[#allocation9_spill]] %s18676_s29  ;;  %s18678_s0 = smov (!%p37_p0, %s39_s0), %s14464_s27 }
  0x11   : > { %p607_p3 = pnand %p11688_p1, %p606_p2  ;;  %p41_p4 = scmp.ge.s32.totalorder %s18678_s0, 2 }
  0x13   : > { %s18680_s0 = smov (%p41_p4, %s18678_s0), 0  ;;  %610 = sbr.rel (%p607_p3) target bundleno = 5127 (0x1407), region = 88 }
  0x14   : > { %18420 = sst [smem:[#allocation10_spill]] %s18680_s0 }
  0x1a   : > { %s11689_s30 = sshll.u32 %s14456_s25, 4  ;;  %p710_p5 = scmp.lt.s32.totalorder %s14452_s24, 1 }
  0x1b   : > { %p705_p6 = scmp.lt.s32.totalorder %s11689_s30, 31  ;;  %s18423_s26 = sld [smem:[#allocation52_spill]] }
  0x1c   : > { %s14600_s18 = scalar_select %p710_p5, %s14452_s24, 1 }
  0x1d   : > { %s18682_s30 = smov (!%p705_p6, %s11689_s30), 31  ;;  %s18424_s4 = sld [smem:[#allocation56_spill]] }
  0x1e   : > { %s11690_s25 = sshll.u32 %s18682_s30, 3  ;;  %s13627_s0 = smul.u32 192, %s14600_s18 }
  0x1f   : > { %s13628_s15 = smul.u32 3, %s14600_s18  ;;  %s12201_s19 = sshll.u32 %s14600_s18, 6 }
  0x20   : > { %s18425_s5 = sld [smem:[#allocation57_spill]]  ;;  %s18426_s6 = sld [smem:[#allocation58_spill]] }
  0x21   : > { %s14614_s28 = scalar_lea.vmem %s18423_s26, %s11690_s25  ;;  %s12202_s20 = sshll.u32 %s14600_s18, 8 }
  0x22   : > { %s11696_s23 = sshll.u32 %s14600_s18, 2  ;;  %s14660_s2 = scalar_lea.vmem %s18281_s12, %s12202_s20 }
  0x23   : > { %s14620_s24 = scalar_lea.vmem %s18424_s4, %s13627_s0  ;;  %s14655_s27 = scalar_lea.vmem %s18280_s11, %s11696_s23 }
  0x24   : > { %s755_s0 = scalar_lea.vmem %s18282_s13, %s14600_s18  ;;  %s11700_s4 = sshll.u32 %s18682_s30, 2 }
  0x25   : > { %s14669_s1 = scalar_lea.vmem %s18286_s17, %s11700_s4 }
  0x26   : > { %s14626_s21 = scalar_lea.vmem %s18425_s5, %s13628_s15  ;;  %s14631_s3 = scalar_lea.vmem %s18426_s6, %s12201_s19 }
  0x27   : > { %s14649_s5 = scalar_lea.vmem %s18279_s10, %s12202_s20  ;;  %s18427_s6 = sld [smem:[#allocation5_spill]] }
  0x2d   : > { %p11701_p7 = scmp.ne.s32.totalorder %s18427_s6, 0 }
  0x2e   : > { %v767_v0 = vld [vmem:[%s14614_s28] sm:$0xff] (!%p11701_p7)  ;;  %v768_v1 = vld [vmem:[%s14614_s28 + $0x8] sm:$0xff] (!%p11701_p7)  ;;  %v769_v2 = vld [vmem:[%s14614_s28 + $0x10] sm:$0xff] (!%p11701_p7) }
  0x2f   : > { %766 = sbr.rel (%p11701_p7) target bundleno = 55 (0x37), region = 92  ;;  %783 = vst [vmem:[#allocation2] sm:$0xff] (!%p11701_p7), %v767_v0  ;;  %784 = vst [vmem:[#allocation2 + $0x8] sm:$0xff] (!%p11701_p7), %v768_v1  ;;  %v770_v3 = vld [vmem:[%s14614_s28 + $0x18] sm:$0xff] (!%p11701_p7)  ;;  %v771_v4 = vld [vmem:[%s14614_s28 + $0x20] sm:$0xff] (!%p11701_p7) }
  0x30   : > { %785 = vst [vmem:[#allocation2 + $0x10] sm:$0xff] (!%p11701_p7), %v769_v2  ;;  %v772_v5 = vld [vmem:[%s14614_s28 + $0x28] sm:$0xff] (!%p11701_p7)  ;;  %786 = vst [vmem:[#allocation2 + $0x18] sm:$0xff] (!%p11701_p7), %v770_v3  ;;  %v773_v6 = vld [vmem:[%s14614_s28 + $0x30] sm:$0xff] (!%p11701_p7) }
  0x31   : > { %787 = vst [vmem:[#allocation2 + $0x20] sm:$0xff] (!%p11701_p7), %v771_v4  ;;  %788 = vst [vmem:[#allocation2 + $0x28] sm:$0xff] (!%p11701_p7), %v772_v5  ;;  %v774_v7 = vld [vmem:[%s14614_s28 + $0x38] sm:$0xff] (!%p11701_p7)  ;;  %v775_v8 = vld [vmem:[%s14614_s28 + $0x40] sm:$0xff] (!%p11701_p7) }
  0x32   : > { %789 = vst [vmem:[#allocation2 + $0x30] sm:$0xff] (!%p11701_p7), %v773_v6  ;;  %790 = vst [vmem:[#allocation2 + $0x38] sm:$0xff] (!%p11701_p7), %v774_v7  ;;  %v776_v9 = vld [vmem:[%s14614_s28 + $0x48] sm:$0xff] (!%p11701_p7)  ;;  %v777_v10 = vld [vmem:[%s14614_s28 + $0x50] sm:$0xff] (!%p11701_p7) }
  0x33   : > { %791 = vst [vmem:[#allocation2 + $0x40] sm:$0xff] (!%p11701_p7), %v775_v8  ;;  %v778_v11 = vld [vmem:[%s14614_s28 + $0x58] sm:$0xff] (!%p11701_p7)  ;;  %792 = vst [vmem:[#allocation2 + $0x48] sm:$0xff] (!%p11701_p7), %v776_v9  ;;  %v779_v12 = vld [vmem:[%s14614_s28 + $0x60] sm:$0xff] (!%p11701_p7) }
  0x34   : > { %793 = vst [vmem:[#allocation2 + $0x50] sm:$0xff] (!%p11701_p7), %v777_v10  ;;  %794 = vst [vmem:[#allocation2 + $0x58] sm:$0xff] (!%p11701_p7), %v778_v11  ;;  %v780_v13 = vld [vmem:[%s14614_s28 + $0x68] sm:$0xff] (!%p11701_p7)  ;;  %v781_v14 = vld [vmem:[%s14614_s28 + $0x70] sm:$0xff] (!%p11701_p7) }
  0x35   : > { %795 = vst [vmem:[#allocation2 + $0x60] sm:$0xff] (!%p11701_p7), %v779_v12  ;;  %796 = vst [vmem:[#allocation2 + $0x68] sm:$0xff] (!%p11701_p7), %v780_v13  ;;  %v782_v15 = vld [vmem:[%s14614_s28 + $0x78] sm:$0xff] (!%p11701_p7) }
  0x36   : > { %797 = vst [vmem:[#allocation2 + $0x70] sm:$0xff] %v781_v14  ;;  %798 = vst [vmem:[#allocation2 + $0x78] sm:$0xff] %v782_v15 }
  0x37 PF: > { %v799_v16 = vld [vmem:[#allocation2] sm:$0xff]  ;;  %v800_v18 = vld [vmem:[#allocation2 + $0x8] sm:$0xff]  ;;  %s18430_s14 = sld [smem:[#allocation55_spill]]  ;;  %vm14472_vm0 = vmmov 0   ;;  %vm1626_vm1 = vcmask 261120   ;;  %vm2559_vm2 = vcmask 1043456   ;;  %s18573_s29 = scalar_lea.vmem %s18276_s7, %s14600_s18 }
  0x38   : > { %v801_v17 = vld [vmem:[#allocation2 + $0x10] sm:$0xff]  ;;  %817 = vadd.xlane.f32.xlu0 %v799_v16  ;;  %v802_v19 = vld [vmem:[#allocation2 + $0x18] sm:$0xff]  ;;  %v13677_v33 = vld [vmem:[%s14620_s24] ss:$12 sps:$4 sm:$0xff]   ;;  %s18450_s19 = sld [smem:[#allocation53_spill]]  ;;  %vm2363_vm3 = vcmask 64512  }
  0x39   : > { %821 = vadd.xlane.f32.xlu1 %v801_v17  ;;  %v803_v20 = vld [vmem:[#allocation2 + $0x20] sm:$0xff]  ;;  %v804_v21 = vld [vmem:[#allocation2 + $0x28] sm:$0xff]  ;;  %s14473_s22 = smov 96   ;;  %s14474_s16 = smov 64   ;;  %vm5253_vm4 = vcmask 523520   ;;  %vm7206_vm5 = vcmask 785920  }
  0x3a   : > { %v14688_v22 = vld [vmem:[#allocation2 + $0x30] sm:$0xff]  ;;  %v14690_v23 = vld [vmem:[#allocation2 + $0x38] sm:$0xff]  ;;  %s14475_s6 = smov 32   ;;  %vm9159_vm6 = vcmask 1048320  }
  0x3b   : > { %v14692_v24 = vld [vmem:[#allocation2 + $0x40] sm:$0xff]  ;;  %v14694_v25 = vld [vmem:[#allocation2 + $0x48] sm:$0xff] }
  0x3c   : > { %819 = vadd.xlane.f32.xlu0 %v800_v18  ;;  %v14698_v26 = vld [vmem:[#allocation2 + $0x50] sm:$0xff]  ;;  %v14700_v27 = vld [vmem:[#allocation2 + $0x58] sm:$0xff] }
  0x3d   : > { %823 = vadd.xlane.f32.xlu1 %v802_v19  ;;  %v14704_v28 = vld [vmem:[#allocation2 + $0x60] sm:$0xff]  ;;  %v14706_v29 = vld [vmem:[#allocation2 + $0x68] sm:$0xff]  ;;  %v14710_v30 = vld [vmem:[#allocation2 + $0x70] sm:$0xff]  ;;  %s18431_s20 = scalar_lea.vmem %s18430_s14, %s14600_s18 }
  0x3e   : > { %v14712_v31 = vld [vmem:[#allocation2 + $0x78] sm:$0xff]  ;;  %v13675_v32 = vld [vmem:[%s14620_s24 + $0x4] ss:$12 sps:$4 sm:$0xff]   ;;  %v13680_v35 = vld [vmem:[%s14620_s24 + $0x8] ss:$12 sps:$4 sm:$0xff]  }
  0x3f   : > { %v13678_v34 = vld [vmem:[%s14620_s24 + $0x1c] ss:$12 sps:$4 sm:$0xff]   ;;  %1223 = vmatprep.subr.bf16.mxu0 %v13675_v32  ;;  %12731 = vmatprep.subr.bf16.mxu1 %v13680_v35  ;;  %v13681_v10 = vld [vmem:[%s14620_s24 + $0x18] ss:$12 sps:$4 sm:$0xff]  }
  0x40   : > { %825 = vadd.xlane.f32.xlu0 %v803_v20  ;;  %1224 = vmatpush1.bf16.msra.mxu0 %v13677_v33 }
  0x41   : > { %827 = vadd.xlane.f32.xlu1 %v804_v21  ;;  %1225 = vmatprep.subr.bf16.mxu0 %v13678_v34  ;;  %v13686_v34 = vld [vmem:[%s14620_s24 + $0x4c] ss:$12 sps:$4 sm:$0xff]  }
  0x42   : > { %12732 = vmatpush3.bf16.msra.mxu1 %v13680_v35  ;;  %v13688_v35 = vld [vmem:[%s14620_s24 + $0x38] ss:$12 sps:$4 sm:$0xff]  }
  0x44   : > { %829 = vadd.xlane.f32.xlu0 %v14688_v22  ;;  %1226 = vmatpush1.bf16.msra.mxu0 %v13681_v10 }
  0x45   : > { %831 = vadd.xlane.f32.xlu1 %v14690_v23 }
  0x48   : > { %833 = vadd.xlane.f32.xlu0 %v14692_v24 }
  0x49   : > { %835 = vadd.xlane.f32.xlu1 %v14694_v25 }
  0x4c   : > { %837 = vadd.xlane.f32.xlu0 %v14698_v26 }
  0x4d   : > { %839 = vadd.xlane.f32.xlu1 %v14700_v27 }
  0x50   : > { %841 = vadd.xlane.f32.xlu0 %v14704_v28 }
  0x51   : > { %843 = vadd.xlane.f32.xlu1 %v14706_v29 }
  0x54   : > { %845 = vadd.xlane.f32.xlu0 %v14710_v30 }
  0x55   : > { %847 = vadd.xlane.f32.xlu1 %v14712_v31 }
  0xc5   : > { %v818_v36 = vpop.xlane.xlu0 %817 }
  0xc6   : > { %v822_v37 = vpop.xlane.xlu1 %821  ;;  %v850_v38 = vmul.f32 0.0078125, %v818_v36 }
  0xc7   : > { %v852_v39 = vmul.f32 0.0078125, %v822_v37 }
  0xc8   : > { %v14722_v40 = vsub.f32 %v799_v16, %v850_v38  ;;  %v13682_v16 = vld [vmem:[%s14620_s24 + $0x34] ss:$12 sps:$4 sm:$0xff]  }
  0xc9   : > { %v14724_v41 = vsub.f32 %v801_v17, %v852_v39  ;;  %v820_v42 = vpop.xlane.xlu0 %819  ;;  %v13684_v17 = vld [vmem:[%s14620_s24 + $0x20] ss:$12 sps:$4 sm:$0xff]   ;;  %1227 = vmatprep.subr.bf16.mxu0 %v13682_v16  ;;  %v13689_v38 = vld [vmem:[%s14620_s24 + $0x48] ss:$12 sps:$4 sm:$0xff]  }
  0xca   : > { %v824_v43 = vpop.xlane.xlu1 %823  ;;  %v851_v44 = vmul.f32 0.0078125, %v820_v42  ;;  %v882_v45 = vmul.f32 %v14722_v40, %v14722_v40  ;;  %12733 = vmatprep.subr.bf16.mxu1 %v13684_v17 }
  0xcb   : > { %v853_v46 = vmul.f32 0.0078125, %v824_v43  ;;  %v884_v47 = vmul.f32 %v14724_v41, %v14724_v41  ;;  %12734 = vmatpush3.bf16.msra.mxu1 %v13684_v17 }
  0xcc   : > { %898 = vadd.xlane.f32.xlu0 %v882_v45  ;;  %v14730_v48 = vsub.f32 %v800_v18, %v851_v44  ;;  %12735 = vmatprep.subr.bf16.mxu1 %v13688_v35  ;;  %v13690_v45 = vld [vmem:[%s14620_s24 + $0x64] ss:$12 sps:$4 sm:$0xff]  }
  0xcd   : > { %v14732_v49 = vsub.f32 %v802_v19, %v853_v46  ;;  %v826_v50 = vpop.xlane.xlu0 %825  ;;  %v13692_v46 = vld [vmem:[%s14620_s24 + $0x50] ss:$12 sps:$4 sm:$0xff]  }
  0xce   : > { %v828_v51 = vpop.xlane.xlu1 %827  ;;  %v854_v52 = vmul.f32 0.0078125, %v826_v50  ;;  %v883_v53 = vmul.f32 %v14730_v48, %v14730_v48 }
  0xcf   : > { %v855_v54 = vmul.f32 0.0078125, %v828_v51  ;;  %v885_v55 = vmul.f32 %v14732_v49, %v14732_v49  ;;  %12736 = vmatpush3.bf16.msra.mxu1 %v13688_v35  ;;  %v13696_v51 = vld [vmem:[%s14620_s24 + $0x68] ss:$12 sps:$4 sm:$0xff]  }
  0xd0   : > { %902 = vadd.xlane.f32.xlu0 %v884_v47  ;;  %900 = vadd.xlane.f32.xlu1 %v883_v53  ;;  %v14738_v56 = vsub.f32 %v803_v20, %v854_v52  ;;  %v13693_v47 = vld [vmem:[%s14620_s24 + $0x60] ss:$12 sps:$4 sm:$0xff]   ;;  %v13697_v52 = vld [vmem:[%s14620_s24 + $0x78] ss:$12 sps:$4 sm:$0xff]  }
  0xd1   : > { %v14740_v57 = vsub.f32 %v804_v21, %v855_v54  ;;  %v830_v58 = vpop.xlane.xlu0 %829  ;;  %12737 = vmatprep.subr.bf16.mxu1 %v13692_v46  ;;  %v13698_v53 = vld [vmem:[%s14620_s24 + $0x94] ss:$12 sps:$4 sm:$0xff]  }
  0xd2   : > { %v832_v59 = vpop.xlane.xlu1 %831  ;;  %v856_v60 = vmul.f32 0.0078125, %v830_v58  ;;  %v886_v61 = vmul.f32 %v14738_v56, %v14738_v56  ;;  %v13700_v54 = vld [vmem:[%s14620_s24 + $0x80] ss:$12 sps:$4 sm:$0xff]  }
  0xd3   : > { %v857_v62 = vmul.f32 0.0078125, %v832_v59  ;;  %v887_v63 = vmul.f32 %v14740_v57, %v14740_v57  ;;  %12738 = vmatpush3.bf16.msra.mxu1 %v13692_v46  ;;  %v13702_v58 = vld [vmem:[%s14620_s24 + $0xac] ss:$12 sps:$4 sm:$0xff]  }
  0xd4   : > { %904 = vadd.xlane.f32.xlu1 %v885_v55  ;;  %906 = vadd.xlane.f32.xlu0 %v886_v61  ;;  %v14747_v0 = vsub.f32 %v14688_v22, %v856_v60  ;;  %v13701_v55 = vld [vmem:[%s14620_s24 + $0x90] ss:$12 sps:$4 sm:$0xff]   ;;  %v13704_v59 = vld [vmem:[%s14620_s24 + $0x98] ss:$12 sps:$4 sm:$0xff]   ;;  %v13705_v60 = vld [vmem:[%s14620_s24 + $0xa8] ss:$12 sps:$4 sm:$0xff]  }
  0xd5   : > { %v14750_v1 = vsub.f32 %v14690_v23, %v857_v62  ;;  %v834_v2 = vpop.xlane.xlu0 %833  ;;  %v13685_v23 = vld [vmem:[%s14620_s24 + $0x30] ss:$12 sps:$4 sm:$0xff]   ;;  %12739 = vmatprep.subr.bf16.mxu1 %v13696_v51  ;;  %v18296_v62 = vmov 0  }
  0xd6   : > { %v836_v3 = vpop.xlane.xlu1 %835  ;;  %v858_v4 = vmul.f32 0.0078125, %v834_v2  ;;  %v888_v5 = vmul.f32 %v14747_v0, %v14747_v0  ;;  %1228 = vmatpush1.bf16.msra.mxu0 %v13685_v23  ;;  %v13706_v61 = vld [vmem:[%s14620_s24 + $0xb0] ss:$12 sps:$4 sm:$0xff]   ;;  %1255 = vmatprep.mubr.bf16.mxu0 %v18296_v62 }
  0xd7   : > { %v859_v6 = vmul.f32 0.0078125, %v836_v3  ;;  %v889_v7 = vmul.f32 %v14750_v1, %v14750_v1  ;;  %1229 = vmatprep.subr.bf16.mxu0 %v13686_v34  ;;  %12740 = vmatpush3.bf16.msra.mxu1 %v13696_v51 }
  0xd8   : > { %908 = vadd.xlane.f32.xlu1 %v887_v63  ;;  %910 = vadd.xlane.f32.xlu0 %v888_v5  ;;  %v14757_v8 = vsub.f32 %v14692_v24, %v858_v4 }
  0xd9   : > { %v14760_v9 = vsub.f32 %v14694_v25, %v859_v6  ;;  %v838_v11 = vpop.xlane.xlu0 %837  ;;  %12741 = vmatprep.subr.bf16.mxu1 %v13700_v54 }
  0xda   : > { %v840_v12 = vpop.xlane.xlu1 %839  ;;  %v860_v13 = vmul.f32 0.0078125, %v838_v11  ;;  %v890_v14 = vmul.f32 %v14757_v8, %v14757_v8  ;;  %1230 = vmatpush1.bf16.msra.mxu0 %v13689_v38 }
  0xdb   : > { %v861_v15 = vmul.f32 0.0078125, %v840_v12  ;;  %v891_v18 = vmul.f32 %v14760_v9, %v14760_v9  ;;  %1231 = vmatprep.subr.bf16.mxu0 %v13690_v45  ;;  %12742 = vmatpush3.bf16.msra.mxu1 %v13700_v54 }
  0xdc   : > { %912 = vadd.xlane.f32.xlu1 %v889_v7  ;;  %914 = vadd.xlane.f32.xlu0 %v890_v14  ;;  %v14770_v19 = vsub.f32 %v14698_v26, %v860_v13 }
  0xdd   : > { %v14773_v20 = vsub.f32 %v14700_v27, %v861_v15  ;;  %v842_v21 = vpop.xlane.xlu0 %841  ;;  %12743 = vmatprep.subr.bf16.mxu1 %v13704_v59 }
  0xde   : > { %v844_v22 = vpop.xlane.xlu1 %843  ;;  %v862_v24 = vmul.f32 0.0078125, %v842_v21  ;;  %v892_v25 = vmul.f32 %v14770_v19, %v14770_v19  ;;  %1232 = vmatpush1.bf16.msra.mxu0 %v13693_v47 }
  0xdf   : > { %v863_v32 = vmul.f32 0.0078125, %v844_v22  ;;  %v893_v26 = vmul.f32 %v14773_v20, %v14773_v20  ;;  %12744 = vmatpush3.bf16.msra.mxu1 %v13704_v59 }
  0xe0   : > { %916 = vadd.xlane.f32.xlu1 %v891_v18  ;;  %918 = vadd.xlane.f32.xlu0 %v892_v25  ;;  %v14781_v27 = vsub.f32 %v14704_v28, %v862_v24 }
  0xe1   : > { %v14784_v33 = vsub.f32 %v14706_v29, %v863_v32  ;;  %v846_v36 = vpop.xlane.xlu0 %845  ;;  %12745 = vmatprep.subr.bf16.mxu1 %v13706_v61 }
  0xe2   : > { %v848_v37 = vpop.xlane.xlu1 %847  ;;  %v864_v39 = vmul.f32 0.0078125, %v846_v36  ;;  %v894_v42 = vmul.f32 %v14781_v27, %v14781_v27 }
  0xe3   : > { %v865_v43 = vmul.f32 0.0078125, %v848_v37  ;;  %v895_v28 = vmul.f32 %v14784_v33, %v14784_v33  ;;  %12746 = vmatpush3.bf16.msra.mxu1 %v13706_v61 }
  0xe4   : > { %920 = vadd.xlane.f32.xlu1 %v893_v26  ;;  %922 = vadd.xlane.f32.xlu0 %v894_v42  ;;  %v14794_v29 = vsub.f32 %v14710_v30, %v864_v39 }
  0xe5   : > { %v14797_v44 = vsub.f32 %v14712_v31, %v865_v43  ;;  %v13694_v31 = vld [vmem:[%s14620_s24 + $0x7c] ss:$12 sps:$4 sm:$0xff]   ;;  %s18428_s24 = sld [smem:[#allocation54_spill]] }
  0xe6   : > { %v896_v50 = vmul.f32 %v14794_v29, %v14794_v29  ;;  %1233 = vmatprep.subr.bf16.mxu0 %v13694_v31  ;;  %v14832_v31 = vld [vmem:[%s18431_s20] ss:$0 sm:$0xff]  ;;  %s18590_s20 = scalar_lea.vmem %s18277_s8, %s14600_s18 }
  0xe7   : > { %v897_v30 = vmul.f32 %v14797_v44, %v14797_v44  ;;  %1234 = vmatpush1.bf16.msra.mxu0 %v13697_v52 }
  0xe8   : > { %924 = vadd.xlane.f32.xlu1 %v895_v28  ;;  %926 = vadd.xlane.f32.xlu0 %v896_v50 }
  0xe9   : > { %1235 = vmatprep.subr.bf16.mxu0 %v13698_v53 }
  0xeb   : > { %1236 = vmatpush1.bf16.msra.mxu0 %v13701_v55  ;;  %s18429_s28 = scalar_lea.vmem %s18428_s24, %s14600_s18 }
  0xec   : > { %928 = vadd.xlane.f32.xlu1 %v897_v30  ;;  %1237 = vmatprep.subr.bf16.mxu0 %v13702_v58  ;;  %v14823_v38 = vld [vmem:[%s18429_s28] ss:$0 sm:$0xff] }
  0xef   : > { %1238 = vmatpush1.bf16.msra.mxu0 %v13705_v60 }
 0x159   : > { %v899_v63 = vpop.xlane.xlu0 %898 }
 0x15a   : > { %v930_v2 = vmul.f32 0.0078125, %v899_v63 }
 0x15c   : > { %v946_v3 = vadd.f32 1e-05, %v930_v2 }
 0x15d   : > { %v901_v4 = vpop.xlane.xlu1 %900  ;;  %v903_v5 = vpop.xlane.xlu0 %902 }
 0x15e   : > { %13795 = vrsqrt.f32 %v946_v3  ;;  %v931_v6 = vmul.f32 0.0078125, %v901_v4  ;;  %v932_v7 = vmul.f32 0.0078125, %v903_v5 }
 0x160   : > { %v947_v10 = vadd.f32 1e-05, %v931_v6  ;;  %v948_v11 = vadd.f32 1e-05, %v932_v7 }
 0x161   : > { %v905_v12 = vpop.xlane.xlu1 %904  ;;  %v907_v13 = vpop.xlane.xlu0 %906 }
 0x162   : > { %13797 = vrsqrt.f32 %v947_v10  ;;  %v933_v14 = vmul.f32 0.0078125, %v905_v12  ;;  %v934_v15 = vmul.f32 0.0078125, %v907_v13 }
 0x163   : > { %13799 = vrsqrt.f32 %v948_v11 }
 0x164   : > { %v949_v16 = vadd.f32 1e-05, %v933_v14  ;;  %v950_v17 = vadd.f32 1e-05, %v934_v15 }
 0x165   : > { %v909_v18 = vpop.xlane.xlu1 %908  ;;  %v911_v21 = vpop.xlane.xlu0 %910 }
 0x166   : > { %13801 = vrsqrt.f32 %v949_v16  ;;  %v935_v22 = vmul.f32 0.0078125, %v909_v18  ;;  %v936_v23 = vmul.f32 0.0078125, %v911_v21 }
 0x167   : > { %13803 = vrsqrt.f32 %v950_v17 }
 0x168   : > { %v13796_v24 = vpop.eup %13795  ;;  %v951_v25 = vadd.f32 1e-05, %v935_v22  ;;  %v952_v32 = vadd.f32 1e-05, %v936_v23 }
 0x169   : > { %v913_v26 = vpop.xlane.xlu1 %912  ;;  %v915_v34 = vpop.xlane.xlu0 %914  ;;  %v978_v35 = vmul.f32 %v13796_v24, %v14722_v40 }
 0x16a   : > { %13805 = vrsqrt.f32 %v951_v25  ;;  %v937_v36 = vmul.f32 0.0078125, %v913_v26  ;;  %v938_v37 = vmul.f32 0.0078125, %v915_v34 }
 0x16b   : > { %13807 = vrsqrt.f32 %v952_v32  ;;  %v1000_v40 = vmul.f32 %v14823_v38, %v978_v35 }
 0x16c   : > { %v13798_v39 = vpop.eup %13797  ;;  %v953_v42 = vadd.f32 1e-05, %v937_v36  ;;  %v954_v43 = vadd.f32 1e-05, %v938_v37 }
 0x16d   : > { %v13800_v28 = vpop.eup %13799  ;;  %v917_v45 = vpop.xlane.xlu1 %916  ;;  %v979_v47 = vmul.f32 %v13798_v39, %v14730_v48  ;;  %v1022_v61 = vadd.f32 %v14832_v31, %v1000_v40 }
 0x16e   : > { %v919_v46 = vpop.xlane.xlu0 %918  ;;  %13809 = vrsqrt.f32 %v953_v42  ;;  %v939_v50 = vmul.f32 0.0078125, %v917_v45  ;;  %v980_v51 = vmul.f32 %v13800_v28, %v14724_v41 }
 0x16f   : > { %v940_v30 = vmul.f32 0.0078125, %v919_v46  ;;  %13811 = vrsqrt.f32 %v954_v43  ;;  %v1001_v52 = vmul.f32 %v14823_v38, %v979_v47 }
 0x170   : > { %v13802_v53 = vpop.eup %13801  ;;  %v955_v54 = vadd.f32 1e-05, %v939_v50  ;;  %v1002_v48 = vmul.f32 %v14823_v38, %v980_v51 }
 0x171   : > { %v956_v55 = vadd.f32 1e-05, %v940_v30  ;;  %v13804_v58 = vpop.eup %13803  ;;  %v921_v59 = vpop.xlane.xlu1 %920  ;;  %v1023_v63 = vadd.f32 %v14832_v31, %v1001_v52  ;;  %v981_v2 = vmul.f32 %v13802_v53, %v14732_v49 }
 0x172   : > { %v923_v60 = vpop.xlane.xlu0 %922  ;;  %13813 = vrsqrt.f32 %v955_v54  ;;  %v941_v3 = vmul.f32 0.0078125, %v921_v59  ;;  %v982_v6 = vmul.f32 %v13804_v58, %v14738_v56  ;;  %v1024_v12 = vadd.f32 %v14832_v31, %v1002_v48 }
 0x173   : > { %v942_v41 = vmul.f32 0.0078125, %v923_v60  ;;  %13815 = vrsqrt.f32 %v956_v55  ;;  %v1038_v4 = vpack.c.bf16 %v1023_v63, %v1022_v61  ;;  %v1003_v5 = vmul.f32 %v14823_v38, %v981_v2 }
 0x174   : > { %v13806_v7 = vpop.eup %13805  ;;  %v957_v10 = vadd.f32 1e-05, %v941_v3  ;;  %v1004_v17 = vmul.f32 %v14823_v38, %v982_v6 }
 0x175   : > { %v958_v11 = vadd.f32 1e-05, %v942_v41  ;;  %v13808_v13 = vpop.eup %13807  ;;  %v925_v14 = vpop.xlane.xlu1 %924  ;;  %1256 = vmatmul.mubr.bf16.vlgmr.msra.gmra.mrb[0].mxu0 %v1038_v4  ;;  %12747 = vmatprep.mubr.bf16.mxu1 %v1038_v4  ;;  %v1025_v49 = vadd.f32 %v14832_v31, %v1003_v5  ;;  %v983_v16 = vmul.f32 %v13806_v7, %v14740_v57 }
 0x176   : > { %v927_v15 = vpop.xlane.xlu0 %926  ;;  %13817 = vrsqrt.f32 %v957_v10  ;;  %v943_v18 = vmul.f32 0.0078125, %v925_v14  ;;  %1265 = vmatprep.mubr.bf16.mxu0 %v18296_v62  ;;  %v984_v56 = vmul.f32 %v13808_v13, %v14747_v0  ;;  %v1026_v35 = vadd.f32 %v14832_v31, %v1004_v17 }
 0x177   : > { %v944_v21 = vmul.f32 0.0078125, %v927_v15  ;;  %13819 = vrsqrt.f32 %v958_v11  ;;  %v1039_v22 = vpack.c.bf16 %v1025_v49, %v1024_v12  ;;  %v1005_v23 = vmul.f32 %v14823_v38, %v983_v16  ;;  %v1078_v49 = vld [vmem:[%s14626_s21] sm:$0x7] }
 0x178   : > { %v13810_v24 = vpop.eup %13809  ;;  %v959_v25 = vadd.f32 1e-05, %v943_v18  ;;  %v1006_v26 = vmul.f32 %v14823_v38, %v984_v56 }
 0x179   : > { %v960_v32 = vadd.f32 1e-05, %v944_v21  ;;  %v13812_v34 = vpop.eup %13811  ;;  %v929_v57 = vpop.xlane.xlu1 %928  ;;  %12748 = vmatmul.mubr.bf16.vlgmr.msra.gmra.mrb[0].mxu1 %v1039_v22  ;;  %v1027_v36 = vadd.f32 %v14832_v31, %v1005_v23  ;;  %v985_v37 = vmul.f32 %v13810_v24, %v14750_v1 }
 0x17a   : > { %13821 = vrsqrt.f32 %v959_v25  ;;  %v945_v0 = vmul.f32 0.0078125, %v929_v57  ;;  %v986_v39 = vmul.f32 %v13812_v34, %v14757_v8  ;;  %v1028_v46 = vadd.f32 %v14832_v31, %v1006_v26 }
 0x17b   : > { %13823 = vrsqrt.f32 %v960_v32  ;;  %v1040_v42 = vpack.c.bf16 %v1027_v36, %v1026_v35  ;;  %v1007_v43 = vmul.f32 %v14823_v38, %v985_v37 }
 0x17c   : > { %v13814_v28 = vpop.eup %13813  ;;  %v961_v45 = vadd.f32 1e-05, %v945_v0  ;;  %v1008_v1 = vmul.f32 %v14823_v38, %v986_v39 }
 0x17d   : > { %v13816_v47 = vpop.eup %13815  ;;  %1266 = vmatmul.mubr.bf16.gmra.mrb[4].mxu0 %v1039_v22  ;;  %12751 = vmatprep.mubr.bf16.mxu1 %v1040_v42  ;;  %v1029_v40 = vadd.f32 %v14832_v31, %v1007_v43  ;;  %v987_v50 = vmul.f32 %v13814_v28, %v14760_v9 }
 0x17e   : > { %13825 = vrsqrt.f32 %v961_v45  ;;  %1275 = vmatprep.mubr.bf16.mxu0 %v18296_v62  ;;  %v988_v8 = vmul.f32 %v13816_v47, %v14770_v19  ;;  %v1030_v55 = vadd.f32 %v14832_v31, %v1008_v1 }
 0x17f   : > { %v1041_v30 = vpack.c.bf16 %v1029_v40, %v1028_v46  ;;  %v1009_v51 = vmul.f32 %v14823_v38, %v987_v50 }
 0x180   : > { %v13818_v52 = vpop.eup %13817  ;;  %v1010_v53 = vmul.f32 %v14823_v38, %v988_v8 }
 0x181   : > { %v13820_v54 = vpop.eup %13819  ;;  %12752 = vmatmul.mubr.bf16.gmra.mrb[4].mxu1 %v1041_v30  ;;  %v1031_v48 = vadd.f32 %v14832_v31, %v1009_v51  ;;  %v989_v9 = vmul.f32 %v13818_v52, %v14773_v20 }
 0x182   : > { %v990_v58 = vmul.f32 %v13820_v54, %v14781_v27  ;;  %v1032_v61 = vadd.f32 %v14832_v31, %v1010_v53 }
 0x183   : > { %v1042_v59 = vpack.c.bf16 %v1031_v48, %v1030_v55  ;;  %v1011_v60 = vmul.f32 %v14823_v38, %v989_v9 }
 0x184   : > { %v13822_v19 = vpop.eup %13821  ;;  %v1012_v41 = vmul.f32 %v14823_v38, %v990_v58 }
 0x185   : > { %v13824_v63 = vpop.eup %13823  ;;  %1276 = vmatmul.mubr.bf16.gmra.mrb[8].mxu0 %v1040_v42  ;;  %12755 = vmatprep.mubr.bf16.mxu1 %v1042_v59  ;;  %v1033_v2 = vadd.f32 %v14832_v31, %v1011_v60  ;;  %v991_v3 = vmul.f32 %v13822_v19, %v14784_v33 }
 0x186   : > { %1285 = vmatprep.mubr.bf16.mxu0 %v18296_v62  ;;  %v992_v20 = vmul.f32 %v13824_v63, %v14794_v29  ;;  %v1034_v6 = vadd.f32 %v14832_v31, %v1012_v41 }
 0x187   : > { %v1043_v27 = vpack.c.bf16 %v1033_v2, %v1032_v61  ;;  %v1013_v4 = vmul.f32 %v14823_v38, %v991_v3 }
 0x188   : > { %v13826_v5 = vpop.eup %13825  ;;  %v1014_v11 = vmul.f32 %v14823_v38, %v992_v20 }
 0x189   : > { %12756 = vmatmul.mubr.bf16.gmra.mrb[8].mxu1 %v1043_v27  ;;  %v1035_v7 = vadd.f32 %v14832_v31, %v1013_v4  ;;  %v993_v10 = vmul.f32 %v13826_v5, %v14797_v44  ;;  %v18298_v44 = vmov 0.0  }
 0x18a   : > { %v1036_v29 = vadd.f32 %v14832_v31, %v1014_v11  ;;  %12763 = vmatprep.subr.bf16.mxu1 %v18298_v44  ;;  %12787 = vmatprep.subr.bf16.mxu0 %v18298_v44 }
 0x18b   : > { %v1044_v33 = vpack.c.bf16 %v1035_v7, %v1034_v6  ;;  %v1015_v12 = vmul.f32 %v14823_v38, %v993_v10  ;;  %v1080_v38 = vlaneseq }
 0x18d   : > { %1286 = vmatmul.mubr.bf16.gmra.mrb[12].mxu0 %v1041_v30  ;;  %12759 = vmatprep.mubr.bf16.mxu1 %v1044_v33  ;;  %v1037_v13 = vadd.f32 %v14832_v31, %v1015_v12  ;;  %v14892_v31 = vshrl.u32 %v1080_v38, 7 }
 0x18e   : > { %1295 = vmatprep.mubr.bf16.mxu0 %v18296_v62 }
 0x18f   : > { %v1045_v14 = vpack.c.bf16 %v1037_v13, %v1036_v29  ;;  %18432 = vst [vmem:[#allocation11_spill] sm:$0xff] %v14892_v31  ;;  %v18293_v15 = vsub.s32 1, %v14892_v31  ;;  %v18294_v16 = vsub.s32 2, %v14892_v31  ;;  %v18295_v18 = vsub.s32 0, %v14892_v31 }
 0x191   : > { %12760 = vmatmul.mubr.bf16.gmra.mrb[12].mxu1 %v1045_v14  ;;  %v14899_v17 = vrot.slane %v1078_v49, %v18293_v15  ;;  %v14904_v22 = vrot.slane %v1078_v49, %v18294_v16  ;;  %v14909_v32 = vrot.slane %v1078_v49, %v18295_v18 }
 0x192   : > { %12765 = vmatprep.mubr.msk.bf16.mxu1 %vm14472_vm0, %v18298_v44 }
 0x195   : > { %1296 = vmatmul.mubr.bf16.gmra.mrb[16].mxu0 %v1042_v59 }
 0x196   : > { %1305 = vmatprep.mubr.bf16.mxu0 %v18296_v62 }
 0x19d   : > { %1306 = vmatmul.mubr.bf16.gmra.mrb[20].mxu0 %v1043_v27 }
 0x19e   : > { %1315 = vmatprep.mubr.bf16.mxu0 %v18296_v62 }
 0x1a5   : > { %1316 = vmatmul.mubr.bf16.gmra.mrb[24].mxu0 %v1044_v33 }
 0x1a6   : > { %1325 = vmatprep.mubr.bf16.mxu0 %v18296_v62 }
 0x1ad   : > { %1326 = vmatmul.mubr.bf16.gmra.mrb[28].mxu0 %v1045_v14 }
 0x1ae   : > { %12789 = vmatprep.mubr.msk.bf16.mxu0 %vm14472_vm0, %v18298_v44 }
 0x248   : > { %v1257_v21 = vpop.f32.mrb[0].mxu0 }
 0x249   : > { %v1259_v56 = vpop.f32.mrb[1].mxu0  ;;  %v1258_v28 = vadd.f32 %v1257_v21, %v14909_v32 }
 0x24a   : > { %v1260_v23 = vadd.f32 %v1259_v56, %v14899_v17  ;;  %v1261_v24 = vpop.f32.mrb[2].mxu0 }
 0x24b   : > { %v1263_v25 = vpop.f32.mrb[3].mxu0  ;;  %v14934_v8 = vpack.c.bf16 %v1258_v28, %v1258_v28  ;;  %v1262_v59 = vadd.f32 %v1261_v24, %v14909_v32 }
 0x24c   : > { %v14911_v26 = vpack.c.bf16 %v1260_v23, %v1260_v23  ;;  %v12749_v34 = vpop.f32.mrb[0].mxu1  ;;  %v1264_v36 = vadd.f32 %v1263_v25, %v14899_v17 }
 0x24d   : > { %v14914_v57 = vadd.f32 %v12749_v34, %v14904_v22  ;;  %v1370_v35 = vpop.f32.mrb[1].mxu1  ;;  %v14962_v20 = vpack.c.bf16 %v1262_v59, %v1262_v59 }
 0x24e   : > { %v14918_v37 = vadd.f32 %v1370_v35, %v14904_v22  ;;  %v12750_v0 = vpop.f32.mrb[2].mxu1  ;;  %v1631_v39 = vsel %vm1626_vm1, %v14911_v26, 0  ;;  %v14930_v40 = vpack.c.bf16 %v1264_v36, %v1264_v36 }
 0x24f   : > { %v14923_v42 = vadd.f32 %v12750_v0, %v14904_v22  ;;  %v1373_v43 = vpop.f32.mrb[3].mxu1  ;;  %12764 = vmatpush3.bf16.xpose.msra.mxu1 %v1631_v39 }
 0x250   : > { %v14927_v45 = vadd.f32 %v1373_v43, %v14904_v22  ;;  %v1267_v46 = vpop.f32.mrb[4].mxu0  ;;  %12769 = vmatprep.subr.bf16.mxu1 %v18298_v44  ;;  %v1677_v48 = vsel %vm1626_vm1, %v14930_v40, 0 }
 0x251   : > { %v1269_v47 = vpop.f32.mrb[5].mxu0  ;;  %v1268_v14 = vadd.f32 %v1267_v46, %v14909_v32 }
 0x252   : > { %v14932_v50 = vpop.f32.mrb[6].mxu0  ;;  %v1270_v53 = vadd.f32 %v1269_v47, %v14899_v17 }
 0x253   : > { %v1273_v1 = vpop.f32.mrb[7].mxu0  ;;  %v14996_v35 = vpack.c.bf16 %v1268_v14, %v1268_v14 }
 0x254   : > { %v12753_v30 = vpop.f32.mrb[4].mxu1  ;;  %v14957_v63 = vpack.c.bf16 %v1270_v53, %v1270_v53  ;;  %v1274_v7 = vadd.f32 %v1273_v1, %v14899_v17 }
 0x255   : > { %v14937_v51 = vadd.f32 %v12753_v30, %v14904_v22  ;;  %v1386_v52 = vpop.f32.mrb[5].mxu1 }
 0x256   : > { %v14941_v54 = vadd.f32 %v1386_v52, %v14904_v22  ;;  %v12754_v55 = vpop.f32.mrb[6].mxu1  ;;  %12766 = vmatmul.mubr.msk.bf16.vlgmr.msra.gmra.mrb[16].mxu1 %vm1626_vm1, %v14934_v8  ;;  %v1723_v33 = vsel %vm1626_vm1, %v14957_v63, 0  ;;  %v14991_v23 = vpack.c.bf16 %v1274_v7, %v1274_v7 }
 0x257   : > { %v14948_v9 = vadd.f32 %v12754_v55, %v14904_v22  ;;  %v1389_v58 = vpop.f32.mrb[7].mxu1  ;;  %12770 = vmatpush3.bf16.xpose.msra.mxu1 %v1677_v48  ;;  %12771 = vmatprep.mubr.msk.bf16.mxu1 %vm14472_vm0, %v18298_v44  ;;  %v1272_v48 = vadd.f32 %v14932_v50, %v14909_v32 }
 0x258   : > { %v14954_v60 = vadd.f32 %v1389_v58, %v14904_v22  ;;  %v1277_v19 = vpop.f32.mrb[8].mxu0  ;;  %12775 = vmatprep.subr.bf16.mxu1 %v18298_v44  ;;  %v1769_v30 = vsel %vm1626_vm1, %v14991_v23, 0 }
 0x259   : > { %v1279_v61 = vpop.f32.mrb[9].mxu0  ;;  %v1278_v38 = vadd.f32 %v1277_v19, %v14909_v32 }
 0x25a   : > { %v1280_v2 = vadd.f32 %v1279_v61, %v14899_v17  ;;  %v14960_v3 = vpop.f32.mrb[10].mxu0 }
 0x25b   : > { %v1283_v41 = vpop.f32.mrb[11].mxu0  ;;  %v14998_v36 = vpack.c.bf16 %v1278_v38, %v1278_v38 }
 0x25c   : > { %v14964_v27 = vpack.c.bf16 %v1280_v2, %v1280_v2  ;;  %v12757_v4 = vpop.f32.mrb[8].mxu1  ;;  %v1284_v46 = vadd.f32 %v1283_v41, %v14899_v17 }
 0x25d   : > { %v14967_v5 = vadd.f32 %v12757_v4, %v14904_v22  ;;  %v1402_v6 = vpop.f32.mrb[9].mxu1 }
 0x25e   : > { %v14971_v10 = vadd.f32 %v1402_v6, %v14904_v22  ;;  %v12758_v11 = vpop.f32.mrb[10].mxu1  ;;  %12772 = vmatmul.mubr.msk.bf16.vlgmr.msra.gmra.mrb[20].mxu1 %vm1626_vm1, %v14962_v20  ;;  %v1815_v12 = vsel %vm1626_vm1, %v14964_v27, 0  ;;  %v15032_v2 = vpack.c.bf16 %v1284_v46, %v1284_v46 }
 0x25f   : > { %v14980_v29 = vadd.f32 %v12758_v11, %v14904_v22  ;;  %v1405_v13 = vpop.f32.mrb[11].mxu1  ;;  %12776 = vmatpush3.bf16.xpose.msra.mxu1 %v1723_v33  ;;  %12788 = vmatpush3.bf16.xpose.msra.mxu0 %v1815_v12 }
 0x260   : > { %v14985_v49 = vadd.f32 %v1405_v13, %v14904_v22  ;;  %v1287_v21 = vpop.f32.mrb[12].mxu0  ;;  %12777 = vmatprep.mubr.msk.bf16.mxu1 %vm14472_vm0, %v18298_v44  ;;  %12781 = vmatprep.subr.bf16.mxu1 %v18298_v44  ;;  %v1861_v33 = vsel %vm1626_vm1, %v15032_v2, 0  ;;  %v1282_v13 = vadd.f32 %v14960_v3, %v14909_v32 }
 0x261   : > { %v1289_v56 = vpop.f32.mrb[13].mxu0  ;;  %12799 = vmatprep.subr.bf16.mxu0 %v18298_v44  ;;  %v1288_v58 = vadd.f32 %v1287_v21, %v14909_v32 }
 0x262   : > { %v1290_v24 = vadd.f32 %v1289_v56, %v14899_v17  ;;  %v14994_v25 = vpop.f32.mrb[14].mxu0 }
 0x263   : > { %v1293_v34 = vpop.f32.mrb[15].mxu0  ;;  %v15037_v6 = vpack.c.bf16 %v1288_v58, %v1288_v58 }
 0x264   : > { %v15000_v0 = vpack.c.bf16 %v1290_v24, %v1290_v24  ;;  %v12761_v39 = vpop.f32.mrb[12].mxu1  ;;  %v1294_v11 = vadd.f32 %v1293_v34, %v14899_v17 }
 0x265   : > { %v15003_v43 = vadd.f32 %v12761_v39, %v14904_v22  ;;  %v1418_v28 = vpop.f32.mrb[13].mxu1  ;;  %v15062_v39 = vpack.c.bf16 %v1282_v13, %v1282_v13 }
 0x266   : > { %v15007_v47 = vadd.f32 %v1418_v28, %v14904_v22  ;;  %v12762_v1 = vpop.f32.mrb[14].mxu1  ;;  %12778 = vmatmul.mubr.msk.bf16.vlgmr.msra.gmra.mrb[24].mxu1 %vm1626_vm1, %v14996_v35  ;;  %12790 = vmatmul.mubr.msk.bf16.vlgmr.msra.gmra.mrb[32].mxu0 %vm1626_vm1, %v14998_v36  ;;  %v1907_v52 = vsel %vm1626_vm1, %v15000_v0, 0  ;;  %v15059_v56 = vpack.c.bf16 %v1294_v11, %v1294_v11 }
 0x267   : > { %18433 = vst [vmem:[#allocation12_spill] sm:$0xff] %v15003_v43  ;;  %v15018_v53 = vadd.f32 %v12762_v1, %v14904_v22  ;;  %v1421_v55 = vpop.f32.mrb[15].mxu1  ;;  %12782 = vmatpush3.bf16.xpose.msra.mxu1 %v1769_v30  ;;  %12800 = vmatpush3.bf16.xpose.msra.mxu0 %v1907_v52 }
 0x268   : > { %v15024_v59 = vadd.f32 %v1421_v55, %v14904_v22  ;;  %v1297_v19 = vpop.f32.mrb[16].mxu0  ;;  %12783 = vmatprep.mubr.msk.bf16.mxu1 %vm14472_vm0, %v18298_v44  ;;  %12801 = vmatprep.mubr.msk.bf16.mxu0 %vm14472_vm0, %v18298_v44  ;;  %v15035_v22 = vpack.c.bf16 %v1272_v48, %v1272_v48  ;;  %v1953_v30 = vsel %vm1626_vm1, %v15059_v56, 0  ;;  %v1292_v55 = vadd.f32 %v14994_v25, %v14909_v32 }
 0x269   : > { %18434 = vst [vmem:[#allocation13_spill] sm:$0xff] %v15018_v53  ;;  %v1299_v61 = vpop.f32.mrb[17].mxu0  ;;  %12793 = vmatprep.subr.bf16.mxu1 %v18298_v44  ;;  %12811 = vmatprep.subr.bf16.mxu0 %v18298_v44  ;;  %v1298_v14 = vadd.f32 %v1297_v19, %v14909_v32 }
 0x26a   : > { %18435 = vst [vmem:[#allocation14_spill] sm:$0xff] %v15024_v59  ;;  %v1300_v50 = vadd.f32 %v1299_v61, %v14899_v17  ;;  %v1301_v41 = vpop.f32.mrb[18].mxu0 }
 0x26b   : > { %v1303_v4 = vpop.f32.mrb[19].mxu0  ;;  %v15064_v28 = vpack.c.bf16 %v1298_v14, %v1298_v14 }
 0x26c   : > { %v15039_v7 = vpack.c.bf16 %v1300_v50, %v1300_v50  ;;  %v1304_v1 = vadd.f32 %v1303_v4, %v14899_v17 }
 0x26e   : > { %12784 = vmatmul.mubr.msk.bf16.vlgmr.msra.gmra.mrb[28].mxu1 %vm1626_vm1, %v15035_v22  ;;  %12802 = vmatmul.mubr.msk.bf16.vlgmr.msra.gmra.mrb[36].mxu0 %vm1626_vm1, %v15037_v6  ;;  %v1999_v12 = vsel %vm1626_vm1, %v15039_v7, 0  ;;  %v15086_v61 = vpack.c.bf16 %v1304_v1, %v1304_v1  ;;  %v1302_v1 = vadd.f32 %v1301_v41, %v14909_v32 }
 0x26f   : > { %12794 = vmatpush3.bf16.xpose.msra.mxu1 %v1861_v33  ;;  %12812 = vmatpush3.bf16.xpose.msra.mxu0 %v1999_v12  ;;  %v15090_v33 = vpack.c.bf16 %v1292_v55, %v1292_v55 }
 0x270   : > { %v1307_v38 = vpop.f32.mrb[20].mxu0  ;;  %12795 = vmatprep.mubr.msk.bf16.mxu1 %vm14472_vm0, %v18298_v44  ;;  %12813 = vmatprep.mubr.msk.bf16.mxu0 %vm14472_vm0, %v18298_v44  ;;  %18436 = vst [vmem:[#allocation15_spill] sm:$0xff] %v15086_v61 }
 0x271   : > { %v1309_v21 = vpop.f32.mrb[21].mxu0  ;;  %12805 = vmatprep.subr.bf16.mxu1 %v18298_v44  ;;  %12823 = vmatprep.subr.bf16.mxu0 %v18298_v44  ;;  %v1308_v48 = vadd.f32 %v1307_v38, %v14909_v32 }
 0x272   : > { %v1310_v24 = vadd.f32 %v1309_v21, %v14899_v17  ;;  %v1311_v34 = vpop.f32.mrb[22].mxu0  ;;  %v2045_v21 = vsel %vm1626_vm1, %v15086_v61, 0 }
 0x273   : > { %v1313_v3 = vpop.f32.mrb[23].mxu0  ;;  %v15092_v12 = vpack.c.bf16 %v1308_v48, %v1308_v48 }
 0x274   : > { %v15066_v46 = vpack.c.bf16 %v1310_v24, %v1310_v24  ;;  %v1314_v38 = vadd.f32 %v1313_v3, %v14899_v17 }
 0x276   : > { %12796 = vmatmul.mubr.msk.bf16.vlgmr.msra.gmra.mrb[32].mxu1 %vm1626_vm1, %v15062_v39  ;;  %12814 = vmatmul.mubr.msk.bf16.vlgmr.msra.gmra.mrb[40].mxu0 %vm1626_vm1, %v15064_v28  ;;  %v2091_v52 = vsel %vm1626_vm1, %v15066_v46, 0  ;;  %v15114_v55 = vpack.c.bf16 %v1314_v38, %v1314_v38 }
 0x277   : > { %12806 = vmatpush3.bf16.xpose.msra.mxu1 %v1953_v30  ;;  %12824 = vmatpush3.bf16.xpose.msra.mxu0 %v2091_v52 }
 0x278   : > { %v1317_v58 = vpop.f32.mrb[24].mxu0  ;;  %12807 = vmatprep.mubr.msk.bf16.mxu1 %vm14472_vm0, %v18298_v44  ;;  %12825 = vmatprep.mubr.msk.bf16.mxu0 %vm14472_vm0, %v18298_v44  ;;  %18438 = vst [vmem:[#allocation17_spill] sm:$0xff] %v15114_v55  ;;  %v2137_v38 = vsel %vm1626_vm1, %v15114_v55, 0 }
 0x279   : > { %v1319_v19 = vpop.f32.mrb[25].mxu0  ;;  %12817 = vmatprep.subr.bf16.mxu1 %v18298_v44  ;;  %12835 = vmatprep.subr.bf16.mxu0 %v18298_v44  ;;  %v1318_v30 = vadd.f32 %v1317_v58, %v14909_v32 }
 0x27a   : > { %v1320_v50 = vadd.f32 %v1319_v19, %v14899_v17  ;;  %v1321_v4 = vpop.f32.mrb[26].mxu0 }
 0x27b   : > { %v1322_v25 = vadd.f32 %v1321_v4, %v14909_v32  ;;  %v1323_v11 = vpop.f32.mrb[27].mxu0  ;;  %v15120_v4 = vpack.c.bf16 %v1318_v30, %v1318_v30 }
 0x27c   : > { %v15094_v13 = vpack.c.bf16 %v1320_v50, %v1320_v50  ;;  %v1324_v14 = vadd.f32 %v1323_v11, %v14899_v17  ;;  %v15118_v50 = vpack.c.bf16 %v1302_v1, %v1302_v1  ;;  %v1312_v1 = vadd.f32 %v1311_v34, %v14909_v32 }
 0x27d   : > { %18440 = vst [vmem:[#allocation19_spill] sm:$0xff] %v15120_v4 }
 0x27e   : > { %18437 = vst [vmem:[#allocation16_spill] sm:$0xff] %v15094_v13  ;;  %12808 = vmatmul.mubr.msk.bf16.vlgmr.msra.gmra.mrb[36].mxu1 %vm1626_vm1, %v15090_v33  ;;  %12826 = vmatmul.mubr.msk.bf16.vlgmr.msra.gmra.mrb[44].mxu0 %vm1626_vm1, %v15092_v12  ;;  %v2183_v24 = vsel %vm1626_vm1, %v15094_v13, 0  ;;  %18439 = vst [vmem:[#allocation18_spill] sm:$0xff] %v15118_v50  ;;  %v15147_v34 = vpack.c.bf16 %v1312_v1, %v1312_v1 }
 0x27f   : > { %12818 = vmatpush3.bf16.xpose.msra.mxu1 %v2045_v21  ;;  %12836 = vmatpush3.bf16.xpose.msra.mxu0 %v2183_v24 }
 0x280   : > { %v1327_v52 = vpop.f32.mrb[28].mxu0  ;;  %12819 = vmatprep.mubr.msk.bf16.mxu1 %vm14472_vm0, %v18298_v44  ;;  %12837 = vmatprep.mubr.msk.bf16.mxu0 %vm14472_vm0, %v18298_v44  ;;  %18444 = vst [vmem:[#allocation23_spill] sm:$0xff] %v15147_v34 }
 0x281   : > { %v1329_v3 = vpop.f32.mrb[29].mxu0  ;;  %12829 = vmatprep.subr.bf16.mxu1 %v18298_v44  ;;  %12847 = vmatprep.subr.bf16.mxu0 %v18298_v44  ;;  %v1328_v30 = vadd.f32 %v1327_v52, %v14909_v32 }
 0x282   : > { %v1330_v48 = vadd.f32 %v1329_v3, %v14899_v17  ;;  %v1331_v19 = vpop.f32.mrb[30].mxu0  ;;  %v15145_v3 = vpack.c.bf16 %v1324_v14, %v1324_v14 }
 0x283   : > { %v1332_v41 = vadd.f32 %v1331_v19, %v14909_v32  ;;  %v1333_v58 = vpop.f32.mrb[31].mxu0  ;;  %v15149_v32 = vpack.c.bf16 %v1328_v30, %v1328_v30 }
 0x284   : > { %v15122_v11 = vpack.c.bf16 %v1330_v48, %v1330_v48  ;;  %v1334_v21 = vadd.f32 %v1333_v58, %v14899_v17  ;;  %v15143_v17 = vpack.c.bf16 %v14918_v37, %v14918_v37  ;;  %18443 = vst [vmem:[#allocation22_spill] sm:$0xff] %v15145_v3  ;;  %v2229_v52 = vsel %vm1626_vm1, %v15145_v3, 0 }
 0x285   : > { %18445 = vst [vmem:[#allocation24_spill] sm:$0xff] %v15149_v32  ;;  %v15167_v48 = vpack.c.bf16 %v1322_v25, %v1322_v25  ;;  %v15178_v58 = vpack.c.bf16 %v14927_v45, %v14927_v45 }
 0x286   : > { %18441 = vst [vmem:[#allocation20_spill] sm:$0xff] %v15122_v11  ;;  %12820 = vmatmul.mubr.msk.bf16.vlgmr.msra.gmra.mrb[40].mxu1 %vm1626_vm1, %v15118_v50  ;;  %12838 = vmatmul.mubr.msk.bf16.vlgmr.msra.gmra.mrb[48].mxu0 %vm1626_vm1, %v15120_v4  ;;  %v2275_v24 = vsel %vm1626_vm1, %v15122_v11, 0  ;;  %18442 = vst [vmem:[#allocation21_spill] sm:$0xff] %v15143_v17  ;;  %v2561_v37 = vsel %vm2559_vm2, %v15143_v17, 0  ;;  %v15165_v14 = vpack.c.bf16 %v1334_v21, %v1334_v21 }
 0x287   : > { %12830 = vmatpush3.bf16.xpose.msra.mxu1 %v2137_v38  ;;  %12848 = vmatpush3.bf16.xpose.msra.mxu0 %v2275_v24  ;;  %18447 = vst [vmem:[#allocation26_spill] sm:$0xff] %v15167_v48  ;;  %18448 = vst [vmem:[#allocation27_spill] sm:$0xff] %v15178_v58  ;;  %v15180_v21 = vpack.c.bf16 %v1332_v41, %v1332_v41  ;;  %v2607_v25 = vsel %vm2559_vm2, %v15178_v58, 0  ;;  %v15192_v38 = vld [vmem:[%s18450_s19] sm:$0xff] }
 0x288   : > { %12831 = vmatprep.mubr.msk.bf16.mxu1 %vm14472_vm0, %v18298_v44  ;;  %12849 = vmatprep.mubr.msk.bf16.mxu0 %vm14472_vm0, %v18298_v44  ;;  %18446 = vst [vmem:[#allocation25_spill] sm:$0xff] %v15165_v14  ;;  %v2321_v19 = vsel %vm1626_vm1, %v15165_v14, 0 }
 0x289   : > { %12841 = vmatprep.subr.bf16.mxu1 %v18298_v44  ;;  %12859 = vmatprep.subr.bf16.mxu0 %v18298_v44  ;;  %18449 = vst [vmem:[#allocation28_spill] sm:$0xff] %v15180_v21 }
 0x28e   : > { %12832 = vmatmul.mubr.msk.bf16.vlgmr.msra.gmra.mrb[44].mxu1 %vm1626_vm1, %v15147_v34  ;;  %12850 = vmatmul.mubr.msk.bf16.vlgmr.msra.gmra.mrb[52].mxu0 %vm1626_vm1, %v15149_v32 }
 0x28f   : > { %12842 = vmatpush3.bf16.xpose.msra.mxu1 %v2229_v52  ;;  %12860 = vmatpush3.bf16.msra.mxu0 %v2561_v37 }
 0x290   : > { %12843 = vmatprep.mubr.msk.bf16.mxu1 %vm14472_vm0, %v18298_v44  ;;  %12853 = vmatprep.subr.bf16.mxu1 %v18298_v44 }
 0x291   : > { %12861 = vmatprep.mubr.msk.bf16.mxu0 %vm14472_vm0, %v18298_v44  ;;  %12871 = vmatprep.subr.bf16.mxu0 %v18298_v44 }
 0x296   : > { %12844 = vmatmul.mubr.msk.bf16.vlgmr.msra.gmra.mrb[48].mxu1 %vm1626_vm1, %v15167_v48 }
 0x297   : > { %12854 = vmatpush3.bf16.xpose.msra.mxu1 %v2321_v19  ;;  %12855 = vmatprep.mubr.msk.bf16.mxu1 %vm14472_vm0, %v18298_v44 }
 0x298   : > { %12865 = vmatprep.subr.bf16.mxu1 %v18298_v44 }
 0x29e   : > { %12856 = vmatmul.mubr.msk.bf16.vlgmr.msra.gmra.mrb[52].mxu1 %vm1626_vm1, %v15180_v21 }
 0x29f   : > { %12866 = vmatpush3.bf16.msra.mxu1 %v2607_v25  ;;  %12867 = vmatprep.mubr.msk.bf16.mxu1 %vm14472_vm0, %v18298_v44 }
 0x2a0   : > { %12877 = vmatprep.subr.bf16.mxu1 %v18298_v44 }
 0x329   : > { %v1667_v45 = vpop.f32.mrb[16].mxu1 }
 0x32a   : > { %v12767_v41 = vpop.f32.mrb[17].mxu1  ;;  %v15195_v24 = vadd.f32 %v1667_v45, %v15192_v38 }
 0x32b   : > { %v1670_v1 = vpop.f32.mrb[18].mxu1 }
 0x32c   : > { %v12768_v30 = vpop.f32.mrb[19].mxu1  ;;  %v2364_v52 = vsel %vm2363_vm3, %v15195_v24, -inf }
 0x32d   : > { %2365 = vmax.xlane.f32.xlu0 %v2364_v52 }
 0x331   : > { %v1713_v37 = vpop.f32.mrb[20].mxu1 }
 0x332   : > { %v12773_v19 = vpop.f32.mrb[21].mxu1  ;;  %v15200_v25 = vadd.f32 %v1713_v37, %v15192_v38 }
 0x333   : > { %v1716_v15 = vpop.f32.mrb[22].mxu1 }
 0x334   : > { %v12774_v16 = vpop.f32.mrb[23].mxu1  ;;  %v2367_v18 = vsel %vm2363_vm3, %v15200_v25, -inf }
 0x335   : > { %2368 = vmax.xlane.f32.xlu1 %v2367_v18 }
 0x339   : > { %v1759_v41 = vpop.f32.mrb[24].mxu1  ;;  %v1851_v45 = vpop.f32.mrb[32].mxu0 }
 0x33a   : > { %v12779_v62 = vpop.f32.mrb[25].mxu1  ;;  %v12791_v1 = vpop.f32.mrb[33].mxu0  ;;  %v15205_v30 = vadd.f32 %v1759_v41, %v15192_v38  ;;  %v15210_v15 = vadd.f32 %v1851_v45, %v15192_v38 }
 0x33b   : > { %v1762_v44 = vpop.f32.mrb[26].mxu1  ;;  %v1854_v52 = vpop.f32.mrb[34].mxu0 }
 0x33c   : > { %v12780_v31 = vpop.f32.mrb[27].mxu1  ;;  %v12792_v19 = vpop.f32.mrb[35].mxu0  ;;  %v2370_v37 = vsel %vm2363_vm3, %v15205_v30, -inf  ;;  %v2376_v16 = vsel %vm2363_vm3, %v15210_v15, -inf }
 0x33d   : > { %2371 = vmax.xlane.f32.xlu0 %v2370_v37 }
 0x341   : > { %v1805_v18 = vpop.f32.mrb[28].mxu1  ;;  %2377 = vmax.xlane.f32.xlu0 %v2376_v16  ;;  %v1943_v62 = vpop.f32.mrb[36].mxu0 }
 0x342   : > { %v12785_v1 = vpop.f32.mrb[29].mxu1  ;;  %v12803_v41 = vpop.f32.mrb[37].mxu0  ;;  %v15215_v44 = vadd.f32 %v1805_v18, %v15192_v38  ;;  %v15218_v31 = vadd.f32 %v1943_v62, %v15192_v38 }
 0x343   : > { %v1808_v52 = vpop.f32.mrb[30].mxu1  ;;  %v1946_v19 = vpop.f32.mrb[38].mxu0 }
 0x344   : > { %v12786_v53 = vpop.f32.mrb[31].mxu1  ;;  %v12804_v45 = vpop.f32.mrb[39].mxu0  ;;  %v2373_v37 = vsel %vm2363_vm3, %v15215_v44, -inf  ;;  %v2382_v58 = vsel %vm2363_vm3, %v15218_v31, -inf }
 0x345   : > { %2374 = vmax.xlane.f32.xlu1 %v2373_v37  ;;  %2383 = vmax.xlane.f32.xlu0 %v2382_v58 }
 0x349   : > { %v1897_v16 = vpop.f32.mrb[32].mxu1  ;;  %v2035_v1 = vpop.f32.mrb[40].mxu0 }
 0x34a   : > { %v12797_v41 = vpop.f32.mrb[33].mxu1  ;;  %v12815_v18 = vpop.f32.mrb[41].mxu0  ;;  %v15225_v21 = vadd.f32 %v1897_v16, %v15192_v38  ;;  %v15228_v62 = vadd.f32 %v2035_v1, %v15192_v38 }
 0x34b   : > { %v1900_v53 = vpop.f32.mrb[34].mxu1  ;;  %v2038_v52 = vpop.f32.mrb[42].mxu0 }
 0x34c   : > { %v12798_v19 = vpop.f32.mrb[35].mxu1  ;;  %v12816_v45 = vpop.f32.mrb[43].mxu0  ;;  %v2379_v14 = vsel %vm2363_vm3, %v15225_v21, -inf  ;;  %v2388_v58 = vsel %vm2363_vm3, %v15228_v62, -inf }
 0x34d   : > { %2380 = vmax.xlane.f32.xlu1 %v2379_v14  ;;  %2389 = vmax.xlane.f32.xlu0 %v2388_v58 }
 0x351   : > { %v1989_v37 = vpop.f32.mrb[36].mxu1  ;;  %v2127_v41 = vpop.f32.mrb[44].mxu0 }
 0x352   : > { %v12809_v18 = vpop.f32.mrb[37].mxu1  ;;  %v12827_v16 = vpop.f32.mrb[45].mxu0  ;;  %v15235_v48 = vadd.f32 %v1989_v37, %v15192_v38  ;;  %v15238_v1 = vadd.f32 %v2127_v41, %v15192_v38 }
 0x353   : > { %v1992_v53 = vpop.f32.mrb[38].mxu1  ;;  %v2130_v52 = vpop.f32.mrb[46].mxu0 }
 0x354   : > { %v12810_v19 = vpop.f32.mrb[39].mxu1  ;;  %v12828_v45 = vpop.f32.mrb[47].mxu0  ;;  %v2385_v3 = vsel %vm2363_vm3, %v15235_v48, -inf  ;;  %v2394_v14 = vsel %vm2363_vm3, %v15238_v1, -inf }
 0x355   : > { %2386 = vmax.xlane.f32.xlu1 %v2385_v3  ;;  %2395 = vmax.xlane.f32.xlu0 %v2394_v14 }
 0x359   : > { %v2081_v58 = vpop.f32.mrb[40].mxu1  ;;  %v2219_v18 = vpop.f32.mrb[48].mxu0 }
 0x35a   : > { %v12821_v16 = vpop.f32.mrb[41].mxu1  ;;  %v12839_v37 = vpop.f32.mrb[49].mxu0  ;;  %v15245_v34 = vadd.f32 %v2081_v58, %v15192_v38  ;;  %v15248_v41 = vadd.f32 %v2219_v18, %v15192_v38 }
 0x35b   : > { %v2084_v53 = vpop.f32.mrb[42].mxu1  ;;  %v2222_v52 = vpop.f32.mrb[50].mxu0 }
 0x35c   : > { %v12822_v19 = vpop.f32.mrb[43].mxu1  ;;  %v12840_v45 = vpop.f32.mrb[51].mxu0  ;;  %v2391_v55 = vsel %vm2363_vm3, %v15245_v34, -inf  ;;  %v2400_v3 = vsel %vm2363_vm3, %v15248_v41, -inf }
 0x35d   : > { %2392 = vmax.xlane.f32.xlu1 %v2391_v55  ;;  %2401 = vmax.xlane.f32.xlu0 %v2400_v3 }
 0x361   : > { %v2173_v14 = vpop.f32.mrb[44].mxu1  ;;  %v2311_v16 = vpop.f32.mrb[52].mxu0 }
 0x362   : > { %v12833_v37 = vpop.f32.mrb[45].mxu1  ;;  %v12851_v58 = vpop.f32.mrb[53].mxu0  ;;  %v15255_v50 = vadd.f32 %v2173_v14, %v15192_v38  ;;  %v15258_v18 = vadd.f32 %v2311_v16, %v15192_v38 }
 0x363   : > { %v2176_v53 = vpop.f32.mrb[46].mxu1  ;;  %v2314_v52 = vpop.f32.mrb[54].mxu0 }
 0x364   : > { %v12834_v19 = vpop.f32.mrb[47].mxu1  ;;  %v12852_v45 = vpop.f32.mrb[55].mxu0  ;;  %v2397_v59 = vsel %vm2363_vm3, %v15255_v50, -inf  ;;  %v2406_v55 = vsel %vm2363_vm3, %v15258_v18, -inf }
 0x365   : > { %2398 = vmax.xlane.f32.xlu1 %v2397_v59  ;;  %2407 = vmax.xlane.f32.xlu0 %v2406_v55 }
 0x369   : > { %v2265_v3 = vpop.f32.mrb[48].mxu1 }
 0x36a   : > { %v12845_v37 = vpop.f32.mrb[49].mxu1  ;;  %v15265_v14 = vadd.f32 %v2265_v3, %v15192_v38 }
 0x36b   : > { %v2268_v58 = vpop.f32.mrb[50].mxu1 }
 0x36c   : > { %v12846_v16 = vpop.f32.mrb[51].mxu1  ;;  %v2403_v53 = vsel %vm2363_vm3, %v15265_v14, -inf }
 0x36d   : > { %2404 = vmax.xlane.f32.xlu1 %v2403_v53 }
 0x371   : > { %v2357_v52 = vpop.f32.mrb[52].mxu1 }
 0x372   : > { %v12857_v19 = vpop.f32.mrb[53].mxu1  ;;  %v15270_v45 = vadd.f32 %v2357_v52, %v15192_v38 }
 0x373   : > { %v2360_v43 = vpop.f32.mrb[54].mxu1 }
 0x374   : > { %v12858_v61 = vpop.f32.mrb[55].mxu1  ;;  %v2409_v59 = vsel %vm2363_vm3, %v15270_v45, -inf }
 0x375   : > { %2410 = vmax.xlane.f32.xlu1 %v2409_v59 }
 0x3ba   : > { %v2366_v55 = vpop.xlane.xlu0 %2365 }
 0x3bb   : > { %v2412_v3 = vsub.f32 %v15195_v24, %v2366_v55 }
 0x3bd   : > { %v2428_v37 = vmul.f32 1.442695, %v2412_v3 }
 0x3bf   : > { %13827 = vpow2.f32 %v2428_v37 }
 0x3c2   : > { %v2369_v58 = vpop.xlane.xlu1 %2368 }
 0x3c3   : > { %v2413_v16 = vsub.f32 %v15200_v25, %v2369_v58 }
 0x3c5   : > { %v2430_v53 = vmul.f32 1.442695, %v2413_v16 }
 0x3c7   : > { %13829 = vpow2.f32 %v2430_v53 }
 0x3c9   : > { %v15276_v19 = vpop.eup %13827 }
 0x3ca   : > { %v2372_v38 = vpop.xlane.xlu0 %2371  ;;  %v2460_v43 = vsel %vm2363_vm3, %v15276_v19, 0.0 }
 0x3cb   : > { %v2414_v61 = vsub.f32 %v15205_v30, %v2372_v38  ;;  %2461 = vadd.xlane.f32.xlu0 %v2460_v43 }
 0x3cd   : > { %v2432_v52 = vmul.f32 1.442695, %v2414_v61 }
 0x3ce   : > { %v2378_v59 = vpop.xlane.xlu0 %2377 }
 0x3cf   : > { %13831 = vpow2.f32 %v2432_v52  ;;  %v2416_v24 = vsub.f32 %v15210_v15, %v2378_v59 }
 0x3d1   : > { %v15282_v55 = vpop.eup %13829  ;;  %v2436_v3 = vmul.f32 1.442695, %v2416_v24 }
 0x3d2   : > { %v2375_v25 = vpop.xlane.xlu1 %2374  ;;  %v2384_v37 = vpop.xlane.xlu0 %2383  ;;  %v2463_v58 = vsel %vm2363_vm3, %v15282_v55, 0.0 }
 0x3d3   : > { %13833 = vpow2.f32 %v2436_v3  ;;  %v2415_v16 = vsub.f32 %v15215_v44, %v2375_v25  ;;  %v2418_v53 = vsub.f32 %v15218_v31, %v2384_v37  ;;  %2464 = vadd.xlane.f32.xlu1 %v2463_v58 }
 0x3d5   : > { %v2434_v30 = vmul.f32 1.442695, %v2415_v16  ;;  %v2440_v38 = vmul.f32 1.442695, %v2418_v53 }
 0x3d7   : > { %13835 = vpow2.f32 %v2434_v30 }
 0x3d8   : > { %13837 = vpow2.f32 %v2440_v38 }
 0x3d9   : > { %v15288_v43 = vpop.eup %13831 }
 0x3da   : > { %v2381_v15 = vpop.xlane.xlu1 %2380  ;;  %v2390_v61 = vpop.xlane.xlu0 %2389  ;;  %v2466_v52 = vsel %vm2363_vm3, %v15288_v43, 0.0 }
 0x3db   : > { %v2417_v59 = vsub.f32 %v15225_v21, %v2381_v15  ;;  %v2420_v24 = vsub.f32 %v15228_v62, %v2390_v61  ;;  %2467 = vadd.xlane.f32.xlu0 %v2466_v52 }
 0x3dd   : > { %v15294_v44 = vpop.eup %13833  ;;  %v2438_v31 = vmul.f32 1.442695, %v2417_v59  ;;  %v2444_v3 = vmul.f32 1.442695, %v2420_v24 }
 0x3de   : > { %v2472_v25 = vsel %vm2363_vm3, %v15294_v44, 0.0 }
 0x3df   : > { %13839 = vpow2.f32 %v2438_v31  ;;  %2473 = vadd.xlane.f32.xlu0 %v2472_v25 }
 0x3e0   : > { %13841 = vpow2.f32 %v2444_v3 }
 0x3e1   : > { %v15298_v37 = vpop.eup %13835 }
 0x3e2   : > { %v15300_v58 = vpop.eup %13837  ;;  %v2387_v16 = vpop.xlane.xlu1 %2386  ;;  %v2469_v21 = vsel %vm2363_vm3, %v15298_v37, 0.0 }
 0x3e3   : > { %v2396_v53 = vpop.xlane.xlu0 %2395  ;;  %v2419_v62 = vsub.f32 %v15235_v48, %v2387_v16  ;;  %2470 = vadd.xlane.f32.xlu1 %v2469_v21  ;;  %v2478_v38 = vsel %vm2363_vm3, %v15300_v58, 0.0 }
 0x3e4   : > { %v2422_v30 = vsub.f32 %v15238_v1, %v2396_v53  ;;  %2479 = vadd.xlane.f32.xlu0 %v2478_v38 }
 0x3e5   : > { %v2442_v15 = vmul.f32 1.442695, %v2419_v62 }
 0x3e6   : > { %v2448_v61 = vmul.f32 1.442695, %v2422_v30 }
 0x3e7   : > { %13843 = vpow2.f32 %v2442_v15 }
 0x3e8   : > { %13845 = vpow2.f32 %v2448_v61 }
 0x3e9   : > { %v15308_v52 = vpop.eup %13839 }
 0x3ea   : > { %v15310_v59 = vpop.eup %13841  ;;  %v2393_v24 = vpop.xlane.xlu1 %2392  ;;  %v2475_v48 = vsel %vm2363_vm3, %v15308_v52, 0.0 }
 0x3eb   : > { %v2402_v31 = vpop.xlane.xlu0 %2401  ;;  %v2421_v1 = vsub.f32 %v15245_v34, %v2393_v24  ;;  %2476 = vadd.xlane.f32.xlu1 %v2475_v48  ;;  %v2484_v25 = vsel %vm2363_vm3, %v15310_v59, 0.0 }
 0x3ec   : > { %v2424_v3 = vsub.f32 %v15248_v41, %v2402_v31  ;;  %2485 = vadd.xlane.f32.xlu0 %v2484_v25 }
 0x3ed   : > { %v2446_v16 = vmul.f32 1.442695, %v2421_v1 }
 0x3ee   : > { %v2452_v53 = vmul.f32 1.442695, %v2424_v3 }
 0x3ef   : > { %13847 = vpow2.f32 %v2446_v16 }
 0x3f0   : > { %13849 = vpow2.f32 %v2452_v53 }
 0x3f1   : > { %v15318_v21 = vpop.eup %13843 }
 0x3f2   : > { %v15320_v62 = vpop.eup %13845  ;;  %v2399_v30 = vpop.xlane.xlu1 %2398  ;;  %v2481_v34 = vsel %vm2363_vm3, %v15318_v21, 0.0 }
 0x3f3   : > { %v2408_v38 = vpop.xlane.xlu0 %2407  ;;  %v2423_v41 = vsub.f32 %v15255_v50, %v2399_v30  ;;  %2482 = vadd.xlane.f32.xlu1 %v2481_v34  ;;  %v2490_v61 = vsel %vm2363_vm3, %v15320_v62, 0.0 }
 0x3f4   : > { %v2426_v15 = vsub.f32 %v15258_v18, %v2408_v38  ;;  %2491 = vadd.xlane.f32.xlu0 %v2490_v61 }
 0x3f5   : > { %v2450_v24 = vmul.f32 1.442695, %v2423_v41 }
 0x3f6   : > { %v2456_v31 = vmul.f32 1.442695, %v2426_v15 }
 0x3f7   : > { %13851 = vpow2.f32 %v2450_v24  ;;  %v15388_v24 = vpack.c.bf16 %v14914_v57, %v14914_v57 }
 0x3f8   : > { %13853 = vpow2.f32 %v2456_v31 }
 0x3f9   : > { %v15328_v48 = vpop.eup %13847  ;;  %18451 = vst [vmem:[#allocation29_spill] sm:$0xff] %v15388_v24 }
 0x3fa   : > { %v15330_v1 = vpop.eup %13849  ;;  %v2487_v3 = vsel %vm2363_vm3, %v15328_v48, 0.0  ;;  %v2405_v30 = vpop.xlane.xlu1 %2404 }
 0x3fb   : > { %2488 = vadd.xlane.f32.xlu1 %v2487_v3  ;;  %v2496_v50 = vsel %vm2363_vm3, %v15330_v1, 0.0  ;;  %v2425_v38 = vsub.f32 %v15265_v14, %v2405_v30 }
 0x3fc   : > { %2497 = vadd.xlane.f32.xlu0 %v2496_v50  ;;  %v15394_v50 = vpack.c.bf16 %v14941_v54, %v14941_v54 }
 0x3fd   : > { %v2454_v34 = vmul.f32 1.442695, %v2425_v38 }
 0x3fe   : > { %18452 = vst [vmem:[#allocation30_spill] sm:$0xff] %v15394_v50 }
 0x3ff   : > { %13855 = vpow2.f32 %v2454_v34 }
 0x401   : > { %v15336_v18 = vpop.eup %13851 }
 0x402   : > { %v15338_v25 = vpop.eup %13853  ;;  %v2493_v16 = vsel %vm2363_vm3, %v15336_v18, 0.0  ;;  %v2411_v15 = vpop.xlane.xlu1 %2410 }
 0x403   : > { %2494 = vadd.xlane.f32.xlu1 %v2493_v16  ;;  %v2502_v53 = vsel %vm2363_vm3, %v15338_v25, 0.0  ;;  %v2427_v61 = vsub.f32 %v15270_v45, %v2411_v15  ;;  %v15400_v45 = vpack.c.bf16 %v14937_v51, %v14937_v51  ;;  %v2653_v51 = vsel %vm2559_vm2, %v15388_v24, 0 }
 0x404   : > { %2503 = vadd.xlane.f32.xlu0 %v2502_v53  ;;  %v15406_v53 = vpack.c.bf16 %v14971_v10, %v14971_v10 }
 0x405   : > { %v2458_v3 = vmul.f32 1.442695, %v2427_v61  ;;  %18453 = vst [vmem:[#allocation31_spill] sm:$0xff] %v15400_v45 }
 0x406   : > { %18454 = vst [vmem:[#allocation32_spill] sm:$0xff] %v15406_v53 }
 0x409   : > { %v15361_v41 = vpop.eup %13855 }
 0x40a   : > { %v2499_v14 = vsel %vm2363_vm3, %v15361_v41, 0.0 }
 0x414   : > { %3461 = vrot.lane.b32.xlu1 %v14930_v40, %s14473_s22 }
 0x41a   : > { %3409 = vrot.lane.b32.xlu0 %v14911_v26, %s14473_s22 }
 0x41e   : > { %3513 = vrot.lane.b32.xlu0 %v14957_v63, %s14473_s22 }
 0x422   : > { %3510 = vrot.lane.b32.xlu0 %v14996_v35, %s14473_s22 }
 0x426   : > { %3617 = vrot.lane.b32.xlu0 %v14964_v27, %s14473_s22 }
 0x42a   : > { %3614 = vrot.lane.b32.xlu0 %v14998_v36, %s14473_s22 }
 0x42e   : > { %3721 = vrot.lane.b32.xlu0 %v15000_v0, %s14473_s22 }
 0x432   : > { %3718 = vrot.lane.b32.xlu0 %v15037_v6, %s14473_s22 }
 0x436   : > { %3825 = vrot.lane.b32.xlu0 %v15039_v7, %s14473_s22 }
 0x438   : > { %2500 = vadd.xlane.f32.xlu1 %v2499_v14  ;;  %v18455_v14 = vmov 0.0  }
 0x43a   : > { %3822 = vrot.lane.b32.xlu0 %v15064_v28, %s14473_s22 }
 0x43e   : > { %3929 = vrot.lane.b32.xlu0 %v15066_v46, %s14473_s22 }
 0x442   : > { %3926 = vrot.lane.b32.xlu0 %v15092_v12, %s14473_s22 }
 0x446   : > { %4033 = vrot.lane.b32.xlu0 %v15094_v13, %s14473_s22 }
 0x449   : > { %3406 = vrot.lane.b32.xlu1 %v14934_v8, %s14473_s22 }
 0x44a   : > { %4030 = vrot.lane.b32.xlu0 %v15120_v4, %s14473_s22 }
 0x44e   : > { %4137 = vrot.lane.b32.xlu0 %v15122_v11, %s14473_s22 }
 0x452   : > { %4134 = vrot.lane.b32.xlu0 %v15149_v32, %s14473_s22 }
 0x456   : > { %4430 = vrot.lane.b32.xlu0 %v15143_v17, %s14473_s22 }
 0x458   : > { %v2462_v31 = vpop.xlane.xlu0 %2461 }
 0x459   : > { %13857 = vrcp.f32 %v2462_v31 }
 0x45a   : > { %4528 = vrot.lane.b32.xlu0 %v15388_v24, %s14473_s22  ;;  %13859 = vpow2.f32 %v2458_v3 }
 0x45e   : > { %4626 = vrot.lane.b32.xlu0 %v15394_v50, %s14473_s22 }
 0x460   : > { %v2465_v57 = vpop.xlane.xlu1 %2464 }
 0x461   : > { %13861 = vrcp.f32 %v2465_v57 }
 0x462   : > { %4724 = vrot.lane.b32.xlu0 %v15400_v45, %s14473_s22 }
 0x463   : > { %v13858_v16 = vpop.eup %13857 }
 0x464   : > { %v2524_v54 = vmul.f32 %v13858_v16, %v15276_v19  ;;  %v15414_v34 = vpop.eup %13859  ;;  %v15421_v19 = vpack.c.bf16 %v14923_v42, %v14923_v42 }
 0x465   : > { %v2505_v61 = vsel %vm2363_vm3, %v15414_v34, 0.0 }
 0x466   : > { %4822 = vrot.lane.b32.xlu0 %v15406_v53, %s14473_s22  ;;  %v2540_v30 = vpack.c.bf16 %v2524_v54, %v2524_v54  ;;  %18456 = vst [vmem:[#allocation33_spill] sm:$0xff] %v15421_v19  ;;  %v2699_v57 = vsel %vm2559_vm2, %v15421_v19, 0 }
 0x468   : > { %12862 = vmatmul.mubr.msk.bf16.vlgmr.msra.gmra.mrb[56].mxu0 %vm2363_vm3, %v2540_v30  ;;  %v2468_v38 = vpop.xlane.xlu0 %2467 }
 0x469   : > { %12872 = vmatpush3.bf16.msra.mxu0 %v2653_v51  ;;  %13863 = vrcp.f32 %v2468_v38  ;;  %12873 = vmatprep.mubr.msk.bf16.mxu0 %vm14472_vm0, %v18455_v14 }
 0x46a   : > { %12883 = vmatprep.subr.bf16.mxu0 %v18455_v14 }
 0x46b   : > { %v13862_v10 = vpop.eup %13861 }
 0x46c   : > { %v2474_v15 = vpop.xlane.xlu0 %2473  ;;  %v2525_v31 = vmul.f32 %v13862_v10, %v15282_v55  ;;  %v2745_v10 = vsel %vm2559_vm2, %v15394_v50, 0 }
 0x46d   : > { %13865 = vrcp.f32 %v2474_v15  ;;  %2506 = vadd.xlane.f32.xlu1 %v2505_v61 }
 0x46e   : > { %v2541_v3 = vpack.c.bf16 %v2525_v31, %v2525_v31  ;;  %v15442_v31 = vpack.c.bf16 %v14954_v60, %v14954_v60  ;;  %v2837_v60 = vsel %vm2559_vm2, %v15400_v45, 0 }
 0x470   : > { %12868 = vmatmul.mubr.msk.bf16.vlgmr.msra.gmra.mrb[56].mxu1 %vm2363_vm3, %v2541_v3  ;;  %v2471_v16 = vpop.xlane.xlu1 %2470  ;;  %18457 = vst [vmem:[#allocation34_spill] sm:$0xff] %v15442_v31 }
 0x471   : > { %12878 = vmatpush3.bf16.msra.mxu1 %v2699_v57  ;;  %13867 = vrcp.f32 %v2471_v16  ;;  %12879 = vmatprep.mubr.msk.bf16.mxu1 %vm14472_vm0, %v18455_v14  ;;  %v2480_v42 = vpop.xlane.xlu0 %2479 }
 0x472   : > { %12889 = vmatprep.subr.bf16.mxu1 %v18455_v14  ;;  %13869 = vrcp.f32 %v2480_v42 }
 0x473   : > { %v13864_v54 = vpop.eup %13863 }
 0x474   : > { %v2526_v55 = vmul.f32 %v13864_v54, %v15288_v43  ;;  %v2791_v54 = vsel %vm2559_vm2, %v15442_v31, 0 }
 0x476   : > { %v2542_v30 = vpack.c.bf16 %v2526_v55, %v2526_v55 }
 0x477   : > { %v13866_v51 = vpop.eup %13865 }
 0x478   : > { %v2477_v38 = vpop.xlane.xlu1 %2476  ;;  %12874 = vmatmul.mubr.msk.bf16.vlgmr.msra.gmra.mrb[60].mxu0 %vm2363_vm3, %v2542_v30  ;;  %v2528_v61 = vmul.f32 %v13866_v51, %v15294_v44  ;;  %v15463_v51 = vpack.c.bf16 %v14948_v9, %v14948_v9  ;;  %v2929_v9 = vsel %vm2559_vm2, %v15406_v53, 0 }
 0x479   : > { %13871 = vrcp.f32 %v2477_v38  ;;  %12884 = vmatpush3.bf16.msra.mxu0 %v2745_v10  ;;  %12885 = vmatprep.mubr.msk.bf16.mxu0 %vm14472_vm0, %v18455_v14  ;;  %v2486_v15 = vpop.xlane.xlu0 %2485 }
 0x47a   : > { %12895 = vmatprep.subr.bf16.mxu0 %v18455_v14  ;;  %13873 = vrcp.f32 %v2486_v15  ;;  %v2544_v16 = vpack.c.bf16 %v2528_v61, %v2528_v61  ;;  %18458 = vst [vmem:[#allocation35_spill] sm:$0xff] %v15463_v51  ;;  %v2883_v61 = vsel %vm2559_vm2, %v15463_v51, 0 }
 0x47b   : > { %v13868_v43 = vpop.eup %13867 }
 0x47c   : > { %v2527_v3 = vmul.f32 %v13868_v43, %v15298_v37  ;;  %v13870_v42 = vpop.eup %13869 }
 0x47d   : > { %v2530_v55 = vmul.f32 %v13870_v42, %v15300_v58  ;;  %v15489_v42 = vpack.c.bf16 %v14985_v49, %v14985_v49 }
 0x47e   : > { %3458 = vrot.lane.b32.xlu1 %v14962_v20, %s14473_s22  ;;  %v2543_v57 = vpack.c.bf16 %v2527_v3, %v2527_v3 }
 0x47f   : > { %v2546_v58 = vpack.c.bf16 %v2530_v55, %v2530_v55  ;;  %18460 = vst [vmem:[#allocation37_spill] sm:$0xff] %v15489_v42 }
 0x480   : > { %12880 = vmatmul.mubr.msk.bf16.vlgmr.msra.gmra.mrb[60].mxu1 %vm2363_vm3, %v2543_v57  ;;  %v2483_v44 = vpop.xlane.xlu1 %2482  ;;  %12886 = vmatmul.mubr.msk.bf16.vlgmr.msra.gmra.mrb[64].mxu0 %vm2363_vm3, %v2544_v16  ;;  %v15485_v16 = vpack.c.bf16 %v14967_v5, %v14967_v5  ;;  %v2975_v5 = vsel %vm2559_vm2, %v15489_v42, 0 }
 0x481   : > { %12890 = vmatpush3.bf16.msra.mxu1 %v2791_v54  ;;  %13875 = vrcp.f32 %v2483_v44  ;;  %12896 = vmatpush3.bf16.msra.mxu0 %v2837_v60  ;;  %v2492_v37 = vpop.xlane.xlu0 %2491 }
 0x482   : > { %3565 = vrot.lane.b32.xlu1 %v14991_v23, %s14473_s22  ;;  %12891 = vmatprep.mubr.msk.bf16.mxu1 %vm14472_vm0, %v18455_v14  ;;  %13877 = vrcp.f32 %v2492_v37  ;;  %18459 = vst [vmem:[#allocation36_spill] sm:$0xff] %v15485_v16  ;;  %v3021_v49 = vsel %vm2559_vm2, %v15485_v16, 0 }
 0x483   : > { %v13872_v30 = vpop.eup %13871  ;;  %12897 = vmatprep.mubr.msk.bf16.mxu0 %vm14472_vm0, %v18455_v14  ;;  %12901 = vmatprep.subr.bf16.mxu1 %v18455_v14 }
 0x484   : > { %12907 = vmatprep.subr.bf16.mxu0 %v18455_v14  ;;  %v2529_v38 = vmul.f32 %v13872_v30, %v15308_v52  ;;  %v13874_v15 = vpop.eup %13873 }
 0x485   : > { %v2532_v3 = vmul.f32 %v13874_v15, %v15310_v59 }
 0x486   : > { %3562 = vrot.lane.b32.xlu1 %v15035_v22, %s14473_s22  ;;  %v2545_v10 = vpack.c.bf16 %v2529_v38, %v2529_v38  ;;  %v15511_v38 = vpack.c.bf16 %v14980_v29, %v14980_v29 }
 0x487   : > { %v2548_v44 = vpack.c.bf16 %v2532_v3, %v2532_v3 }
 0x488   : > { %12892 = vmatmul.mubr.msk.bf16.vlgmr.msra.gmra.mrb[64].mxu1 %vm2363_vm3, %v2545_v10  ;;  %v2489_v43 = vpop.xlane.xlu1 %2488  ;;  %12898 = vmatmul.mubr.msk.bf16.vlgmr.msra.gmra.mrb[68].mxu0 %vm2363_vm3, %v2546_v58  ;;  %18461 = vst [vmem:[#allocation38_spill] sm:$0xff] %v15511_v38  ;;  %v15515_v10 = vpack.c.bf16 %v15007_v47, %v15007_v47  ;;  %v3067_v29 = vsel %vm2559_vm2, %v15511_v38, 0 }
 0x489   : > { %12902 = vmatpush3.bf16.msra.mxu1 %v2883_v61  ;;  %13879 = vrcp.f32 %v2489_v43  ;;  %12908 = vmatpush3.bf16.msra.mxu0 %v2929_v9  ;;  %v2498_v52 = vpop.xlane.xlu0 %2497 }
 0x48a   : > { %3669 = vrot.lane.b32.xlu1 %v15032_v2, %s14473_s22  ;;  %12903 = vmatprep.mubr.msk.bf16.mxu1 %vm14472_vm0, %v18455_v14  ;;  %13881 = vrcp.f32 %v2498_v52  ;;  %18462 = vst [vmem:[#allocation39_spill] sm:$0xff] %v15515_v10  ;;  %v3113_v47 = vsel %vm2559_vm2, %v15515_v10, 0  ;;  %v18464_v52 = vld [vmem:[#allocation12_spill] sm:$0xff] }
 0x48b   : > { %v13876_v57 = vpop.eup %13875  ;;  %12909 = vmatprep.mubr.msk.bf16.mxu0 %vm14472_vm0, %v18455_v14  ;;  %12913 = vmatprep.subr.bf16.mxu1 %v18455_v14  ;;  %v15537_v3 = vpack.c.bf16 %v18464_v52, %v18464_v52  ;;  %v18474_v52 = vld [vmem:[#allocation27_spill] sm:$0xff] }
 0x48c   : > { %12919 = vmatprep.subr.bf16.mxu0 %v18455_v14  ;;  %v2531_v54 = vmul.f32 %v13876_v57, %v15318_v21  ;;  %v13878_v60 = vpop.eup %13877  ;;  %v18465_v57 = vld [vmem:[#allocation14_spill] sm:$0xff] }
 0x48d   : > { %v2534_v55 = vmul.f32 %v13878_v60, %v15320_v62 }
 0x48e   : > { %3666 = vrot.lane.b32.xlu1 %v15062_v39, %s14473_s22  ;;  %v2547_v59 = vpack.c.bf16 %v2531_v54, %v2531_v54  ;;  %v15541_v54 = vpack.c.bf16 %v18465_v57, %v18465_v57 }
 0x48f   : > { %v2550_v15 = vpack.c.bf16 %v2534_v55, %v2534_v55 }
 0x490   : > { %12904 = vmatmul.mubr.msk.bf16.vlgmr.msra.gmra.mrb[68].mxu1 %vm2363_vm3, %v2547_v59  ;;  %v2495_v37 = vpop.xlane.xlu1 %2494  ;;  %12910 = vmatmul.mubr.msk.bf16.vlgmr.msra.gmra.mrb[72].mxu0 %vm2363_vm3, %v2548_v44 }
 0x491   : > { %12914 = vmatpush3.bf16.msra.mxu1 %v2975_v5  ;;  %13883 = vrcp.f32 %v2495_v37  ;;  %12920 = vmatpush3.bf16.msra.mxu0 %v3021_v49  ;;  %v2504_v21 = vpop.xlane.xlu0 %2503  ;;  %v3159_v37 = vsel %vm2559_vm2, %v15541_v54, 0  ;;  %v3205_v49 = vsel %vm2559_vm2, %v15537_v3, 0 }
 0x492   : > { %3773 = vrot.lane.b32.xlu1 %v15059_v56, %s14473_s22  ;;  %12915 = vmatprep.mubr.msk.bf16.mxu1 %vm14472_vm0, %v18455_v14  ;;  %13885 = vrcp.f32 %v2504_v21 }
 0x493   : > { %v13880_v30 = vpop.eup %13879  ;;  %12921 = vmatprep.mubr.msk.bf16.mxu0 %vm14472_vm0, %v18455_v14  ;;  %12925 = vmatprep.subr.bf16.mxu1 %v18455_v14 }
 0x494   : > { %12931 = vmatprep.subr.bf16.mxu0 %v18455_v14  ;;  %v2533_v58 = vmul.f32 %v13880_v30, %v15328_v48  ;;  %v13882_v61 = vpop.eup %13881  ;;  %v18463_v48 = vld [vmem:[#allocation15_spill] sm:$0xff] }
 0x495   : > { %v2536_v43 = vmul.f32 %v13882_v61, %v15330_v1  ;;  %18466 = vst [vmem:[#allocation15_spill] sm:$0xff] %v15541_v54  ;;  %v18467_v1 = vld [vmem:[#allocation18_spill] sm:$0xff]  ;;  %v3410_v55 = vpop.permute.xlu0 %3409  ;;  %v18469_v30 = vld [vmem:[#allocation23_spill] sm:$0xff] }
 0x496   : > { %3770 = vrot.lane.b32.xlu1 %v15090_v33, %s14473_s22  ;;  %v2549_v62 = vpack.c.bf16 %v2533_v58, %v2533_v58  ;;  %v18471_v61 = vld [vmem:[#allocation26_spill] sm:$0xff] }
 0x497   : > { %v2552_v60 = vpack.c.bf16 %v2536_v43, %v2536_v43  ;;  %v18473_v43 = vld [vmem:[#allocation28_spill] sm:$0xff] }
 0x498   : > { %12916 = vmatmul.mubr.msk.bf16.vlgmr.msra.gmra.mrb[72].mxu1 %vm2363_vm3, %v2549_v62  ;;  %12922 = vmatmul.mubr.msk.bf16.vlgmr.msra.gmra.mrb[76].mxu0 %vm2363_vm3, %v2550_v15  ;;  %v3415_v62 = vsel %vm1626_vm1, %v3410_v55, 0 }
 0x499   : > { %12926 = vmatpush3.bf16.msra.mxu1 %v3067_v29  ;;  %12932 = vmatpush3.bf16.msra.mxu0 %v3113_v47  ;;  %v3514_v15 = vpop.permute.xlu0 %3513  ;;  %v18472_v47 = vld [vmem:[#allocation25_spill] sm:$0xff] }
 0x49a   : > { %3877 = vrot.lane.b32.xlu1 %v18463_v48, %s14473_s22  ;;  %12927 = vmatprep.mubr.msk.bf16.mxu1 %vm14472_vm0, %v18455_v14 }
 0x49b   : > { %v13884_v9 = vpop.eup %13883  ;;  %12933 = vmatprep.mubr.msk.bf16.mxu0 %vm14472_vm0, %v18455_v14  ;;  %12937 = vmatprep.subr.bf16.mxu1 %v18455_v14 }
 0x49c   : > { %12943 = vmatprep.subr.bf16.mxu0 %v18455_v14  ;;  %v2535_v59 = vmul.f32 %v13884_v9, %v15336_v18  ;;  %v13886_v5 = vpop.eup %13885  ;;  %v18468_v18 = vld [vmem:[#allocation17_spill] sm:$0xff] }
 0x49d   : > { %v2538_v21 = vmul.f32 %v13886_v5, %v15338_v25  ;;  %v18470_v25 = vld [vmem:[#allocation22_spill] sm:$0xff]  ;;  %v3511_v29 = vpop.permute.xlu0 %3510 }
 0x49e   : > { %3874 = vrot.lane.b32.xlu1 %v18467_v1, %s14473_s22  ;;  %v2551_v44 = vpack.c.bf16 %v2535_v59, %v2535_v59  ;;  %v15581_v59 = vpop.permute.xlu1 %3461 }
 0x49f   : > { %v2554_v58 = vpack.c.bf16 %v2538_v21, %v2538_v21 }
 0x4a0   : > { %12928 = vmatmul.mubr.msk.bf16.vlgmr.msra.gmra.mrb[76].mxu1 %vm2363_vm3, %v2551_v44  ;;  %12934 = vmatmul.mubr.msk.bf16.vlgmr.msra.gmra.mrb[80].mxu0 %vm2363_vm3, %v2552_v60 }
 0x4a1   : > { %12938 = vmatpush3.bf16.msra.mxu1 %v3159_v37  ;;  %12944 = vmatpush3.bf16.msra.mxu0 %v3205_v49  ;;  %v3618_v9 = vpop.permute.xlu0 %3617  ;;  %v3519_v49 = vsel %vm1626_vm1, %v3514_v15, 0 }
 0x4a2   : > { %3981 = vrot.lane.b32.xlu1 %v18468_v18, %s14473_s22  ;;  %12945 = vmatprep.mubr.msk.bf16.mxu0 %vm14472_vm0, %v18455_v14 }
 0x4a3   : > { %12955 = vmatprep.subr.bf16.mxu0 %v18455_v14  ;;  %12939 = vmatprep.mubr.msk.bf16.mxu1 %vm14472_vm0, %v18455_v14 }
 0x4a4   : > { %12949 = vmatprep.subr.bf16.mxu1 %v18455_v14 }
 0x4a5   : > { %v3615_v57 = vpop.permute.xlu0 %3614 }
 0x4a6   : > { %3978 = vrot.lane.b32.xlu1 %v18469_v30, %s14473_s22 }
 0x4a8   : > { %12946 = vmatmul.mubr.msk.bf16.vlgmr.msra.gmra.mrb[84].mxu0 %vm2363_vm3, %v2554_v58  ;;  %v18475_v58 = vld [vmem:[#allocation13_spill] sm:$0xff] }
 0x4a9   : > { %12957 = vmatprep.mubr.msk.bf16.mxu0 %vm14472_vm0, %v18455_v14  ;;  %v3722_v44 = vpop.permute.xlu0 %3721 }
 0x4aa   : > { %12956 = vmatpush3.bf16.xpose.msra.mxu0 %v3415_v62  ;;  %4085 = vrot.lane.b32.xlu1 %v18470_v25, %s14473_s22  ;;  %v15598_v62 = vpack.c.bf16 %v18475_v58, %v18475_v58 }
 0x4ab   : > { %12967 = vmatprep.subr.bf16.mxu0 %v18455_v14 }
 0x4ad   : > { %v3719_v5 = vpop.permute.xlu0 %3718 }
 0x4ae   : > { %4082 = vrot.lane.b32.xlu1 %v18471_v61, %s14473_s22 }
 0x4b1   : > { %v3826_v21 = vpop.permute.xlu0 %3825 }
 0x4b2   : > { %4189 = vrot.lane.b32.xlu1 %v18472_v47, %s14473_s22  ;;  %v3831_v58 = vsel %vm1626_vm1, %v3826_v21, 0 }
 0x4b6   : > { %4186 = vrot.lane.b32.xlu1 %v18473_v43, %s14473_s22 }
 0x4ba   : > { %4479 = vrot.lane.b32.xlu1 %v18474_v52, %s14473_s22 }
 0x4be   : > { %4577 = vrot.lane.b32.xlu1 %v15421_v19, %s14473_s22 }
 0x4c2   : > { %4675 = vrot.lane.b32.xlu1 %v15442_v31, %s14473_s22 }
 0x4c5   : > { %v2501_v60 = vpop.xlane.xlu1 %2500 }
 0x4c6   : > { %13887 = vrcp.f32 %v2501_v60  ;;  %4773 = vrot.lane.b32.xlu1 %v15463_v51, %s14473_s22  ;;  %v3623_v60 = vsel %vm1626_vm1, %v3618_v9, 0 }
 0x4c9   : > { %v3407_v37 = vpop.permute.xlu1 %3406 }
 0x4ca   : > { %4871 = vrot.lane.b32.xlu1 %v15489_v42, %s14473_s22  ;;  %12958 = vmatmul.mubr.msk.bf16.vlgmr.msra.gmra.mrb[88].mxu0 %vm1626_vm1, %v3407_v37 }
 0x4cb   : > { %12968 = vmatpush3.bf16.xpose.msra.mxu0 %v3519_v49  ;;  %12969 = vmatprep.mubr.msk.bf16.mxu0 %vm14472_vm0, %v18455_v14  ;;  %v3823_v49 = vpop.permute.xlu0 %3822 }
 0x4cc   : > { %12979 = vmatprep.subr.bf16.mxu0 %v18455_v14 }
 0x4ce   : > { %4920 = vrot.lane.b32.xlu1 %v15485_v16, %s14473_s22 }
 0x4cf   : > { %v3930_v9 = vpop.permute.xlu0 %3929 }
 0x4d0   : > { %v13888_v55 = vpop.eup %13887 }
 0x4d1   : > { %v2537_v15 = vmul.f32 %v13888_v55, %v15361_v41  ;;  %v3251_v41 = vsel %vm2559_vm2, %v15598_v62, 0 }
 0x4d2   : > { %4969 = vrot.lane.b32.xlu1 %v15511_v38, %s14473_s22  ;;  %12970 = vmatmul.mubr.msk.bf16.vlgmr.msra.gmra.mrb[92].mxu0 %vm1626_vm1, %v3511_v29  ;;  %v3727_v29 = vsel %vm1626_vm1, %v3722_v44, 0 }
 0x4d3   : > { %12980 = vmatpush3.bf16.xpose.msra.mxu0 %v3623_v60  ;;  %v2553_v37 = vpack.c.bf16 %v2537_v15, %v2537_v15  ;;  %12981 = vmatprep.mubr.msk.bf16.mxu0 %vm14472_vm0, %v18455_v14  ;;  %v3927_v55 = vpop.permute.xlu0 %3926 }
 0x4d4   : > { %12991 = vmatprep.subr.bf16.mxu0 %v18455_v14 }
 0x4d5   : > { %12940 = vmatmul.mubr.msk.bf16.vlgmr.msra.gmra.mrb[80].mxu1 %vm2363_vm3, %v2553_v37 }
 0x4d6   : > { %12950 = vmatpush3.bf16.msra.mxu1 %v3251_v41  ;;  %12951 = vmatprep.mubr.msk.bf16.mxu1 %vm14472_vm0, %v18455_v14 }
 0x4d7   : > { %12961 = vmatprep.subr.bf16.mxu1 %v18455_v14  ;;  %v4034_v44 = vpop.permute.xlu0 %4033 }
 0x4da   : > { %12982 = vmatmul.mubr.msk.bf16.vlgmr.msra.gmra.mrb[96].mxu0 %vm1626_vm1, %v3615_v57  ;;  %v3935_v57 = vsel %vm1626_vm1, %v3930_v9, 0 }
 0x4db   : > { %12992 = vmatpush3.bf16.xpose.msra.mxu0 %v3727_v29  ;;  %12993 = vmatprep.mubr.msk.bf16.mxu0 %vm14472_vm0, %v18455_v14  ;;  %v4031_v21 = vpop.permute.xlu0 %4030 }
 0x4dc   : > { %13003 = vmatprep.subr.bf16.mxu0 %v18455_v14 }
 0x4df   : > { %v4138_v15 = vpop.permute.xlu0 %4137 }
 0x4e0   : > { %v4143_v37 = vsel %vm1626_vm1, %v4138_v15, 0 }
 0x4e2   : > { %12994 = vmatmul.mubr.msk.bf16.vlgmr.msra.gmra.mrb[100].mxu0 %vm1626_vm1, %v3719_v5  ;;  %v4039_v5 = vsel %vm1626_vm1, %v4034_v44, 0 }
 0x4e3   : > { %13004 = vmatpush3.bf16.xpose.msra.mxu0 %v3831_v58  ;;  %13005 = vmatprep.mubr.msk.bf16.mxu0 %vm14472_vm0, %v18455_v14  ;;  %v4135_v60 = vpop.permute.xlu0 %4134 }
 0x4e4   : > { %13015 = vmatprep.subr.bf16.mxu0 %v18455_v14 }
 0x4e7   : > { %v4431_v29 = vpop.permute.xlu0 %4430 }
 0x4e8   : > { %v4436_v9 = vsel %vm2559_vm2, %v4431_v29, 0 }
 0x4ea   : > { %13006 = vmatmul.mubr.msk.bf16.vlgmr.msra.gmra.mrb[104].mxu0 %vm1626_vm1, %v3823_v49 }
 0x4eb   : > { %13016 = vmatpush3.bf16.xpose.msra.mxu0 %v3935_v57  ;;  %13017 = vmatprep.mubr.msk.bf16.mxu0 %vm14472_vm0, %v18455_v14  ;;  %v15777_v31 = vpop.permute.xlu0 %4528 }
 0x4ec   : > { %13027 = vmatprep.subr.bf16.mxu0 %v18455_v14 }
 0x4f2   : > { %13018 = vmatmul.mubr.msk.bf16.vlgmr.msra.gmra.mrb[108].mxu0 %vm1626_vm1, %v3927_v55 }
 0x4f3   : > { %13028 = vmatpush3.bf16.xpose.msra.mxu0 %v4039_v5  ;;  %13029 = vmatprep.mubr.msk.bf16.mxu0 %vm14472_vm0, %v18455_v14  ;;  %v3467_v5 = vsel %vm1626_vm1, %v15581_v59, 0 }
 0x4f4   : > { %13039 = vmatprep.subr.bf16.mxu0 %v18455_v14 }
 0x4fa   : > { %v2507_v49 = vpop.xlane.xlu1 %2506  ;;  %13030 = vmatmul.mubr.msk.bf16.vlgmr.msra.gmra.mrb[112].mxu0 %vm1626_vm1, %v4031_v21 }
 0x4fb   : > { %13889 = vrcp.f32 %v2507_v49  ;;  %13040 = vmatpush3.bf16.xpose.msra.mxu0 %v4143_v37  ;;  %13041 = vmatprep.mubr.msk.bf16.mxu0 %vm14472_vm0, %v18455_v14 }
 0x4fc   : > { %13051 = vmatprep.subr.bf16.mxu0 %v18455_v14 }
 0x4fe   : > { %v3459_v41 = vpop.permute.xlu1 %3458 }
 0x502   : > { %v3566_v55 = vpop.permute.xlu1 %3565  ;;  %13042 = vmatmul.mubr.msk.bf16.vlgmr.msra.gmra.mrb[116].mxu0 %vm1626_vm1, %v4135_v60 }
 0x503   : > { %13052 = vmatpush3.bf16.msra.mxu0 %v4436_v9  ;;  %13053 = vmatprep.mubr.msk.bf16.mxu0 %vm14472_vm0, %v18455_v14  ;;  %v3571_v37 = vsel %vm1626_vm1, %v3566_v55, 0 }
 0x504   : > { %13063 = vmatprep.subr.bf16.mxu0 %v18455_v14 }
 0x505   : > { %v13890_v58 = vpop.eup %13889 }
 0x506   : > { %v3563_v44 = vpop.permute.xlu1 %3562  ;;  %v2539_v57 = vmul.f32 %v13890_v58, %v15414_v34 }
 0x508   : > { %v2555_v21 = vpack.c.bf16 %v2539_v57, %v2539_v57 }
 0x50a   : > { %12952 = vmatmul.mubr.msk.bf16.vlgmr.msra.gmra.mrb[84].mxu1 %vm2363_vm3, %v2555_v21  ;;  %v3670_v15 = vpop.permute.xlu1 %3669 }
 0x50b   : > { %12962 = vmatpush3.bf16.xpose.msra.mxu1 %v3467_v5  ;;  %12963 = vmatprep.mubr.msk.bf16.mxu1 %vm14472_vm0, %v18455_v14  ;;  %v3675_v59 = vsel %vm1626_vm1, %v3670_v15, 0 }
 0x50c   : > { %12973 = vmatprep.subr.bf16.mxu1 %v18455_v14 }
 0x50e   : > { %v3667_v60 = vpop.permute.xlu1 %3666 }
 0x512   : > { %12964 = vmatmul.mubr.msk.bf16.vlgmr.msra.gmra.mrb[88].mxu1 %vm1626_vm1, %v3459_v41  ;;  %v3774_v49 = vpop.permute.xlu1 %3773 }
 0x513   : > { %12974 = vmatpush3.bf16.xpose.msra.mxu1 %v3571_v37  ;;  %12975 = vmatprep.mubr.msk.bf16.mxu1 %vm14472_vm0, %v18455_v14  ;;  %v3779_v9 = vsel %vm1626_vm1, %v3774_v49, 0 }
 0x514   : > { %12985 = vmatprep.subr.bf16.mxu1 %v18455_v14 }
 0x516   : > { %v3771_v34 = vpop.permute.xlu1 %3770 }
 0x51a   : > { %12976 = vmatmul.mubr.msk.bf16.vlgmr.msra.gmra.mrb[92].mxu1 %vm1626_vm1, %v3563_v44  ;;  %v3878_v29 = vpop.permute.xlu1 %3877 }
 0x51b   : > { %12986 = vmatpush3.bf16.xpose.msra.mxu1 %v3675_v59  ;;  %12987 = vmatprep.mubr.msk.bf16.mxu1 %vm14472_vm0, %v18455_v14  ;;  %v3883_v44 = vsel %vm1626_vm1, %v3878_v29, 0 }
 0x51c   : > { %12997 = vmatprep.subr.bf16.mxu1 %v18455_v14 }
 0x51e   : > { %v3875_v41 = vpop.permute.xlu1 %3874 }
 0x522   : > { %12988 = vmatmul.mubr.msk.bf16.vlgmr.msra.gmra.mrb[96].mxu1 %vm1626_vm1, %v3667_v60  ;;  %v3982_v55 = vpop.permute.xlu1 %3981 }
 0x523   : > { %12998 = vmatpush3.bf16.xpose.msra.mxu1 %v3779_v9  ;;  %12999 = vmatprep.mubr.msk.bf16.mxu1 %vm14472_vm0, %v18455_v14  ;;  %v3987_v21 = vsel %vm1626_vm1, %v3982_v55, 0 }
 0x524   : > { %13009 = vmatprep.subr.bf16.mxu1 %v18455_v14 }
 0x526   : > { %v3979_v58 = vpop.permute.xlu1 %3978 }
 0x52a   : > { %13000 = vmatmul.mubr.msk.bf16.vlgmr.msra.gmra.mrb[100].mxu1 %vm1626_vm1, %v3771_v34  ;;  %v4086_v57 = vpop.permute.xlu1 %4085 }
 0x52b   : > { %13010 = vmatpush3.bf16.xpose.msra.mxu1 %v3883_v44  ;;  %13011 = vmatprep.mubr.msk.bf16.mxu1 %vm14472_vm0, %v18455_v14  ;;  %v4091_v15 = vsel %vm1626_vm1, %v4086_v57, 0 }
 0x52c   : > { %13021 = vmatprep.subr.bf16.mxu1 %v18455_v14 }
 0x52e   : > { %v4083_v5 = vpop.permute.xlu1 %4082 }
 0x532   : > { %13012 = vmatmul.mubr.msk.bf16.vlgmr.msra.gmra.mrb[104].mxu1 %vm1626_vm1, %v3875_v41  ;;  %v4190_v60 = vpop.permute.xlu1 %4189 }
 0x533   : > { %13022 = vmatpush3.bf16.xpose.msra.mxu1 %v3987_v21  ;;  %13023 = vmatprep.mubr.msk.bf16.mxu1 %vm14472_vm0, %v18455_v14  ;;  %v4195_v41 = vsel %vm1626_vm1, %v4190_v60, 0 }
 0x534   : > { %13033 = vmatprep.subr.bf16.mxu1 %v18455_v14 }
 0x536   : > { %v4187_v29 = vpop.permute.xlu1 %4186 }
 0x53a   : > { %13024 = vmatmul.mubr.msk.bf16.vlgmr.msra.gmra.mrb[108].mxu1 %vm1626_vm1, %v3979_v58  ;;  %v4480_v21 = vpop.permute.xlu1 %4479 }
 0x53b   : > { %13034 = vmatpush3.bf16.xpose.msra.mxu1 %v4091_v15  ;;  %v2597_v37 = vpop.f32.mrb[56].mxu0  ;;  %13035 = vmatprep.mubr.msk.bf16.mxu1 %vm14472_vm0, %v18455_v14  ;;  %v4485_v15 = vsel %vm2559_vm2, %v4480_v21, 0 }
 0x53c   : > { %v12863_v49 = vpop.f32.mrb[57].mxu0  ;;  %13045 = vmatprep.subr.bf16.mxu1 %v18455_v14 }
 0x53d   : > { %v2600_v34 = vpop.f32.mrb[58].mxu0 }
 0x53e   : > { %v12864_v59 = vpop.f32.mrb[59].mxu0 }
 0x542   : > { %13036 = vmatmul.mubr.msk.bf16.vlgmr.msra.gmra.mrb[112].mxu1 %vm1626_vm1, %v4083_v5 }
 0x543   : > { %13046 = vmatpush3.bf16.xpose.msra.mxu1 %v4195_v41  ;;  %v2643_v9 = vpop.f32.mrb[56].mxu1  ;;  %13047 = vmatprep.mubr.msk.bf16.mxu1 %vm14472_vm0, %v18455_v14 }
 0x544   : > { %v3293_v55 = vpack.c.bf16 %v2643_v9, %v2597_v37  ;;  %v12869_v58 = vpop.f32.mrb[57].mxu1  ;;  %13057 = vmatprep.subr.bf16.mxu1 %v18455_v14 }
 0x545   : > { %v2646_v44 = vpop.f32.mrb[58].mxu1 }
 0x546   : > { %3301 = vst.msk [vmem:[#allocation4] sm:$0xff] %vm1626_vm1, %v3293_v55  ;;  %v12870_v57 = vpop.f32.mrb[59].mxu1 }
 0x54a   : > { %13048 = vmatmul.mubr.msk.bf16.vlgmr.msra.gmra.mrb[116].mxu1 %vm1626_vm1, %v4187_v29 }
 0x54b   : > { %13058 = vmatpush3.bf16.msra.mxu1 %v4485_v15  ;;  %v2689_v5 = vpop.f32.mrb[60].mxu0  ;;  %13059 = vmatprep.mubr.msk.bf16.mxu1 %vm14472_vm0, %v18455_v14 }
 0x54c   : > { %v12875_v60 = vpop.f32.mrb[61].mxu0  ;;  %13069 = vmatprep.subr.bf16.mxu1 %v18455_v14 }
 0x54d   : > { %v2692_v37 = vpop.f32.mrb[62].mxu0 }
 0x54e   : > { %v12876_v49 = vpop.f32.mrb[63].mxu0 }
 0x553   : > { %v2735_v34 = vpop.f32.mrb[60].mxu1  ;;  %v2781_v59 = vpop.f32.mrb[64].mxu0 }
 0x554   : > { %v3294_v41 = vpack.c.bf16 %v2735_v34, %v2689_v5  ;;  %v12881_v9 = vpop.f32.mrb[61].mxu1  ;;  %v12887_v55 = vpop.f32.mrb[65].mxu0 }
 0x555   : > { %v2738_v58 = vpop.f32.mrb[62].mxu1  ;;  %v2784_v44 = vpop.f32.mrb[66].mxu0 }
 0x556   : > { %3302 = vst.msk [vmem:[#allocation4 + $0x8] sm:$0xff] %vm1626_vm1, %v3294_v41  ;;  %v12882_v29 = vpop.f32.mrb[63].mxu1  ;;  %v12888_v57 = vpop.f32.mrb[67].mxu0 }
 0x55b   : > { %v2827_v21 = vpop.f32.mrb[64].mxu1  ;;  %v2873_v15 = vpop.f32.mrb[68].mxu0 }
 0x55c   : > { %v3295_v53 = vpack.c.bf16 %v2827_v21, %v2781_v59  ;;  %v12893_v45 = vpop.f32.mrb[65].mxu1  ;;  %v12899_v60 = vpop.f32.mrb[69].mxu0 }
 0x55d   : > { %v2830_v50 = vpop.f32.mrb[66].mxu1  ;;  %v2876_v38 = vpop.f32.mrb[70].mxu0 }
 0x55e   : > { %3303 = vst.msk [vmem:[#allocation4 + $0x10] sm:$0xff] %vm1626_vm1, %v3295_v53  ;;  %v12894_v37 = vpop.f32.mrb[67].mxu1  ;;  %v12900_v49 = vpop.f32.mrb[71].mxu0 }
 0x563   : > { %v2919_v5 = vpop.f32.mrb[68].mxu1  ;;  %v2965_v34 = vpop.f32.mrb[72].mxu0 }
 0x564   : > { %v3296_v9 = vpack.c.bf16 %v2919_v5, %v2873_v15  ;;  %v12905_v55 = vpop.f32.mrb[69].mxu1  ;;  %v12911_v58 = vpop.f32.mrb[73].mxu0 }
 0x565   : > { %v2922_v44 = vpop.f32.mrb[70].mxu1  ;;  %v2968_v41 = vpop.f32.mrb[74].mxu0 }
 0x566   : > { %3304 = vst.msk [vmem:[#allocation4 + $0x18] sm:$0xff] %vm1626_vm1, %v3296_v9  ;;  %v12906_v29 = vpop.f32.mrb[71].mxu1  ;;  %v12912_v57 = vpop.f32.mrb[75].mxu0 }
 0x56b   : > { %v3011_v59 = vpop.f32.mrb[72].mxu1  ;;  %v3057_v45 = vpop.f32.mrb[76].mxu0 }
 0x56c   : > { %v3297_v21 = vpack.c.bf16 %v3011_v59, %v2965_v34  ;;  %v12917_v50 = vpop.f32.mrb[73].mxu1  ;;  %v12923_v38 = vpop.f32.mrb[77].mxu0 }
 0x56d   : > { %v3014_v60 = vpop.f32.mrb[74].mxu1  ;;  %v3060_v53 = vpop.f32.mrb[78].mxu0 }
 0x56e   : > { %3305 = vst.msk [vmem:[#allocation4 + $0x20] sm:$0xff] %vm1626_vm1, %v3297_v21  ;;  %v12918_v37 = vpop.f32.mrb[75].mxu1  ;;  %v12924_v49 = vpop.f32.mrb[79].mxu0  ;;  %v15700_v21 = vld [vmem:[%s18450_s19] sm:$0xff] }
 0x573   : > { %v3103_v15 = vpop.f32.mrb[76].mxu1  ;;  %v3149_v5 = vpop.f32.mrb[80].mxu0 }
 0x574   : > { %v3298_v55 = vpack.c.bf16 %v3103_v15, %v3057_v45  ;;  %v12929_v58 = vpop.f32.mrb[77].mxu1  ;;  %v12935_v44 = vpop.f32.mrb[81].mxu0 }
 0x575   : > { %v3106_v41 = vpop.f32.mrb[78].mxu1  ;;  %v3152_v9 = vpop.f32.mrb[82].mxu0 }
 0x576   : > { %3306 = vst.msk [vmem:[#allocation4 + $0x28] sm:$0xff] %vm1626_vm1, %v3298_v55  ;;  %v12930_v29 = vpop.f32.mrb[79].mxu1  ;;  %v12936_v57 = vpop.f32.mrb[83].mxu0 }
 0x57b   : > { %v3241_v34 = vpop.f32.mrb[84].mxu0 }
 0x57c   : > { %v12947_v59 = vpop.f32.mrb[85].mxu0 }
 0x57d   : > { %v3244_v50 = vpop.f32.mrb[86].mxu0 }
 0x57e   : > { %v12948_v38 = vpop.f32.mrb[87].mxu0 }
 0x59d   : > { %v3451_v60 = vpop.f32.mrb[88].mxu0 }
 0x59e   : > { %v15703_v45 = vadd.f32 %v15700_v21, %v3451_v60  ;;  %v12959_v53 = vpop.f32.mrb[89].mxu0 }
 0x59f   : > { %v3454_v37 = vpop.f32.mrb[90].mxu0 }
 0x5a0   : > { %v12960_v49 = vpop.f32.mrb[91].mxu0  ;;  %v4237_v15 = vsel %vm2363_vm3, %v15703_v45, -inf }
 0x5a1   : > { %4238 = vmax.xlane.f32.xlu0 %v4237_v15 }
 0x5a5   : > { %v3555_v55 = vpop.f32.mrb[92].mxu0 }
 0x5a6   : > { %v15708_v58 = vadd.f32 %v15700_v21, %v3555_v55  ;;  %v12971_v44 = vpop.f32.mrb[93].mxu0 }
 0x5a7   : > { %v3558_v41 = vpop.f32.mrb[94].mxu0 }
 0x5a8   : > { %v3195_v9 = vpop.f32.mrb[80].mxu1  ;;  %v12972_v29 = vpop.f32.mrb[95].mxu0  ;;  %v4243_v57 = vsel %vm2363_vm3, %v15708_v58, -inf }
 0x5a9   : > { %v3299_v59 = vpack.c.bf16 %v3195_v9, %v3149_v5  ;;  %v12941_v50 = vpop.f32.mrb[81].mxu1  ;;  %4244 = vmax.xlane.f32.xlu0 %v4243_v57 }
 0x5aa   : > { %v3198_v38 = vpop.f32.mrb[82].mxu1 }
 0x5ab   : > { %3307 = vst.msk [vmem:[#allocation4 + $0x30] sm:$0xff] %vm1626_vm1, %v3299_v59  ;;  %v12942_v60 = vpop.f32.mrb[83].mxu1 }
 0x5ad   : > { %v3659_v53 = vpop.f32.mrb[96].mxu0 }
 0x5ae   : > { %v12983_v37 = vpop.f32.mrb[97].mxu0 }
 0x5af   : > { %v3662_v49 = vpop.f32.mrb[98].mxu0 }
 0x5b0   : > { %v12984_v15 = vpop.f32.mrb[99].mxu0 }
 0x5b5   : > { %v3763_v55 = vpop.f32.mrb[100].mxu0 }
 0x5b6   : > { %v12995_v24 = vpop.f32.mrb[101].mxu0 }
 0x5b7   : > { %v3766_v44 = vpop.f32.mrb[102].mxu0 }
 0x5b8   : > { %v12996_v41 = vpop.f32.mrb[103].mxu0 }
 0x5bd   : > { %v3867_v16 = vpop.f32.mrb[104].mxu0 }
 0x5be   : > { %v13007_v29 = vpop.f32.mrb[105].mxu0 }
 0x5bf   : > { %v3870_v17 = vpop.f32.mrb[106].mxu0 }
 0x5c0   : > { %v13008_v42 = vpop.f32.mrb[107].mxu0 }
 0x5c5   : > { %v3971_v32 = vpop.f32.mrb[108].mxu0 }
 0x5c6   : > { %v13019_v5 = vpop.f32.mrb[109].mxu0 }
 0x5c7   : > { %v3974_v9 = vpop.f32.mrb[110].mxu0 }
 0x5c8   : > { %v13020_v57 = vpop.f32.mrb[111].mxu0 }
 0x5cd   : > { %v4075_v50 = vpop.f32.mrb[112].mxu0 }
 0x5ce   : > { %v13031_v38 = vpop.f32.mrb[113].mxu0 }
 0x5cf   : > { %v4078_v59 = vpop.f32.mrb[114].mxu0 }
 0x5d0   : > { %v13032_v60 = vpop.f32.mrb[115].mxu0 }
 0x5d5   : > { %v4179_v51 = vpop.f32.mrb[116].mxu0 }
 0x5d6   : > { %v13043_v37 = vpop.f32.mrb[117].mxu0 }
 0x5d7   : > { %v4182_v49 = vpop.f32.mrb[118].mxu0  ;;  %v15723_v37 = vadd.f32 %v15700_v21, %v3659_v53  ;;  %v15736_v53 = vadd.f32 %v15700_v21, %v3867_v16 }
 0x5d8   : > { %v13044_v15 = vpop.f32.mrb[119].mxu0 }
 0x5dd   : > { %v3287_v11 = vpop.f32.mrb[84].mxu1 }
 0x5de   : > { %v3300_v24 = vpack.c.bf16 %v3287_v11, %v3241_v34  ;;  %v12953_v44 = vpop.f32.mrb[85].mxu1 }
 0x5df   : > { %v3290_v41 = vpop.f32.mrb[86].mxu1  ;;  %v4249_v44 = vsel %vm2363_vm3, %v15723_v37, -inf }
 0x5e0   : > { %3308 = vst.msk [vmem:[#allocation4 + $0x38] sm:$0xff] %vm1626_vm1, %v3300_v24  ;;  %v12954_v17 = vpop.f32.mrb[87].mxu1  ;;  %v15728_v24 = vadd.f32 %v15700_v21, %v3763_v55 }
 0x5e2   : > { %v4255_v55 = vsel %vm2363_vm3, %v15728_v24, -inf }
 0x5e5   : > { %v3503_v42 = vpop.f32.mrb[88].mxu1 }
 0x5e6   : > { %v15715_v29 = vadd.f32 %v15700_v21, %v3503_v42  ;;  %v12965_v5 = vpop.f32.mrb[89].mxu1 }
 0x5e7   : > { %v3506_v9 = vpop.f32.mrb[90].mxu1 }
 0x5e8   : > { %v12966_v57 = vpop.f32.mrb[91].mxu1  ;;  %v4240_v38 = vsel %vm2363_vm3, %v15715_v29, -inf }
 0x5e9   : > { %4241 = vmax.xlane.f32.xlu1 %v4240_v38  ;;  %v15743_v38 = vadd.f32 %v15700_v21, %v3971_v32 }
 0x5eb   : > { %v4267_v32 = vsel %vm2363_vm3, %v15743_v38, -inf }
 0x5ed   : > { %v3607_v59 = vpop.f32.mrb[92].mxu1 }
 0x5ee   : > { %v15720_v60 = vadd.f32 %v15700_v21, %v3607_v59  ;;  %v12977_v11 = vpop.f32.mrb[93].mxu1  ;;  %v4261_v59 = vsel %vm2363_vm3, %v15736_v53, -inf }
 0x5ef   : > { %v3610_v34 = vpop.f32.mrb[94].mxu1 }
 0x5f0   : > { %v12978_v49 = vpop.f32.mrb[95].mxu1  ;;  %v4246_v15 = vsel %vm2363_vm3, %v15720_v60, -inf }
 0x5f1   : > { %4247 = vmax.xlane.f32.xlu0 %v4246_v15  ;;  %v15751_v15 = vadd.f32 %v15700_v21, %v4075_v50 }
 0x5f5   : > { %v3711_v41 = vpop.f32.mrb[96].mxu1  ;;  %4250 = vmax.xlane.f32.xlu0 %v4249_v44 }
 0x5f6   : > { %v15733_v17 = vadd.f32 %v15700_v21, %v3711_v41  ;;  %v12989_v42 = vpop.f32.mrb[97].mxu1 }
 0x5f7   : > { %v3714_v5 = vpop.f32.mrb[98].mxu1  ;;  %v15758_v42 = vadd.f32 %v15700_v21, %v4179_v51 }
 0x5f8   : > { %v12990_v9 = vpop.f32.mrb[99].mxu1  ;;  %v4252_v57 = vsel %vm2363_vm3, %v15733_v17, -inf  ;;  %v4273_v5 = vsel %vm2363_vm3, %v15751_v15, -inf }
 0x5f9   : > { %4253 = vmax.xlane.f32.xlu1 %v4252_v57  ;;  %4256 = vmax.xlane.f32.xlu0 %v4255_v55 }
 0x5fd   : > { %v3815_v11 = vpop.f32.mrb[100].mxu1  ;;  %4262 = vmax.xlane.f32.xlu0 %v4261_v59 }
 0x5fe   : > { %v15748_v16 = vadd.f32 %v15700_v21, %v3815_v11  ;;  %v13001_v34 = vpop.f32.mrb[101].mxu1 }
 0x5ff   : > { %v3818_v49 = vpop.f32.mrb[102].mxu1  ;;  %v4279_v34 = vsel %vm2363_vm3, %v15758_v42, -inf }
 0x600   : > { %v13002_v44 = vpop.f32.mrb[103].mxu1  ;;  %v4258_v41 = vsel %vm2363_vm3, %v15748_v16, -inf }
 0x601   : > { %4259 = vmax.xlane.f32.xlu1 %v4258_v41  ;;  %4268 = vmax.xlane.f32.xlu0 %v4267_v32 }
 0x605   : > { %v3919_v9 = vpop.f32.mrb[104].mxu1  ;;  %4274 = vmax.xlane.f32.xlu0 %v4273_v5 }
 0x606   : > { %v15763_v50 = vadd.f32 %v15700_v21, %v3919_v9  ;;  %v13013_v57 = vpop.f32.mrb[105].mxu1 }
 0x607   : > { %v3922_v55 = vpop.f32.mrb[106].mxu1 }
 0x608   : > { %v13014_v59 = vpop.f32.mrb[107].mxu1  ;;  %v4264_v11 = vsel %vm2363_vm3, %v15763_v50, -inf }
 0x609   : > { %4265 = vmax.xlane.f32.xlu1 %v4264_v11  ;;  %4280 = vmax.xlane.f32.xlu0 %v4279_v34 }
 0x60d   : > { %v4023_v51 = vpop.f32.mrb[108].mxu1 }
 0x60e   : > { %v15770_v49 = vadd.f32 %v15700_v21, %v4023_v51  ;;  %v13025_v44 = vpop.f32.mrb[109].mxu1 }
 0x60f   : > { %v4026_v41 = vpop.f32.mrb[110].mxu1  ;;  %v15781_v44 = vpop.permute.xlu0 %4626 }
 0x610   : > { %v13026_v32 = vpop.f32.mrb[111].mxu1  ;;  %v4270_v5 = vsel %vm2363_vm3, %v15770_v49, -inf }
 0x611   : > { %4271 = vmax.xlane.f32.xlu1 %v4270_v5 }
 0x615   : > { %v4127_v9 = vpop.f32.mrb[112].mxu1 }
 0x616   : > { %v15775_v57 = vadd.f32 %v15700_v21, %v4127_v9  ;;  %v13037_v55 = vpop.f32.mrb[113].mxu1  ;;  %v15785_v9 = vpop.permute.xlu0 %4724 }
 0x617   : > { %v4130_v59 = vpop.f32.mrb[114].mxu1  ;;  %18476 = vst [vmem:[#allocation12_spill] sm:$0xff] %v15785_v9 }
 0x618   : > { %v13038_v11 = vpop.f32.mrb[115].mxu1  ;;  %v4276_v34 = vsel %vm2363_vm3, %v15775_v57, -inf }
 0x619   : > { %4277 = vmax.xlane.f32.xlu1 %v4276_v34 }
 0x61a   : > { %v15787_v55 = vpop.permute.xlu0 %4822 }
 0x61b   : > { %18477 = vst [vmem:[#allocation14_spill] sm:$0xff] %v15787_v55 }
 0x61d   : > { %v4231_v51 = vpop.f32.mrb[116].mxu1 }
 0x61e   : > { %v13049_v41 = vpop.f32.mrb[117].mxu1 }
 0x61f   : > { %v4234_v32 = vpop.f32.mrb[118].mxu1  ;;  %5018 = vrot.lane.b32.xlu0 %v15515_v10, %s14473_s22 }
 0x620   : > { %v13050_v5 = vpop.f32.mrb[119].mxu1 }
 0x62a   : > { %5067 = vrot.lane.b32.xlu1 %v15541_v54, %s14473_s22 }
 0x62e   : > { %v4239_v59 = vpop.xlane.xlu0 %4238 }
 0x62f   : > { %v4285_v11 = vsub.f32 %v15703_v45, %v4239_v59  ;;  %v15802_v45 = vadd.f32 %v15700_v21, %v4231_v51 }
 0x631   : > { %v4301_v34 = vmul.f32 1.442695, %v4285_v11 }
 0x633   : > { %13891 = vpow2.f32 %v4301_v34 }
 0x636   : > { %v4245_v4 = vpop.xlane.xlu0 %4244 }
 0x637   : > { %v4287_v41 = vsub.f32 %v15708_v58, %v4245_v4  ;;  %v4282_v4 = vsel %vm2363_vm3, %v15802_v45, -inf  ;;  %v15806_v58 = vpop.permute.xlu1 %4577 }
 0x639   : > { %v4305_v32 = vmul.f32 1.442695, %v4287_v41 }
 0x63b   : > { %13893 = vpow2.f32 %v4305_v32  ;;  %v15808_v59 = vpop.permute.xlu1 %4675 }
 0x63d   : > { %v15793_v19 = vpop.eup %13891 }
 0x63e   : > { %v4333_v5 = vsel %vm2363_vm3, %v15793_v19, 0.0 }
 0x63f   : > { %4334 = vadd.xlane.f32.xlu0 %v4333_v5  ;;  %v15810_v11 = vpop.permute.xlu1 %4773 }
 0x640   : > { %18478 = vst [vmem:[#allocation18_spill] sm:$0xff] %v15810_v11 }
 0x643   : > { %v15812_v34 = vpop.permute.xlu1 %4871 }
 0x644   : > { %18479 = vst [vmem:[#allocation17_spill] sm:$0xff] %v15812_v34 }
 0x645   : > { %v15797_v10 = vpop.eup %13893 }
 0x646   : > { %v4339_v54 = vsel %vm2363_vm3, %v15797_v10, 0.0 }
 0x647   : > { %4340 = vadd.xlane.f32.xlu0 %v4339_v54  ;;  %v15814_v41 = vpop.permute.xlu1 %4920 }
 0x648   : > { %18480 = vst [vmem:[#allocation23_spill] sm:$0xff] %v15814_v41 }
 0x64b   : > { %v15816_v32 = vpop.permute.xlu1 %4969 }
 0x64c   : > { %18481 = vst [vmem:[#allocation22_spill] sm:$0xff] %v15816_v32 }
 0x64e   : > { %4283 = vmax.xlane.f32.xlu1 %v4282_v4 }
 0x676   : > { %v4242_v54 = vpop.xlane.xlu1 %4241 }
 0x677   : > { %v4286_v21 = vsub.f32 %v15715_v29, %v4242_v54 }
 0x679   : > { %v4303_v51 = vmul.f32 1.442695, %v4286_v21 }
 0x67b   : > { %13895 = vpow2.f32 %v4303_v51 }
 0x67e   : > { %v4248_v5 = vpop.xlane.xlu0 %4247 }
 0x67f   : > { %v4288_v4 = vsub.f32 %v15720_v60, %v4248_v5 }
 0x681   : > { %v4307_v55 = vmul.f32 1.442695, %v4288_v4 }
 0x682   : > { %v4251_v13 = vpop.xlane.xlu0 %4250 }
 0x683   : > { %13897 = vpow2.f32 %v4307_v55  ;;  %v4289_v52 = vsub.f32 %v15723_v37, %v4251_v13 }
 0x685   : > { %v15821_v11 = vpop.eup %13895  ;;  %v4309_v34 = vmul.f32 1.442695, %v4289_v52 }
 0x686   : > { %v4254_v9 = vpop.xlane.xlu1 %4253  ;;  %v4257_v41 = vpop.xlane.xlu0 %4256  ;;  %v4336_v32 = vsel %vm2363_vm3, %v15821_v11, 0.0 }
 0x687   : > { %13899 = vpow2.f32 %v4309_v34  ;;  %v4290_v29 = vsub.f32 %v15733_v17, %v4254_v9  ;;  %v4291_v54 = vsub.f32 %v15728_v24, %v4257_v41  ;;  %4337 = vadd.xlane.f32.xlu1 %v4336_v32 }
 0x689   : > { %v4311_v60 = vmul.f32 1.442695, %v4290_v29  ;;  %v4313_v21 = vmul.f32 1.442695, %v4291_v54 }
 0x68a   : > { %v4263_v51 = vpop.xlane.xlu0 %4262 }
 0x68b   : > { %13901 = vpow2.f32 %v4311_v60  ;;  %v4293_v52 = vsub.f32 %v15736_v53, %v4263_v51 }
 0x68c   : > { %13903 = vpow2.f32 %v4313_v21 }
 0x68d   : > { %v15827_v13 = vpop.eup %13897  ;;  %v4317_v24 = vmul.f32 1.442695, %v4293_v52 }
 0x68e   : > { %v4260_v37 = vpop.xlane.xlu1 %4259  ;;  %v4269_v55 = vpop.xlane.xlu0 %4268  ;;  %v4342_v5 = vsel %vm2363_vm3, %v15827_v13, 0.0 }
 0x68f   : > { %v4292_v34 = vsub.f32 %v15748_v16, %v4260_v37  ;;  %4343 = vadd.xlane.f32.xlu1 %v4342_v5  ;;  %v4295_v41 = vsub.f32 %v15743_v38, %v4269_v55 }
 0x691   : > { %v15833_v17 = vpop.eup %13899  ;;  %v4315_v9 = vmul.f32 1.442695, %v4292_v34  ;;  %v4321_v29 = vmul.f32 1.442695, %v4295_v41 }
 0x692   : > { %v4275_v32 = vpop.xlane.xlu0 %4274  ;;  %v4345_v4 = vsel %vm2363_vm3, %v15833_v17, 0.0 }
 0x693   : > { %13905 = vpow2.f32 %v4315_v9  ;;  %4346 = vadd.xlane.f32.xlu0 %v4345_v4  ;;  %v4297_v54 = vsub.f32 %v15751_v15, %v4275_v32 }
 0x694   : > { %13907 = vpow2.f32 %v4317_v24 }
 0x695   : > { %v15838_v53 = vpop.eup %13901  ;;  %13909 = vpow2.f32 %v4321_v29  ;;  %v4325_v52 = vmul.f32 1.442695, %v4297_v54 }
 0x696   : > { %v15841_v16 = vpop.eup %13903  ;;  %v4266_v60 = vpop.xlane.xlu1 %4265  ;;  %v4348_v21 = vsel %vm2363_vm3, %v15838_v53, 0.0 }
 0x697   : > { %v4294_v38 = vsub.f32 %v15763_v50, %v4266_v60  ;;  %4349 = vadd.xlane.f32.xlu1 %v4348_v21  ;;  %v4351_v51 = vsel %vm2363_vm3, %v15841_v16, 0.0 }
 0x698   : > { %4352 = vadd.xlane.f32.xlu0 %v4351_v51 }
 0x699   : > { %v4319_v37 = vmul.f32 1.442695, %v4294_v38 }
 0x69b   : > { %13911 = vpow2.f32 %v4319_v37 }
 0x69c   : > { %13913 = vpow2.f32 %v4325_v52 }
 0x69d   : > { %v15848_v55 = vpop.eup %13905 }
 0x69e   : > { %v4272_v15 = vpop.xlane.xlu1 %4271  ;;  %v4354_v5 = vsel %vm2363_vm3, %v15848_v55, 0.0  ;;  %v15852_v34 = vpop.eup %13907 }
 0x69f   : > { %v4296_v50 = vsub.f32 %v15770_v49, %v4272_v15  ;;  %4355 = vadd.xlane.f32.xlu1 %v4354_v5  ;;  %v4357_v9 = vsel %vm2363_vm3, %v15852_v34, 0.0  ;;  %v15857_v41 = vpop.eup %13909 }
 0x6a0   : > { %v4363_v29 = vsel %vm2363_vm3, %v15857_v41, 0.0 }
 0x6a1   : > { %v4323_v24 = vmul.f32 1.442695, %v4296_v50 }
 0x6a3   : > { %13915 = vpow2.f32 %v4323_v24  ;;  %4358 = vadd.xlane.f32.xlu1 %v4357_v9 }
 0x6a5   : > { %v15859_v32 = vpop.eup %13911 }
 0x6a6   : > { %v4278_v4 = vpop.xlane.xlu1 %4277  ;;  %v4360_v54 = vsel %vm2363_vm3, %v15859_v32, 0.0  ;;  %v15865_v60 = vpop.eup %13913 }
 0x6a7   : > { %v4298_v49 = vsub.f32 %v15775_v57, %v4278_v4  ;;  %4364 = vadd.xlane.f32.xlu1 %v4363_v29  ;;  %4361 = vadd.xlane.f32.xlu0 %v4360_v54  ;;  %v4369_v38 = vsel %vm2363_vm3, %v15865_v60, 0.0  ;;  %v4281_v57 = vpop.xlane.xlu0 %4280 }
 0x6a8   : > { %v4299_v50 = vsub.f32 %v15758_v42, %v4281_v57  ;;  %v4534_v42 = vsel %vm2559_vm2, %v15777_v31, 0 }
 0x6a9   : > { %v4327_v21 = vmul.f32 1.442695, %v4298_v49 }
 0x6aa   : > { %v4329_v9 = vmul.f32 1.442695, %v4299_v50  ;;  %v15885_v54 = vpop.permute.xlu1 %5067 }
 0x6ab   : > { %13917 = vpow2.f32 %v4327_v21  ;;  %4370 = vadd.xlane.f32.xlu1 %v4369_v38  ;;  %v15880_v5 = vpop.permute.xlu0 %5018 }
 0x6ad   : > { %v15870_v51 = vpop.eup %13915 }
 0x6ae   : > { %v4366_v52 = vsel %vm2363_vm3, %v15870_v51, 0.0 }
 0x6af   : > { %4367 = vadd.xlane.f32.xlu0 %v4366_v52 }
 0x6b5   : > { %v15874_v37 = vpop.eup %13917 }
 0x6b6   : > { %v4372_v15 = vsel %vm2363_vm3, %v15874_v37, 0.0 }
 0x6b7   : > { %4373 = vadd.xlane.f32.xlu0 %v4372_v15 }
 0x6bc   : > { %5165 = vrot.lane.b32.xlu1 %v15598_v62, %s14473_s22 }
 0x6cc   : > { %v4335_v24 = vpop.xlane.xlu0 %4334 }
 0x6cd   : > { %13919 = vrcp.f32 %v4335_v24  ;;  %5116 = vrot.lane.b32.xlu0 %v15537_v3, %s14473_s22 }
 0x6ce   : > { %13921 = vpow2.f32 %v4329_v9 }
 0x6d4   : > { %v4341_v4 = vpop.xlane.xlu0 %4340 }
 0x6d5   : > { %13923 = vrcp.f32 %v4341_v4 }
 0x6d7   : > { %v13920_v29 = vpop.eup %13919 }
 0x6d8   : > { %v4397_v49 = vmul.f32 %v13920_v29, %v15793_v19  ;;  %v15888_v52 = vpop.eup %13921 }
 0x6d9   : > { %v4375_v19 = vsel %vm2363_vm3, %v15888_v52, 0.0 }
 0x6da   : > { %v4413_v21 = vpack.c.bf16 %v4397_v49, %v4397_v49 }
 0x6db   : > { %v4284_v38 = vpop.xlane.xlu1 %4283 }
 0x6dc   : > { %v4300_v15 = vsub.f32 %v15802_v45, %v4284_v38  ;;  %13054 = vmatmul.mubr.msk.bf16.vlgmr.msra.gmra.mrb[120].mxu0 %vm2363_vm3, %v4413_v21  ;;  %v4632_v45 = vsel %vm2559_vm2, %v15781_v44, 0 }
 0x6dd   : > { %13064 = vmatpush3.bf16.msra.mxu0 %v4534_v42  ;;  %13065 = vmatprep.mubr.msk.bf16.mxu0 %vm14472_vm0, %v18455_v14  ;;  %v4583_v42 = vsel %vm2559_vm2, %v15806_v58, 0 }
 0x6de   : > { %v4331_v57 = vmul.f32 1.442695, %v4300_v15  ;;  %13075 = vmatprep.subr.bf16.mxu0 %v18455_v14 }
 0x6df   : > { %v13924_v50 = vpop.eup %13923 }
 0x6e0   : > { %13925 = vpow2.f32 %v4331_v57  ;;  %4376 = vadd.xlane.f32.xlu1 %v4375_v19  ;;  %v4399_v24 = vmul.f32 %v13924_v50, %v15797_v10 }
 0x6e2   : > { %v4415_v31 = vpack.c.bf16 %v4399_v24, %v4399_v24  ;;  %v4681_v24 = vsel %vm2559_vm2, %v15808_v59, 0 }
 0x6e4   : > { %13066 = vmatmul.mubr.msk.bf16.vlgmr.msra.gmra.mrb[124].mxu0 %vm2363_vm3, %v4415_v31 }
 0x6e5   : > { %13076 = vmatpush3.bf16.msra.mxu0 %v4632_v45  ;;  %13077 = vmatprep.mubr.msk.bf16.mxu0 %vm14472_vm0, %v18455_v14 }
 0x6e6   : > { %13087 = vmatprep.subr.bf16.mxu0 %v18455_v14 }
 0x6ea   : > { %v15906_v9 = vpop.eup %13925 }
 0x6eb   : > { %v4378_v4 = vsel %vm2363_vm3, %v15906_v9, 0.0 }
 0x6ec   : > { %4379 = vadd.xlane.f32.xlu0 %v4378_v4 }
 0x6f1   : > { %5414 = vrot.lane.b32.xlu1 %v14930_v40, %s14474_s16 }
 0x6f5   : > { %5411 = vrot.lane.b32.xlu1 %v14962_v20, %s14474_s16 }
 0x6f9   : > { %5518 = vrot.lane.b32.xlu1 %v14991_v23, %s14474_s16 }
 0x6fd   : > { %5515 = vrot.lane.b32.xlu1 %v15035_v22, %s14474_s16 }
 0x701   : > { %5622 = vrot.lane.b32.xlu1 %v15032_v2, %s14474_s16 }
 0x702   : > { %5362 = vrot.lane.b32.xlu0 %v14911_v26, %s14474_s16 }
 0x705   : > { %5619 = vrot.lane.b32.xlu1 %v15062_v39, %s14474_s16 }
 0x706   : > { %5359 = vrot.lane.b32.xlu0 %v14934_v8, %s14474_s16 }
 0x709   : > { %5726 = vrot.lane.b32.xlu1 %v15059_v56, %s14474_s16 }
 0x70a   : > { %5466 = vrot.lane.b32.xlu0 %v14957_v63, %s14474_s16 }
 0x70d   : > { %5723 = vrot.lane.b32.xlu1 %v15090_v33, %s14474_s16 }
 0x70e   : > { %5463 = vrot.lane.b32.xlu0 %v14996_v35, %s14474_s16 }
 0x711   : > { %5830 = vrot.lane.b32.xlu1 %v18463_v48, %s14474_s16 }
 0x712   : > { %5570 = vrot.lane.b32.xlu0 %v14964_v27, %s14474_s16 }
 0x714   : > { %v4338_v10 = vpop.xlane.xlu1 %4337 }
 0x715   : > { %13927 = vrcp.f32 %v4338_v10  ;;  %5827 = vrot.lane.b32.xlu1 %v18467_v1, %s14474_s16  ;;  %v18482_v10 = vld [vmem:[#allocation12_spill] sm:$0xff] }
 0x716   : > { %5567 = vrot.lane.b32.xlu0 %v14998_v36, %s14474_s16 }
 0x719   : > { %5934 = vrot.lane.b32.xlu1 %v18468_v18, %s14474_s16 }
 0x71a   : > { %5674 = vrot.lane.b32.xlu0 %v15000_v0, %s14474_s16 }
 0x71c   : > { %v4344_v44 = vpop.xlane.xlu1 %4343 }
 0x71d   : > { %13929 = vrcp.f32 %v4344_v44  ;;  %5931 = vrot.lane.b32.xlu1 %v18469_v30, %s14474_s16  ;;  %v4730_v44 = vsel %vm2559_vm2, %v18482_v10, 0 }
 0x71e   : > { %5671 = vrot.lane.b32.xlu0 %v15037_v6, %s14474_s16 }
 0x71f   : > { %v13928_v29 = vpop.eup %13927 }
 0x720   : > { %v4347_v49 = vpop.xlane.xlu0 %4346  ;;  %v4398_v21 = vmul.f32 %v13928_v29, %v15821_v11 }
 0x721   : > { %13931 = vrcp.f32 %v4347_v49  ;;  %6038 = vrot.lane.b32.xlu1 %v18470_v25, %s14474_s16  ;;  %v18483_v49 = vld [vmem:[#allocation27_spill] sm:$0xff] }
 0x722   : > { %5778 = vrot.lane.b32.xlu0 %v15039_v7, %s14474_s16  ;;  %v4414_v38 = vpack.c.bf16 %v4398_v21, %v4398_v21  ;;  %v18484_v21 = vld [vmem:[#allocation16_spill] sm:$0xff] }
 0x724   : > { %13060 = vmatmul.mubr.msk.bf16.vlgmr.msra.gmra.mrb[120].mxu1 %vm2363_vm3, %v4414_v38  ;;  %v4350_v15 = vpop.xlane.xlu1 %4349 }
 0x725   : > { %13070 = vmatpush3.bf16.msra.mxu1 %v4583_v42  ;;  %13933 = vrcp.f32 %v4350_v15  ;;  %v4353_v57 = vpop.xlane.xlu0 %4352  ;;  %6035 = vrot.lane.b32.xlu1 %v18471_v61, %s14474_s16  ;;  %v18485_v15 = vld [vmem:[#allocation18_spill] sm:$0xff] }
 0x726   : > { %13935 = vrcp.f32 %v4353_v57  ;;  %5775 = vrot.lane.b32.xlu0 %v15064_v28, %s14474_s16  ;;  %13071 = vmatprep.mubr.msk.bf16.mxu1 %vm14472_vm0, %v18455_v14  ;;  %v4779_v57 = vsel %vm2559_vm2, %v18485_v15, 0  ;;  %v18493_v15 = vld [vmem:[#allocation24_spill] sm:$0xff] }
 0x727   : > { %v13930_v11 = vpop.eup %13929  ;;  %13081 = vmatprep.subr.bf16.mxu1 %v18455_v14 }
 0x728   : > { %v4400_v58 = vmul.f32 %v13930_v11, %v15827_v13 }
 0x729   : > { %6142 = vrot.lane.b32.xlu1 %v18472_v47, %s14474_s16 }
 0x72a   : > { %5882 = vrot.lane.b32.xlu0 %v15066_v46, %s14474_s16  ;;  %v4416_v50 = vpack.c.bf16 %v4400_v58, %v4400_v58  ;;  %v18486_v58 = vld [vmem:[#allocation33_spill] sm:$0xff] }
 0x72b   : > { %v13932_v19 = vpop.eup %13931 }
 0x72c   : > { %13072 = vmatmul.mubr.msk.bf16.vlgmr.msra.gmra.mrb[124].mxu1 %vm2363_vm3, %v4416_v50  ;;  %v4356_v31 = vpop.xlane.xlu1 %4355  ;;  %v4401_v45 = vmul.f32 %v13932_v19, %v15833_v17  ;;  %v18487_v50 = vld [vmem:[#allocation19_spill] sm:$0xff] }
 0x72d   : > { %13082 = vmatpush3.bf16.msra.mxu1 %v4681_v24  ;;  %13937 = vrcp.f32 %v4356_v31  ;;  %6139 = vrot.lane.b32.xlu1 %v18473_v43, %s14474_s16  ;;  %v18488_v24 = vld [vmem:[#allocation14_spill] sm:$0xff] }
 0x72e   : > { %5879 = vrot.lane.b32.xlu0 %v15092_v12, %s14474_s16  ;;  %v4417_v13 = vpack.c.bf16 %v4401_v45, %v4401_v45  ;;  %13083 = vmatprep.mubr.msk.bf16.mxu1 %vm14472_vm0, %v18455_v14  ;;  %v4828_v31 = vsel %vm2559_vm2, %v18488_v24, 0 }
 0x72f   : > { %v13934_v4 = vpop.eup %13933  ;;  %13093 = vmatprep.subr.bf16.mxu1 %v18455_v14 }
 0x730   : > { %v13936_v59 = vpop.eup %13935  ;;  %v4359_v17 = vpop.xlane.xlu1 %4358  ;;  %13078 = vmatmul.mubr.msk.bf16.vlgmr.msra.gmra.mrb[128].mxu0 %vm2363_vm3, %v4417_v13  ;;  %v4402_v29 = vmul.f32 %v13934_v4, %v15838_v53  ;;  %v18489_v4 = vld [vmem:[#allocation34_spill] sm:$0xff] }
 0x731   : > { %13939 = vrcp.f32 %v4359_v17  ;;  %13088 = vmatpush3.bf16.msra.mxu0 %v4730_v44  ;;  %6432 = vrot.lane.b32.xlu1 %v18483_v49, %s14474_s16  ;;  %v4403_v42 = vmul.f32 %v13936_v59, %v15841_v16  ;;  %v18490_v59 = vld [vmem:[#allocation20_spill] sm:$0xff]  ;;  %v18491_v17 = vld [vmem:[#allocation17_spill] sm:$0xff] }
 0x732   : > { %5986 = vrot.lane.b32.xlu0 %v18484_v21, %s14474_s16  ;;  %v4418_v38 = vpack.c.bf16 %v4402_v29, %v4402_v29  ;;  %13089 = vmatprep.mubr.msk.bf16.mxu0 %vm14472_vm0, %v18455_v14  ;;  %v4877_v29 = vsel %vm2559_vm2, %v18491_v17, 0 }
 0x733   : > { %13099 = vmatprep.subr.bf16.mxu0 %v18455_v14  ;;  %v4419_v19 = vpack.c.bf16 %v4403_v42, %v4403_v42  ;;  %v18492_v42 = vld [vmem:[#allocation35_spill] sm:$0xff] }
 0x734   : > { %13084 = vmatmul.mubr.msk.bf16.vlgmr.msra.gmra.mrb[128].mxu1 %vm2363_vm3, %v4418_v38  ;;  %v4365_v53 = vpop.xlane.xlu1 %4364  ;;  %v4362_v11 = vpop.xlane.xlu0 %4361 }
 0x735   : > { %13094 = vmatpush3.bf16.msra.mxu1 %v4779_v57  ;;  %13941 = vrcp.f32 %v4365_v53  ;;  %6530 = vrot.lane.b32.xlu1 %v18486_v58, %s14474_s16 }
 0x736   : > { %13943 = vrcp.f32 %v4362_v11  ;;  %5983 = vrot.lane.b32.xlu0 %v18487_v50, %s14474_s16  ;;  %13095 = vmatprep.mubr.msk.bf16.mxu1 %vm14472_vm0, %v18455_v14 }
 0x737   : > { %v13938_v16 = vpop.eup %13937  ;;  %13105 = vmatprep.subr.bf16.mxu1 %v18455_v14 }
 0x738   : > { %13090 = vmatmul.mubr.msk.bf16.vlgmr.msra.gmra.mrb[132].mxu0 %vm2363_vm3, %v4419_v19  ;;  %v4404_v45 = vmul.f32 %v13938_v16, %v15848_v55  ;;  %v4371_v13 = vpop.xlane.xlu1 %4370  ;;  %v18494_v19 = vld [vmem:[#allocation23_spill] sm:$0xff] }
 0x739   : > { %13100 = vmatpush3.bf16.msra.mxu0 %v4828_v31  ;;  %6628 = vrot.lane.b32.xlu1 %v18489_v4, %s14474_s16  ;;  %13945 = vrcp.f32 %v4371_v13  ;;  %v4926_v16 = vsel %vm2559_vm2, %v18494_v19, 0  ;;  %v18496_v31 = vld [vmem:[#allocation21_spill] sm:$0xff]  ;;  %v18501_v19 = vld [vmem:[#allocation30_spill] sm:$0xff]  ;;  %v18521_v4 = vld [vmem:[#allocation39_spill] sm:$0xff] }
 0x73a   : > { %6090 = vrot.lane.b32.xlu0 %v18490_v59, %s14474_s16  ;;  %v4420_v10 = vpack.c.bf16 %v4404_v45, %v4404_v45  ;;  %13101 = vmatprep.mubr.msk.bf16.mxu0 %vm14472_vm0, %v18455_v14 }
 0x73b   : > { %v13940_v44 = vpop.eup %13939  ;;  %13111 = vmatprep.subr.bf16.mxu0 %v18455_v14 }
 0x73c   : > { %13096 = vmatmul.mubr.msk.bf16.vlgmr.msra.gmra.mrb[132].mxu1 %vm2363_vm3, %v4420_v10  ;;  %v4368_v55 = vpop.xlane.xlu0 %4367  ;;  %v4405_v38 = vmul.f32 %v13940_v44, %v15852_v34  ;;  %v18495_v34 = vld [vmem:[#allocation37_spill] sm:$0xff]  ;;  %v18497_v44 = vld [vmem:[#allocation22_spill] sm:$0xff] }
 0x73d   : > { %13106 = vmatpush3.bf16.msra.mxu1 %v4877_v29  ;;  %13947 = vrcp.f32 %v4368_v55  ;;  %6726 = vrot.lane.b32.xlu1 %v18492_v42, %s14474_s16  ;;  %v4975_v17 = vsel %vm2559_vm2, %v18497_v44, 0  ;;  %v18499_v55 = vld [vmem:[#allocation29_spill] sm:$0xff]  ;;  %v5166_v44 = vpop.permute.xlu1 %5165 }
 0x73e   : > { %6087 = vrot.lane.b32.xlu0 %v18493_v15, %s14474_s16  ;;  %v4421_v57 = vpack.c.bf16 %v4405_v38, %v4405_v38  ;;  %13107 = vmatprep.mubr.msk.bf16.mxu1 %vm14472_vm0, %v18455_v14 }
 0x73f   : > { %v13942_v53 = vpop.eup %13941  ;;  %13117 = vmatprep.subr.bf16.mxu1 %v18455_v14 }
 0x740   : > { %v13944_v11 = vpop.eup %13943  ;;  %13102 = vmatmul.mubr.msk.bf16.vlgmr.msra.gmra.mrb[136].mxu0 %vm2363_vm3, %v4421_v57  ;;  %v4407_v45 = vmul.f32 %v13942_v53, %v15857_v41  ;;  %v5024_v57 = vsel %vm2559_vm2, %v15880_v5, 0  ;;  %v5073_v5 = vsel %vm2559_vm2, %v15885_v54, 0 }
 0x741   : > { %13112 = vmatpush3.bf16.msra.mxu0 %v4926_v16  ;;  %6824 = vrot.lane.b32.xlu1 %v18495_v34, %s14474_s16  ;;  %v4406_v24 = vmul.f32 %v13944_v11, %v15859_v32  ;;  %v18498_v32 = vld [vmem:[#allocation36_spill] sm:$0xff]  ;;  %v18500_v11 = vld [vmem:[#allocation38_spill] sm:$0xff] }
 0x742   : > { %6383 = vrot.lane.b32.xlu0 %v18496_v31, %s14474_s16  ;;  %13113 = vmatprep.mubr.msk.bf16.mxu0 %vm14472_vm0, %v18455_v14  ;;  %v4423_v38 = vpack.c.bf16 %v4407_v45, %v4407_v45 }
 0x743   : > { %v4422_v13 = vpack.c.bf16 %v4406_v24, %v4406_v24  ;;  %13123 = vmatprep.subr.bf16.mxu0 %v18455_v14  ;;  %v13946_v29 = vpop.eup %13945 }
 0x744   : > { %v4374_v10 = vpop.xlane.xlu0 %4373  ;;  %v4409_v24 = vmul.f32 %v13946_v29, %v15865_v60 }
 0x745   : > { %13108 = vmatmul.mubr.msk.bf16.vlgmr.msra.gmra.mrb[136].mxu1 %vm2363_vm3, %v4422_v13  ;;  %13949 = vrcp.f32 %v4374_v10  ;;  %6873 = vrot.lane.b32.xlu1 %v18498_v32, %s14474_s16 }
 0x746   : > { %13118 = vmatpush3.bf16.msra.mxu1 %v4975_v17  ;;  %6481 = vrot.lane.b32.xlu0 %v18499_v55, %s14474_s16  ;;  %v4425_v13 = vpack.c.bf16 %v4409_v24, %v4409_v24  ;;  %v18503_v17 = vld [vmem:[#allocation32_spill] sm:$0xff] }
 0x747   : > { %v13948_v41 = vpop.eup %13947  ;;  %13119 = vmatprep.mubr.msk.bf16.mxu1 %vm14472_vm0, %v18455_v14  ;;  %13129 = vmatprep.subr.bf16.mxu1 %v18455_v14 }
 0x748   : > { %13114 = vmatmul.mubr.msk.bf16.vlgmr.msra.gmra.mrb[140].mxu0 %vm2363_vm3, %v4423_v38  ;;  %v4408_v53 = vmul.f32 %v13948_v41, %v15870_v51  ;;  %v5117_v45 = vpop.permute.xlu0 %5116  ;;  %v18502_v51 = vld [vmem:[#allocation31_spill] sm:$0xff]  ;;  %v5171_v38 = vsel %vm2559_vm2, %v5166_v44, 0 }
 0x749   : > { %13124 = vmatpush3.bf16.msra.mxu0 %v5024_v57  ;;  %6922 = vrot.lane.b32.xlu1 %v18500_v11, %s14474_s16  ;;  %v5122_v60 = vsel %vm2559_vm2, %v5117_v45, 0 }
 0x74a   : > { %6579 = vrot.lane.b32.xlu0 %v18501_v19, %s14474_s16  ;;  %v4424_v16 = vpack.c.bf16 %v4408_v53, %v4408_v53  ;;  %13125 = vmatprep.mubr.msk.bf16.mxu0 %vm14472_vm0, %v18455_v14 }
 0x74b   : > { %13135 = vmatprep.subr.bf16.mxu0 %v18455_v14 }
 0x74d   : > { %13120 = vmatmul.mubr.msk.bf16.vlgmr.msra.gmra.mrb[140].mxu1 %vm2363_vm3, %v4424_v16 }
 0x74e   : > { %13130 = vmatpush3.bf16.msra.mxu1 %v5073_v5  ;;  %6677 = vrot.lane.b32.xlu0 %v18502_v51, %s14474_s16 }
 0x74f   : > { %v13950_v10 = vpop.eup %13949  ;;  %13131 = vmatprep.mubr.msk.bf16.mxu1 %vm14472_vm0, %v18455_v14  ;;  %13141 = vmatprep.subr.bf16.mxu1 %v18455_v14 }
 0x750   : > { %13126 = vmatmul.mubr.msk.bf16.vlgmr.msra.gmra.mrb[144].mxu0 %vm2363_vm3, %v4425_v13  ;;  %v4410_v54 = vmul.f32 %v13950_v10, %v15874_v37 }
 0x751   : > { %13136 = vmatpush3.bf16.msra.mxu0 %v5122_v60  ;;  %13137 = vmatprep.mubr.msk.bf16.mxu0 %vm14472_vm0, %v18455_v14 }
 0x752   : > { %6775 = vrot.lane.b32.xlu0 %v18503_v17, %s14474_s16  ;;  %v4426_v29 = vpack.c.bf16 %v4410_v54, %v4410_v54  ;;  %13147 = vmatprep.subr.bf16.mxu0 %v18455_v14 }
 0x755   : > { %13132 = vmatmul.mubr.msk.bf16.vlgmr.msra.gmra.mrb[144].mxu1 %vm2363_vm3, %v4426_v29 }
 0x756   : > { %13142 = vmatpush3.bf16.msra.mxu1 %v5171_v38  ;;  %13143 = vmatprep.mubr.msk.bf16.mxu1 %vm14472_vm0, %v18455_v14 }
 0x757   : > { %13153 = vmatprep.subr.bf16.mxu1 %v18455_v14 }
 0x76d   : > { %v4377_v37 = vpop.xlane.xlu1 %4376 }
 0x76e   : > { %13951 = vrcp.f32 %v4377_v37 }
 0x771   : > { %v5415_v41 = vpop.permute.xlu1 %5414 }
 0x775   : > { %v5412_v57 = vpop.permute.xlu1 %5411 }
 0x778   : > { %v13952_v53 = vpop.eup %13951 }
 0x779   : > { %v5519_v16 = vpop.permute.xlu1 %5518  ;;  %v4380_v24 = vpop.xlane.xlu0 %4379  ;;  %v4411_v5 = vmul.f32 %v13952_v53, %v15888_v52 }
 0x77a   : > { %13953 = vrcp.f32 %v4380_v24 }
 0x77b   : > { %v4427_v45 = vpack.c.bf16 %v4411_v5, %v4411_v5  ;;  %v5420_v5 = vsel %vm1626_vm1, %v5415_v41, 0 }
 0x77d   : > { %v5516_v13 = vpop.permute.xlu1 %5515  ;;  %13138 = vmatmul.mubr.msk.bf16.vlgmr.msra.gmra.mrb[148].mxu0 %vm2363_vm3, %v4427_v45  ;;  %v5363_v10 = vpop.permute.xlu0 %5362 }
 0x77e   : > { %v5368_v60 = vsel %vm1626_vm1, %v5363_v10, 0  ;;  %13149 = vmatprep.mubr.msk.bf16.mxu0 %vm14472_vm0, %v18455_v14 }
 0x77f   : > { %13148 = vmatpush3.bf16.xpose.msra.mxu0 %v5368_v60 }
 0x780   : > { %13159 = vmatprep.subr.bf16.mxu0 %v18455_v14 }
 0x781   : > { %v5623_v54 = vpop.permute.xlu1 %5622  ;;  %v5360_v44 = vpop.permute.xlu0 %5359 }
 0x784   : > { %v13954_v29 = vpop.eup %13953 }
 0x785   : > { %v5620_v38 = vpop.permute.xlu1 %5619  ;;  %v5467_v37 = vpop.permute.xlu0 %5466  ;;  %v4412_v52 = vmul.f32 %v13954_v29, %v15906_v9 }
 0x786   : > { %v5472_v53 = vsel %vm1626_vm1, %v5467_v37, 0  ;;  %13150 = vmatmul.mubr.msk.bf16.vlgmr.msra.gmra.mrb[152].mxu0 %vm1626_vm1, %v5360_v44  ;;  %v5524_v44 = vsel %vm1626_vm1, %v5519_v16, 0 }
 0x787   : > { %13160 = vmatpush3.bf16.xpose.msra.mxu0 %v5472_v53  ;;  %v4428_v24 = vpack.c.bf16 %v4412_v52, %v4412_v52  ;;  %13161 = vmatprep.mubr.msk.bf16.mxu0 %vm14472_vm0, %v18455_v14 }
 0x788   : > { %13171 = vmatprep.subr.bf16.mxu0 %v18455_v14 }
 0x789   : > { %13144 = vmatmul.mubr.msk.bf16.vlgmr.msra.gmra.mrb[148].mxu1 %vm2363_vm3, %v4428_v24  ;;  %v5464_v45 = vpop.permute.xlu0 %5463  ;;  %v5727_v10 = vpop.permute.xlu1 %5726 }
 0x78a   : > { %13154 = vmatpush3.bf16.xpose.msra.mxu1 %v5420_v5  ;;  %13155 = vmatprep.mubr.msk.bf16.mxu1 %vm14472_vm0, %v18455_v14 }
 0x78b   : > { %13165 = vmatprep.subr.bf16.mxu1 %v18455_v14 }
 0x78d   : > { %v5571_v9 = vpop.permute.xlu0 %5570  ;;  %v5724_v41 = vpop.permute.xlu1 %5723 }
 0x78e   : > { %v5576_v60 = vsel %vm1626_vm1, %v5571_v9, 0  ;;  %13162 = vmatmul.mubr.msk.bf16.vlgmr.msra.gmra.mrb[156].mxu0 %vm1626_vm1, %v5464_v45 }
 0x78f   : > { %13172 = vmatpush3.bf16.xpose.msra.mxu0 %v5576_v60  ;;  %13173 = vmatprep.mubr.msk.bf16.mxu0 %vm14472_vm0, %v18455_v14 }
 0x790   : > { %13183 = vmatprep.subr.bf16.mxu0 %v18455_v14 }
 0x791   : > { %13156 = vmatmul.mubr.msk.bf16.vlgmr.msra.gmra.mrb[152].mxu1 %vm1626_vm1, %v5412_v57  ;;  %v5568_v29 = vpop.permute.xlu0 %5567  ;;  %v5831_v52 = vpop.permute.xlu1 %5830  ;;  %v5628_v57 = vsel %vm1626_vm1, %v5623_v54, 0 }
 0x792   : > { %13166 = vmatpush3.bf16.xpose.msra.mxu1 %v5524_v44  ;;  %13167 = vmatprep.mubr.msk.bf16.mxu1 %vm14472_vm0, %v18455_v14 }
 0x793   : > { %13177 = vmatprep.subr.bf16.mxu1 %v18455_v14 }
 0x795   : > { %v5675_v37 = vpop.permute.xlu0 %5674  ;;  %v5828_v24 = vpop.permute.xlu1 %5827 }
 0x796   : > { %v5680_v53 = vsel %vm1626_vm1, %v5675_v37, 0  ;;  %13174 = vmatmul.mubr.msk.bf16.vlgmr.msra.gmra.mrb[160].mxu0 %vm1626_vm1, %v5568_v29 }
 0x797   : > { %13184 = vmatpush3.bf16.xpose.msra.mxu0 %v5680_v53  ;;  %13185 = vmatprep.mubr.msk.bf16.mxu0 %vm14472_vm0, %v18455_v14 }
 0x798   : > { %13195 = vmatprep.subr.bf16.mxu0 %v18455_v14 }
 0x799   : > { %13168 = vmatmul.mubr.msk.bf16.vlgmr.msra.gmra.mrb[156].mxu1 %vm1626_vm1, %v5516_v13  ;;  %v5672_v16 = vpop.permute.xlu0 %5671  ;;  %v5732_v13 = vsel %vm1626_vm1, %v5727_v10, 0  ;;  %v5935_v9 = vpop.permute.xlu1 %5934 }
 0x79a   : > { %13178 = vmatpush3.bf16.xpose.msra.mxu1 %v5628_v57  ;;  %13179 = vmatprep.mubr.msk.bf16.mxu1 %vm14472_vm0, %v18455_v14 }
 0x79b   : > { %13189 = vmatprep.subr.bf16.mxu1 %v18455_v14 }
 0x79d   : > { %v5779_v5 = vpop.permute.xlu0 %5778  ;;  %v5932_v10 = vpop.permute.xlu1 %5931 }
 0x79e   : > { %v5784_v45 = vsel %vm1626_vm1, %v5779_v5, 0  ;;  %13186 = vmatmul.mubr.msk.bf16.vlgmr.msra.gmra.mrb[164].mxu0 %vm1626_vm1, %v5672_v16 }
 0x79f   : > { %13196 = vmatpush3.bf16.xpose.msra.mxu0 %v5784_v45  ;;  %13197 = vmatprep.mubr.msk.bf16.mxu0 %vm14472_vm0, %v18455_v14 }
 0x7a0   : > { %13207 = vmatprep.subr.bf16.mxu0 %v18455_v14 }
 0x7a1   : > { %13180 = vmatmul.mubr.msk.bf16.vlgmr.msra.gmra.mrb[160].mxu1 %vm1626_vm1, %v5620_v38  ;;  %v5776_v54 = vpop.permute.xlu0 %5775  ;;  %v5836_v38 = vsel %vm1626_vm1, %v5831_v52, 0  ;;  %v6039_v53 = vpop.permute.xlu1 %6038  ;;  %v5940_v52 = vsel %vm1626_vm1, %v5935_v9, 0 }
 0x7a2   : > { %13190 = vmatpush3.bf16.xpose.msra.mxu1 %v5732_v13  ;;  %13191 = vmatprep.mubr.msk.bf16.mxu1 %vm14472_vm0, %v18455_v14  ;;  %v6044_v9 = vsel %vm1626_vm1, %v6039_v53, 0 }
 0x7a3   : > { %13201 = vmatprep.subr.bf16.mxu1 %v18455_v14 }
 0x7a5   : > { %v5883_v60 = vpop.permute.xlu0 %5882 }
 0x7a6   : > { %v5888_v44 = vsel %vm1626_vm1, %v5883_v60, 0  ;;  %13198 = vmatmul.mubr.msk.bf16.vlgmr.msra.gmra.mrb[168].mxu0 %vm1626_vm1, %v5776_v54  ;;  %v6036_v54 = vpop.permute.xlu1 %6035 }
 0x7a7   : > { %13208 = vmatpush3.bf16.xpose.msra.mxu0 %v5888_v44  ;;  %13209 = vmatprep.mubr.msk.bf16.mxu0 %vm14472_vm0, %v18455_v14 }
 0x7a8   : > { %13219 = vmatprep.subr.bf16.mxu0 %v18455_v14 }
 0x7a9   : > { %13192 = vmatmul.mubr.msk.bf16.vlgmr.msra.gmra.mrb[164].mxu1 %vm1626_vm1, %v5724_v41  ;;  %v5880_v29 = vpop.permute.xlu0 %5879 }
 0x7aa   : > { %13202 = vmatpush3.bf16.xpose.msra.mxu1 %v5836_v38  ;;  %13203 = vmatprep.mubr.msk.bf16.mxu1 %vm14472_vm0, %v18455_v14 }
 0x7ab   : > { %13213 = vmatprep.subr.bf16.mxu1 %v18455_v14 }
 0x7ad   : > { %v5987_v37 = vpop.permute.xlu0 %5986 }
 0x7ae   : > { %v5992_v57 = vsel %vm1626_vm1, %v5987_v37, 0  ;;  %13210 = vmatmul.mubr.msk.bf16.vlgmr.msra.gmra.mrb[172].mxu0 %vm1626_vm1, %v5880_v29  ;;  %v6143_v37 = vpop.permute.xlu1 %6142 }
 0x7af   : > { %v16139_v16 = vpop.f32.mrb[120].mxu0  ;;  %13220 = vmatpush3.bf16.xpose.msra.mxu0 %v5992_v57  ;;  %13221 = vmatprep.mubr.msk.bf16.mxu0 %vm14472_vm0, %v18455_v14  ;;  %v6148_v53 = vsel %vm1626_vm1, %v6143_v37, 0 }
 0x7b0   : > { %18504 = vst [vmem:[#allocation26_spill] sm:$0xff] %v16139_v16  ;;  %v13055_v41 = vpop.f32.mrb[121].mxu0  ;;  %13231 = vmatprep.subr.bf16.mxu0 %v18455_v14 }
 0x7b1   : > { %13204 = vmatmul.mubr.msk.bf16.vlgmr.msra.gmra.mrb[168].mxu1 %vm1626_vm1, %v5828_v24  ;;  %v5984_v5 = vpop.permute.xlu0 %5983  ;;  %v4475_v45 = vpop.f32.mrb[122].mxu0 }
 0x7b2   : > { %13214 = vmatpush3.bf16.xpose.msra.mxu1 %v5940_v52  ;;  %13215 = vmatprep.mubr.msk.bf16.mxu1 %vm14472_vm0, %v18455_v14  ;;  %v13056_v13 = vpop.f32.mrb[123].mxu0 }
 0x7b3   : > { %13225 = vmatprep.subr.bf16.mxu1 %v18455_v14 }
 0x7b5   : > { %v6091_v60 = vpop.permute.xlu0 %6090 }
 0x7b6   : > { %v6096_v44 = vsel %vm1626_vm1, %v6091_v60, 0  ;;  %13222 = vmatmul.mubr.msk.bf16.vlgmr.msra.gmra.mrb[176].mxu0 %vm1626_vm1, %v5984_v5 }
 0x7b7   : > { %v16151_v38 = vpop.f32.mrb[124].mxu0  ;;  %13232 = vmatpush3.bf16.xpose.msra.mxu0 %v6096_v44  ;;  %13233 = vmatprep.mubr.msk.bf16.mxu0 %vm14472_vm0, %v18455_v14 }
 0x7b8   : > { %18505 = vst [vmem:[#allocation25_spill] sm:$0xff] %v16151_v38  ;;  %v13067_v24 = vpop.f32.mrb[125].mxu0  ;;  %13243 = vmatprep.subr.bf16.mxu0 %v18455_v14 }
 0x7b9   : > { %13216 = vmatmul.mubr.msk.bf16.vlgmr.msra.gmra.mrb[172].mxu1 %vm1626_vm1, %v5932_v10  ;;  %v6088_v29 = vpop.permute.xlu0 %6087  ;;  %v4573_v57 = vpop.f32.mrb[126].mxu0 }
 0x7ba   : > { %13226 = vmatpush3.bf16.xpose.msra.mxu1 %v6044_v9  ;;  %13227 = vmatprep.mubr.msk.bf16.mxu1 %vm14472_vm0, %v18455_v14  ;;  %v13068_v41 = vpop.f32.mrb[127].mxu0  ;;  %v6140_v10 = vpop.permute.xlu1 %6139 }
 0x7bb   : > { %13237 = vmatprep.subr.bf16.mxu1 %v18455_v14 }
 0x7bd   : > { %v6384_v52 = vpop.permute.xlu0 %6383 }
 0x7be   : > { %v6389_v5 = vsel %vm2559_vm2, %v6384_v52, 0  ;;  %13234 = vmatmul.mubr.msk.bf16.vlgmr.msra.gmra.mrb[180].mxu0 %vm1626_vm1, %v6088_v29  ;;  %v6433_v45 = vpop.permute.xlu1 %6432 }
 0x7bf   : > { %13244 = vmatpush3.bf16.msra.mxu0 %v6389_v5  ;;  %13245 = vmatprep.mubr.msk.bf16.mxu0 %vm14472_vm0, %v18455_v14  ;;  %v6438_v13 = vsel %vm2559_vm2, %v6433_v45, 0 }
 0x7c0   : > { %13255 = vmatprep.subr.bf16.mxu0 %v18455_v14 }
 0x7c1   : > { %13228 = vmatmul.mubr.msk.bf16.vlgmr.msra.gmra.mrb[176].mxu1 %vm1626_vm1, %v6036_v54 }
 0x7c2   : > { %13238 = vmatpush3.bf16.xpose.msra.mxu1 %v6148_v53  ;;  %13239 = vmatprep.mubr.msk.bf16.mxu1 %vm14472_vm0, %v18455_v14 }
 0x7c3   : > { %13249 = vmatprep.subr.bf16.mxu1 %v18455_v14 }
 0x7c9   : > { %13240 = vmatmul.mubr.msk.bf16.vlgmr.msra.gmra.mrb[180].mxu1 %vm1626_vm1, %v6140_v10 }
 0x7ca   : > { %13250 = vmatpush3.bf16.msra.mxu1 %v6438_v13  ;;  %13251 = vmatprep.mubr.msk.bf16.mxu1 %vm14472_vm0, %v18455_v14 }
 0x7cb   : > { %13261 = vmatprep.subr.bf16.mxu1 %v18455_v14 }
 0x7f7   : > { %v16176_v60 = vpop.f32.mrb[120].mxu1 }
 0x7f8   : > { %18506 = vst [vmem:[#allocation28_spill] sm:$0xff] %v16176_v60  ;;  %v13061_v44 = vpop.f32.mrb[121].mxu1 }
 0x7f9   : > { %v4524_v24 = vpop.f32.mrb[122].mxu1 }
 0x7fa   : > { %v13062_v9 = vpop.f32.mrb[123].mxu1 }
 0x7ff   : > { %v16180_v29 = vpop.f32.mrb[124].mxu1 }
 0x800   : > { %18507 = vst [vmem:[#allocation13_spill] sm:$0xff] %v16180_v29  ;;  %v13073_v57 = vpop.f32.mrb[125].mxu1 }
 0x801   : > { %v4622_v41 = vpop.f32.mrb[126].mxu1 }
 0x802   : > { %v13074_v52 = vpop.f32.mrb[127].mxu1 }
 0x803   : > { %v16184_v5 = vpop.f32.mrb[128].mxu0 }
 0x804   : > { %18508 = vst [vmem:[#allocation12_spill] sm:$0xff] %v16184_v5  ;;  %v13079_v10 = vpop.f32.mrb[129].mxu0 }
 0x805   : > { %v4671_v53 = vpop.f32.mrb[130].mxu0 }
 0x806   : > { %v13080_v45 = vpop.f32.mrb[131].mxu0 }
 0x807   : > { %v16186_v13 = vpop.f32.mrb[128].mxu1 }
 0x808   : > { %18509 = vst [vmem:[#allocation18_spill] sm:$0xff] %v16186_v13  ;;  %v13085_v24 = vpop.f32.mrb[129].mxu1 }
 0x809   : > { %v4720_v9 = vpop.f32.mrb[130].mxu1 }
 0x80a   : > { %v13086_v54 = vpop.f32.mrb[131].mxu1 }
 0x80b   : > { %v16190_v16 = vpop.f32.mrb[132].mxu0 }
 0x80c   : > { %18510 = vst [vmem:[#allocation14_spill] sm:$0xff] %v16190_v16  ;;  %v13091_v60 = vpop.f32.mrb[133].mxu0 }
 0x80d   : > { %v4769_v37 = vpop.f32.mrb[134].mxu0 }
 0x80e   : > { %v13092_v57 = vpop.f32.mrb[135].mxu0 }
 0x80f   : > { %v16192_v41 = vpop.f32.mrb[132].mxu1 }
 0x810   : > { %18511 = vst [vmem:[#allocation17_spill] sm:$0xff] %v16192_v41  ;;  %v13097_v10 = vpop.f32.mrb[133].mxu1 }
 0x811   : > { %v4818_v53 = vpop.f32.mrb[134].mxu1 }
 0x812   : > { %v13098_v45 = vpop.f32.mrb[135].mxu1 }
 0x813   : > { %v16196_v38 = vpop.f32.mrb[136].mxu0 }
 0x814   : > { %18512 = vst [vmem:[#allocation23_spill] sm:$0xff] %v16196_v38  ;;  %v13103_v29 = vpop.f32.mrb[137].mxu0 }
 0x815   : > { %v4867_v44 = vpop.f32.mrb[138].mxu0 }
 0x816   : > { %v13104_v24 = vpop.f32.mrb[139].mxu0 }
 0x818   : > { %v16198_v9 = vpop.f32.mrb[136].mxu1 }
 0x819   : > { %18513 = vst [vmem:[#allocation22_spill] sm:$0xff] %v16198_v9  ;;  %v13109_v54 = vpop.f32.mrb[137].mxu1 }
 0x81a   : > { %v4916_v37 = vpop.f32.mrb[138].mxu1 }
 0x81b   : > { %v13110_v57 = vpop.f32.mrb[139].mxu1  ;;  %v16202_v5 = vpop.f32.mrb[140].mxu0 }
 0x81c   : > { %18514 = vst [vmem:[#allocation40_spill] sm:$0xff] %v16202_v5  ;;  %v13115_v13 = vpop.f32.mrb[141].mxu0 }
 0x81d   : > { %v4965_v52 = vpop.f32.mrb[142].mxu0 }
 0x81e   : > { %v13116_v10 = vpop.f32.mrb[143].mxu0 }
 0x820   : > { %v16204_v53 = vpop.f32.mrb[140].mxu1 }
 0x821   : > { %18515 = vst [vmem:[#allocation41_spill] sm:$0xff] %v16204_v53  ;;  %v13121_v44 = vpop.f32.mrb[141].mxu1 }
 0x822   : > { %v5014_v45 = vpop.f32.mrb[142].mxu1 }
 0x823   : > { %v13122_v24 = vpop.f32.mrb[143].mxu1  ;;  %v16208_v16 = vpop.f32.mrb[144].mxu0 }
 0x824   : > { %18516 = vst [vmem:[#allocation42_spill] sm:$0xff] %v16208_v16  ;;  %v13127_v41 = vpop.f32.mrb[145].mxu0 }
 0x825   : > { %v5063_v60 = vpop.f32.mrb[146].mxu0  ;;  %v16219_v41 = vld [vmem:[%s18450_s19] sm:$0xff] }
 0x826   : > { %v13128_v54 = vpop.f32.mrb[147].mxu0 }
 0x828   : > { %v16210_v37 = vpop.f32.mrb[144].mxu1 }
 0x829   : > { %18517 = vst [vmem:[#allocation43_spill] sm:$0xff] %v16210_v37  ;;  %v13133_v52 = vpop.f32.mrb[145].mxu1 }
 0x82a   : > { %v5112_v57 = vpop.f32.mrb[146].mxu1 }
 0x82b   : > { %v13134_v10 = vpop.f32.mrb[147].mxu1 }
 0x850   : > { %v16214_v38 = vpop.f32.mrb[148].mxu0 }
 0x851   : > { %18518 = vst [vmem:[#allocation44_spill] sm:$0xff] %v16214_v38  ;;  %v13139_v9 = vpop.f32.mrb[149].mxu0 }
 0x852   : > { %v5161_v29 = vpop.f32.mrb[150].mxu0 }
 0x853   : > { %v13140_v44 = vpop.f32.mrb[151].mxu0 }
 0x859   : > { %v5404_v45 = vpop.f32.mrb[152].mxu0 }
 0x85a   : > { %v16222_v60 = vadd.f32 %v16219_v41, %v5404_v45  ;;  %v13151_v24 = vpop.f32.mrb[153].mxu0 }
 0x85b   : > { %v5407_v54 = vpop.f32.mrb[154].mxu0 }
 0x85c   : > { %v16224_v13 = vpop.f32.mrb[148].mxu1  ;;  %v13152_v52 = vpop.f32.mrb[155].mxu0  ;;  %v6190_v57 = vsel %vm2363_vm3, %v16222_v60, -inf }
 0x85d   : > { %18519 = vst [vmem:[#allocation45_spill] sm:$0xff] %v16224_v13  ;;  %v13145_v29 = vpop.f32.mrb[149].mxu1  ;;  %6191 = vmax.xlane.f32.xlu0 %v6190_v57 }
 0x85e   : > { %v5210_v10 = vpop.f32.mrb[150].mxu1 }
 0x85f   : > { %v13146_v44 = vpop.f32.mrb[151].mxu1 }
 0x861   : > { %v5508_v16 = vpop.f32.mrb[156].mxu0 }
 0x862   : > { %v16231_v37 = vadd.f32 %v16219_v41, %v5508_v16  ;;  %v13163_v45 = vpop.f32.mrb[157].mxu0 }
 0x863   : > { %v5511_v24 = vpop.f32.mrb[158].mxu0 }
 0x864   : > { %v5456_v54 = vpop.f32.mrb[152].mxu1  ;;  %v13164_v5 = vpop.f32.mrb[159].mxu0  ;;  %v6196_v52 = vsel %vm2363_vm3, %v16231_v37, -inf }
 0x865   : > { %v16236_v53 = vadd.f32 %v16219_v41, %v5456_v54  ;;  %v13157_v11 = vpop.f32.mrb[153].mxu1  ;;  %6197 = vmax.xlane.f32.xlu0 %v6196_v52 }
 0x866   : > { %v5459_v29 = vpop.f32.mrb[154].mxu1 }
 0x867   : > { %v13158_v57 = vpop.f32.mrb[155].mxu1  ;;  %v6193_v10 = vsel %vm2363_vm3, %v16236_v53, -inf }
 0x868   : > { %6194 = vmax.xlane.f32.xlu1 %v6193_v10 }
 0x869   : > { %v5612_v16 = vpop.f32.mrb[160].mxu0 }
 0x86a   : > { %v13175_v44 = vpop.f32.mrb[161].mxu0  ;;  %v16244_v54 = vadd.f32 %v16219_v41, %v5612_v16 }
 0x86b   : > { %v5615_v45 = vpop.f32.mrb[162].mxu0 }
 0x86c   : > { %v5560_v24 = vpop.f32.mrb[156].mxu1  ;;  %v13176_v9 = vpop.f32.mrb[163].mxu0 }
 0x86d   : > { %v16241_v5 = vadd.f32 %v16219_v41, %v5560_v24  ;;  %v13169_v38 = vpop.f32.mrb[157].mxu1  ;;  %v6202_v9 = vsel %vm2363_vm3, %v16244_v54, -inf }
 0x86e   : > { %v5563_v13 = vpop.f32.mrb[158].mxu1 }
 0x86f   : > { %v13170_v11 = vpop.f32.mrb[159].mxu1  ;;  %v6199_v52 = vsel %vm2363_vm3, %v16241_v5, -inf }
 0x870   : > { %6200 = vmax.xlane.f32.xlu0 %v6199_v52 }
 0x871   : > { %v5716_v29 = vpop.f32.mrb[164].mxu0 }
 0x872   : > { %v13187_v57 = vpop.f32.mrb[165].mxu0  ;;  %v16249_v10 = vadd.f32 %v16219_v41, %v5716_v29 }
 0x873   : > { %v5719_v44 = vpop.f32.mrb[166].mxu0 }
 0x874   : > { %v5664_v45 = vpop.f32.mrb[160].mxu1  ;;  %6203 = vmax.xlane.f32.xlu0 %v6202_v9  ;;  %v13188_v38 = vpop.f32.mrb[167].mxu0  ;;  %v6208_v29 = vsel %vm2363_vm3, %v16249_v10, -inf }
 0x875   : > { %v16254_v13 = vadd.f32 %v16219_v41, %v5664_v45  ;;  %v13181_v16 = vpop.f32.mrb[161].mxu1 }
 0x876   : > { %v5667_v24 = vpop.f32.mrb[162].mxu1 }
 0x877   : > { %v13182_v11 = vpop.f32.mrb[163].mxu1  ;;  %v6205_v52 = vsel %vm2363_vm3, %v16254_v13, -inf }
 0x878   : > { %6206 = vmax.xlane.f32.xlu1 %v6205_v52  ;;  %6209 = vmax.xlane.f32.xlu0 %v6208_v29 }
 0x879   : > { %v5820_v57 = vpop.f32.mrb[168].mxu0 }
 0x87a   : > { %v16261_v44 = vadd.f32 %v16219_v41, %v5820_v57  ;;  %v13199_v9 = vpop.f32.mrb[169].mxu0 }
 0x87b   : > { %v5823_v38 = vpop.f32.mrb[170].mxu0 }
 0x87c   : > { %v5768_v32 = vpop.f32.mrb[164].mxu1  ;;  %v13200_v45 = vpop.f32.mrb[171].mxu0  ;;  %v6214_v16 = vsel %vm2363_vm3, %v16261_v44, -inf }
 0x87d   : > { %v16266_v24 = vadd.f32 %v16219_v41, %v5768_v32  ;;  %v13193_v11 = vpop.f32.mrb[165].mxu1  ;;  %6215 = vmax.xlane.f32.xlu0 %v6214_v16 }
 0x87e   : > { %v5771_v17 = vpop.f32.mrb[166].mxu1 }
 0x87f   : > { %v13194_v34 = vpop.f32.mrb[167].mxu1  ;;  %v6211_v52 = vsel %vm2363_vm3, %v16266_v24, -inf }
 0x880   : > { %6212 = vmax.xlane.f32.xlu1 %v6211_v52 }
 0x881   : > { %v5924_v29 = vpop.f32.mrb[172].mxu0 }
 0x882   : > { %v16271_v57 = vadd.f32 %v16219_v41, %v5924_v29  ;;  %v13211_v9 = vpop.f32.mrb[173].mxu0 }
 0x883   : > { %v5927_v38 = vpop.f32.mrb[174].mxu0 }
 0x884   : > { %v5872_v45 = vpop.f32.mrb[168].mxu1  ;;  %v13212_v51 = vpop.f32.mrb[175].mxu0  ;;  %v6220_v32 = vsel %vm2363_vm3, %v16271_v57, -inf }
 0x885   : > { %v16276_v11 = vadd.f32 %v16219_v41, %v5872_v45  ;;  %v13205_v17 = vpop.f32.mrb[169].mxu1  ;;  %6221 = vmax.xlane.f32.xlu0 %v6220_v32 }
 0x886   : > { %v5875_v34 = vpop.f32.mrb[170].mxu1 }
 0x887   : > { %v13206_v16 = vpop.f32.mrb[171].mxu1  ;;  %v6217_v52 = vsel %vm2363_vm3, %v16276_v11, -inf }
 0x888   : > { %6218 = vmax.xlane.f32.xlu1 %v6217_v52 }
 0x889   : > { %v6028_v29 = vpop.f32.mrb[176].mxu0 }
 0x88a   : > { %v16281_v9 = vadd.f32 %v16219_v41, %v6028_v29  ;;  %v13223_v38 = vpop.f32.mrb[177].mxu0 }
 0x88b   : > { %v6031_v51 = vpop.f32.mrb[178].mxu0 }
 0x88c   : > { %v5976_v19 = vpop.f32.mrb[172].mxu1  ;;  %v13224_v55 = vpop.f32.mrb[179].mxu0  ;;  %v6226_v45 = vsel %vm2363_vm3, %v16281_v9, -inf }
 0x88d   : > { %v16286_v17 = vadd.f32 %v16219_v41, %v5976_v19  ;;  %v13217_v32 = vpop.f32.mrb[173].mxu1  ;;  %6227 = vmax.xlane.f32.xlu0 %v6226_v45 }
 0x88e   : > { %v5979_v34 = vpop.f32.mrb[174].mxu1 }
 0x88f   : > { %v13218_v16 = vpop.f32.mrb[175].mxu1  ;;  %v6223_v52 = vsel %vm2363_vm3, %v16286_v17, -inf }
 0x890   : > { %6224 = vmax.xlane.f32.xlu1 %v6223_v52 }
 0x891   : > { %v6132_v29 = vpop.f32.mrb[180].mxu0 }
 0x892   : > { %v16291_v38 = vadd.f32 %v16219_v41, %v6132_v29  ;;  %v13235_v51 = vpop.f32.mrb[181].mxu0 }
 0x893   : > { %v6135_v55 = vpop.f32.mrb[182].mxu0 }
 0x894   : > { %v6080_v31 = vpop.f32.mrb[176].mxu1  ;;  %v13236_v42 = vpop.f32.mrb[183].mxu0  ;;  %v6232_v19 = vsel %vm2363_vm3, %v16291_v38, -inf }
 0x895   : > { %v16296_v32 = vadd.f32 %v16219_v41, %v6080_v31  ;;  %v13229_v45 = vpop.f32.mrb[177].mxu1  ;;  %6233 = vmax.xlane.f32.xlu0 %v6232_v19  ;;  %v18520_v42 = vld [vmem:[#allocation15_spill] sm:$0xff] }
 0x896   : > { %v6083_v34 = vpop.f32.mrb[178].mxu1  ;;  %v16309_v45 = vpop.permute.xlu1 %6530 }
 0x897   : > { %v13230_v16 = vpop.f32.mrb[179].mxu1  ;;  %v6229_v52 = vsel %vm2363_vm3, %v16296_v32, -inf  ;;  %v16311_v34 = vpop.permute.xlu0 %6481 }
 0x898   : > { %6230 = vmax.xlane.f32.xlu1 %v6229_v52 }
 0x89b   : > { %v16315_v16 = vpop.permute.xlu0 %6579 }
 0x89c   : > { %v6184_v29 = vpop.f32.mrb[180].mxu1 }
 0x89d   : > { %v13241_v15 = vpop.f32.mrb[181].mxu1  ;;  %v16305_v31 = vadd.f32 %v16219_v41, %v6184_v29 }
 0x89e   : > { %v6187_v51 = vpop.f32.mrb[182].mxu1  ;;  %v16313_v15 = vpop.permute.xlu1 %6628 }
 0x89f   : > { %v13242_v55 = vpop.f32.mrb[183].mxu1  ;;  %v6235_v19 = vsel %vm2363_vm3, %v16305_v31, -inf  ;;  %v16319_v51 = vpop.permute.xlu0 %6677 }
 0x8a0   : > { %18523 = vst [vmem:[#allocation47_spill] sm:$0xff] %v16319_v51 }
 0x8a2   : > { %v16317_v52 = vpop.permute.xlu1 %6726 }
 0x8a3   : > { %18522 = vst [vmem:[#allocation46_spill] sm:$0xff] %v16317_v52  ;;  %v16323_v41 = vpop.permute.xlu0 %6775 }
 0x8a6   : > { %v16321_v55 = vpop.permute.xlu1 %6824 }
 0x8a7   : > { %18524 = vst [vmem:[#allocation48_spill] sm:$0xff] %v16321_v55 }
 0x8a9   : > { %7020 = vrot.lane.b32.xlu1 %v18520_v42, %s14474_s16 }
 0x8ab   : > { %6971 = vrot.lane.b32.xlu0 %v18521_v4, %s14474_s16  ;;  %v16325_v4 = vpop.permute.xlu1 %6873 }
 0x8ac   : > { %18525 = vst [vmem:[#allocation49_spill] sm:$0xff] %v16325_v4 }
 0x8af   : > { %v16328_v59 = vpop.permute.xlu1 %6922 }
 0x8cd   : > { %6236 = vmax.xlane.f32.xlu1 %v6235_v19 }
 0x8ea   : > { %v6192_v29 = vpop.xlane.xlu0 %6191 }
 0x8eb   : > { %v6238_v19 = vsub.f32 %v16222_v60, %v6192_v29 }
 0x8ed   : > { %v6254_v42 = vmul.f32 1.442695, %v6238_v19 }
 0x8ef   : > { %13955 = vpow2.f32 %v6254_v42 }
 0x8f2   : > { %v6198_v58 = vpop.xlane.xlu0 %6197 }
 0x8f3   : > { %v6240_v50 = vsub.f32 %v16231_v37, %v6198_v58 }
 0x8f5   : > { %v6258_v49 = vmul.f32 1.442695, %v6240_v50  ;;  %v6195_v52 = vpop.xlane.xlu1 %6194 }
 0x8f6   : > { %v6239_v21 = vsub.f32 %v16236_v53, %v6195_v52 }
 0x8f7   : > { %13957 = vpow2.f32 %v6258_v49 }
 0x8f8   : > { %v6256_v55 = vmul.f32 1.442695, %v6239_v21 }
 0x8f9   : > { %v16332_v51 = vpop.eup %13955 }
 0x8fa   : > { %13959 = vpow2.f32 %v6256_v55  ;;  %v6286_v4 = vsel %vm2363_vm3, %v16332_v51, 0.0 }
 0x8fb   : > { %6287 = vadd.xlane.f32.xlu0 %v6286_v4 }
 0x8fd   : > { %v6201_v60 = vpop.xlane.xlu0 %6200 }
 0x8fe   : > { %v6241_v42 = vsub.f32 %v16241_v5, %v6201_v60 }
 0x900   : > { %v6260_v29 = vmul.f32 1.442695, %v6241_v42 }
 0x901   : > { %v16337_v19 = vpop.eup %13957  ;;  %v6204_v58 = vpop.xlane.xlu0 %6203 }
 0x902   : > { %13961 = vpow2.f32 %v6260_v29  ;;  %v6242_v50 = vsub.f32 %v16244_v54, %v6204_v58  ;;  %v6292_v49 = vsel %vm2363_vm3, %v16337_v19, 0.0 }
 0x903   : > { %6293 = vadd.xlane.f32.xlu0 %v6292_v49 }
 0x904   : > { %v16342_v21 = vpop.eup %13959  ;;  %v6262_v53 = vmul.f32 1.442695, %v6242_v50 }
 0x905   : > { %v6207_v37 = vpop.xlane.xlu1 %6206  ;;  %v6210_v52 = vpop.xlane.xlu0 %6209  ;;  %v6289_v4 = vsel %vm2363_vm3, %v16342_v21, 0.0 }
 0x906   : > { %13963 = vpow2.f32 %v6262_v53  ;;  %v6243_v5 = vsub.f32 %v16254_v13, %v6207_v37  ;;  %v6244_v55 = vsub.f32 %v16249_v10, %v6210_v52  ;;  %6290 = vadd.xlane.f32.xlu1 %v6289_v4 }
 0x908   : > { %v6264_v60 = vmul.f32 1.442695, %v6243_v5  ;;  %v6266_v54 = vmul.f32 1.442695, %v6244_v55 }
 0x90a   : > { %13965 = vpow2.f32 %v6264_v60  ;;  %v6216_v42 = vpop.xlane.xlu0 %6215 }
 0x90b   : > { %13967 = vpow2.f32 %v6266_v54  ;;  %v6246_v58 = vsub.f32 %v16261_v44, %v6216_v42 }
 0x90c   : > { %v16348_v29 = vpop.eup %13961 }
 0x90d   : > { %v6213_v50 = vpop.xlane.xlu1 %6212  ;;  %v6295_v49 = vsel %vm2363_vm3, %v16348_v29, 0.0  ;;  %v6270_v10 = vmul.f32 1.442695, %v6246_v58 }
 0x90e   : > { %v6245_v53 = vsub.f32 %v16266_v24, %v6213_v50  ;;  %6296 = vadd.xlane.f32.xlu1 %v6295_v49 }
 0x910   : > { %v16354_v13 = vpop.eup %13963  ;;  %v6268_v37 = vmul.f32 1.442695, %v6245_v53 }
 0x911   : > { %v6298_v52 = vsel %vm2363_vm3, %v16354_v13, 0.0 }
 0x912   : > { %13969 = vpow2.f32 %v6268_v37  ;;  %v6222_v4 = vpop.xlane.xlu0 %6221  ;;  %6299 = vadd.xlane.f32.xlu0 %v6298_v52 }
 0x913   : > { %v6248_v5 = vsub.f32 %v16271_v57, %v6222_v4  ;;  %13971 = vpow2.f32 %v6270_v10 }
 0x914   : > { %v16359_v44 = vpop.eup %13965 }
 0x915   : > { %v16361_v55 = vpop.eup %13967  ;;  %v6274_v60 = vmul.f32 1.442695, %v6248_v5  ;;  %v6219_v24 = vpop.xlane.xlu1 %6218  ;;  %v6301_v54 = vsel %vm2363_vm3, %v16359_v44, 0.0 }
 0x916   : > { %v6247_v42 = vsub.f32 %v16276_v11, %v6219_v24  ;;  %6302 = vadd.xlane.f32.xlu1 %v6301_v54  ;;  %v6304_v58 = vsel %vm2363_vm3, %v16361_v55, 0.0 }
 0x917   : > { %6305 = vadd.xlane.f32.xlu0 %v6304_v58  ;;  %13973 = vpow2.f32 %v6274_v60 }
 0x918   : > { %v6272_v50 = vmul.f32 1.442695, %v6247_v42 }
 0x91a   : > { %13975 = vpow2.f32 %v6272_v50  ;;  %v6228_v57 = vpop.xlane.xlu0 %6227 }
 0x91b   : > { %v6250_v49 = vsub.f32 %v16281_v9, %v6228_v57 }
 0x91c   : > { %v16369_v53 = vpop.eup %13969 }
 0x91d   : > { %v6278_v10 = vmul.f32 1.442695, %v6250_v49  ;;  %v6225_v37 = vpop.xlane.xlu1 %6224  ;;  %v6307_v52 = vsel %vm2363_vm3, %v16369_v53, 0.0  ;;  %v16373_v4 = vpop.eup %13971 }
 0x91e   : > { %v6249_v11 = vsub.f32 %v16286_v17, %v6225_v37  ;;  %6308 = vadd.xlane.f32.xlu1 %v6307_v52  ;;  %v6310_v60 = vsel %vm2363_vm3, %v16373_v4, 0.0 }
 0x91f   : > { %13977 = vpow2.f32 %v6278_v10 }
 0x920   : > { %v6276_v5 = vmul.f32 1.442695, %v6249_v11 }
 0x921   : > { %v16378_v24 = vpop.eup %13973 }
 0x922   : > { %13979 = vpow2.f32 %v6276_v5  ;;  %6311 = vadd.xlane.f32.xlu1 %v6310_v60  ;;  %v6316_v42 = vsel %vm2363_vm3, %v16378_v24, 0.0  ;;  %v6234_v11 = vpop.xlane.xlu0 %6233 }
 0x923   : > { %v6252_v5 = vsub.f32 %v16291_v38, %v6234_v11 }
 0x924   : > { %v16380_v9 = vpop.eup %13975 }
 0x925   : > { %v6231_v54 = vpop.xlane.xlu1 %6230  ;;  %v6313_v58 = vsel %vm2363_vm3, %v16380_v9, 0.0  ;;  %v6282_v60 = vmul.f32 1.442695, %v6252_v5 }
 0x926   : > { %v6251_v17 = vsub.f32 %v16296_v32, %v6231_v54  ;;  %6317 = vadd.xlane.f32.xlu1 %v6316_v42  ;;  %6314 = vadd.xlane.f32.xlu0 %v6313_v58 }
 0x928   : > { %v6280_v50 = vmul.f32 1.442695, %v6251_v17 }
 0x929   : > { %v16387_v57 = vpop.eup %13977  ;;  %v16404_v54 = vpop.permute.xlu1 %7020 }
 0x92a   : > { %13981 = vpow2.f32 %v6280_v50  ;;  %v6322_v49 = vsel %vm2363_vm3, %v16387_v57, 0.0 }
 0x92b   : > { %6323 = vadd.xlane.f32.xlu1 %v6322_v49  ;;  %13983 = vpow2.f32 %v6282_v60  ;;  %v18530_v60 = vld [vmem:[#allocation19_spill] sm:$0xff] }
 0x92c   : > { %v16391_v10 = vpop.eup %13979 }
 0x92d   : > { %v6319_v37 = vsel %vm2363_vm3, %v16391_v10, 0.0 }
 0x92e   : > { %6320 = vadd.xlane.f32.xlu0 %v6319_v37 }
 0x934   : > { %v16395_v52 = vpop.eup %13981 }
 0x935   : > { %v6325_v32 = vsel %vm2363_vm3, %v16395_v52, 0.0  ;;  %v16407_v17 = vpop.eup %13983 }
 0x936   : > { %6326 = vadd.xlane.f32.xlu0 %v6325_v32  ;;  %v6328_v49 = vsel %vm2363_vm3, %v16407_v17, 0.0  ;;  %v18529_v32 = vld [vmem:[#allocation46_spill] sm:$0xff] }
 0x937   : > { %v6732_v11 = vsel %vm2559_vm2, %v18529_v32, 0 }
 0x93c   : > { %7118 = vrot.lane.b32.xlu1 %v15598_v62, %s14474_s16 }
 0x94c   : > { %7069 = vrot.lane.b32.xlu0 %v15537_v3, %s14474_s16 }
 0x95a   : > { %v6237_v42 = vpop.xlane.xlu1 %6236 }
 0x95b   : > { %v6253_v58 = vsub.f32 %v16305_v31, %v6237_v42  ;;  %v16427_v31 = vpop.permute.xlu0 %6971 }
 0x95d   : > { %v6284_v50 = vmul.f32 1.442695, %v6253_v58  ;;  %v18531_v58 = vld [vmem:[#allocation33_spill] sm:$0xff] }
 0x95f   : > { %13985 = vpow2.f32 %v6284_v50  ;;  %v6781_v50 = vsel %vm2559_vm2, %v16323_v41, 0  ;;  %v18534_v41 = vld [vmem:[#allocation48_spill] sm:$0xff] }
 0x960   : > { %6329 = vadd.xlane.f32.xlu1 %v6328_v49 }
 0x969   : > { %v16411_v37 = vpop.eup %13985 }
 0x96a   : > { %v6331_v38 = vsel %vm2363_vm3, %v16411_v37, 0.0 }
 0x96b   : > { %6332 = vadd.xlane.f32.xlu0 %v6331_v38 }
 0x971   : > { %7367 = vrot.lane.b32.xlu1 %v14930_v40, %s14475_s6 }
 0x975   : > { %7364 = vrot.lane.b32.xlu1 %v14962_v20, %s14475_s6 }
 0x979   : > { %7471 = vrot.lane.b32.xlu1 %v14991_v23, %s14475_s6 }
 0x97d   : > { %7468 = vrot.lane.b32.xlu1 %v15035_v22, %s14475_s6 }
 0x981   : > { %7315 = vrot.lane.b32.xlu0 %v14911_v26, %s14475_s6  ;;  %7575 = vrot.lane.b32.xlu1 %v15032_v2, %s14475_s6 }
 0x985   : > { %7312 = vrot.lane.b32.xlu0 %v14934_v8, %s14475_s6  ;;  %7572 = vrot.lane.b32.xlu1 %v15062_v39, %s14475_s6 }
 0x988   : > { %v6288_v40 = vpop.xlane.xlu0 %6287 }
 0x989   : > { %13987 = vrcp.f32 %v6288_v40  ;;  %7419 = vrot.lane.b32.xlu0 %v14957_v63, %s14475_s6  ;;  %7679 = vrot.lane.b32.xlu1 %v15059_v56, %s14475_s6  ;;  %v18532_v40 = vld [vmem:[#allocation20_spill] sm:$0xff] }
 0x98d   : > { %7416 = vrot.lane.b32.xlu0 %v14996_v35, %s14475_s6  ;;  %7676 = vrot.lane.b32.xlu1 %v15090_v33, %s14475_s6  ;;  %v6487_v35 = vsel %vm2559_vm2, %v16311_v34, 0  ;;  %v6585_v33 = vsel %vm2559_vm2, %v16315_v16, 0  ;;  %v6634_v34 = vsel %vm2559_vm2, %v16313_v15, 0  ;;  %v18526_v15 = vld [vmem:[#allocation47_spill] sm:$0xff] }
 0x990   : > { %v6294_v26 = vpop.xlane.xlu0 %6293 }
 0x991   : > { %13989 = vrcp.f32 %v6294_v26  ;;  %7523 = vrot.lane.b32.xlu0 %v14964_v27, %s14475_s6  ;;  %7783 = vrot.lane.b32.xlu1 %v18463_v48, %s14475_s6 }
 0x993   : > { %v13988_v8 = vpop.eup %13987  ;;  %v6291_v20 = vpop.xlane.xlu1 %6290 }
 0x994   : > { %13991 = vrcp.f32 %v6291_v20  ;;  %v6350_v63 = vmul.f32 %v13988_v8, %v16332_v51  ;;  %v6683_v51 = vsel %vm2559_vm2, %v18526_v15, 0  ;;  %v18533_v20 = vld [vmem:[#allocation34_spill] sm:$0xff] }
 0x995   : > { %7520 = vrot.lane.b32.xlu0 %v14998_v36, %s14475_s6  ;;  %7780 = vrot.lane.b32.xlu1 %v18467_v1, %s14475_s6 }
 0x996   : > { %v6366_v23 = vpack.c.bf16 %v6350_v63, %v6350_v63  ;;  %v6830_v63 = vsel %vm2559_vm2, %v18534_v41, 0 }
 0x998   : > { %13246 = vmatmul.mubr.msk.bf16.vlgmr.msra.gmra.mrb[184].mxu0 %vm2363_vm3, %v6366_v23 }
 0x999   : > { %13256 = vmatpush3.bf16.msra.mxu0 %v6487_v35  ;;  %7627 = vrot.lane.b32.xlu0 %v15000_v0, %s14475_s6  ;;  %v18535_v35 = vld [vmem:[#allocation24_spill] sm:$0xff] }
 0x99a   : > { %7887 = vrot.lane.b32.xlu1 %v18468_v18, %s14475_s6  ;;  %13257 = vmatprep.mubr.msk.bf16.mxu0 %vm14472_vm0, %v18455_v14 }
 0x99b   : > { %v13990_v27 = vpop.eup %13989  ;;  %v6297_v36 = vpop.xlane.xlu1 %6296  ;;  %13267 = vmatprep.subr.bf16.mxu0 %v18455_v14 }
 0x99c   : > { %13993 = vrcp.f32 %v6297_v36  ;;  %v6352_v2 = vmul.f32 %v13990_v27, %v16337_v19 }
 0x99d   : > { %7624 = vrot.lane.b32.xlu0 %v15037_v6, %s14475_s6  ;;  %v6536_v6 = vsel %vm2559_vm2, %v16309_v45, 0 }
 0x99e   : > { %v13992_v22 = vpop.eup %13991  ;;  %7884 = vrot.lane.b32.xlu1 %v18469_v30, %s14475_s6  ;;  %v6368_v0 = vpack.c.bf16 %v6352_v2, %v6352_v2  ;;  %v18536_v2 = vld [vmem:[#allocation35_spill] sm:$0xff] }
 0x99f   : > { %v6300_v56 = vpop.xlane.xlu0 %6299  ;;  %v6351_v39 = vmul.f32 %v13992_v22, %v16342_v21 }
 0x9a0   : > { %13995 = vrcp.f32 %v6300_v56  ;;  %13258 = vmatmul.mubr.msk.bf16.vlgmr.msra.gmra.mrb[188].mxu0 %vm2363_vm3, %v6368_v0  ;;  %v18537_v0 = vld [vmem:[#allocation49_spill] sm:$0xff] }
 0x9a1   : > { %13268 = vmatpush3.bf16.msra.mxu0 %v6585_v33  ;;  %7731 = vrot.lane.b32.xlu0 %v15039_v7, %s14475_s6  ;;  %v6367_v48 = vpack.c.bf16 %v6351_v39, %v6351_v39  ;;  %v6879_v56 = vsel %vm2559_vm2, %v18537_v0, 0  ;;  %v18538_v39 = vld [vmem:[#allocation21_spill] sm:$0xff] }
 0x9a2   : > { %7991 = vrot.lane.b32.xlu1 %v18470_v25, %s14475_s6  ;;  %13269 = vmatprep.mubr.msk.bf16.mxu0 %vm14472_vm0, %v18455_v14 }
 0x9a3   : > { %13252 = vmatmul.mubr.msk.bf16.vlgmr.msra.gmra.mrb[184].mxu1 %vm2363_vm3, %v6367_v48  ;;  %v6303_v1 = vpop.xlane.xlu1 %6302  ;;  %13279 = vmatprep.subr.bf16.mxu0 %v18455_v14 }
 0x9a4   : > { %13262 = vmatpush3.bf16.msra.mxu1 %v6536_v6  ;;  %13997 = vrcp.f32 %v6303_v1  ;;  %v6306_v18 = vpop.xlane.xlu0 %6305  ;;  %13263 = vmatprep.mubr.msk.bf16.mxu1 %vm14472_vm0, %v18455_v14  ;;  %v6928_v1 = vsel %vm2559_vm2, %v16328_v59, 0 }
 0x9a5   : > { %13999 = vrcp.f32 %v6306_v18  ;;  %7728 = vrot.lane.b32.xlu0 %v15064_v28, %s14475_s6  ;;  %13273 = vmatprep.subr.bf16.mxu1 %v18455_v14 }
 0x9a6   : > { %v13994_v7 = vpop.eup %13993  ;;  %7988 = vrot.lane.b32.xlu1 %v18471_v61, %s14475_s6 }
 0x9a7   : > { %v6353_v30 = vmul.f32 %v13994_v7, %v16348_v29 }
 0x9a9   : > { %7835 = vrot.lane.b32.xlu0 %v15066_v46, %s14475_s6  ;;  %v6369_v25 = vpack.c.bf16 %v6353_v30, %v6353_v30 }
 0x9aa   : > { %v13996_v45 = vpop.eup %13995  ;;  %8095 = vrot.lane.b32.xlu1 %v18472_v47, %s14475_s6 }
 0x9ab   : > { %13264 = vmatmul.mubr.msk.bf16.vlgmr.msra.gmra.mrb[188].mxu1 %vm2363_vm3, %v6369_v25  ;;  %v6309_v28 = vpop.xlane.xlu1 %6308  ;;  %v6354_v16 = vmul.f32 %v13996_v45, %v16354_v13  ;;  %v18528_v13 = vld [vmem:[#allocation27_spill] sm:$0xff]  ;;  %v18540_v25 = vld [vmem:[#allocation30_spill] sm:$0xff] }
 0x9ac   : > { %13274 = vmatpush3.bf16.msra.mxu1 %v6634_v34  ;;  %14001 = vrcp.f32 %v6309_v28  ;;  %13275 = vmatprep.mubr.msk.bf16.mxu1 %vm14472_vm0, %v18455_v14  ;;  %v7026_v28 = vsel %vm2559_vm2, %v16404_v54, 0 }
 0x9ad   : > { %7832 = vrot.lane.b32.xlu0 %v15092_v12, %s14475_s6  ;;  %v6370_v46 = vpack.c.bf16 %v6354_v16, %v6354_v16  ;;  %13285 = vmatprep.subr.bf16.mxu1 %v18455_v14  ;;  %v18527_v12 = vld [vmem:[#allocation16_spill] sm:$0xff] }
 0x9ae   : > { %v13998_v61 = vpop.eup %13997  ;;  %8092 = vrot.lane.b32.xlu1 %v18473_v43, %s14475_s6 }
 0x9af   : > { %v14000_v47 = vpop.eup %13999  ;;  %v6312_v19 = vpop.xlane.xlu1 %6311  ;;  %13270 = vmatmul.mubr.msk.bf16.vlgmr.msra.gmra.mrb[192].mxu0 %vm2363_vm3, %v6370_v46  ;;  %v6355_v21 = vmul.f32 %v13998_v61, %v16359_v44 }
 0x9b0   : > { %14003 = vrcp.f32 %v6312_v19  ;;  %13280 = vmatpush3.bf16.msra.mxu0 %v6683_v51  ;;  %13281 = vmatprep.mubr.msk.bf16.mxu0 %vm14472_vm0, %v18455_v14  ;;  %v6356_v43 = vmul.f32 %v14000_v47, %v16361_v55 }
 0x9b1   : > { %7939 = vrot.lane.b32.xlu0 %v18527_v12, %s14475_s6  ;;  %v6371_v29 = vpack.c.bf16 %v6355_v21, %v6355_v21  ;;  %13291 = vmatprep.subr.bf16.mxu0 %v18455_v14 }
 0x9b2   : > { %8385 = vrot.lane.b32.xlu1 %v18528_v13, %s14475_s6  ;;  %v6372_v55 = vpack.c.bf16 %v6356_v43, %v6356_v43 }
 0x9b3   : > { %13276 = vmatmul.mubr.msk.bf16.vlgmr.msra.gmra.mrb[192].mxu1 %vm2363_vm3, %v6371_v29  ;;  %v6318_v44 = vpop.xlane.xlu1 %6317  ;;  %v6315_v5 = vpop.xlane.xlu0 %6314 }
 0x9b4   : > { %13286 = vmatpush3.bf16.msra.mxu1 %v6732_v11  ;;  %14005 = vrcp.f32 %v6318_v44  ;;  %13287 = vmatprep.mubr.msk.bf16.mxu1 %vm14472_vm0, %v18455_v14 }
 0x9b5   : > { %14007 = vrcp.f32 %v6315_v5  ;;  %7936 = vrot.lane.b32.xlu0 %v18530_v60, %s14475_s6  ;;  %13297 = vmatprep.subr.bf16.mxu1 %v18455_v14 }
 0x9b6   : > { %v14002_v42 = vpop.eup %14001  ;;  %8483 = vrot.lane.b32.xlu1 %v18531_v58, %s14475_s6 }
 0x9b7   : > { %13282 = vmatmul.mubr.msk.bf16.vlgmr.msra.gmra.mrb[196].mxu0 %vm2363_vm3, %v6372_v55  ;;  %v6357_v49 = vmul.f32 %v14002_v42, %v16369_v53 }
 0x9b8   : > { %13292 = vmatpush3.bf16.msra.mxu0 %v6781_v50  ;;  %v6324_v38 = vpop.xlane.xlu1 %6323  ;;  %13293 = vmatprep.mubr.msk.bf16.mxu0 %vm14472_vm0, %v18455_v14 }
 0x9b9   : > { %8043 = vrot.lane.b32.xlu0 %v18532_v40, %s14475_s6  ;;  %v6373_v26 = vpack.c.bf16 %v6357_v49, %v6357_v49  ;;  %13303 = vmatprep.subr.bf16.mxu0 %v18455_v14  ;;  %14009 = vrcp.f32 %v6324_v38 }
 0x9ba   : > { %v14004_v8 = vpop.eup %14003  ;;  %8581 = vrot.lane.b32.xlu1 %v18533_v20, %s14475_s6 }
 0x9bb   : > { %13288 = vmatmul.mubr.msk.bf16.vlgmr.msra.gmra.mrb[196].mxu1 %vm2363_vm3, %v6373_v26  ;;  %v6321_v53 = vpop.xlane.xlu0 %6320  ;;  %v6358_v23 = vmul.f32 %v14004_v8, %v16373_v4 }
 0x9bc   : > { %13298 = vmatpush3.bf16.msra.mxu1 %v6830_v63  ;;  %14011 = vrcp.f32 %v6321_v53  ;;  %13299 = vmatprep.mubr.msk.bf16.mxu1 %vm14472_vm0, %v18455_v14  ;;  %v7119_v54 = vpop.permute.xlu1 %7118 }
 0x9bd   : > { %8040 = vrot.lane.b32.xlu0 %v18535_v35, %s14475_s6  ;;  %v6374_v27 = vpack.c.bf16 %v6358_v23, %v6358_v23  ;;  %13309 = vmatprep.subr.bf16.mxu1 %v18455_v14  ;;  %v7124_v15 = vsel %vm2559_vm2, %v7119_v54, 0 }
 0x9be   : > { %v14006_v36 = vpop.eup %14005  ;;  %8679 = vrot.lane.b32.xlu1 %v18536_v2, %s14475_s6 }
 0x9bf   : > { %v14008_v22 = vpop.eup %14007  ;;  %13294 = vmatmul.mubr.msk.bf16.vlgmr.msra.gmra.mrb[200].mxu0 %vm2363_vm3, %v6374_v27  ;;  %v6360_v33 = vmul.f32 %v14006_v36, %v16378_v24  ;;  %v6977_v24 = vsel %vm2559_vm2, %v16427_v31, 0 }
 0x9c0   : > { %13304 = vmatpush3.bf16.msra.mxu0 %v6879_v56  ;;  %v6359_v4 = vmul.f32 %v14008_v22, %v16380_v9  ;;  %13305 = vmatprep.mubr.msk.bf16.mxu0 %vm14472_vm0, %v18455_v14  ;;  %v18539_v9 = vld [vmem:[#allocation29_spill] sm:$0xff] }
 0x9c1   : > { %8336 = vrot.lane.b32.xlu0 %v18538_v39, %s14475_s6  ;;  %13315 = vmatprep.subr.bf16.mxu0 %v18455_v14  ;;  %v6376_v7 = vpack.c.bf16 %v6360_v33, %v6360_v33 }
 0x9c2   : > { %v6375_v48 = vpack.c.bf16 %v6359_v4, %v6359_v4 }
 0x9c3   : > { %v6327_v6 = vpop.xlane.xlu0 %6326  ;;  %v14010_v18 = vpop.eup %14009 }
 0x9c4   : > { %13300 = vmatmul.mubr.msk.bf16.vlgmr.msra.gmra.mrb[200].mxu1 %vm2363_vm3, %v6375_v48  ;;  %14013 = vrcp.f32 %v6327_v6  ;;  %v6362_v34 = vmul.f32 %v14010_v18, %v16387_v57 }
 0x9c5   : > { %13310 = vmatpush3.bf16.msra.mxu1 %v6928_v1  ;;  %8434 = vrot.lane.b32.xlu0 %v18539_v9, %s14475_s6 }
 0x9c6   : > { %v14012_v30 = vpop.eup %14011  ;;  %13311 = vmatprep.mubr.msk.bf16.mxu1 %vm14472_vm0, %v18455_v14  ;;  %13321 = vmatprep.subr.bf16.mxu1 %v18455_v14  ;;  %v6378_v16 = vpack.c.bf16 %v6362_v34, %v6362_v34 }
 0x9c7   : > { %13306 = vmatmul.mubr.msk.bf16.vlgmr.msra.gmra.mrb[204].mxu0 %vm2363_vm3, %v6376_v7  ;;  %v6361_v59 = vmul.f32 %v14012_v30, %v16391_v10  ;;  %v7070_v31 = vpop.permute.xlu0 %7069  ;;  %v18541_v10 = vld [vmem:[#allocation31_spill] sm:$0xff] }
 0x9c8   : > { %13316 = vmatpush3.bf16.msra.mxu0 %v6977_v24  ;;  %13317 = vmatprep.mubr.msk.bf16.mxu0 %vm14472_vm0, %v18455_v14  ;;  %v7075_v61 = vsel %vm2559_vm2, %v7070_v31, 0 }
 0x9c9   : > { %8532 = vrot.lane.b32.xlu0 %v18540_v25, %s14475_s6  ;;  %v6377_v45 = vpack.c.bf16 %v6361_v59, %v6361_v59  ;;  %13327 = vmatprep.subr.bf16.mxu0 %v18455_v14 }
 0x9cc   : > { %13312 = vmatmul.mubr.msk.bf16.vlgmr.msra.gmra.mrb[204].mxu1 %vm2363_vm3, %v6377_v45 }
 0x9cd   : > { %13322 = vmatpush3.bf16.msra.mxu1 %v7026_v28  ;;  %8630 = vrot.lane.b32.xlu0 %v18541_v10, %s14475_s6 }
 0x9ce   : > { %v14014_v46 = vpop.eup %14013  ;;  %13323 = vmatprep.mubr.msk.bf16.mxu1 %vm14472_vm0, %v18455_v14  ;;  %13333 = vmatprep.subr.bf16.mxu1 %v18455_v14 }
 0x9cf   : > { %13318 = vmatmul.mubr.msk.bf16.vlgmr.msra.gmra.mrb[208].mxu0 %vm2363_vm3, %v6378_v16  ;;  %v6363_v57 = vmul.f32 %v14014_v46, %v16395_v52 }
 0x9d0   : > { %13328 = vmatpush3.bf16.msra.mxu0 %v7075_v61  ;;  %13329 = vmatprep.mubr.msk.bf16.mxu0 %vm14472_vm0, %v18455_v14 }
 0x9d1   : > { %v6379_v47 = vpack.c.bf16 %v6363_v57, %v6363_v57  ;;  %13339 = vmatprep.subr.bf16.mxu0 %v18455_v14 }
 0x9d4   : > { %13324 = vmatmul.mubr.msk.bf16.vlgmr.msra.gmra.mrb[208].mxu1 %vm2363_vm3, %v6379_v47 }
 0x9d5   : > { %13334 = vmatpush3.bf16.msra.mxu1 %v7124_v15  ;;  %13335 = vmatprep.mubr.msk.bf16.mxu1 %vm14472_vm0, %v18455_v14 }
 0x9d6   : > { %13345 = vmatprep.subr.bf16.mxu1 %v18455_v14 }
 0x9ed   : > { %v6330_v51 = vpop.xlane.xlu1 %6329 }
 0x9ee   : > { %14015 = vrcp.f32 %v6330_v51 }
 0x9f1   : > { %v7368_v52 = vpop.permute.xlu1 %7367 }
 0x9f2   : > { %v7373_v38 = vsel %vm1626_vm1, %v7368_v52, 0 }
 0x9f5   : > { %v7365_v19 = vpop.permute.xlu1 %7364 }
 0x9f8   : > { %v14016_v21 = vpop.eup %14015  ;;  %v6333_v12 = vpop.xlane.xlu0 %6332 }
 0x9f9   : > { %14017 = vrcp.f32 %v6333_v12  ;;  %v7472_v29 = vpop.permute.xlu1 %7471  ;;  %v6364_v43 = vmul.f32 %v14016_v21, %v16407_v17 }
 0x9fa   : > { %v7477_v41 = vsel %vm1626_vm1, %v7472_v29, 0 }
 0x9fb   : > { %v6380_v13 = vpack.c.bf16 %v6364_v43, %v6364_v43 }
 0x9fc   : > { %v7316_v32 = vpop.permute.xlu0 %7315 }
 0x9fd   : > { %v7321_v11 = vsel %vm1626_vm1, %v7316_v32, 0  ;;  %v7469_v44 = vpop.permute.xlu1 %7468  ;;  %13330 = vmatmul.mubr.msk.bf16.vlgmr.msra.gmra.mrb[212].mxu0 %vm2363_vm3, %v6380_v13 }
 0x9fe   : > { %13340 = vmatpush3.bf16.xpose.msra.mxu0 %v7321_v11  ;;  %13341 = vmatprep.mubr.msk.bf16.mxu0 %vm14472_vm0, %v18455_v14 }
 0x9ff   : > { %13351 = vmatprep.subr.bf16.mxu0 %v18455_v14 }
 0xa00   : > { %v7313_v5 = vpop.permute.xlu0 %7312 }
 0xa01   : > { %v7576_v60 = vpop.permute.xlu1 %7575 }
 0xa02   : > { %v7581_v27 = vsel %vm1626_vm1, %v7576_v60, 0 }
 0xa03   : > { %v14018_v55 = vpop.eup %14017 }
 0xa04   : > { %v7420_v42 = vpop.permute.xlu0 %7419  ;;  %v6365_v58 = vmul.f32 %v14018_v55, %v16411_v37 }
 0xa05   : > { %v7425_v17 = vsel %vm1626_vm1, %v7420_v42, 0  ;;  %v7573_v50 = vpop.permute.xlu1 %7572  ;;  %13342 = vmatmul.mubr.msk.bf16.vlgmr.msra.gmra.mrb[216].mxu0 %vm1626_vm1, %v7313_v5 }
 0xa06   : > { %13352 = vmatpush3.bf16.xpose.msra.mxu0 %v7425_v17  ;;  %v6381_v49 = vpack.c.bf16 %v6365_v58, %v6365_v58  ;;  %13353 = vmatprep.mubr.msk.bf16.mxu0 %vm14472_vm0, %v18455_v14 }
 0xa07   : > { %13363 = vmatprep.subr.bf16.mxu0 %v18455_v14 }
 0xa08   : > { %13336 = vmatmul.mubr.msk.bf16.vlgmr.msra.gmra.mrb[212].mxu1 %vm2363_vm3, %v6381_v49  ;;  %v7417_v40 = vpop.permute.xlu0 %7416 }
 0xa09   : > { %13346 = vmatpush3.bf16.xpose.msra.mxu1 %v7373_v38  ;;  %v7680_v26 = vpop.permute.xlu1 %7679  ;;  %13347 = vmatprep.mubr.msk.bf16.mxu1 %vm14472_vm0, %v18455_v14 }
 0xa0a   : > { %13357 = vmatprep.subr.bf16.mxu1 %v18455_v14  ;;  %v7685_v56 = vsel %vm1626_vm1, %v7680_v26, 0 }
 0xa0c   : > { %v7524_v37 = vpop.permute.xlu0 %7523 }
 0xa0d   : > { %v7529_v8 = vsel %vm1626_vm1, %v7524_v37, 0  ;;  %13354 = vmatmul.mubr.msk.bf16.vlgmr.msra.gmra.mrb[220].mxu0 %vm1626_vm1, %v7417_v40  ;;  %v7677_v20 = vpop.permute.xlu1 %7676 }
 0xa0e   : > { %13364 = vmatpush3.bf16.xpose.msra.mxu0 %v7529_v8  ;;  %13365 = vmatprep.mubr.msk.bf16.mxu0 %vm14472_vm0, %v18455_v14 }
 0xa0f   : > { %13375 = vmatprep.subr.bf16.mxu0 %v18455_v14 }
 0xa10   : > { %13348 = vmatmul.mubr.msk.bf16.vlgmr.msra.gmra.mrb[216].mxu1 %vm1626_vm1, %v7365_v19  ;;  %v7521_v63 = vpop.permute.xlu0 %7520 }
 0xa11   : > { %13358 = vmatpush3.bf16.xpose.msra.mxu1 %v7477_v41  ;;  %13359 = vmatprep.mubr.msk.bf16.mxu1 %vm14472_vm0, %v18455_v14  ;;  %v7784_v23 = vpop.permute.xlu1 %7783 }
 0xa12   : > { %13369 = vmatprep.subr.bf16.mxu1 %v18455_v14  ;;  %v7789_v1 = vsel %vm1626_vm1, %v7784_v23, 0 }
 0xa14   : > { %v7628_v53 = vpop.permute.xlu0 %7627 }
 0xa15   : > { %v7633_v35 = vsel %vm1626_vm1, %v7628_v53, 0  ;;  %13366 = vmatmul.mubr.msk.bf16.vlgmr.msra.gmra.mrb[224].mxu0 %vm1626_vm1, %v7521_v63  ;;  %v7781_v2 = vpop.permute.xlu1 %7780 }
 0xa16   : > { %13376 = vmatpush3.bf16.xpose.msra.mxu0 %v7633_v35  ;;  %13377 = vmatprep.mubr.msk.bf16.mxu0 %vm14472_vm0, %v18455_v14 }
 0xa17   : > { %13387 = vmatprep.subr.bf16.mxu0 %v18455_v14 }
 0xa18   : > { %13360 = vmatmul.mubr.msk.bf16.vlgmr.msra.gmra.mrb[220].mxu1 %vm1626_vm1, %v7469_v44  ;;  %v7625_v36 = vpop.permute.xlu0 %7624 }
 0xa19   : > { %13370 = vmatpush3.bf16.xpose.msra.mxu1 %v7581_v27  ;;  %13371 = vmatprep.mubr.msk.bf16.mxu1 %vm14472_vm0, %v18455_v14  ;;  %v7888_v39 = vpop.permute.xlu1 %7887 }
 0xa1a   : > { %13381 = vmatprep.subr.bf16.mxu1 %v18455_v14  ;;  %v7893_v24 = vsel %vm1626_vm1, %v7888_v39, 0 }
 0xa1c   : > { %v7732_v22 = vpop.permute.xlu0 %7731 }
 0xa1d   : > { %v7737_v0 = vsel %vm1626_vm1, %v7732_v22, 0  ;;  %13378 = vmatmul.mubr.msk.bf16.vlgmr.msra.gmra.mrb[228].mxu0 %vm1626_vm1, %v7625_v36  ;;  %v7885_v6 = vpop.permute.xlu1 %7884 }
 0xa1e   : > { %13388 = vmatpush3.bf16.xpose.msra.mxu0 %v7737_v0  ;;  %13389 = vmatprep.mubr.msk.bf16.mxu0 %vm14472_vm0, %v18455_v14 }
 0xa1f   : > { %13399 = vmatprep.subr.bf16.mxu0 %v18455_v14 }
 0xa20   : > { %13372 = vmatmul.mubr.msk.bf16.vlgmr.msra.gmra.mrb[224].mxu1 %vm1626_vm1, %v7573_v50  ;;  %v7729_v4 = vpop.permute.xlu0 %7728 }
 0xa21   : > { %13382 = vmatpush3.bf16.xpose.msra.mxu1 %v7685_v56  ;;  %13383 = vmatprep.mubr.msk.bf16.mxu1 %vm14472_vm0, %v18455_v14  ;;  %v7992_v7 = vpop.permute.xlu1 %7991 }
 0xa22   : > { %13393 = vmatprep.subr.bf16.mxu1 %v18455_v14  ;;  %v7997_v28 = vsel %vm1626_vm1, %v7992_v7, 0 }
 0xa24   : > { %v7836_v33 = vpop.permute.xlu0 %7835 }
 0xa25   : > { %v7841_v48 = vsel %vm1626_vm1, %v7836_v33, 0  ;;  %13390 = vmatmul.mubr.msk.bf16.vlgmr.msra.gmra.mrb[232].mxu0 %vm1626_vm1, %v7729_v4  ;;  %v7989_v25 = vpop.permute.xlu1 %7988 }
 0xa26   : > { %13400 = vmatpush3.bf16.xpose.msra.mxu0 %v7841_v48  ;;  %13401 = vmatprep.mubr.msk.bf16.mxu0 %vm14472_vm0, %v18455_v14 }
 0xa27   : > { %13411 = vmatprep.subr.bf16.mxu0 %v18455_v14 }
 0xa28   : > { %13384 = vmatmul.mubr.msk.bf16.vlgmr.msra.gmra.mrb[228].mxu1 %vm1626_vm1, %v7677_v20  ;;  %v7833_v18 = vpop.permute.xlu0 %7832 }
 0xa29   : > { %13394 = vmatpush3.bf16.xpose.msra.mxu1 %v7789_v1  ;;  %13395 = vmatprep.mubr.msk.bf16.mxu1 %vm14472_vm0, %v18455_v14  ;;  %v8096_v10 = vpop.permute.xlu1 %8095 }
 0xa2a   : > { %13405 = vmatprep.subr.bf16.mxu1 %v18455_v14  ;;  %v8101_v57 = vsel %vm1626_vm1, %v8096_v10, 0 }
 0xa2c   : > { %v7940_v9 = vpop.permute.xlu0 %7939 }
 0xa2d   : > { %v7945_v30 = vsel %vm1626_vm1, %v7940_v9, 0  ;;  %13402 = vmatmul.mubr.msk.bf16.vlgmr.msra.gmra.mrb[236].mxu0 %vm1626_vm1, %v7833_v18  ;;  %v8093_v61 = vpop.permute.xlu1 %8092 }
 0xa2e   : > { %13412 = vmatpush3.bf16.xpose.msra.mxu0 %v7945_v30  ;;  %13413 = vmatprep.mubr.msk.bf16.mxu0 %vm14472_vm0, %v18455_v14 }
 0xa2f   : > { %13423 = vmatprep.subr.bf16.mxu0 %v18455_v14 }
 0xa30   : > { %13396 = vmatmul.mubr.msk.bf16.vlgmr.msra.gmra.mrb[232].mxu1 %vm1626_vm1, %v7781_v2  ;;  %v7937_v59 = vpop.permute.xlu0 %7936 }
 0xa31   : > { %13406 = vmatpush3.bf16.xpose.msra.mxu1 %v7893_v24  ;;  %13407 = vmatprep.mubr.msk.bf16.mxu1 %vm14472_vm0, %v18455_v14  ;;  %v8386_v54 = vpop.permute.xlu1 %8385 }
 0xa32   : > { %13417 = vmatprep.subr.bf16.mxu1 %v18455_v14  ;;  %v8391_v47 = vsel %vm2559_vm2, %v8386_v54, 0 }
 0xa34   : > { %v8044_v45 = vpop.permute.xlu0 %8043 }
 0xa35   : > { %v8049_v34 = vsel %vm1626_vm1, %v8044_v45, 0  ;;  %13414 = vmatmul.mubr.msk.bf16.vlgmr.msra.gmra.mrb[240].mxu0 %vm1626_vm1, %v7937_v59 }
 0xa36   : > { %13424 = vmatpush3.bf16.xpose.msra.mxu0 %v8049_v34  ;;  %13425 = vmatprep.mubr.msk.bf16.mxu0 %vm14472_vm0, %v18455_v14 }
 0xa37   : > { %13435 = vmatprep.subr.bf16.mxu0 %v18455_v14 }
 0xa38   : > { %13408 = vmatmul.mubr.msk.bf16.vlgmr.msra.gmra.mrb[236].mxu1 %vm1626_vm1, %v7885_v6  ;;  %v8041_v31 = vpop.permute.xlu0 %8040 }
 0xa39   : > { %13418 = vmatpush3.bf16.xpose.msra.mxu1 %v7997_v28  ;;  %13419 = vmatprep.mubr.msk.bf16.mxu1 %vm14472_vm0, %v18455_v14 }
 0xa3a   : > { %13429 = vmatprep.subr.bf16.mxu1 %v18455_v14 }
 0xa3c   : > { %v8337_v16 = vpop.permute.xlu0 %8336 }
 0xa3d   : > { %v8342_v46 = vsel %vm2559_vm2, %v8337_v16, 0  ;;  %13426 = vmatmul.mubr.msk.bf16.vlgmr.msra.gmra.mrb[244].mxu0 %vm1626_vm1, %v8041_v31 }
 0xa3e   : > { %13436 = vmatpush3.bf16.msra.mxu0 %v8342_v46  ;;  %13437 = vmatprep.mubr.msk.bf16.mxu0 %vm14472_vm0, %v18455_v14 }
 0xa3f   : > { %13447 = vmatprep.subr.bf16.mxu0 %v18455_v14 }
 0xa40   : > { %13420 = vmatmul.mubr.msk.bf16.vlgmr.msra.gmra.mrb[240].mxu1 %vm1626_vm1, %v7989_v25 }
 0xa41   : > { %13430 = vmatpush3.bf16.xpose.msra.mxu1 %v8101_v57  ;;  %13431 = vmatprep.mubr.msk.bf16.mxu1 %vm14472_vm0, %v18455_v14 }
 0xa42   : > { %13441 = vmatprep.subr.bf16.mxu1 %v18455_v14 }
 0xa48   : > { %13432 = vmatmul.mubr.msk.bf16.vlgmr.msra.gmra.mrb[244].mxu1 %vm1626_vm1, %v8093_v61 }
 0xa49   : > { %13442 = vmatpush3.bf16.msra.mxu1 %v8391_v47  ;;  %13443 = vmatprep.mubr.msk.bf16.mxu1 %vm14472_vm0, %v18455_v14 }
 0xa4a   : > { %13453 = vmatprep.subr.bf16.mxu1 %v18455_v14 }
 0xa6b   : > { %v16685_v15 = vpop.f32.mrb[184].mxu0 }
 0xa6c   : > { %v13247_v51 = vpop.f32.mrb[185].mxu0 }
 0xa6d   : > { %v6428_v52 = vpop.f32.mrb[186].mxu0 }
 0xa6e   : > { %v13248_v19 = vpop.f32.mrb[187].mxu0 }
 0xa73   : > { %v16687_v21 = vpop.f32.mrb[188].mxu0 }
 0xa74   : > { %v13259_v12 = vpop.f32.mrb[189].mxu0 }
 0xa75   : > { %v6526_v29 = vpop.f32.mrb[190].mxu0 }
 0xa76   : > { %v16689_v43 = vpop.f32.mrb[184].mxu1  ;;  %v13260_v13 = vpop.f32.mrb[191].mxu0 }
 0xa77   : > { %v7166_v32 = vpack.c.bf16 %v16689_v43, %v16685_v15  ;;  %v13253_v11 = vpop.f32.mrb[185].mxu1 }
 0xa78   : > { %v6477_v44 = vpop.f32.mrb[186].mxu1 }
 0xa79   : > { %v13254_v5 = vpop.f32.mrb[187].mxu1  ;;  %v16732_v44 = vld [vmem:[%s18450_s19] sm:$0xff] }
 0xa7e   : > { %v16693_v60 = vpop.f32.mrb[188].mxu1 }
 0xa7f   : > { %v7167_v55 = vpack.c.bf16 %v16693_v60, %v16687_v21  ;;  %v13265_v42 = vpop.f32.mrb[189].mxu1 }
 0xa80   : > { %v6575_v58 = vpop.f32.mrb[190].mxu1 }
 0xa81   : > { %v13266_v17 = vpop.f32.mrb[191].mxu1 }
 0xa82   : > { %v16697_v50 = vpop.f32.mrb[192].mxu0 }
 0xa83   : > { %v13271_v49 = vpop.f32.mrb[193].mxu0 }
 0xa84   : > { %v6624_v38 = vpop.f32.mrb[194].mxu0 }
 0xa85   : > { %v13272_v40 = vpop.f32.mrb[195].mxu0 }
 0xa86   : > { %v16699_v26 = vpop.f32.mrb[192].mxu1 }
 0xa87   : > { %v7168_v37 = vpack.c.bf16 %v16699_v26, %v16697_v50  ;;  %v13277_v8 = vpop.f32.mrb[193].mxu1 }
 0xa88   : > { %v6673_v20 = vpop.f32.mrb[194].mxu1 }
 0xa89   : > { %v13278_v41 = vpop.f32.mrb[195].mxu1 }
 0xa8a   : > { %v16703_v63 = vpop.f32.mrb[196].mxu0 }
 0xa8b   : > { %v13283_v53 = vpop.f32.mrb[197].mxu0 }
 0xa8c   : > { %v6722_v23 = vpop.f32.mrb[198].mxu0 }
 0xa8d   : > { %v13284_v35 = vpop.f32.mrb[199].mxu0 }
 0xa8e   : > { %v16705_v27 = vpop.f32.mrb[196].mxu1 }
 0xa8f   : > { %v7169_v36 = vpack.c.bf16 %v16705_v27, %v16703_v63  ;;  %v13289_v2 = vpop.f32.mrb[197].mxu1 }
 0xa90   : > { %v6771_v22 = vpop.f32.mrb[198].mxu1 }
 0xa91   : > { %v13290_v0 = vpop.f32.mrb[199].mxu1 }
 0xa92   : > { %v16709_v56 = vpop.f32.mrb[200].mxu0 }
 0xa93   : > { %v13295_v4 = vpop.f32.mrb[201].mxu0 }
 0xa94   : > { %v6820_v39 = vpop.f32.mrb[202].mxu0 }
 0xa95   : > { %v13296_v33 = vpop.f32.mrb[203].mxu0 }
 0xa97   : > { %v16711_v48 = vpop.f32.mrb[200].mxu1 }
 0xa98   : > { %v7170_v6 = vpack.c.bf16 %v16711_v48, %v16709_v56  ;;  %v13301_v1 = vpop.f32.mrb[201].mxu1 }
 0xa99   : > { %v6869_v18 = vpop.f32.mrb[202].mxu1 }
 0xa9a   : > { %v13302_v9 = vpop.f32.mrb[203].mxu1  ;;  %v16715_v7 = vpop.f32.mrb[204].mxu0 }
 0xa9b   : > { %v13307_v30 = vpop.f32.mrb[205].mxu0 }
 0xa9c   : > { %v6918_v24 = vpop.f32.mrb[206].mxu0 }
 0xa9d   : > { %v13308_v59 = vpop.f32.mrb[207].mxu0 }
 0xa9f   : > { %v16717_v25 = vpop.f32.mrb[204].mxu1 }
 0xaa0   : > { %v7171_v45 = vpack.c.bf16 %v16717_v25, %v16715_v7  ;;  %v13313_v34 = vpop.f32.mrb[205].mxu1  ;;  %v18570_v7 = vld [vmem:[#allocation45_spill] sm:$0xff]  ;;  %v18571_v25 = vld [vmem:[#allocation44_spill] sm:$0xff] }
 0xaa1   : > { %v6967_v28 = vpop.f32.mrb[206].mxu1 }
 0xaa2   : > { %v13314_v31 = vpop.f32.mrb[207].mxu1  ;;  %v16721_v10 = vpop.f32.mrb[208].mxu0 }
 0xaa3   : > { %v13319_v16 = vpop.f32.mrb[209].mxu0 }
 0xaa4   : > { %v7016_v46 = vpop.f32.mrb[210].mxu0 }
 0xaa5   : > { %v13320_v61 = vpop.f32.mrb[211].mxu0 }
 0xaa7   : > { %v16723_v57 = vpop.f32.mrb[208].mxu1 }
 0xaa8   : > { %v7172_v54 = vpack.c.bf16 %v16723_v57, %v16721_v10  ;;  %v13325_v47 = vpop.f32.mrb[209].mxu1 }
 0xaa9   : > { %v7065_v51 = vpop.f32.mrb[210].mxu1 }
 0xaaa   : > { %v13326_v52 = vpop.f32.mrb[211].mxu1 }
 0xad0   : > { %v16727_v19 = vpop.f32.mrb[212].mxu0 }
 0xad1   : > { %v13331_v12 = vpop.f32.mrb[213].mxu0 }
 0xad2   : > { %v7114_v29 = vpop.f32.mrb[214].mxu0 }
 0xad3   : > { %v13332_v13 = vpop.f32.mrb[215].mxu0 }
 0xad8   : > { %v7357_v11 = vpop.f32.mrb[216].mxu0 }
 0xad9   : > { %v16735_v5 = vadd.f32 %v16732_v44, %v7357_v11  ;;  %v13343_v42 = vpop.f32.mrb[217].mxu0 }
 0xada   : > { %v7360_v58 = vpop.f32.mrb[218].mxu0 }
 0xadb   : > { %v16737_v17 = vpop.f32.mrb[212].mxu1  ;;  %v13344_v49 = vpop.f32.mrb[219].mxu0  ;;  %v8143_v38 = vsel %vm2363_vm3, %v16735_v5, -inf }
 0xadc   : > { %v7173_v40 = vpack.c.bf16 %v16737_v17, %v16727_v19  ;;  %v13337_v8 = vpop.f32.mrb[213].mxu1  ;;  %8144 = vmax.xlane.f32.xlu0 %v8143_v38 }
 0xadd   : > { %v7163_v20 = vpop.f32.mrb[214].mxu1 }
 0xade   : > { %v13338_v41 = vpop.f32.mrb[215].mxu1 }
 0xae0   : > { %v7461_v53 = vpop.f32.mrb[220].mxu0 }
 0xae1   : > { %v16744_v23 = vadd.f32 %v16732_v44, %v7461_v53  ;;  %v13355_v35 = vpop.f32.mrb[221].mxu0 }
 0xae2   : > { %v7464_v2 = vpop.f32.mrb[222].mxu0 }
 0xae3   : > { %v7409_v22 = vpop.f32.mrb[216].mxu1  ;;  %v13356_v0 = vpop.f32.mrb[223].mxu0  ;;  %v8149_v4 = vsel %vm2363_vm3, %v16744_v23, -inf }
 0xae4   : > { %v16749_v39 = vadd.f32 %v16732_v44, %v7409_v22  ;;  %v13349_v33 = vpop.f32.mrb[217].mxu1  ;;  %8150 = vmax.xlane.f32.xlu0 %v8149_v4 }
 0xae5   : > { %v7412_v1 = vpop.f32.mrb[218].mxu1 }
 0xae6   : > { %v13350_v18 = vpop.f32.mrb[219].mxu1  ;;  %v8146_v9 = vsel %vm2363_vm3, %v16749_v39, -inf }
 0xae7   : > { %8147 = vmax.xlane.f32.xlu1 %v8146_v9 }
 0xae8   : > { %v7565_v30 = vpop.f32.mrb[224].mxu0 }
 0xae9   : > { %v13367_v24 = vpop.f32.mrb[225].mxu0  ;;  %v16757_v61 = vadd.f32 %v16732_v44, %v7565_v30 }
 0xaea   : > { %v7568_v59 = vpop.f32.mrb[226].mxu0 }
 0xaeb   : > { %v7513_v34 = vpop.f32.mrb[220].mxu1  ;;  %v13368_v28 = vpop.f32.mrb[227].mxu0  ;;  %v8155_v11 = vsel %vm2363_vm3, %v16757_v61, -inf }
 0xaec   : > { %v16754_v31 = vadd.f32 %v16732_v44, %v7513_v34  ;;  %v13361_v16 = vpop.f32.mrb[221].mxu1 }
 0xaed   : > { %v7516_v46 = vpop.f32.mrb[222].mxu1 }
 0xaee   : > { %v13362_v47 = vpop.f32.mrb[223].mxu1  ;;  %v8152_v51 = vsel %vm2363_vm3, %v16754_v31, -inf }
 0xaef   : > { %8153 = vmax.xlane.f32.xlu0 %v8152_v51 }
 0xaf0   : > { %v7669_v52 = vpop.f32.mrb[228].mxu0 }
 0xaf1   : > { %v13379_v12 = vpop.f32.mrb[229].mxu0  ;;  %v16762_v29 = vadd.f32 %v16732_v44, %v7669_v52 }
 0xaf2   : > { %v7672_v13 = vpop.f32.mrb[230].mxu0 }
 0xaf3   : > { %v7617_v42 = vpop.f32.mrb[224].mxu1  ;;  %8156 = vmax.xlane.f32.xlu0 %v8155_v11  ;;  %v13380_v58 = vpop.f32.mrb[231].mxu0  ;;  %v8161_v53 = vsel %vm2363_vm3, %v16762_v29, -inf }
 0xaf4   : > { %v16767_v49 = vadd.f32 %v16732_v44, %v7617_v42  ;;  %v13373_v38 = vpop.f32.mrb[225].mxu1 }
 0xaf5   : > { %v7620_v8 = vpop.f32.mrb[226].mxu1 }
 0xaf6   : > { %v13374_v20 = vpop.f32.mrb[227].mxu1  ;;  %v8158_v41 = vsel %vm2363_vm3, %v16767_v49, -inf }
 0xaf7   : > { %8159 = vmax.xlane.f32.xlu1 %v8158_v41  ;;  %8162 = vmax.xlane.f32.xlu0 %v8161_v53 }
 0xaf8   : > { %v7773_v35 = vpop.f32.mrb[232].mxu0 }
 0xaf9   : > { %v16774_v2 = vadd.f32 %v16732_v44, %v7773_v35  ;;  %v13391_v22 = vpop.f32.mrb[233].mxu0 }
 0xafa   : > { %v7776_v0 = vpop.f32.mrb[234].mxu0 }
 0xafb   : > { %v7721_v4 = vpop.f32.mrb[228].mxu1  ;;  %v13392_v33 = vpop.f32.mrb[235].mxu0  ;;  %v8167_v1 = vsel %vm2363_vm3, %v16774_v2, -inf }
 0xafc   : > { %v16779_v18 = vadd.f32 %v16732_v44, %v7721_v4  ;;  %v13385_v9 = vpop.f32.mrb[229].mxu1  ;;  %8168 = vmax.xlane.f32.xlu0 %v8167_v1 }
 0xafd   : > { %v7724_v30 = vpop.f32.mrb[230].mxu1 }
 0xafe   : > { %v13386_v24 = vpop.f32.mrb[231].mxu1  ;;  %v8164_v59 = vsel %vm2363_vm3, %v16779_v18, -inf }
 0xaff   : > { %8165 = vmax.xlane.f32.xlu1 %v8164_v59 }
 0xb00   : > { %v7877_v34 = vpop.f32.mrb[236].mxu0 }
 0xb01   : > { %v16784_v28 = vadd.f32 %v16732_v44, %v7877_v34  ;;  %v13403_v16 = vpop.f32.mrb[237].mxu0 }
 0xb02   : > { %v7880_v46 = vpop.f32.mrb[238].mxu0 }
 0xb03   : > { %v7825_v47 = vpop.f32.mrb[232].mxu1  ;;  %v13404_v51 = vpop.f32.mrb[239].mxu0  ;;  %v8173_v52 = vsel %vm2363_vm3, %v16784_v28, -inf }
 0xb04   : > { %v16789_v12 = vadd.f32 %v16732_v44, %v7825_v47  ;;  %v13397_v13 = vpop.f32.mrb[233].mxu1  ;;  %8174 = vmax.xlane.f32.xlu0 %v8173_v52 }
 0xb05   : > { %v7828_v11 = vpop.f32.mrb[234].mxu1 }
 0xb06   : > { %v13398_v42 = vpop.f32.mrb[235].mxu1  ;;  %v8170_v58 = vsel %vm2363_vm3, %v16789_v12, -inf }
 0xb07   : > { %8171 = vmax.xlane.f32.xlu1 %v8170_v58 }
 0xb08   : > { %v7981_v38 = vpop.f32.mrb[240].mxu0 }
 0xb09   : > { %v16794_v8 = vadd.f32 %v16732_v44, %v7981_v38  ;;  %v13415_v20 = vpop.f32.mrb[241].mxu0 }
 0xb0a   : > { %v7984_v41 = vpop.f32.mrb[242].mxu0 }
 0xb0b   : > { %v7929_v53 = vpop.f32.mrb[236].mxu1  ;;  %v13416_v35 = vpop.f32.mrb[243].mxu0  ;;  %v8179_v22 = vsel %vm2363_vm3, %v16794_v8, -inf }
 0xb0c   : > { %v16799_v0 = vadd.f32 %v16732_v44, %v7929_v53  ;;  %v13409_v4 = vpop.f32.mrb[237].mxu1  ;;  %8180 = vmax.xlane.f32.xlu0 %v8179_v22  ;;  %v18542_v53 = vld [vmem:[#allocation37_spill] sm:$0xff]  ;;  %v18543_v35 = vld [vmem:[#allocation32_spill] sm:$0xff] }
 0xb0d   : > { %v7932_v33 = vpop.f32.mrb[238].mxu1  ;;  %v18544_v22 = vld [vmem:[#allocation36_spill] sm:$0xff]  ;;  %v18545_v4 = vld [vmem:[#allocation38_spill] sm:$0xff] }
 0xb0e   : > { %v13410_v1 = vpop.f32.mrb[239].mxu1  ;;  %v8176_v9 = vsel %vm2363_vm3, %v16799_v0, -inf }
 0xb0f   : > { %8177 = vmax.xlane.f32.xlu1 %v8176_v9  ;;  %v16826_v9 = vpop.permute.xlu0 %8434 }
 0xb10   : > { %v8085_v30 = vpop.f32.mrb[244].mxu0 }
 0xb11   : > { %v16804_v24 = vadd.f32 %v16732_v44, %v8085_v30  ;;  %v13427_v59 = vpop.f32.mrb[245].mxu0 }
 0xb12   : > { %v8088_v34 = vpop.f32.mrb[246].mxu0  ;;  %v16830_v59 = vpop.permute.xlu1 %8483 }
 0xb13   : > { %v8033_v16 = vpop.f32.mrb[240].mxu1  ;;  %v13428_v46 = vpop.f32.mrb[247].mxu0  ;;  %v8185_v47 = vsel %vm2363_vm3, %v16804_v24, -inf }
 0xb14   : > { %v16809_v51 = vadd.f32 %v16732_v44, %v8033_v16  ;;  %v13421_v52 = vpop.f32.mrb[241].mxu1  ;;  %8186 = vmax.xlane.f32.xlu0 %v8185_v47  ;;  %v16828_v30 = vpop.permute.xlu0 %8532 }
 0xb15   : > { %v8036_v13 = vpop.f32.mrb[242].mxu1 }
 0xb16   : > { %v13422_v11 = vpop.f32.mrb[243].mxu1  ;;  %v8182_v42 = vsel %vm2363_vm3, %v16809_v51, -inf  ;;  %v16834_v46 = vpop.permute.xlu1 %8581 }
 0xb17   : > { %8183 = vmax.xlane.f32.xlu1 %v8182_v42 }
 0xb18   : > { %v16832_v34 = vpop.permute.xlu0 %8630 }
 0xb1b   : > { %v8137_v58 = vpop.f32.mrb[244].mxu1 }
 0xb1c   : > { %v13433_v38 = vpop.f32.mrb[245].mxu1  ;;  %v16822_v33 = vadd.f32 %v16732_v44, %v8137_v58  ;;  %v16837_v44 = vpop.permute.xlu1 %8679 }
 0xb1d   : > { %v8140_v20 = vpop.f32.mrb[246].mxu1 }
 0xb1e   : > { %v13434_v41 = vpop.f32.mrb[247].mxu1  ;;  %v8188_v1 = vsel %vm2363_vm3, %v16822_v33, -inf }
 0xb28   : > { %8777 = vrot.lane.b32.xlu1 %v18542_v53, %s14475_s6 }
 0xb2a   : > { %8728 = vrot.lane.b32.xlu0 %v18543_v35, %s14475_s6 }
 0xb2c   : > { %8826 = vrot.lane.b32.xlu1 %v18544_v22, %s14475_s6 }
 0xb30   : > { %8875 = vrot.lane.b32.xlu1 %v18545_v4, %s14475_s6 }
 0xb54   : > { %8189 = vmax.xlane.f32.xlu1 %v8188_v1 }
 0xb69   : > { %v8145_v16 = vpop.xlane.xlu0 %8144 }
 0xb6a   : > { %v8191_v47 = vsub.f32 %v16735_v5, %v8145_v16 }
 0xb6c   : > { %v8207_v52 = vmul.f32 1.442695, %v8191_v47 }
 0xb6e   : > { %14019 = vpow2.f32 %v8207_v52 }
 0xb71   : > { %v8151_v13 = vpop.xlane.xlu0 %8150 }
 0xb72   : > { %v8193_v11 = vsub.f32 %v16744_v23, %v8151_v13 }
 0xb74   : > { %v8211_v42 = vmul.f32 1.442695, %v8193_v11  ;;  %v8148_v58 = vpop.xlane.xlu1 %8147 }
 0xb75   : > { %v8192_v38 = vsub.f32 %v16749_v39, %v8148_v58 }
 0xb76   : > { %14021 = vpow2.f32 %v8211_v42 }
 0xb77   : > { %v8209_v20 = vmul.f32 1.442695, %v8192_v38 }
 0xb78   : > { %v16841_v41 = vpop.eup %14019 }
 0xb79   : > { %14023 = vpow2.f32 %v8209_v20  ;;  %v8239_v53 = vsel %vm2363_vm3, %v16841_v41, 0.0 }
 0xb7a   : > { %8240 = vadd.xlane.f32.xlu0 %v8239_v53 }
 0xb7c   : > { %v8154_v5 = vpop.xlane.xlu0 %8153 }
 0xb7d   : > { %v8194_v35 = vsub.f32 %v16754_v31, %v8154_v5 }
 0xb7f   : > { %v8213_v22 = vmul.f32 1.442695, %v8194_v35 }
 0xb80   : > { %v16846_v4 = vpop.eup %14021  ;;  %v8157_v23 = vpop.xlane.xlu0 %8156 }
 0xb81   : > { %14025 = vpow2.f32 %v8213_v22  ;;  %v8195_v1 = vsub.f32 %v16757_v61, %v8157_v23  ;;  %v8245_v39 = vsel %vm2363_vm3, %v16846_v4, 0.0 }
 0xb82   : > { %8246 = vadd.xlane.f32.xlu0 %v8245_v39 }
 0xb83   : > { %v16851_v16 = vpop.eup %14023  ;;  %v8215_v47 = vmul.f32 1.442695, %v8195_v1 }
 0xb84   : > { %v8160_v52 = vpop.xlane.xlu1 %8159  ;;  %v8163_v13 = vpop.xlane.xlu0 %8162  ;;  %v8242_v11 = vsel %vm2363_vm3, %v16851_v16, 0.0 }
 0xb85   : > { %14027 = vpow2.f32 %v8215_v47  ;;  %v8196_v31 = vsub.f32 %v16767_v49, %v8160_v52  ;;  %v8197_v42 = vsub.f32 %v16762_v29, %v8163_v13  ;;  %8243 = vadd.xlane.f32.xlu1 %v8242_v11 }
 0xb87   : > { %v8217_v58 = vmul.f32 1.442695, %v8196_v31  ;;  %v8219_v61 = vmul.f32 1.442695, %v8197_v42 }
 0xb89   : > { %14029 = vpow2.f32 %v8217_v58  ;;  %v8169_v38 = vpop.xlane.xlu0 %8168 }
 0xb8a   : > { %14031 = vpow2.f32 %v8219_v61  ;;  %v8199_v53 = vsub.f32 %v16774_v2, %v8169_v38 }
 0xb8b   : > { %v16857_v20 = vpop.eup %14025 }
 0xb8c   : > { %v8166_v5 = vpop.xlane.xlu1 %8165  ;;  %v8248_v35 = vsel %vm2363_vm3, %v16857_v20, 0.0  ;;  %v8223_v29 = vmul.f32 1.442695, %v8199_v53 }
 0xb8d   : > { %v8198_v22 = vsub.f32 %v16779_v18, %v8166_v5  ;;  %8249 = vadd.xlane.f32.xlu1 %v8248_v35 }
 0xb8f   : > { %v16863_v49 = vpop.eup %14027  ;;  %v8221_v23 = vmul.f32 1.442695, %v8198_v22 }
 0xb90   : > { %v8251_v1 = vsel %vm2363_vm3, %v16863_v49, 0.0 }
 0xb91   : > { %14033 = vpow2.f32 %v8221_v23  ;;  %v8175_v39 = vpop.xlane.xlu0 %8174  ;;  %8252 = vadd.xlane.f32.xlu0 %v8251_v1 }
 0xb92   : > { %v8201_v47 = vsub.f32 %v16784_v28, %v8175_v39  ;;  %14035 = vpow2.f32 %v8223_v29 }
 0xb93   : > { %v16868_v2 = vpop.eup %14029 }
 0xb94   : > { %v16870_v52 = vpop.eup %14031  ;;  %v8227_v13 = vmul.f32 1.442695, %v8201_v47  ;;  %v8172_v18 = vpop.xlane.xlu1 %8171  ;;  %v8254_v11 = vsel %vm2363_vm3, %v16868_v2, 0.0  ;;  %v18546_v47 = vld [vmem:[#allocation15_spill] sm:$0xff] }
 0xb95   : > { %v8200_v31 = vsub.f32 %v16789_v12, %v8172_v18  ;;  %8255 = vadd.xlane.f32.xlu1 %v8254_v11  ;;  %v8257_v42 = vsel %vm2363_vm3, %v16870_v52, 0.0  ;;  %v18547_v18 = vld [vmem:[#allocation39_spill] sm:$0xff] }
 0xb96   : > { %8258 = vadd.xlane.f32.xlu0 %v8257_v42  ;;  %14037 = vpow2.f32 %v8227_v13 }
 0xb97   : > { %v8225_v58 = vmul.f32 1.442695, %v8200_v31 }
 0xb99   : > { %14039 = vpow2.f32 %v8225_v58  ;;  %v8181_v13 = vpop.xlane.xlu0 %8180 }
 0xb9a   : > { %v8203_v11 = vsub.f32 %v16794_v8, %v8181_v13 }
 0xb9b   : > { %v16877_v28 = vpop.eup %14033 }
 0xb9c   : > { %v8178_v61 = vpop.xlane.xlu1 %8177  ;;  %v8260_v38 = vsel %vm2363_vm3, %v16877_v28, 0.0  ;;  %v16881_v53 = vpop.eup %14035  ;;  %v8231_v42 = vmul.f32 1.442695, %v8203_v11 }
 0xb9d   : > { %v8202_v5 = vsub.f32 %v16799_v0, %v8178_v61  ;;  %8261 = vadd.xlane.f32.xlu1 %v8260_v38  ;;  %v8263_v35 = vsel %vm2363_vm3, %v16881_v53, 0.0 }
 0xb9f   : > { %v8229_v12 = vmul.f32 1.442695, %v8202_v5 }
 0xba0   : > { %v16886_v22 = vpop.eup %14037 }
 0xba1   : > { %14041 = vpow2.f32 %v8229_v12  ;;  %8264 = vadd.xlane.f32.xlu1 %v8263_v35  ;;  %v8269_v23 = vsel %vm2363_vm3, %v16886_v22, 0.0  ;;  %v8187_v31 = vpop.xlane.xlu0 %8186 }
 0xba2   : > { %v8205_v58 = vsub.f32 %v16804_v24, %v8187_v31  ;;  %14043 = vpow2.f32 %v8231_v42 }
 0xba3   : > { %v16888_v29 = vpop.eup %14039 }
 0xba4   : > { %v8266_v1 = vsel %vm2363_vm3, %v16888_v29, 0.0  ;;  %v8184_v61 = vpop.xlane.xlu1 %8183  ;;  %v8235_v38 = vmul.f32 1.442695, %v8205_v58 }
 0xba5   : > { %8270 = vadd.xlane.f32.xlu1 %v8269_v23  ;;  %8267 = vadd.xlane.f32.xlu0 %v8266_v1  ;;  %v8204_v5 = vsub.f32 %v16809_v51, %v8184_v61  ;;  %v18548_v61 = vld [vmem:[#allocation13_spill] sm:$0xff] }
 0xba6   : > { %14045 = vpow2.f32 %v8235_v38  ;;  %v18549_v38 = vld [vmem:[#allocation25_spill] sm:$0xff] }
 0xba7   : > { %v8233_v12 = vmul.f32 1.442695, %v8204_v5  ;;  %v18550_v5 = vpack.c.bf16 %v18548_v61, %v18549_v38 }
 0xba8   : > { %v16905_v35 = vpop.permute.xlu1 %8777 }
 0xba9   : > { %14047 = vpow2.f32 %v8233_v12 }
 0xbab   : > { %v16894_v0 = vpop.eup %14041 }
 0xbac   : > { %v8272_v39 = vsel %vm2363_vm3, %v16894_v0, 0.0  ;;  %v16907_v23 = vpop.eup %14043  ;;  %v16909_v1 = vpop.permute.xlu1 %8826 }
 0xbad   : > { %8273 = vadd.xlane.f32.xlu0 %v8272_v39  ;;  %v8275_v8 = vsel %vm2363_vm3, %v16907_v23, 0.0 }
 0xbb0   : > { %v16913_v39 = vpop.eup %14045  ;;  %v16915_v24 = vpop.permute.xlu1 %8875 }
 0xbb1   : > { %v8281_v51 = vsel %vm2363_vm3, %v16913_v39, 0.0 }
 0xbb6   : > { %8973 = vrot.lane.b32.xlu1 %v18546_v47, %s14475_s6  ;;  %v16919_v47 = vpop.eup %14047 }
 0xbc3   : > { %8924 = vrot.lane.b32.xlu0 %v18547_v18, %s14475_s6  ;;  %v8278_v18 = vsel %vm2363_vm3, %v16919_v47, 0.0 }
 0xbda   : > { %8276 = vadd.xlane.f32.xlu1 %v8275_v8  ;;  %v18552_v8 = vld [vmem:[#allocation26_spill] sm:$0xff] }
 0xbde   : > { %8282 = vadd.xlane.f32.xlu1 %v8281_v51 }
 0xbe1   : > { %v8190_v13 = vpop.xlane.xlu1 %8189 }
 0xbe2   : > { %v8206_v11 = vsub.f32 %v16822_v33, %v8190_v13  ;;  %8279 = vadd.xlane.f32.xlu0 %v8278_v18  ;;  %v16938_v33 = vpop.permute.xlu0 %8728 }
 0xbe4   : > { %v8237_v31 = vmul.f32 1.442695, %v8206_v11 }
 0xbe6   : > { %14049 = vpow2.f32 %v8237_v31 }
 0xbef   : > { %9071 = vrot.lane.b32.xlu1 %v15598_v62, %s14475_s6  ;;  %v18551_v62 = vld [vmem:[#allocation28_spill] sm:$0xff] }
 0xbf0   : > { %v16926_v42 = vpop.eup %14049  ;;  %v18553_v51 = vpack.c.bf16 %v18551_v62, %v18552_v8 }
 0xbf1   : > { %v8284_v58 = vsel %vm2363_vm3, %v16926_v42, 0.0 }
 0xbf2   : > { %8285 = vadd.xlane.f32.xlu0 %v8284_v58 }
 0xbf3   : > { %5231 = vrot.lane.b32.xlu1 %v18550_v5, %s14475_s6 }
 0xbf7   : > { %7184 = vrot.lane.b32.xlu1 %v7167_v55, %s14474_s16 }
 0xc07   : > { %v8241_v12 = vpop.xlane.xlu0 %8240 }
 0xc08   : > { %14051 = vrcp.f32 %v8241_v12  ;;  %9022 = vrot.lane.b32.xlu0 %v15537_v3, %s14475_s6  ;;  %v8440_v3 = vsel %vm2559_vm2, %v16826_v9, 0  ;;  %v8538_v9 = vsel %vm2559_vm2, %v16828_v30, 0 }
 0xc0c   : > { %5229 = vrot.lane.b32.xlu0 %v18553_v51, %s14475_s6 }
 0xc0f   : > { %v8247_v13 = vpop.xlane.xlu0 %8246 }
 0xc10   : > { %14053 = vrcp.f32 %v8247_v13  ;;  %7182 = vrot.lane.b32.xlu0 %v7166_v32, %s14474_s16 }
 0xc12   : > { %v14052_v21 = vpop.eup %14051  ;;  %v8244_v60 = vpop.xlane.xlu1 %8243 }
 0xc13   : > { %v8303_v55 = vmul.f32 %v14052_v21, %v16841_v41  ;;  %14055 = vrcp.f32 %v8244_v60  ;;  %v8636_v60 = vsel %vm2559_vm2, %v16832_v34, 0 }
 0xc15   : > { %v8319_v18 = vpack.c.bf16 %v8303_v55, %v8303_v55 }
 0xc17   : > { %13438 = vmatmul.mubr.msk.bf16.vlgmr.msra.gmra.mrb[248].mxu0 %vm2363_vm3, %v8319_v18 }
 0xc18   : > { %13448 = vmatpush3.bf16.msra.mxu0 %v8440_v3  ;;  %13449 = vmatprep.mubr.msk.bf16.mxu0 %vm14472_vm0, %v18455_v14  ;;  %v8685_v3 = vsel %vm2559_vm2, %v16837_v44, 0 }
 0xc19   : > { %13459 = vmatprep.subr.bf16.mxu0 %v18455_v14 }
 0xc1a   : > { %v14054_v11 = vpop.eup %14053  ;;  %v8250_v15 = vpop.xlane.xlu1 %8249 }
 0xc1b   : > { %v8305_v43 = vmul.f32 %v14054_v11, %v16846_v4  ;;  %14057 = vrcp.f32 %v8250_v15  ;;  %v8489_v4 = vsel %vm2559_vm2, %v16830_v59, 0  ;;  %v8587_v59 = vsel %vm2559_vm2, %v16834_v46, 0 }
 0xc1d   : > { %v14056_v32 = vpop.eup %14055  ;;  %v8321_v41 = vpack.c.bf16 %v8305_v43, %v8305_v43 }
 0xc1e   : > { %v8304_v31 = vmul.f32 %v14056_v32, %v16851_v16  ;;  %v8253_v58 = vpop.xlane.xlu0 %8252 }
 0xc1f   : > { %14059 = vrcp.f32 %v8253_v58  ;;  %13450 = vmatmul.mubr.msk.bf16.vlgmr.msra.gmra.mrb[252].mxu0 %vm2363_vm3, %v8321_v41  ;;  %v8783_v41 = vsel %vm2559_vm2, %v16905_v35, 0 }
 0xc20   : > { %13460 = vmatpush3.bf16.msra.mxu0 %v8538_v9  ;;  %v8320_v61 = vpack.c.bf16 %v8304_v31, %v8304_v31  ;;  %13461 = vmatprep.mubr.msk.bf16.mxu0 %vm14472_vm0, %v18455_v14 }
 0xc21   : > { %13471 = vmatprep.subr.bf16.mxu0 %v18455_v14 }
 0xc22   : > { %13444 = vmatmul.mubr.msk.bf16.vlgmr.msra.gmra.mrb[248].mxu1 %vm2363_vm3, %v8320_v61  ;;  %v8256_v16 = vpop.xlane.xlu1 %8255  ;;  %v8832_v61 = vsel %vm2559_vm2, %v16909_v1, 0 }
 0xc23   : > { %13454 = vmatpush3.bf16.msra.mxu1 %v8489_v4  ;;  %14061 = vrcp.f32 %v8256_v16  ;;  %v8259_v38 = vpop.xlane.xlu0 %8258  ;;  %13455 = vmatprep.mubr.msk.bf16.mxu1 %vm14472_vm0, %v18455_v14  ;;  %v8881_v16 = vsel %vm2559_vm2, %v16915_v24, 0 }
 0xc24   : > { %14063 = vrcp.f32 %v8259_v38  ;;  %13465 = vmatprep.subr.bf16.mxu1 %v18455_v14 }
 0xc25   : > { %v14058_v30 = vpop.eup %14057 }
 0xc26   : > { %v8306_v5 = vmul.f32 %v14058_v30, %v16857_v20 }
 0xc28   : > { %v8322_v12 = vpack.c.bf16 %v8306_v5, %v8306_v5 }
 0xc29   : > { %v14060_v62 = vpop.eup %14059 }
 0xc2a   : > { %v8307_v8 = vmul.f32 %v14060_v62, %v16863_v49  ;;  %13456 = vmatmul.mubr.msk.bf16.vlgmr.msra.gmra.mrb[252].mxu1 %vm2363_vm3, %v8322_v12  ;;  %v8262_v51 = vpop.xlane.xlu1 %8261 }
 0xc2b   : > { %13466 = vmatpush3.bf16.msra.mxu1 %v8587_v59  ;;  %14065 = vrcp.f32 %v8262_v51  ;;  %13467 = vmatprep.mubr.msk.bf16.mxu1 %vm14472_vm0, %v18455_v14 }
 0xc2c   : > { %v8323_v13 = vpack.c.bf16 %v8307_v8, %v8307_v8  ;;  %13477 = vmatprep.subr.bf16.mxu1 %v18455_v14 }
 0xc2d   : > { %v14062_v21 = vpop.eup %14061 }
 0xc2e   : > { %v14064_v20 = vpop.eup %14063  ;;  %v8308_v46 = vmul.f32 %v14062_v21, %v16868_v2  ;;  %v8265_v55 = vpop.xlane.xlu1 %8264  ;;  %13462 = vmatmul.mubr.msk.bf16.vlgmr.msra.gmra.mrb[0].mxu0 %vm2363_vm3, %v8323_v13 }
 0xc2f   : > { %14067 = vrcp.f32 %v8265_v55  ;;  %13472 = vmatpush3.bf16.msra.mxu0 %v8636_v60  ;;  %13473 = vmatprep.mubr.msk.bf16.mxu0 %vm14472_vm0, %v18455_v14  ;;  %v8309_v18 = vmul.f32 %v14064_v20, %v16870_v52  ;;  %v8734_v52 = vsel %vm2559_vm2, %v16938_v33, 0 }
 0xc30   : > { %v8324_v49 = vpack.c.bf16 %v8308_v46, %v8308_v46  ;;  %13483 = vmatprep.subr.bf16.mxu0 %v18455_v14 }
 0xc31   : > { %v8325_v11 = vpack.c.bf16 %v8309_v18, %v8309_v18 }
 0xc32   : > { %13468 = vmatmul.mubr.msk.bf16.vlgmr.msra.gmra.mrb[0].mxu1 %vm2363_vm3, %v8324_v49  ;;  %v8271_v34 = vpop.xlane.xlu1 %8270  ;;  %v8268_v2 = vpop.xlane.xlu0 %8267 }
 0xc33   : > { %13478 = vmatpush3.bf16.msra.mxu1 %v8685_v3  ;;  %14069 = vrcp.f32 %v8271_v34  ;;  %13479 = vmatprep.mubr.msk.bf16.mxu1 %vm14472_vm0, %v18455_v14 }
 0xc34   : > { %14071 = vrcp.f32 %v8268_v2  ;;  %13489 = vmatprep.subr.bf16.mxu1 %v18455_v14 }
 0xc35   : > { %v14066_v15 = vpop.eup %14065 }
 0xc36   : > { %v8310_v43 = vmul.f32 %v14066_v15, %v16877_v28  ;;  %13474 = vmatmul.mubr.msk.bf16.vlgmr.msra.gmra.mrb[4].mxu0 %vm2363_vm3, %v8325_v11  ;;  %v8974_v24 = vpop.permute.xlu1 %8973 }
 0xc37   : > { %13484 = vmatpush3.bf16.msra.mxu0 %v8734_v52  ;;  %13485 = vmatprep.mubr.msk.bf16.mxu0 %vm14472_vm0, %v18455_v14  ;;  %v8979_v12 = vsel %vm2559_vm2, %v8974_v24, 0 }
 0xc38   : > { %v8326_v44 = vpack.c.bf16 %v8310_v43, %v8310_v43  ;;  %13495 = vmatprep.subr.bf16.mxu0 %v18455_v14 }
 0xc39   : > { %v14068_v32 = vpop.eup %14067 }
 0xc3a   : > { %v8311_v31 = vmul.f32 %v14068_v32, %v16881_v53  ;;  %13480 = vmatmul.mubr.msk.bf16.vlgmr.msra.gmra.mrb[4].mxu1 %vm2363_vm3, %v8326_v44  ;;  %v8274_v33 = vpop.xlane.xlu0 %8273  ;;  %v18554_v44 = vmov 0   ;;  %v13707_v32 = vld [vmem:[%s14631_s3] sm:$0xff]  }
 0xc3b   : > { %13490 = vmatpush3.bf16.msra.mxu1 %v8783_v41  ;;  %14073 = vrcp.f32 %v8274_v33  ;;  %13491 = vmatprep.mubr.msk.bf16.mxu1 %vm14472_vm0, %v18455_v14  ;;  %v13708_v41 = vld [vmem:[%s14631_s3 + $0x8] sm:$0xff]   ;;  %v13710_v33 = vld [vmem:[%s14631_s3 + $0x18] sm:$0xff]  }
 0xc3c   : > { %v8327_v28 = vpack.c.bf16 %v8311_v31, %v8311_v31  ;;  %13501 = vmatprep.subr.bf16.mxu1 %v18455_v14  ;;  %v13709_v31 = vld [vmem:[%s14631_s3 + $0x10] sm:$0xff]  }
 0xc3d   : > { %v14070_v58 = vpop.eup %14069 }
 0xc3e   : > { %v14072_v9 = vpop.eup %14071  ;;  %13486 = vmatmul.mubr.msk.bf16.vlgmr.msra.gmra.mrb[8].mxu0 %vm2363_vm3, %v8327_v28  ;;  %v8313_v35 = vmul.f32 %v14070_v58, %v16886_v22  ;;  %v8925_v38 = vpop.permute.xlu0 %8924  ;;  %v13711_v58 = vld [vmem:[%s14631_s3 + $0x20] sm:$0xff]  }
 0xc3f   : > { %v8312_v53 = vmul.f32 %v14072_v9, %v16888_v29  ;;  %13496 = vmatpush3.bf16.msra.mxu0 %v8832_v61  ;;  %13497 = vmatprep.mubr.msk.bf16.mxu0 %vm14472_vm0, %v18455_v14  ;;  %v8930_v22 = vsel %vm2559_vm2, %v8925_v38, 0 }
 0xc40   : > { %13507 = vmatprep.subr.bf16.mxu0 %v18455_v14  ;;  %v8329_v1 = vpack.c.bf16 %v8313_v35, %v8313_v35 }
 0xc41   : > { %v8328_v4 = vpack.c.bf16 %v8312_v53, %v8312_v53  ;;  %v13712_v53 = vld [vmem:[%s14631_s3 + $0x28] sm:$0xff]  }
 0xc43   : > { %13492 = vmatmul.mubr.msk.bf16.vlgmr.msra.gmra.mrb[8].mxu1 %vm2363_vm3, %v8328_v4 }
 0xc44   : > { %13502 = vmatpush3.bf16.msra.mxu1 %v8881_v16  ;;  %13503 = vmatprep.mubr.msk.bf16.mxu1 %vm14472_vm0, %v18455_v14  ;;  %v13713_v16 = vld [vmem:[%s14631_s3 + $0x30] sm:$0xff]  }
 0xc45   : > { %v14074_v29 = vpop.eup %14073  ;;  %13513 = vmatprep.subr.bf16.mxu1 %v18455_v14 }
 0xc46   : > { %v8314_v30 = vmul.f32 %v14074_v29, %v16894_v0  ;;  %13498 = vmatmul.mubr.msk.bf16.vlgmr.msra.gmra.mrb[12].mxu0 %vm2363_vm3, %v8329_v1 }
 0xc47   : > { %13508 = vmatpush3.bf16.msra.mxu0 %v8930_v22  ;;  %13509 = vmatprep.mubr.msk.bf16.mxu0 %vm14472_vm0, %v18455_v14 }
 0xc48   : > { %v8330_v5 = vpack.c.bf16 %v8314_v30, %v8314_v30  ;;  %13519 = vmatprep.subr.bf16.mxu0 %v18455_v14 }
 0xc4b   : > { %13504 = vmatmul.mubr.msk.bf16.vlgmr.msra.gmra.mrb[12].mxu1 %vm2363_vm3, %v8330_v5  ;;  %v13714_v5 = vld [vmem:[%s14631_s3 + $0x38] sm:$0xff]  }
 0xc4c   : > { %13514 = vmatpush3.bf16.msra.mxu1 %v8979_v12  ;;  %13515 = vmatprep.mubr.msk.bf16.mxu1 %vm14472_vm0, %v18455_v14 }
 0xc4d   : > { %13525 = vmatprep.subr.bf16.mxu1 %v18455_v14 }
 0xc67   : > { %v8277_v0 = vpop.xlane.xlu1 %8276 }
 0xc68   : > { %14075 = vrcp.f32 %v8277_v0  ;;  %v18555_v0 = vld [vmem:[#allocation18_spill] sm:$0xff] }
 0xc6b   : > { %v8283_v62 = vpop.xlane.xlu1 %8282 }
 0xc6f   : > { %v9072_v59 = vpop.permute.xlu1 %9071  ;;  %v8280_v8 = vpop.xlane.xlu0 %8279 }
 0xc70   : > { %14077 = vrcp.f32 %v8280_v8 }
 0xc71   : > { %14079 = vrcp.f32 %v8283_v62  ;;  %v18556_v62 = vld [vmem:[#allocation12_spill] sm:$0xff] }
 0xc72   : > { %v14076_v51 = vpop.eup %14075 }
 0xc73   : > { %v8315_v13 = vmul.f32 %v14076_v51, %v16907_v23  ;;  %v5232_v21 = vpop.permute.xlu1 %5231  ;;  %v9077_v23 = vsel %vm2559_vm2, %v9072_v59, 0  ;;  %v18557_v59 = vpack.c.bf16 %v18555_v0, %v18556_v62 }
 0xc74   : > { %5255 = vst.msk [vmem:[#allocation4 + $0x8] sm:$0xff] %vm5253_vm4, %v5232_v21 }
 0xc75   : > { %v8331_v20 = vpack.c.bf16 %v8315_v13, %v8315_v13 }
 0xc77   : > { %v7185_v60 = vpop.permute.xlu1 %7184  ;;  %13510 = vmatmul.mubr.msk.bf16.vlgmr.msra.gmra.mrb[16].mxu0 %vm2363_vm3, %v8331_v20 }
 0xc78   : > { %7208 = vst.msk [vmem:[#allocation4 + $0x8] sm:$0xff] %vm7206_vm5, %v7185_v60  ;;  %13521 = vmatprep.mubr.msk.bf16.mxu0 %vm14472_vm0, %v18455_v14 }
 0xc7a   : > { %v14078_v46 = vpop.eup %14077 }
 0xc7b   : > { %v8316_v55 = vmul.f32 %v14078_v46, %v16919_v47  ;;  %v14080_v18 = vpop.eup %14079 }
 0xc7c   : > { %v8317_v34 = vmul.f32 %v14080_v18, %v16913_v39  ;;  %v18559_v18 = vld [vmem:[#allocation14_spill] sm:$0xff] }
 0xc7d   : > { %v8332_v49 = vpack.c.bf16 %v8316_v55, %v8316_v55 }
 0xc7e   : > { %v8333_v47 = vpack.c.bf16 %v8317_v34, %v8317_v34 }
 0xc7f   : > { %13516 = vmatmul.mubr.msk.bf16.vlgmr.msra.gmra.mrb[16].mxu1 %vm2363_vm3, %v8332_v49  ;;  %v8286_v3 = vpop.xlane.xlu0 %8285  ;;  %v18558_v49 = vld [vmem:[#allocation17_spill] sm:$0xff] }
 0xc80   : > { %13526 = vmatpush3.bf16.msra.mxu1 %v9077_v23  ;;  %14081 = vrcp.f32 %v8286_v3  ;;  %13527 = vmatprep.mubr.msk.bf16.mxu1 %vm14472_vm0, %v18455_v14  ;;  %v18560_v23 = vpack.c.bf16 %v18558_v49, %v18559_v18 }
 0xc83   : > { %v9023_v2 = vpop.permute.xlu0 %9022 }
 0xc84   : > { %v9028_v11 = vsel %vm2559_vm2, %v9023_v2, 0 }
 0xc85   : > { %13520 = vmatpush3.bf16.msra.mxu0 %v9028_v11 }
 0xc86   : > { %13531 = vmatprep.subr.bf16.mxu0 %v13707_v32 }
 0xc87   : > { %v5230_v15 = vpop.permute.xlu0 %5229 }
 0xc88   : > { %5254 = vst.msk [vmem:[#allocation4] sm:$0xff] %vm5253_vm4, %v5230_v15  ;;  %13522 = vmatmul.mubr.msk.bf16.vlgmr.msra.gmra.mrb[20].mxu0 %vm2363_vm3, %v8333_v47 }
 0xc89   : > { %13532 = vmatpush3.bf16.msra.mxu0 %v13707_v32 }
 0xc8a   : > { %v14082_v52 = vpop.eup %14081  ;;  %13533 = vmatprep.subr.bf16.mxu0 %v13708_v41 }
 0xc8b   : > { %v8318_v43 = vmul.f32 %v14082_v52, %v16926_v42  ;;  %v7183_v14 = vpop.permute.xlu0 %7182  ;;  %v18561_v52 = vld [vmem:[#allocation22_spill] sm:$0xff] }
 0xc8c   : > { %7207 = vst.msk [vmem:[#allocation4] sm:$0xff] %vm7206_vm5, %v7183_v14 }
 0xc8d   : > { %v8334_v39 = vpack.c.bf16 %v8318_v43, %v8318_v43  ;;  %13534 = vmatpush3.bf16.msra.mxu0 %v13708_v41  ;;  %v18562_v43 = vld [vmem:[#allocation23_spill] sm:$0xff] }
 0xc8e   : > { %13535 = vmatprep.subr.bf16.mxu0 %v13709_v31  ;;  %v18563_v14 = vpack.c.bf16 %v18561_v52, %v18562_v43 }
 0xc8f   : > { %13528 = vmatmul.mubr.msk.bf16.vlgmr.msra.gmra.mrb[20].mxu1 %vm2363_vm3, %v8334_v39 }
 0xc90   : > { %9836 = vmatprep.mubr.bf16.mxu1 %v18554_v44 }
 0xc91   : > { %13536 = vmatpush3.bf16.msra.mxu0 %v13709_v31 }
 0xc92   : > { %13537 = vmatprep.subr.bf16.mxu0 %v13710_v33 }
 0xc95   : > { %13538 = vmatpush3.bf16.msra.mxu0 %v13710_v33 }
 0xc96   : > { %13539 = vmatprep.subr.bf16.mxu0 %v13711_v58 }
 0xc99   : > { %13540 = vmatpush3.bf16.msra.mxu0 %v13711_v58  ;;  %v18565_v58 = vld [vmem:[#allocation40_spill] sm:$0xff] }
 0xc9a   : > { %13541 = vmatprep.subr.bf16.mxu0 %v13712_v53 }
 0xc9d   : > { %13542 = vmatpush3.bf16.msra.mxu0 %v13712_v53 }
 0xc9e   : > { %13543 = vmatprep.subr.bf16.mxu0 %v13713_v16 }
 0xca1   : > { %13544 = vmatpush3.bf16.msra.mxu0 %v13713_v16 }
 0xca2   : > { %13545 = vmatprep.subr.bf16.mxu0 %v13714_v5 }
 0xca5   : > { %13546 = vmatpush3.bf16.msra.mxu0 %v13714_v5 }
 0xcea   : > { %v8378_v42 = vpop.f32.mrb[248].mxu0 }
 0xceb   : > { %v13439_v28 = vpop.f32.mrb[249].mxu0 }
 0xcec   : > { %v8381_v9 = vpop.f32.mrb[250].mxu0  ;;  %v18564_v28 = vld [vmem:[#allocation41_spill] sm:$0xff] }
 0xced   : > { %v13440_v61 = vpop.f32.mrb[251].mxu0  ;;  %v18566_v9 = vpack.c.bf16 %v18564_v28, %v18565_v58 }
 0xcf2   : > { %v8476_v35 = vpop.f32.mrb[252].mxu0 }
 0xcf3   : > { %v13451_v4 = vpop.f32.mrb[253].mxu0 }
 0xcf4   : > { %v8479_v38 = vpop.f32.mrb[254].mxu0 }
 0xcf5   : > { %v8427_v1 = vpop.f32.mrb[248].mxu1  ;;  %v13452_v29 = vpop.f32.mrb[255].mxu0 }
 0xcf6   : > { %v9119_v30 = vpack.c.bf16 %v8427_v1, %v8378_v42  ;;  %v13445_v22 = vpop.f32.mrb[249].mxu1  ;;  %v18567_v29 = vld [vmem:[#allocation43_spill] sm:$0xff] }
 0xcf7   : > { %v8430_v24 = vpop.f32.mrb[250].mxu1 }
 0xcf8   : > { %v13446_v12 = vpop.f32.mrb[251].mxu1  ;;  %9135 = vrot.lane.b32.xlu0 %v9119_v30, %s14473_s22  ;;  %v18568_v30 = vld [vmem:[#allocation42_spill] sm:$0xff] }
 0xcf9   : > { %v18569_v22 = vpack.c.bf16 %v18567_v29, %v18568_v30  ;;  %v14374_v30 = vld [vmem:[#allocation2] sm:$0xff] }
 0xcfc   : > { %5233 = vrot.lane.b32.xlu0 %v18557_v59, %s14475_s6 }
 0xcfd   : > { %v8525_v8 = vpop.f32.mrb[252].mxu1 }
 0xcfe   : > { %v9120_v51 = vpack.c.bf16 %v8525_v8, %v8476_v35  ;;  %v13457_v13 = vpop.f32.mrb[253].mxu1 }
 0xcff   : > { %v8528_v21 = vpop.f32.mrb[254].mxu1 }
 0xd00   : > { %v13458_v20 = vpop.f32.mrb[255].mxu1  ;;  %7186 = vrot.lane.b32.xlu0 %v7168_v37, %s14474_s16  ;;  %9137 = vrot.lane.b32.xlu1 %v9120_v51, %s14473_s22 }
 0xd01   : > { %v8574_v60 = vpop.f32.mrb[0].mxu0 }
 0xd02   : > { %v13463_v46 = vpop.f32.mrb[1].mxu0 }
 0xd03   : > { %v8577_v55 = vpop.f32.mrb[2].mxu0 }
 0xd04   : > { %5235 = vrot.lane.b32.xlu1 %v18560_v23, %s14475_s6  ;;  %v13464_v3 = vpop.f32.mrb[3].mxu0 }
 0xd05   : > { %v8623_v34 = vpop.f32.mrb[0].mxu1 }
 0xd06   : > { %v9121_v2 = vpack.c.bf16 %v8623_v34, %v8574_v60  ;;  %v13469_v11 = vpop.f32.mrb[1].mxu1 }
 0xd07   : > { %v8626_v47 = vpop.f32.mrb[2].mxu1 }
 0xd08   : > { %v13470_v15 = vpop.f32.mrb[3].mxu1  ;;  %7188 = vrot.lane.b32.xlu1 %v7169_v36, %s14474_s16  ;;  %9139 = vrot.lane.b32.xlu0 %v9121_v2, %s14473_s22 }
 0xd09   : > { %v8672_v50 = vpop.f32.mrb[4].mxu0 }
 0xd0a   : > { %v13475_v26 = vpop.f32.mrb[5].mxu0 }
 0xd0b   : > { %v8675_v37 = vpop.f32.mrb[6].mxu0 }
 0xd0c   : > { %5237 = vrot.lane.b32.xlu0 %v18563_v14, %s14475_s6  ;;  %v13476_v39 = vpop.f32.mrb[7].mxu0 }
 0xd0d   : > { %v8721_v32 = vpop.f32.mrb[4].mxu1 }
 0xd0e   : > { %v9122_v41 = vpack.c.bf16 %v8721_v32, %v8672_v50  ;;  %v13481_v31 = vpop.f32.mrb[5].mxu1 }
 0xd0f   : > { %v8724_v33 = vpop.f32.mrb[6].mxu1 }
 0xd10   : > { %v13482_v42 = vpop.f32.mrb[7].mxu1  ;;  %7190 = vrot.lane.b32.xlu0 %v7170_v6, %s14474_s16  ;;  %9141 = vrot.lane.b32.xlu1 %v9122_v41, %s14473_s22 }
 0xd11   : > { %v8770_v63 = vpop.f32.mrb[8].mxu0 }
 0xd12   : > { %v13487_v27 = vpop.f32.mrb[9].mxu0 }
 0xd13   : > { %v8773_v36 = vpop.f32.mrb[10].mxu0 }
 0xd14   : > { %5239 = vrot.lane.b32.xlu1 %v18566_v9, %s14475_s6  ;;  %v13488_v61 = vpop.f32.mrb[11].mxu0 }
 0xd16   : > { %v8819_v53 = vpop.f32.mrb[8].mxu1 }
 0xd17   : > { %v9123_v35 = vpack.c.bf16 %v8819_v53, %v8770_v63  ;;  %v13493_v4 = vpop.f32.mrb[9].mxu1 }
 0xd18   : > { %v8822_v16 = vpop.f32.mrb[10].mxu1  ;;  %7192 = vrot.lane.b32.xlu1 %v7171_v45, %s14474_s16  ;;  %v18572_v45 = vpack.c.bf16 %v18570_v7, %v18571_v25  ;;  %v14377_v25 = vld [vmem:[#allocation2 + $0x18] sm:$0xff] }
 0xd19   : > { %v13494_v56 = vpop.f32.mrb[11].mxu1  ;;  %9143 = vrot.lane.b32.xlu0 %v9123_v35, %s14473_s22  ;;  %v8868_v48 = vpop.f32.mrb[12].mxu0  ;;  %v17141_v16 = vld [vmem:[%s18573_s29] ss:$0 sm:$0xff] }
 0xd1a   : > { %v13499_v6 = vpop.f32.mrb[13].mxu0 }
 0xd1b   : > { %v8871_v38 = vpop.f32.mrb[14].mxu0 }
 0xd1c   : > { %v13500_v1 = vpop.f32.mrb[15].mxu0 }
 0xd1d   : > { %5241 = vrot.lane.b32.xlu0 %v18569_v22, %s14475_s6 }
 0xd1e   : > { %v8917_v24 = vpop.f32.mrb[12].mxu1 }
 0xd1f   : > { %v9124_v5 = vpack.c.bf16 %v8917_v24, %v8868_v48  ;;  %v13505_v12 = vpop.f32.mrb[13].mxu1 }
 0xd20   : > { %v8920_v0 = vpop.f32.mrb[14].mxu1 }
 0xd21   : > { %v13506_v62 = vpop.f32.mrb[15].mxu1  ;;  %7194 = vrot.lane.b32.xlu0 %v7172_v54, %s14474_s16  ;;  %9145 = vrot.lane.b32.xlu1 %v9124_v5, %s14473_s22  ;;  %v14375_v5 = vld [vmem:[#allocation2 + $0x8] sm:$0xff]  ;;  %v14376_v0 = vld [vmem:[#allocation2 + $0x10] sm:$0xff] }
 0xd25   : > { %5243 = vrot.lane.b32.xlu1 %v18572_v45, %s14475_s6 }
 0xd29   : > { %7196 = vrot.lane.b32.xlu1 %v7173_v40, %s14474_s16 }
 0xd4a   : > { %v8966_v59 = vpop.f32.mrb[16].mxu0 }
 0xd4b   : > { %v13511_v8 = vpop.f32.mrb[17].mxu0 }
 0xd4c   : > { %v8969_v51 = vpop.f32.mrb[18].mxu0 }
 0xd4d   : > { %v13512_v13 = vpop.f32.mrb[19].mxu0 }
 0xd52   : > { %v9015_v21 = vpop.f32.mrb[16].mxu1 }
 0xd53   : > { %v9125_v20 = vpack.c.bf16 %v9015_v21, %v8966_v59  ;;  %v13517_v10 = vpop.f32.mrb[17].mxu1 }
 0xd54   : > { %v9018_v57 = vpop.f32.mrb[18].mxu1  ;;  %v14378_v10 = vld [vmem:[#allocation2 + $0x20] sm:$0xff] }
 0xd55   : > { %v13518_v54 = vpop.f32.mrb[19].mxu1  ;;  %9147 = vrot.lane.b32.xlu0 %v9125_v20, %s14473_s22 }
 0xd5b   : > { %v9064_v60 = vpop.f32.mrb[20].mxu0 }
 0xd5c   : > { %v13523_v46 = vpop.f32.mrb[21].mxu0 }
 0xd5d   : > { %v9067_v55 = vpop.f32.mrb[22].mxu0  ;;  %v14379_v46 = vld [vmem:[#allocation2 + $0x28] sm:$0xff] }
 0xd5e   : > { %v13524_v49 = vpop.f32.mrb[23].mxu0 }
 0xd5f   : > { %v14380_v49 = vld [vmem:[#allocation2 + $0x30] sm:$0xff] }
 0xd62   : > { %v9113_v18 = vpop.f32.mrb[20].mxu1 }
 0xd63   : > { %v9126_v23 = vpack.c.bf16 %v9113_v18, %v9064_v60  ;;  %v13529_v3 = vpop.f32.mrb[21].mxu1 }
 0xd64   : > { %v9116_v19 = vpop.f32.mrb[22].mxu1 }
 0xd65   : > { %v13530_v17 = vpop.f32.mrb[23].mxu1  ;;  %9149 = vrot.lane.b32.xlu1 %v9126_v23, %s14473_s22  ;;  %v14381_v23 = vld [vmem:[#allocation2 + $0x38] sm:$0xff]  ;;  %s18591_s22 = scalar_lea.vmem %s18278_s9, %s14600_s18  ;;  %s18665_s18 = sld [smem:[#allocation5_spill]] }
 0xd6a   : > { %v9136_v40 = vpop.permute.xlu0 %9135 }
 0xd6b   : > { %9160 = vst.msk [vmem:[#allocation4] sm:$0xff] %vm9159_vm6, %v9136_v40  ;;  %p12188_p8 = scmp.ne.s32.totalorder %s18665_s18, 1 }
 0xd6c   : > { %s18666_s25 = sld [smem:[#allocation61_spill]] (!%p12188_p8)  ;;  %s18668_s18 = sld [smem:[#allocation59_spill]] (!%p12188_p8) }
 0xd6e   : > { %v5234_v34 = vpop.permute.xlu0 %5233 }
 0xd6f   : > { %5256 = vst.msk [vmem:[#allocation4 + $0x10] sm:$0xff] %vm5253_vm4, %v5234_v34 }
 0xd72   : > { %v7187_v2 = vpop.permute.xlu0 %7186  ;;  %v9138_v11 = vpop.permute.xlu1 %9137  ;;  %v9168_v47 = vld [vmem:[#allocation4] sm:$0xff]  ;;  %s18667_s16 = smov (!%p12188_p8), %s18666_s25 }
 0xd73   : > { %7209 = vst.msk [vmem:[#allocation4 + $0x10] sm:$0xff] %vm7206_vm5, %v7187_v2  ;;  %13547 = vmatprep.mubr.bf16.mxu0 %v9168_v47  ;;  %v14382_v47 = vld [vmem:[#allocation2 + $0x40] sm:$0xff] }
 0xd74   : > { %9161 = vst.msk [vmem:[#allocation4 + $0x8] sm:$0xff] %vm9159_vm6, %v9138_v11 }
 0xd76   : > { %v5236_v15 = vpop.permute.xlu1 %5235 }
 0xd77   : > { %5257 = vst.msk [vmem:[#allocation4 + $0x18] sm:$0xff] %vm5253_vm4, %v5236_v15 }
 0xd7a   : > { %v7189_v50 = vpop.permute.xlu1 %7188  ;;  %v9140_v26 = vpop.permute.xlu0 %9139 }
 0xd7b   : > { %v9169_v37 = vld [vmem:[#allocation4 + $0x8] sm:$0xff]  ;;  %7210 = vst.msk [vmem:[#allocation4 + $0x18] sm:$0xff] %vm7206_vm5, %v7189_v50 }
 0xd7c   : > { %9162 = vst.msk [vmem:[#allocation4 + $0x10] sm:$0xff] %vm9159_vm6, %v9140_v26  ;;  %13548 = vmatmul.mubr.bf16.vlgmr.msra.gmra.mrb[24].mxu0 %v9169_v37  ;;  %v14383_v37 = vld [vmem:[#allocation2 + $0x48] sm:$0xff] }
 0xd7e   : > { %v5238_v52 = vpop.permute.xlu0 %5237 }
 0xd7f   : > { %5258 = vst.msk [vmem:[#allocation4 + $0x20] sm:$0xff] %vm5253_vm4, %v5238_v52 }
 0xd82   : > { %v7191_v43 = vpop.permute.xlu0 %7190  ;;  %v9142_v14 = vpop.permute.xlu1 %9141 }
 0xd83   : > { %v9170_v39 = vld [vmem:[#allocation4 + $0x10] sm:$0xff]  ;;  %7211 = vst.msk [vmem:[#allocation4 + $0x20] sm:$0xff] %vm7206_vm5, %v7191_v43 }
 0xd84   : > { %9163 = vst.msk [vmem:[#allocation4 + $0x18] sm:$0xff] %vm9159_vm6, %v9142_v14  ;;  %13551 = vmatprep.mubr.bf16.mxu0 %v9170_v39  ;;  %v14384_v43 = vld [vmem:[#allocation2 + $0x50] sm:$0xff]  ;;  %v14385_v39 = vld [vmem:[#allocation2 + $0x58] sm:$0xff] }
 0xd86   : > { %v5240_v32 = vpop.permute.xlu1 %5239 }
 0xd87   : > { %5259 = vst.msk [vmem:[#allocation4 + $0x28] sm:$0xff] %vm5253_vm4, %v5240_v32 }
 0xd8a   : > { %v7193_v41 = vpop.permute.xlu1 %7192 }
 0xd8b   : > { %v9171_v31 = vld [vmem:[#allocation4 + $0x18] sm:$0xff]  ;;  %7212 = vst.msk [vmem:[#allocation4 + $0x28] sm:$0xff] %vm7206_vm5, %v7193_v41  ;;  %v9144_v33 = vpop.permute.xlu0 %9143 }
 0xd8c   : > { %13552 = vmatmul.mubr.bf16.gmra.mrb[28].mxu0 %v9171_v31  ;;  %9164 = vst.msk [vmem:[#allocation4 + $0x20] sm:$0xff] %vm9159_vm6, %v9144_v33 }
 0xd8f   : > { %v5242_v42 = vpop.permute.xlu0 %5241 }
 0xd90   : > { %5260 = vst.msk [vmem:[#allocation4 + $0x30] sm:$0xff] %vm5253_vm4, %v5242_v42 }
 0xd93   : > { %v7195_v63 = vpop.permute.xlu0 %7194  ;;  %v9146_v27 = vpop.permute.xlu1 %9145  ;;  %v9172_v36 = vld [vmem:[#allocation4 + $0x20] sm:$0xff] }
 0xd94   : > { %7213 = vst.msk [vmem:[#allocation4 + $0x30] sm:$0xff] %vm7206_vm5, %v7195_v63  ;;  %13555 = vmatprep.mubr.bf16.mxu0 %v9172_v36  ;;  %v14386_v36 = vld [vmem:[#allocation2 + $0x60] sm:$0xff] }
 0xd95   : > { %9165 = vst.msk [vmem:[#allocation4 + $0x28] sm:$0xff] %vm9159_vm6, %v9146_v27 }
 0xd97   : > { %v5244_v28 = vpop.permute.xlu1 %5243 }
 0xd98   : > { %5261 = vst.msk [vmem:[#allocation4 + $0x38] sm:$0xff] %vm5253_vm4, %v5244_v28 }
 0xd9b   : > { %v7197_v58 = vpop.permute.xlu1 %7196 }
 0xd9c   : > { %v9173_v9 = vld [vmem:[#allocation4 + $0x28] sm:$0xff]  ;;  %7214 = vst.msk [vmem:[#allocation4 + $0x38] sm:$0xff] %vm7206_vm5, %v7197_v58 }
 0xd9d   : > { %13556 = vmatmul.mubr.bf16.gmra.mrb[32].mxu0 %v9173_v9 }
 0xdc7   : > { %v9148_v61 = vpop.permute.xlu0 %9147 }
 0xdc8   : > { %9166 = vst.msk [vmem:[#allocation4 + $0x30] sm:$0xff] %vm9159_vm6, %v9148_v61  ;;  %v14387_v61 = vld [vmem:[#allocation2 + $0x68] sm:$0xff] }
 0xdcf   : > { %v9174_v53 = vld [vmem:[#allocation4 + $0x30] sm:$0xff] }
 0xdd0   : > { %13559 = vmatprep.mubr.bf16.mxu0 %v9174_v53 }
 0xdd7   : > { %v9150_v35 = vpop.permute.xlu1 %9149 }
 0xdd8   : > { %9167 = vst.msk [vmem:[#allocation4 + $0x38] sm:$0xff] %vm9159_vm6, %v9150_v35  ;;  %v14388_v35 = vld [vmem:[#allocation2 + $0x70] sm:$0xff] }
 0xddf   : > { %v9175_v4 = vld [vmem:[#allocation4 + $0x38] sm:$0xff] }
 0xde0   : > { %13560 = vmatmul.mubr.bf16.gmra.mrb[36].mxu0 %v9175_v4 }
 0xde1   : > { %9949 = vmatprep.mubr.bf16.mxu0 %v18554_v44 }
 0xe4f   : > { %v13549_v56 = vpop.f32.mrb[24].mxu0 }
 0xe50   : > { %v9281_v48 = vpop.f32.mrb[25].mxu0  ;;  %v9290_v29 = vadd.f32 %v13549_v56, %v17141_v16  ;;  %v14389_v56 = vld [vmem:[#allocation2 + $0x78] sm:$0xff] }
 0xe51   : > { %v9282_v6 = vadd.f32 %v17141_v16, %v9281_v48  ;;  %v13550_v38 = vpop.f32.mrb[26].mxu0 }
 0xe52   : > { %v9284_v1 = vpop.f32.mrb[27].mxu0  ;;  %v17151_v62 = vadd.f32 %v14376_v0, %v9290_v29  ;;  %v9293_v7 = vadd.f32 %v13550_v38, %v17141_v16  ;;  %v13718_v38 = vld [vmem:[%s14649_s5 + $0x8] ss:$16 sps:$4 sm:$0xff]   ;;  %v13723_v29 = vld [vmem:[%s14649_s5 + $0x24] ss:$16 sps:$4 sm:$0xff]  }
 0xe53   : > { %v17145_v22 = vadd.f32 %v14374_v30, %v9282_v6  ;;  %v9285_v24 = vadd.f32 %v17141_v16, %v9284_v1  ;;  %v13717_v6 = vld [vmem:[%s14649_s5 + $0x4] ss:$16 sps:$4 sm:$0xff]   ;;  %v13720_v1 = vld [vmem:[%s14649_s5 + $0xc] ss:$16 sps:$4 sm:$0xff]  }
 0xe54   : > { %18576 = vst [vmem:[#allocation27_spill] sm:$0xff] %v17151_v62  ;;  %v17156_v45 = vadd.f32 %v14377_v25, %v9293_v7  ;;  %9804 = vmatprep.subr.bf16.mxu1 %v13717_v6  ;;  %v13726_v30 = vld [vmem:[%s14649_s5 + $0x2c] ss:$16 sps:$4 sm:$0xff]   ;;  %9917 = vmatprep.subr.bf16.mxu0 %v13720_v1  ;;  %v13741_v6 = vld [vmem:[%s14649_s5 + $0x84] ss:$16 sps:$4 sm:$0xff]  }
 0xe55   : > { %18574 = vst [vmem:[#allocation47_spill] sm:$0xff] %v17145_v22  ;;  %v17148_v12 = vadd.f32 %v14375_v5, %v9285_v24  ;;  %9362 = vadd.xlane.f32.xlu0 %v17145_v22  ;;  %v13721_v24 = vld [vmem:[%s14649_s5 + $0x20] ss:$16 sps:$4 sm:$0xff]   ;;  %9918 = vmatpush1.bf16.msra.mxu0 %v13718_v38  ;;  %v13724_v5 = vld [vmem:[%s14649_s5 + $0x28] ss:$16 sps:$4 sm:$0xff]  }
 0xe56   : > { %18577 = vst [vmem:[#allocation46_spill] sm:$0xff] %v17156_v45  ;;  %9919 = vmatprep.subr.bf16.mxu0 %v13726_v30  ;;  %v13744_v38 = vld [vmem:[%s14649_s5 + $0x8c] ss:$16 sps:$4 sm:$0xff]   ;;  %v13739_v1 = vld [vmem:[%s14649_s5 + $0x80] ss:$16 sps:$4 sm:$0xff]  }
 0xe57   : > { %18575 = vst [vmem:[#allocation16_spill] sm:$0xff] %v17148_v12  ;;  %9364 = vadd.xlane.f32.xlu1 %v17148_v12 }
 0xe59   : > { %9366 = vadd.xlane.f32.xlu0 %v17151_v62  ;;  %9920 = vmatpush1.bf16.msra.mxu0 %v13724_v5  ;;  %v13747_v5 = vld [vmem:[%s14649_s5 + $0xa4] ss:$16 sps:$4 sm:$0xff]  }
 0xe5d   : > { %9368 = vadd.xlane.f32.xlu0 %v17156_v45 }
 0xe5f   : > { %v13553_v59 = vpop.f32.mrb[28].mxu0 }
 0xe60   : > { %v9297_v8 = vpop.f32.mrb[29].mxu0  ;;  %v9306_v20 = vadd.f32 %v13553_v59, %v17141_v16 }
 0xe61   : > { %v9298_v51 = vadd.f32 %v17141_v16, %v9297_v8  ;;  %v13554_v13 = vpop.f32.mrb[30].mxu0 }
 0xe62   : > { %v9300_v21 = vpop.f32.mrb[31].mxu0  ;;  %v9309_v60 = vadd.f32 %v13554_v13, %v17141_v16  ;;  %v17168_v18 = vadd.f32 %v14380_v49, %v9306_v20 }
 0xe63   : > { %v17161_v57 = vadd.f32 %v14378_v10, %v9298_v51  ;;  %v9301_v54 = vadd.f32 %v17141_v16, %v9300_v21 }
 0xe64   : > { %18580 = vst [vmem:[#allocation20_spill] sm:$0xff] %v17168_v18  ;;  %v17171_v3 = vadd.f32 %v14381_v23, %v9309_v60 }
 0xe65   : > { %18578 = vst [vmem:[#allocation19_spill] sm:$0xff] %v17161_v57  ;;  %v17165_v55 = vadd.f32 %v14379_v46, %v9301_v54  ;;  %9370 = vadd.xlane.f32.xlu0 %v17161_v57 }
 0xe66   : > { %18581 = vst [vmem:[#allocation34_spill] sm:$0xff] %v17171_v3 }
 0xe67   : > { %18579 = vst [vmem:[#allocation33_spill] sm:$0xff] %v17165_v55  ;;  %9372 = vadd.xlane.f32.xlu1 %v17165_v55 }
 0xe69   : > { %9374 = vadd.xlane.f32.xlu0 %v17168_v18 }
 0xe6b   : > { %9376 = vadd.xlane.f32.xlu1 %v17171_v3 }
 0xe70   : > { %v13557_v19 = vpop.f32.mrb[32].mxu0 }
 0xe71   : > { %v9313_v17 = vpop.f32.mrb[33].mxu0  ;;  %v9322_v11 = vadd.f32 %v13557_v19, %v17141_v16 }
 0xe72   : > { %v9314_v40 = vadd.f32 %v17141_v16, %v9313_v17  ;;  %v13558_v34 = vpop.f32.mrb[34].mxu0 }
 0xe73   : > { %v9316_v2 = vpop.f32.mrb[35].mxu0  ;;  %v9325_v26 = vadd.f32 %v13558_v34, %v17141_v16  ;;  %v17184_v14 = vadd.f32 %v14384_v43, %v9322_v11 }
 0xe74   : > { %v17177_v15 = vadd.f32 %v14382_v47, %v9314_v40  ;;  %v9317_v50 = vadd.f32 %v17141_v16, %v9316_v2 }
 0xe75   : > { %18584 = vst [vmem:[#allocation35_spill] sm:$0xff] %v17184_v14  ;;  %v17187_v32 = vadd.f32 %v14385_v39, %v9325_v26  ;;  %v13729_v39 = vld [vmem:[%s14649_s5 + $0x44] ss:$16 sps:$4 sm:$0xff]  }
 0xe76   : > { %18582 = vst [vmem:[#allocation48_spill] sm:$0xff] %v17177_v15  ;;  %v17181_v52 = vadd.f32 %v14383_v37, %v9317_v50  ;;  %9378 = vadd.xlane.f32.xlu0 %v17177_v15 }
 0xe77   : > { %18585 = vst [vmem:[#allocation49_spill] sm:$0xff] %v17187_v32 }
 0xe78   : > { %18583 = vst [vmem:[#allocation24_spill] sm:$0xff] %v17181_v52  ;;  %9380 = vadd.xlane.f32.xlu1 %v17181_v52 }
 0xe7a   : > { %9382 = vadd.xlane.f32.xlu0 %v17184_v14 }
 0xe7c   : > { %9384 = vadd.xlane.f32.xlu1 %v17187_v32 }
 0xeb3   : > { %v13561_v41 = vpop.f32.mrb[36].mxu0 }
 0xeb4   : > { %v9329_v31 = vpop.f32.mrb[37].mxu0  ;;  %v9338_v27 = vadd.f32 %v13561_v41, %v17141_v16  ;;  %v13732_v41 = vld [vmem:[%s14649_s5 + $0x4c] ss:$16 sps:$4 sm:$0xff]  }
 0xeb5   : > { %v9330_v33 = vadd.f32 %v17141_v16, %v9329_v31  ;;  %v13562_v42 = vpop.f32.mrb[38].mxu0  ;;  %9921 = vmatprep.subr.bf16.mxu0 %v13732_v41  ;;  %v13762_v41 = vld [vmem:[%s14649_s5 + $0xec] ss:$16 sps:$4 sm:$0xff]  }
 0xeb6   : > { %v9332_v63 = vpop.f32.mrb[39].mxu0  ;;  %v9341_v9 = vadd.f32 %v13562_v42, %v17141_v16  ;;  %v17200_v4 = vadd.f32 %v14388_v35, %v9338_v27  ;;  %v13730_v27 = vld [vmem:[%s14649_s5 + $0x48] ss:$16 sps:$4 sm:$0xff]  }
 0xeb7   : > { %v17193_v28 = vadd.f32 %v14386_v36, %v9330_v33  ;;  %v9333_v58 = vadd.f32 %v17141_v16, %v9332_v63  ;;  %v13715_v16 = vld [vmem:[%s14649_s5] ss:$16 sps:$4 sm:$0xff]   ;;  %9922 = vmatpush1.bf16.msra.mxu0 %v13730_v27 }
 0xeb8   : > { %18588 = vst [vmem:[#allocation30_spill] sm:$0xff] %v17200_v4  ;;  %v17203_v48 = vadd.f32 %v14389_v56, %v9341_v9  ;;  %9805 = vmatpush1.bf16.msra.mxu1 %v13715_v16  ;;  %v13727_v63 = vld [vmem:[%s14649_s5 + $0x40] ss:$16 sps:$4 sm:$0xff]   ;;  %v13735_v9 = vld [vmem:[%s14649_s5 + $0x64] ss:$16 sps:$4 sm:$0xff]  }
 0xeb9   : > { %18586 = vst [vmem:[#allocation21_spill] sm:$0xff] %v17193_v28  ;;  %v17197_v53 = vadd.f32 %v14387_v61, %v9333_v58  ;;  %9386 = vadd.xlane.f32.xlu0 %v17193_v28  ;;  %9806 = vmatprep.subr.bf16.mxu1 %v13723_v29  ;;  %v13738_v61 = vld [vmem:[%s14649_s5 + $0x6c] ss:$16 sps:$4 sm:$0xff]   ;;  %v13733_v56 = vld [vmem:[%s14649_s5 + $0x60] ss:$16 sps:$4 sm:$0xff]  }
 0xeba   : > { %18589 = vst [vmem:[#allocation31_spill] sm:$0xff] %v17203_v48  ;;  %v13736_v16 = vld [vmem:[%s14649_s5 + $0x68] ss:$16 sps:$4 sm:$0xff]   ;;  %9923 = vmatprep.subr.bf16.mxu0 %v13738_v61 }
 0xebb   : > { %18587 = vst [vmem:[#allocation29_spill] sm:$0xff] %v17197_v53  ;;  %9388 = vadd.xlane.f32.xlu1 %v17197_v53  ;;  %9924 = vmatpush1.bf16.msra.mxu0 %v13736_v16  ;;  %v13742_v29 = vld [vmem:[%s14649_s5 + $0x88] ss:$16 sps:$4 sm:$0xff]  }
 0xebc   : > { %9807 = vmatpush1.bf16.msra.mxu1 %v13721_v24  ;;  %9925 = vmatprep.subr.bf16.mxu0 %v13744_v38 }
 0xebd   : > { %9390 = vadd.xlane.f32.xlu0 %v17200_v4  ;;  %9808 = vmatprep.subr.bf16.mxu1 %v13729_v39  ;;  %v13759_v39 = vld [vmem:[%s14649_s5 + $0xe4] ss:$16 sps:$4 sm:$0xff]  }
 0xebf   : > { %9392 = vadd.xlane.f32.xlu1 %v17203_v48  ;;  %9926 = vmatpush1.bf16.msra.mxu0 %v13742_v29 }
 0xec0   : > { %9809 = vmatpush1.bf16.msra.mxu1 %v13727_v63 }
 0xec1   : > { %9810 = vmatprep.subr.bf16.mxu1 %v13735_v9 }
 0xec4   : > { %9811 = vmatpush1.bf16.msra.mxu1 %v13733_v56 }
 0xec5   : > { %9812 = vmatprep.subr.bf16.mxu1 %v13741_v6 }
 0xec8   : > { %9813 = vmatpush1.bf16.msra.mxu1 %v13739_v1 }
 0xec9   : > { %9814 = vmatprep.subr.bf16.mxu1 %v13747_v5 }
 0xee2   : > { %v9363_v0 = vpop.xlane.xlu0 %9362 }
 0xee3   : > { %v9394_v7 = vmul.f32 0.0078125, %v9363_v0  ;;  %v13750_v0 = vld [vmem:[%s14649_s5 + $0xac] ss:$16 sps:$4 sm:$0xff]  }
 0xee4   : > { %v9365_v25 = vpop.xlane.xlu1 %9364  ;;  %9927 = vmatprep.subr.bf16.mxu0 %v13750_v0 }
 0xee5   : > { %v17216_v59 = vsub.f32 %v17145_v22, %v9394_v7  ;;  %v9395_v8 = vmul.f32 0.0078125, %v9365_v25  ;;  %v13745_v25 = vld [vmem:[%s14649_s5 + $0xa0] ss:$16 sps:$4 sm:$0xff]  }
 0xee6   : > { %v9367_v51 = vpop.xlane.xlu0 %9366  ;;  %9815 = vmatpush1.bf16.msra.mxu1 %v13745_v25 }
 0xee7   : > { %v17219_v13 = vsub.f32 %v17148_v12, %v9395_v8  ;;  %v9396_v21 = vmul.f32 0.0078125, %v9367_v51  ;;  %v9426_v20 = vmul.f32 %v17216_v59, %v17216_v59  ;;  %v13748_v8 = vld [vmem:[%s14649_s5 + $0xa8] ss:$16 sps:$4 sm:$0xff]  }
 0xee8   : > { %9928 = vmatpush1.bf16.msra.mxu0 %v13748_v8 }
 0xee9   : > { %v17224_v10 = vsub.f32 %v17151_v62, %v9396_v21  ;;  %9442 = vadd.xlane.f32.xlu0 %v9426_v20  ;;  %v9427_v54 = vmul.f32 %v17219_v13, %v17219_v13 }
 0xeea   : > { %v9369_v60 = vpop.xlane.xlu0 %9368 }
 0xeeb   : > { %v9397_v46 = vmul.f32 0.0078125, %v9369_v60  ;;  %9444 = vadd.xlane.f32.xlu1 %v9427_v54  ;;  %v9428_v49 = vmul.f32 %v17224_v10, %v17224_v10 }
 0xeed   : > { %v17231_v23 = vsub.f32 %v17156_v45, %v9397_v46  ;;  %9446 = vadd.xlane.f32.xlu0 %v9428_v49  ;;  %v13753_v49 = vld [vmem:[%s14649_s5 + $0xc4] ss:$16 sps:$4 sm:$0xff]  }
 0xeee   : > { %9816 = vmatprep.subr.bf16.mxu1 %v13753_v49 }
 0xeef   : > { %v9429_v19 = vmul.f32 %v17231_v23, %v17231_v23 }
 0xef1   : > { %9448 = vadd.xlane.f32.xlu1 %v9429_v19  ;;  %v13756_v19 = vld [vmem:[%s14649_s5 + $0xcc] ss:$16 sps:$4 sm:$0xff]  }
 0xef2   : > { %v9371_v17 = vpop.xlane.xlu0 %9370  ;;  %9929 = vmatprep.subr.bf16.mxu0 %v13756_v19 }
 0xef3   : > { %v9398_v40 = vmul.f32 0.0078125, %v9371_v17 }
 0xef4   : > { %v9373_v34 = vpop.xlane.xlu1 %9372 }
 0xef5   : > { %v17236_v2 = vsub.f32 %v17161_v57, %v9398_v40  ;;  %v9399_v11 = vmul.f32 0.0078125, %v9373_v34  ;;  %v13751_v40 = vld [vmem:[%s14649_s5 + $0xc0] ss:$16 sps:$4 sm:$0xff]   ;;  %v13754_v34 = vld [vmem:[%s14649_s5 + $0xc8] ss:$16 sps:$4 sm:$0xff]  }
 0xef6   : > { %v9375_v47 = vpop.xlane.xlu0 %9374  ;;  %9817 = vmatpush1.bf16.msra.mxu1 %v13751_v40  ;;  %9930 = vmatpush1.bf16.msra.mxu0 %v13754_v34 }
 0xef7   : > { %v17239_v50 = vsub.f32 %v17165_v55, %v9399_v11  ;;  %v9400_v26 = vmul.f32 0.0078125, %v9375_v47  ;;  %v9430_v37 = vmul.f32 %v17236_v2, %v17236_v2  ;;  %9818 = vmatprep.subr.bf16.mxu1 %v13759_v39  ;;  %9931 = vmatprep.subr.bf16.mxu0 %v13762_v41 }
 0xef8   : > { %v9377_v43 = vpop.xlane.xlu1 %9376 }
 0xef9   : > { %v17246_v31 = vsub.f32 %v17168_v18, %v9400_v26  ;;  %v9401_v33 = vmul.f32 0.0078125, %v9377_v43  ;;  %9450 = vadd.xlane.f32.xlu0 %v9430_v37  ;;  %v9431_v42 = vmul.f32 %v17239_v50, %v17239_v50 }
 0xefb   : > { %v17253_v36 = vsub.f32 %v17171_v3, %v9401_v33  ;;  %9452 = vadd.xlane.f32.xlu1 %v9431_v42  ;;  %v9432_v58 = vmul.f32 %v17246_v31, %v17246_v31  ;;  %v13757_v33 = vld [vmem:[%s14649_s5 + $0xe0] ss:$16 sps:$4 sm:$0xff]   ;;  %v13760_v42 = vld [vmem:[%s14649_s5 + $0xe8] ss:$16 sps:$4 sm:$0xff]  }
 0xefc   : > { %9819 = vmatpush1.bf16.msra.mxu1 %v13757_v33  ;;  %9932 = vmatpush1.bf16.msra.mxu0 %v13760_v42 }
 0xefd   : > { %9454 = vadd.xlane.f32.xlu0 %v9432_v58  ;;  %v9433_v35 = vmul.f32 %v17253_v36, %v17253_v36 }
 0xeff   : > { %9456 = vadd.xlane.f32.xlu1 %v9433_v35 }
 0xf03   : > { %v9379_v30 = vpop.xlane.xlu0 %9378 }
 0xf04   : > { %v9402_v24 = vmul.f32 0.0078125, %v9379_v30 }
 0xf05   : > { %v9381_v7 = vpop.xlane.xlu1 %9380 }
 0xf06   : > { %v17272_v51 = vsub.f32 %v17177_v15, %v9402_v24  ;;  %v9403_v21 = vmul.f32 0.0078125, %v9381_v7 }
 0xf07   : > { %v9383_v20 = vpop.xlane.xlu0 %9382 }
 0xf08   : > { %v17275_v54 = vsub.f32 %v17181_v52, %v9403_v21  ;;  %v9404_v60 = vmul.f32 0.0078125, %v9383_v20  ;;  %v9434_v46 = vmul.f32 %v17272_v51, %v17272_v51 }
 0xf09   : > { %v9385_v17 = vpop.xlane.xlu1 %9384 }
 0xf0a   : > { %v17284_v11 = vsub.f32 %v17184_v14, %v9404_v60  ;;  %v9405_v47 = vmul.f32 0.0078125, %v9385_v17  ;;  %9458 = vadd.xlane.f32.xlu0 %v9434_v46  ;;  %v9435_v26 = vmul.f32 %v17275_v54, %v17275_v54 }
 0xf0c   : > { %v17289_v37 = vsub.f32 %v17187_v32, %v9405_v47  ;;  %9460 = vadd.xlane.f32.xlu1 %v9435_v26  ;;  %v9436_v43 = vmul.f32 %v17284_v11, %v17284_v11 }
 0xf0e   : > { %9462 = vadd.xlane.f32.xlu0 %v9436_v43  ;;  %v9437_v63 = vmul.f32 %v17289_v37, %v17289_v37  ;;  %v17324_v43 = vld [vmem:[%s18590_s20] ss:$0 sm:$0xff] }
 0xf10   : > { %9464 = vadd.xlane.f32.xlu1 %v9437_v63 }
 0xf46   : > { %v9387_v27 = vpop.xlane.xlu0 %9386 }
 0xf47   : > { %v9406_v58 = vmul.f32 0.0078125, %v9387_v27 }
 0xf48   : > { %v9389_v9 = vpop.xlane.xlu1 %9388 }
 0xf49   : > { %v17300_v61 = vsub.f32 %v17193_v28, %v9406_v58  ;;  %v9407_v35 = vmul.f32 0.0078125, %v9389_v9 }
 0xf4a   : > { %v9391_v56 = vpop.xlane.xlu0 %9390 }
 0xf4b   : > { %v17303_v16 = vsub.f32 %v17197_v53, %v9407_v35  ;;  %v9408_v6 = vmul.f32 0.0078125, %v9391_v56  ;;  %v9438_v38 = vmul.f32 %v17300_v61, %v17300_v61  ;;  %v17334_v35 = vld [vmem:[%s18591_s22] ss:$0 sm:$0xff] }
 0xf4c   : > { %v9393_v1 = vpop.xlane.xlu1 %9392 }
 0xf4d   : > { %v17308_v29 = vsub.f32 %v17200_v4, %v9408_v6  ;;  %v9409_v30 = vmul.f32 0.0078125, %v9393_v1  ;;  %9466 = vadd.xlane.f32.xlu0 %v9438_v38  ;;  %v9439_v24 = vmul.f32 %v17303_v16, %v17303_v16 }
 0xf4f   : > { %v17313_v5 = vsub.f32 %v17203_v48, %v9409_v30  ;;  %9468 = vadd.xlane.f32.xlu1 %v9439_v24  ;;  %v9440_v0 = vmul.f32 %v17308_v29, %v17308_v29 }
 0xf51   : > { %9470 = vadd.xlane.f32.xlu0 %v9440_v0  ;;  %v9441_v7 = vmul.f32 %v17313_v5, %v17313_v5 }
 0xf53   : > { %9472 = vadd.xlane.f32.xlu1 %v9441_v7 }
 0xf76   : > { %v9443_v25 = vpop.xlane.xlu0 %9442 }
 0xf77   : > { %v9474_v8 = vmul.f32 0.0078125, %v9443_v25 }
 0xf78   : > { %v9445_v21 = vpop.xlane.xlu1 %9444 }
 0xf79   : > { %v9490_v20 = vadd.f32 1e-05, %v9474_v8  ;;  %v9475_v60 = vmul.f32 0.0078125, %v9445_v21 }
 0xf7a   : > { %v9447_v46 = vpop.xlane.xlu0 %9446 }
 0xf7b   : > { %14083 = vrsqrt.f32 %v9490_v20  ;;  %v9491_v49 = vadd.f32 1e-05, %v9475_v60  ;;  %v9476_v19 = vmul.f32 0.0078125, %v9447_v46 }
 0xf7d   : > { %14085 = vrsqrt.f32 %v9491_v49  ;;  %v9492_v17 = vadd.f32 1e-05, %v9476_v19 }
 0xf7e   : > { %v9449_v40 = vpop.xlane.xlu1 %9448 }
 0xf7f   : > { %14087 = vrsqrt.f32 %v9492_v17  ;;  %v9477_v34 = vmul.f32 0.0078125, %v9449_v40 }
 0xf81   : > { %v9493_v47 = vadd.f32 1e-05, %v9477_v34 }
 0xf83   : > { %14089 = vrsqrt.f32 %v9493_v47 }
 0xf85   : > { %v14084_v26 = vpop.eup %14083 }
 0xf86   : > { %v9522_v39 = vmul.f32 %v14084_v26, %v17216_v59  ;;  %v9451_v41 = vpop.xlane.xlu0 %9450 }
 0xf87   : > { %v14086_v33 = vpop.eup %14085  ;;  %v9478_v42 = vmul.f32 0.0078125, %v9451_v41 }
 0xf88   : > { %v9544_v63 = vmul.f32 %v17324_v43, %v9522_v39  ;;  %v9523_v27 = vmul.f32 %v14086_v33, %v17219_v13  ;;  %v9453_v58 = vpop.xlane.xlu1 %9452 }
 0xf89   : > { %v14088_v9 = vpop.eup %14087  ;;  %v9494_v56 = vadd.f32 1e-05, %v9478_v42  ;;  %v9479_v6 = vmul.f32 0.0078125, %v9453_v58 }
 0xf8a   : > { %v9545_v38 = vmul.f32 %v17324_v43, %v9523_v27  ;;  %v9455_v59 = vpop.xlane.xlu0 %9454  ;;  %v9566_v24 = vadd.f32 %v17334_v35, %v9544_v63  ;;  %v9524_v0 = vmul.f32 %v14088_v9, %v17224_v10 }
 0xf8b   : > { %14091 = vrsqrt.f32 %v9494_v56  ;;  %v9495_v1 = vadd.f32 1e-05, %v9479_v6  ;;  %v9480_v30 = vmul.f32 0.0078125, %v9455_v59 }
 0xf8c   : > { %v9567_v13 = vadd.f32 %v17334_v35, %v9545_v38  ;;  %v9457_v7 = vpop.xlane.xlu1 %9456  ;;  %v9546_v49 = vmul.f32 %v17324_v43, %v9524_v0 }
 0xf8d   : > { %v14090_v25 = vpop.eup %14089  ;;  %14093 = vrsqrt.f32 %v9495_v1  ;;  %v9496_v8 = vadd.f32 1e-05, %v9480_v30  ;;  %v9481_v21 = vmul.f32 0.0078125, %v9457_v7 }
 0xf8e   : > { %v9582_v20 = vpack.c.bf16 %v9567_v13, %v9566_v24  ;;  %v9525_v60 = vmul.f32 %v14090_v25, %v17231_v23  ;;  %v9568_v17 = vadd.f32 %v17334_v35, %v9546_v49 }
 0xf8f   : > { %14095 = vrsqrt.f32 %v9496_v8  ;;  %v9497_v46 = vadd.f32 1e-05, %v9481_v21 }
 0xf90   : > { %v9547_v19 = vmul.f32 %v17324_v43, %v9525_v60  ;;  %9837 = vmatmul.mubr.bf16.vlgmr.msra.gmra.mrb[24].mxu1 %v9582_v20  ;;  %9950 = vmatmul.mubr.bf16.vlgmr.msra.gmra.mrb[40].mxu0 %v9582_v20 }
 0xf91   : > { %14097 = vrsqrt.f32 %v9497_v46  ;;  %9846 = vmatprep.mubr.bf16.mxu1 %v18554_v44  ;;  %9959 = vmatprep.mubr.bf16.mxu0 %v18554_v44 }
 0xf92   : > { %v9569_v10 = vadd.f32 %v17334_v35, %v9547_v19 }
 0xf94   : > { %v9583_v34 = vpack.c.bf16 %v9569_v10, %v9568_v17 }
 0xf95   : > { %v14092_v40 = vpop.eup %14091 }
 0xf96   : > { %v9526_v23 = vmul.f32 %v14092_v40, %v17236_v2 }
 0xf97   : > { %v14094_v47 = vpop.eup %14093  ;;  %v9459_v26 = vpop.xlane.xlu0 %9458 }
 0xf98   : > { %v9548_v39 = vmul.f32 %v17324_v43, %v9526_v23  ;;  %v9527_v41 = vmul.f32 %v14094_v47, %v17239_v50  ;;  %v9482_v33 = vmul.f32 0.0078125, %v9459_v26  ;;  %9847 = vmatmul.mubr.bf16.gmra.mrb[28].mxu1 %v9583_v34  ;;  %9960 = vmatmul.mubr.bf16.gmra.mrb[44].mxu0 %v9583_v34 }
 0xf99   : > { %v14096_v42 = vpop.eup %14095  ;;  %v9461_v63 = vpop.xlane.xlu1 %9460  ;;  %9856 = vmatprep.mubr.bf16.mxu1 %v18554_v44  ;;  %9969 = vmatprep.mubr.bf16.mxu0 %v18554_v44 }
 0xf9a   : > { %v9549_v27 = vmul.f32 %v17324_v43, %v9527_v41  ;;  %v9498_v58 = vadd.f32 1e-05, %v9482_v33  ;;  %v9570_v2 = vadd.f32 %v17334_v35, %v9548_v39  ;;  %v9483_v56 = vmul.f32 0.0078125, %v9461_v63 }
 0xf9b   : > { %v14098_v9 = vpop.eup %14097  ;;  %v9463_v6 = vpop.xlane.xlu0 %9462  ;;  %v9528_v50 = vmul.f32 %v14096_v42, %v17246_v31 }
 0xf9c   : > { %v9571_v38 = vadd.f32 %v17334_v35, %v9549_v27  ;;  %v9529_v59 = vmul.f32 %v14098_v9, %v17253_v36  ;;  %14099 = vrsqrt.f32 %v9498_v58  ;;  %v9499_v1 = vadd.f32 1e-05, %v9483_v56 }
 0xf9d   : > { %v9484_v30 = vmul.f32 0.0078125, %v9463_v6  ;;  %v9465_v24 = vpop.xlane.xlu1 %9464  ;;  %v9550_v8 = vmul.f32 %v17324_v43, %v9528_v50 }
 0xf9e   : > { %v9584_v13 = vpack.c.bf16 %v9571_v38, %v9570_v2  ;;  %v9551_v0 = vmul.f32 %v17324_v43, %v9529_v59  ;;  %v9485_v7 = vmul.f32 0.0078125, %v9465_v24  ;;  %14101 = vrsqrt.f32 %v9499_v1 }
 0xf9f   : > { %v9500_v25 = vadd.f32 1e-05, %v9484_v30  ;;  %v9572_v36 = vadd.f32 %v17334_v35, %v9550_v8 }
 0xfa0   : > { %v9501_v21 = vadd.f32 1e-05, %v9485_v7  ;;  %9857 = vmatmul.mubr.bf16.gmra.mrb[32].mxu1 %v9584_v13  ;;  %9970 = vmatmul.mubr.bf16.gmra.mrb[48].mxu0 %v9584_v13  ;;  %v9573_v31 = vadd.f32 %v17334_v35, %v9551_v0  ;;  %v13763_v0 = vld [vmem:[%s14660_s2 + $0x40] sm:$0xff]  }
 0xfa1   : > { %14103 = vrsqrt.f32 %v9500_v25  ;;  %9866 = vmatprep.mubr.bf16.mxu1 %v18554_v44  ;;  %9979 = vmatprep.mubr.bf16.mxu0 %v18554_v44  ;;  %v17384_v7 = vld [vmem:[%s14660_s2 + $0xc0] sm:$0xff]  }
 0xfa2   : > { %14105 = vrsqrt.f32 %v9501_v21  ;;  %v9585_v60 = vpack.c.bf16 %v9573_v31, %v9572_v36  ;;  %v13765_v21 = vld [vmem:[%s14660_s2] sm:$0xff]   ;;  %12587 = vmatprep.subr.bf16.mxu1 %v13763_v0  ;;  %12651 = vmatprep.subr.bf16.mxu0 %v17384_v7 }
 0xfa3   : > { %v17390_v31 = vld [vmem:[%s14660_s2 + $0x80] sm:$0xff]   ;;  %12588 = vmatpush3.bf16.msra.mxu1 %v13765_v21 }
 0xfa4   : > { %12652 = vmatpush3.bf16.msra.mxu0 %v17390_v31  ;;  %v18603_v0 = vld [vmem:[#allocation11_spill] sm:$0xff] }
 0xfa6   : > { %v14100_v20 = vpop.eup %14099 }
 0xfa7   : > { %v9530_v46 = vmul.f32 %v14100_v20, %v17272_v51 }
 0xfa8   : > { %9867 = vmatmul.mubr.bf16.gmra.mrb[36].mxu1 %v9585_v60  ;;  %9980 = vmatmul.mubr.bf16.gmra.mrb[52].mxu0 %v9585_v60  ;;  %v14102_v49 = vpop.eup %14101 }
 0xfa9   : > { %9876 = vmatprep.mubr.bf16.mxu1 %v18554_v44  ;;  %9989 = vmatprep.mubr.bf16.mxu0 %v18554_v44  ;;  %v9552_v19 = vmul.f32 %v17324_v43, %v9530_v46  ;;  %v9531_v10 = vmul.f32 %v14102_v49, %v17275_v54 }
 0xfab   : > { %v14104_v17 = vpop.eup %14103  ;;  %v9553_v34 = vmul.f32 %v17324_v43, %v9531_v10  ;;  %v9574_v47 = vadd.f32 %v17334_v35, %v9552_v19 }
 0xfac   : > { %v14106_v40 = vpop.eup %14105  ;;  %v9532_v26 = vmul.f32 %v14104_v17, %v17284_v11 }
 0xfad   : > { %v9533_v23 = vmul.f32 %v14106_v40, %v17289_v37  ;;  %v9575_v51 = vadd.f32 %v17334_v35, %v9553_v34  ;;  %v13767_v34 = vld [vmem:[%s14660_s2 + $0x48] sm:$0xff]  }
 0xfae   : > { %v9554_v33 = vmul.f32 %v17324_v43, %v9532_v26  ;;  %12589 = vmatprep.subr.bf16.mxu1 %v13767_v34  ;;  %v17421_v26 = vld [vmem:[%s14660_s2 + $0x90] sm:$0xff]  }
 0xfaf   : > { %v9586_v39 = vpack.c.bf16 %v9575_v51, %v9574_v47  ;;  %v9555_v41 = vmul.f32 %v17324_v43, %v9533_v23  ;;  %v13769_v23 = vld [vmem:[%s14660_s2 + $0x8] sm:$0xff]   ;;  %v13773_v51 = vld [vmem:[%s14660_s2 + $0x10] sm:$0xff]   ;;  %18592 = vst [vmem:[#allocation37_spill] sm:$0xff] %v17421_v26 }
 0xfb0   : > { %v9576_v37 = vadd.f32 %v17334_v35, %v9554_v33  ;;  %v17411_v47 = vld [vmem:[%s14660_s2 + $0x88] sm:$0xff]   ;;  %12590 = vmatpush3.bf16.msra.mxu1 %v13769_v23  ;;  %v13777_v33 = vld [vmem:[%s14660_s2 + $0x18] sm:$0xff]  }
 0xfb1   : > { %9877 = vmatmul.mubr.bf16.gmra.mrb[40].mxu1 %v9586_v39  ;;  %9990 = vmatmul.mubr.bf16.gmra.mrb[56].mxu0 %v9586_v39  ;;  %v9577_v54 = vadd.f32 %v17334_v35, %v9555_v41  ;;  %v13775_v39 = vld [vmem:[%s14660_s2 + $0x58] sm:$0xff]  }
 0xfb2   : > { %9886 = vmatprep.mubr.bf16.mxu1 %v18554_v44  ;;  %9999 = vmatprep.mubr.bf16.mxu0 %v18554_v44  ;;  %v17427_v41 = vld [vmem:[%s14660_s2 + $0xd8] sm:$0xff]  }
 0xfb3   : > { %v9587_v42 = vpack.c.bf16 %v9577_v54, %v9576_v37  ;;  %18593 = vst [vmem:[#allocation32_spill] sm:$0xff] %v17427_v41  ;;  %v17431_v54 = vld [vmem:[%s14660_s2 + $0x98] sm:$0xff]   ;;  %v13779_v37 = vld [vmem:[%s14660_s2 + $0x60] sm:$0xff]  }
 0xfb4   : > { %18594 = vst [vmem:[#allocation36_spill] sm:$0xff] %v17431_v54 }
 0xfb9   : > { %9887 = vmatmul.mubr.bf16.gmra.mrb[44].mxu1 %v9587_v42  ;;  %10000 = vmatmul.mubr.bf16.gmra.mrb[60].mxu0 %v9587_v42  ;;  %v17437_v42 = vld [vmem:[%s14660_s2 + $0xe0] sm:$0xff]  }
 0xfba   : > { %9896 = vmatprep.mubr.bf16.mxu1 %v18554_v44  ;;  %10009 = vmatprep.mubr.bf16.mxu0 %v18554_v44  ;;  %18595 = vst [vmem:[#allocation38_spill] sm:$0xff] %v17437_v42 }
 0xfda   : > { %v9467_v11 = vpop.xlane.xlu0 %9466 }
 0xfdb   : > { %v9486_v63 = vmul.f32 0.0078125, %v9467_v11  ;;  %v13781_v11 = vld [vmem:[%s14660_s2 + $0x20] sm:$0xff]  }
 0xfdc   : > { %v9469_v27 = vpop.xlane.xlu1 %9468 }
 0xfdd   : > { %v9502_v58 = vadd.f32 1e-05, %v9486_v63  ;;  %v9487_v9 = vmul.f32 0.0078125, %v9469_v27  ;;  %v17441_v63 = vld [vmem:[%s14660_s2 + $0xa0] sm:$0xff]   ;;  %v13783_v27 = vld [vmem:[%s14660_s2 + $0x68] sm:$0xff]  }
 0xfde   : > { %v9471_v2 = vpop.xlane.xlu0 %9470  ;;  %18596 = vst [vmem:[#allocation15_spill] sm:$0xff] %v17441_v63 }
 0xfdf   : > { %14107 = vrsqrt.f32 %v9502_v58  ;;  %v9503_v56 = vadd.f32 1e-05, %v9487_v9  ;;  %v9488_v6 = vmul.f32 0.0078125, %v9471_v2  ;;  %v17447_v58 = vld [vmem:[%s14660_s2 + $0xe8] sm:$0xff]  }
 0xfe0   : > { %v9473_v38 = vpop.xlane.xlu1 %9472  ;;  %18597 = vst [vmem:[#allocation39_spill] sm:$0xff] %v17447_v58  ;;  %v13785_v9 = vld [vmem:[%s14660_s2 + $0x28] sm:$0xff]  }
 0xfe1   : > { %14109 = vrsqrt.f32 %v9503_v56  ;;  %v9504_v50 = vadd.f32 1e-05, %v9488_v6  ;;  %v9489_v59 = vmul.f32 0.0078125, %v9473_v38  ;;  %v17451_v2 = vld [vmem:[%s14660_s2 + $0xa8] sm:$0xff]   ;;  %v13787_v56 = vld [vmem:[%s14660_s2 + $0x70] sm:$0xff]  }
 0xfe2   : > { %18598 = vst [vmem:[#allocation13_spill] sm:$0xff] %v17451_v2  ;;  %v17457_v6 = vld [vmem:[%s14660_s2 + $0xf0] sm:$0xff]  }
 0xfe3   : > { %14111 = vrsqrt.f32 %v9504_v50  ;;  %v9505_v1 = vadd.f32 1e-05, %v9489_v59  ;;  %18599 = vst [vmem:[#allocation25_spill] sm:$0xff] %v17457_v6  ;;  %v13789_v38 = vld [vmem:[%s14660_s2 + $0x30] sm:$0xff]   ;;  %v13791_v59 = vld [vmem:[%s14660_s2 + $0x78] sm:$0xff]  }
 0xfe4   : > { %v17461_v50 = vld [vmem:[%s14660_s2 + $0xb0] sm:$0xff]  }
 0xfe5   : > { %14113 = vrsqrt.f32 %v9505_v1  ;;  %18600 = vst [vmem:[#allocation28_spill] sm:$0xff] %v17461_v50  ;;  %v17467_v1 = vld [vmem:[%s14660_s2 + $0xf8] sm:$0xff]  }
 0xfe6   : > { %18601 = vst [vmem:[#allocation26_spill] sm:$0xff] %v17467_v1 }
 0xfe9   : > { %v14108_v30 = vpop.eup %14107 }
 0xfea   : > { %v9534_v24 = vmul.f32 %v14108_v30, %v17300_v61  ;;  %v13793_v30 = vld [vmem:[%s14660_s2 + $0x38] sm:$0xff]  }
 0xfeb   : > { %v14110_v13 = vpop.eup %14109 }
 0xfec   : > { %v9556_v25 = vmul.f32 %v17324_v43, %v9534_v24  ;;  %v9535_v8 = vmul.f32 %v14110_v13, %v17303_v16  ;;  %v17471_v24 = vld [vmem:[%s14660_s2 + $0xb8] sm:$0xff]   ;;  %v9622_v13 = vld [vmem:[%s14655_s27] sm:$0xf] }
 0xfed   : > { %v14112_v36 = vpop.eup %14111  ;;  %18602 = vst [vmem:[#allocation18_spill] sm:$0xff] %v17471_v24 }
 0xfee   : > { %v9557_v20 = vmul.f32 %v17324_v43, %v9535_v8  ;;  %v9578_v60 = vadd.f32 %v17334_v35, %v9556_v25  ;;  %v9536_v16 = vmul.f32 %v14112_v36, %v17308_v29  ;;  %v9638_v25 = vsub.s32 3, %v18603_v0 }
 0xfef   : > { %v14114_v61 = vpop.eup %14113  ;;  %v18604_v8 = vsub.s32 0, %v18603_v0  ;;  %v18605_v36 = vsub.s32 2, %v18603_v0 }
 0xff0   : > { %v9579_v46 = vadd.f32 %v17334_v35, %v9557_v20  ;;  %v9537_v49 = vmul.f32 %v14114_v61, %v17313_v5  ;;  %v9558_v17 = vmul.f32 %v17324_v43, %v9536_v16  ;;  %v18606_v61 = vsub.s32 1, %v18603_v0 }
 0xff1   : > { %v17480_v21 = vrot.slane %v9622_v13, %v18604_v8  ;;  %v17484_v20 = vrot.slane %v9622_v13, %v18605_v36 }
 0xff2   : > { %v9588_v19 = vpack.c.bf16 %v9579_v46, %v9578_v60  ;;  %v9559_v10 = vmul.f32 %v17324_v43, %v9537_v49  ;;  %v9580_v5 = vadd.f32 %v17334_v35, %v9558_v17  ;;  %v17407_v43 = vld [vmem:[%s14660_s2 + $0xc8] sm:$0xff]   ;;  %v17488_v60 = vrot.slane %v9622_v13, %v18606_v61 }
 0xff3   : > { %12653 = vmatprep.subr.bf16.mxu0 %v17407_v43  ;;  %v17490_v46 = vrot.slane %v9622_v13, %v9638_v25 }
 0xff4   : > { %9897 = vmatmul.mubr.bf16.gmra.mrb[48].mxu1 %v9588_v19  ;;  %10010 = vmatmul.mubr.bf16.gmra.mrb[64].mxu0 %v9588_v19  ;;  %v9581_v29 = vadd.f32 %v17334_v35, %v9559_v10  ;;  %v17417_v35 = vld [vmem:[%s14660_s2 + $0xd0] sm:$0xff]  }
 0xff5   : > { %9906 = vmatprep.mubr.bf16.mxu1 %v18554_v44  ;;  %10019 = vmatprep.mubr.bf16.mxu0 %v18554_v44  ;;  %v13771_v44 = vld [vmem:[%s14660_s2 + $0x50] sm:$0xff]  }
 0xff6   : > { %v9589_v40 = vpack.c.bf16 %v9581_v29, %v9580_v5  ;;  %12654 = vmatpush3.bf16.msra.mxu0 %v17411_v47  ;;  %12591 = vmatprep.subr.bf16.mxu1 %v13771_v44 }
 0xff7   : > { %12655 = vmatprep.subr.bf16.mxu0 %v17417_v35  ;;  %12592 = vmatpush3.bf16.msra.mxu1 %v13773_v51 }
 0xff8   : > { %12593 = vmatprep.subr.bf16.mxu1 %v13775_v39 }
 0xffa   : > { %12656 = vmatpush3.bf16.msra.mxu0 %v17421_v26 }
 0xffb   : > { %12657 = vmatprep.subr.bf16.mxu0 %v17427_v41  ;;  %12594 = vmatpush3.bf16.msra.mxu1 %v13777_v33 }
 0xffc   : > { %9907 = vmatmul.mubr.bf16.gmra.mrb[52].mxu1 %v9589_v40  ;;  %10020 = vmatmul.mubr.bf16.gmra.mrb[68].mxu0 %v9589_v40 }
 0xffd   : > { %12595 = vmatprep.subr.bf16.mxu1 %v13779_v37 }
 0xffe   : > { %12658 = vmatpush3.bf16.msra.mxu0 %v17431_v54 }
 0xfff   : > { %12659 = vmatprep.subr.bf16.mxu0 %v17437_v42  ;;  %12596 = vmatpush3.bf16.msra.mxu1 %v13781_v11 }
0x1000   : > { %12597 = vmatprep.subr.bf16.mxu1 %v13783_v27 }
0x1002   : > { %12660 = vmatpush3.bf16.msra.mxu0 %v17441_v63 }
0x1003   : > { %12661 = vmatprep.subr.bf16.mxu0 %v17447_v58  ;;  %12598 = vmatpush3.bf16.msra.mxu1 %v13785_v9 }
0x1004   : > { %12599 = vmatprep.subr.bf16.mxu1 %v13787_v56 }
0x1006   : > { %12662 = vmatpush3.bf16.msra.mxu0 %v17451_v2 }
0x1007   : > { %12663 = vmatprep.subr.bf16.mxu0 %v17457_v6  ;;  %12600 = vmatpush3.bf16.msra.mxu1 %v13789_v38 }
0x1008   : > { %12601 = vmatprep.subr.bf16.mxu1 %v13791_v59 }
0x100a   : > { %12664 = vmatpush3.bf16.msra.mxu0 %v17461_v50 }
0x100b   : > { %12665 = vmatprep.subr.bf16.mxu0 %v17467_v1  ;;  %12602 = vmatpush3.bf16.msra.mxu1 %v13793_v30 }
0x100c   : > { %13595 = vmatprep.subr.bf16.mxu1 %v17384_v7 }
0x100e   : > { %12666 = vmatpush3.bf16.msra.mxu0 %v17471_v24 }
0x1063   : > { %v9838_v16 = vpop.f32.mrb[24].mxu1  ;;  %v9951_v49 = vpop.f32.mrb[40].mxu0 }
0x1064   : > { %v17493_v7 = vadd.f32 %v9838_v16, %v17480_v21  ;;  %v17496_v19 = vadd.f32 %v9951_v49, %v17484_v20  ;;  %v9840_v10 = vpop.f32.mrb[25].mxu1  ;;  %v9953_v17 = vpop.f32.mrb[41].mxu0 }
0x1065   : > { %v17499_v29 = vadd.f32 %v9840_v10, %v17488_v60  ;;  %v17502_v5 = vadd.f32 %v9953_v17, %v17490_v46  ;;  %v9842_v40 = vpop.f32.mrb[26].mxu1  ;;  %v9955_v34 = vpop.f32.mrb[42].mxu0 }
0x1066   : > { %v12091_v23 = vmul.f32 -1.702, %v17493_v7  ;;  %v12093_v44 = vmul.f32 -1.702, %v17496_v19  ;;  %v17507_v51 = vadd.f32 %v9842_v40, %v17480_v21  ;;  %v17510_v39 = vadd.f32 %v9955_v34, %v17484_v20  ;;  %v9844_v33 = vpop.f32.mrb[27].mxu1  ;;  %v9957_v37 = vpop.f32.mrb[43].mxu0 }
0x1067   : > { %v12092_v11 = vmul.f32 -1.702, %v17499_v29  ;;  %v12094_v27 = vmul.f32 -1.702, %v17502_v5  ;;  %v17515_v9 = vadd.f32 %v9844_v33, %v17488_v60  ;;  %v17518_v56 = vadd.f32 %v9957_v37, %v17490_v46 }
0x1068   : > { %v10158_v38 = vmul.f32 1.442695, %v12091_v23  ;;  %v10162_v59 = vmul.f32 1.442695, %v12093_v44  ;;  %v12095_v30 = vmul.f32 -1.702, %v17507_v51 }
0x1069   : > { %v10160_v13 = vmul.f32 1.442695, %v12092_v11  ;;  %v10164_v0 = vmul.f32 1.442695, %v12094_v27  ;;  %v12097_v25 = vmul.f32 -1.702, %v17510_v39 }
0x106a   : > { %14115 = vpow2.f32 %v10158_v38  ;;  %v10166_v8 = vmul.f32 1.442695, %v12095_v30  ;;  %v12096_v36 = vmul.f32 -1.702, %v17515_v9  ;;  %v12098_v61 = vmul.f32 -1.702, %v17518_v56 }
0x106b   : > { %14117 = vpow2.f32 %v10162_v59  ;;  %v10170_v16 = vmul.f32 1.442695, %v12097_v25  ;;  %v9848_v49 = vpop.f32.mrb[28].mxu1  ;;  %v9961_v10 = vpop.f32.mrb[44].mxu0 }
0x106c   : > { %14119 = vpow2.f32 %v10160_v13  ;;  %v10168_v17 = vmul.f32 1.442695, %v12096_v36  ;;  %v10172_v40 = vmul.f32 1.442695, %v12098_v61  ;;  %v17525_v34 = vadd.f32 %v9848_v49, %v17480_v21  ;;  %v9850_v23 = vpop.f32.mrb[29].mxu1  ;;  %v9963_v44 = vpop.f32.mrb[45].mxu0 }
0x106d   : > { %14121 = vpow2.f32 %v10164_v0  ;;  %v17528_v33 = vadd.f32 %v9961_v10, %v17484_v20  ;;  %v17531_v37 = vadd.f32 %v9850_v23, %v17488_v60  ;;  %v17534_v11 = vadd.f32 %v9963_v44, %v17490_v46  ;;  %v9852_v27 = vpop.f32.mrb[30].mxu1  ;;  %v9965_v38 = vpop.f32.mrb[46].mxu0 }
0x106e   : > { %14123 = vpow2.f32 %v10166_v8  ;;  %v12099_v59 = vmul.f32 -1.702, %v17525_v34  ;;  %v17538_v30 = vadd.f32 %v9852_v27, %v17480_v21  ;;  %v9854_v13 = vpop.f32.mrb[31].mxu1  ;;  %v9967_v25 = vpop.f32.mrb[47].mxu0  ;;  %v17545_v48 = vadd.f32 %v9965_v38, %v17484_v20 }
0x106f   : > { %14125 = vpow2.f32 %v10170_v16  ;;  %v12101_v0 = vmul.f32 -1.702, %v17528_v33  ;;  %v12100_v36 = vmul.f32 -1.702, %v17531_v37  ;;  %v12102_v61 = vmul.f32 -1.702, %v17534_v11 }
0x1070   : > { %14127 = vpow2.f32 %v10168_v17  ;;  %v10174_v49 = vmul.f32 1.442695, %v12099_v59  ;;  %v12103_v10 = vmul.f32 -1.702, %v17538_v30  ;;  %v12105_v14 = vmul.f32 -1.702, %v17545_v48 }
0x1071   : > { %14129 = vpow2.f32 %v10172_v40  ;;  %v10178_v8 = vmul.f32 1.442695, %v12101_v0  ;;  %v10176_v23 = vmul.f32 1.442695, %v12100_v36  ;;  %v10180_v44 = vmul.f32 1.442695, %v12102_v61 }
0x1072   : > { %14131 = vpow2.f32 %v10174_v49  ;;  %v10182_v27 = vmul.f32 1.442695, %v12103_v10  ;;  %v17548_v40 = vadd.f32 %v9854_v13, %v17488_v60 }
0x1073   : > { %14133 = vpow2.f32 %v10178_v8  ;;  %v9858_v16 = vpop.f32.mrb[32].mxu1  ;;  %v9971_v4 = vpop.f32.mrb[48].mxu0 }
0x1074   : > { %v14116_v53 = vpop.eup %14115  ;;  %14135 = vpow2.f32 %v10176_v23  ;;  %v9860_v28 = vpop.f32.mrb[33].mxu1  ;;  %v12104_v3 = vmul.f32 -1.702, %v17548_v40 }
0x1075   : > { %v9973_v32 = vpop.f32.mrb[49].mxu0  ;;  %v14118_v17 = vpop.eup %14117  ;;  %v10286_v59 = vadd.f32 1.0, %v14116_v53  ;;  %14137 = vpow2.f32 %v10180_v44  ;;  %v17552_v53 = vadd.f32 %v9967_v25, %v17490_v46  ;;  %v17562_v25 = vadd.f32 %v9860_v28, %v17488_v60 }
0x1076   : > { %v9862_v0 = vpop.f32.mrb[34].mxu1  ;;  %v9975_v36 = vpop.f32.mrb[50].mxu0  ;;  %v10288_v49 = vadd.f32 1.0, %v14118_v17  ;;  %14139 = vpow2.f32 %v10182_v27 }
0x1077   : > { %v14120_v61 = vpop.eup %14119  ;;  %v9864_v10 = vpop.f32.mrb[35].mxu1  ;;  %14141 = vrcp.f32 %v10286_v59  ;;  %v17556_v59 = vadd.f32 %v9858_v16, %v17480_v21  ;;  %18607 = vst [vmem:[#allocation12_spill] sm:$0xff] %v17562_v25  ;;  %v17566_v16 = vadd.f32 %v9973_v32, %v17490_v46  ;;  %v17573_v28 = vadd.f32 %v9862_v0, %v17480_v21 }
0x1078   : > { %v14122_v38 = vpop.eup %14121  ;;  %v10287_v8 = vadd.f32 1.0, %v14120_v61  ;;  %v9977_v23 = vpop.f32.mrb[51].mxu0  ;;  %14143 = vrcp.f32 %v10288_v49  ;;  %v17559_v61 = vadd.f32 %v9971_v4, %v17484_v20 }
0x1079   : > { %v14124_v52 = vpop.eup %14123  ;;  %v10289_v15 = vadd.f32 1.0, %v14122_v38  ;;  %v10186_v38 = vmul.f32 1.442695, %v12105_v14  ;;  %18608 = vst [vmem:[#allocation17_spill] sm:$0xff] %v17566_v16  ;;  %v12107_v62 = vmul.f32 -1.702, %v17556_v59 }
0x107a   : > { %v14126_v13 = vpop.eup %14125  ;;  %14145 = vrcp.f32 %v10287_v8  ;;  %v10290_v44 = vadd.f32 1.0, %v14124_v52  ;;  %v12109_v32 = vmul.f32 -1.702, %v17559_v61 }
0x107b   : > { %v14128_v17 = vpop.eup %14127  ;;  %14147 = vrcp.f32 %v10289_v15  ;;  %v10292_v27 = vadd.f32 1.0, %v14126_v13  ;;  %v9868_v8 = vpop.f32.mrb[36].mxu1  ;;  %v12106_v15 = vmul.f32 -1.702, %v17552_v53  ;;  %v10190_v63 = vmul.f32 1.442695, %v12107_v62 }
0x107c   : > { %v14130_v18 = vpop.eup %14129  ;;  %14149 = vrcp.f32 %v10290_v44  ;;  %v10291_v49 = vadd.f32 1.0, %v14128_v17  ;;  %v9981_v52 = vpop.f32.mrb[52].mxu0  ;;  %v10184_v17 = vmul.f32 1.442695, %v12104_v3 }
0x107d   : > { %v14132_v55 = vpop.eup %14131  ;;  %14151 = vrcp.f32 %v10292_v27  ;;  %v10293_v57 = vadd.f32 1.0, %v14130_v18  ;;  %v17568_v13 = vpop.f32.mrb[37].mxu1  ;;  %v10188_v58 = vmul.f32 1.442695, %v12106_v15 }
0x107e   : > { %v17570_v4 = vpop.f32.mrb[53].mxu0  ;;  %v14134_v44 = vpop.eup %14133  ;;  %14153 = vrcp.f32 %v10291_v49  ;;  %v10294_v14 = vadd.f32 1.0, %v14132_v55  ;;  %v12108_v55 = vmul.f32 -1.702, %v17562_v25 }
0x107f   : > { %v17575_v45 = vpop.f32.mrb[38].mxu1  ;;  %v14136_v27 = vpop.eup %14135  ;;  %14155 = vrcp.f32 %v10293_v57  ;;  %v10296_v18 = vadd.f32 1.0, %v14134_v44  ;;  %v12110_v57 = vmul.f32 -1.702, %v17566_v16  ;;  %v17588_v44 = vadd.f32 %v9975_v36, %v17484_v20 }
0x1080   : > { %v17579_v12 = vpop.f32.mrb[54].mxu0  ;;  %v14138_v22 = vpop.eup %14137  ;;  %14157 = vrcp.f32 %v10294_v14  ;;  %v10295_v24 = vadd.f32 1.0, %v14136_v27  ;;  %v12111_v14 = vmul.f32 -1.702, %v17573_v28  ;;  %v17592_v27 = vadd.f32 %v9864_v10, %v17488_v60 }
0x1081   : > { %v17582_v3 = vpop.f32.mrb[39].mxu1  ;;  %v17584_v0 = vpop.f32.mrb[55].mxu0  ;;  %14159 = vrcp.f32 %v10296_v18  ;;  %v10297_v1 = vadd.f32 1.0, %v14138_v22  ;;  %v17595_v18 = vadd.f32 %v9977_v23, %v17490_v46  ;;  %v10194_v36 = vmul.f32 1.442695, %v12109_v32 }
0x1082   : > { %v14140_v49 = vpop.eup %14139  ;;  %14161 = vrcp.f32 %v10295_v24  ;;  %18609 = vst [vmem:[#allocation14_spill] sm:$0xff] %v17592_v27  ;;  %v10192_v42 = vmul.f32 1.442695, %v12108_v55  ;;  %v17600_v24 = vadd.f32 %v9868_v8, %v17480_v21  ;;  %v10196_v10 = vmul.f32 1.442695, %v12110_v57 }
0x1083   : > { %v14142_v50 = vpop.eup %14141  ;;  %v10298_v6 = vadd.f32 1.0, %v14140_v49  ;;  %14163 = vrcp.f32 %v10297_v1  ;;  %18610 = vst [vmem:[#allocation22_spill] sm:$0xff] %v17595_v18  ;;  %v12113_v54 = vmul.f32 -1.702, %v17588_v44  ;;  %v17606_v1 = vadd.f32 %v9981_v52, %v17484_v20 }
0x1084   : > { %v14144_v2 = vpop.eup %14143  ;;  %18611 = vst [vmem:[#allocation23_spill] sm:$0xff] %v17600_v24  ;;  %v10198_v23 = vmul.f32 1.442695, %v12111_v14  ;;  %v12112_v15 = vmul.f32 -1.702, %v17592_v27  ;;  %v17611_v32 = vpop.f32.mrb[56].mxu0  ;;  %v17614_v55 = vmul.f32 %v14142_v50, %v17493_v7 }
0x1085   : > { %v17597_v22 = vpop.eup %14145  ;;  %14165 = vrcp.f32 %v10298_v6  ;;  %18612 = vst [vmem:[#allocation41_spill] sm:$0xff] %v17606_v1  ;;  %v17609_v6 = vpop.f32.mrb[40].mxu1  ;;  %v12114_v52 = vmul.f32 -1.702, %v17595_v18  ;;  %v17627_v16 = vmul.f32 %v14144_v2, %v17496_v19  ;;  %v12115_v50 = vmul.f32 -1.702, %v17600_v24 }
0x1086   : > { %v17602_v49 = vpop.eup %14147  ;;  %14167 = vpow2.f32 %v10186_v38  ;;  %v17620_v57 = vpop.f32.mrb[41].mxu1  ;;  %v10202_v18 = vmul.f32 1.442695, %v12113_v54  ;;  %v12117_v2 = vmul.f32 -1.702, %v17606_v1 }
0x1087   : > { %v14150_v62 = vpop.eup %14149  ;;  %14169 = vpow2.f32 %v10184_v17  ;;  %v17622_v17 = vpop.f32.mrb[57].mxu0  ;;  %v10200_v24 = vmul.f32 1.442695, %v12112_v15  ;;  %v10204_v41 = vmul.f32 1.442695, %v12114_v52 }
0x1088   : > { %v14152_v8 = vpop.eup %14151  ;;  %v17617_v38 = vmul.f32 %v14150_v62, %v17507_v51  ;;  %14171 = vpow2.f32 %v10188_v58  ;;  %v17633_v7 = vpop.f32.mrb[42].mxu1  ;;  %v10206_v54 = vmul.f32 1.442695, %v12115_v50  ;;  %v10210_v1 = vmul.f32 1.442695, %v12117_v2 }
0x1089   : > { %v17624_v14 = vpop.eup %14153  ;;  %v17630_v25 = vmul.f32 %v14152_v8, %v17510_v39  ;;  %14173 = vpow2.f32 %v10190_v63  ;;  %v17635_v58 = vpop.f32.mrb[58].mxu0 }
0x108a   : > { %v17637_v51 = vpop.eup %14155  ;;  %14175 = vpow2.f32 %v10194_v36  ;;  %v17642_v19 = vpop.f32.mrb[43].mxu1  ;;  %v17654_v36 = vadd.f32 %v17568_v13, %v17488_v60  ;;  %v17670_v13 = vadd.f32 %v17570_v4, %v17490_v46 }
0x108b   : > { %v17644_v39 = vpop.f32.mrb[59].mxu0  ;;  %v14158_v63 = vpop.eup %14157  ;;  %14177 = vpow2.f32 %v10192_v42 }
0x108c   : > { %18613 = vst [vmem:[#allocation40_spill] sm:$0xff] %v17644_v39  ;;  %v17648_v27 = vpop.eup %14159  ;;  %14179 = vpow2.f32 %v10196_v10  ;;  %18614 = vst [vmem:[#allocation43_spill] sm:$0xff] %v17654_v36  ;;  %v17658_v42 = vpop.f32.mrb[44].mxu1  ;;  %v17663_v52 = vmul.f32 %v14158_v63, %v17525_v34  ;;  %v12116_v8 = vmul.f32 -1.702, %v17654_v36 }
0x108d   : > { %v17650_v26 = vpop.eup %14161  ;;  %14181 = vpow2.f32 %v10198_v23  ;;  %v17660_v15 = vpop.f32.mrb[60].mxu0  ;;  %18616 = vst [vmem:[#allocation45_spill] sm:$0xff] %v17670_v13 }
0x108e   : > { %v17656_v62 = vpop.eup %14163  ;;  %14183 = vpow2.f32 %v10202_v18  ;;  %18615 = vst [vmem:[#allocation42_spill] sm:$0xff] %v17660_v15  ;;  %v17672_v18 = vpop.f32.mrb[45].mxu1 }
0x108f   : > { %v14166_v39 = vpop.eup %14165  ;;  %14185 = vpow2.f32 %v10200_v24  ;;  %v17674_v50 = vpop.f32.mrb[61].mxu0 }
0x1090   : > { %v14168_v10 = vpop.eup %14167  ;;  %v17666_v23 = vmul.f32 %v14166_v39, %v17538_v30  ;;  %14187 = vpow2.f32 %v10204_v41  ;;  %18617 = vst [vmem:[#allocation44_spill] sm:$0xff] %v17674_v50  ;;  %v17677_v15 = vpop.f32.mrb[46].mxu1  ;;  %v10479_v50 = vmul.f32 %v17597_v22, %v17499_v29  ;;  %v17696_v30 = vadd.f32 %v17579_v12, %v17484_v20 }
0x1091   : > { %v14170_v24 = vpop.eup %14169  ;;  %v10300_v2 = vadd.f32 1.0, %v14168_v10  ;;  %14189 = vpow2.f32 %v10206_v54  ;;  %18618 = vst [vmem:[#allocation11_spill] sm:$0xff] %v17677_v15  ;;  %v17681_v39 = vpop.f32.mrb[62].mxu0  ;;  %v17689_v10 = vadd.f32 %v17575_v45, %v17480_v21  ;;  %v10481_v29 = vmul.f32 %v17602_v49, %v17502_v5 }
0x1092   : > { %v14172_v34 = vpop.eup %14171  ;;  %v10299_v41 = vadd.f32 1.0, %v14170_v24  ;;  %14191 = vpow2.f32 %v10210_v1  ;;  %v17683_v4 = vpop.f32.mrb[47].mxu1  ;;  %v12118_v1 = vmul.f32 -1.702, %v17670_v13  ;;  %v10485_v12 = vmul.f32 %v17637_v51, %v17518_v56 }
0x1093   : > { %18619 = vst [vmem:[#allocation50_spill] sm:$0xff] %v17683_v4  ;;  %v14174_v63 = vpop.eup %14173  ;;  %14193 = vrcp.f32 %v10300_v2  ;;  %v10301_v54 = vadd.f32 1.0, %v14172_v34  ;;  %v17691_v36 = vpop.f32.mrb[63].mxu0  ;;  %v10208_v2 = vmul.f32 1.442695, %v12116_v8  ;;  %v10483_v34 = vmul.f32 %v17624_v14, %v17515_v9 }
0x1094   : > { %18620 = vst [vmem:[#allocation51_spill] sm:$0xff] %v17691_v36  ;;  %v14176_v15 = vpop.eup %14175  ;;  %14195 = vrcp.f32 %v10299_v41  ;;  %v10302_v24 = vadd.f32 1.0, %v14174_v63  ;;  %v17704_v63 = vadd.f32 %v17582_v3, %v17488_v60  ;;  %v12119_v5 = vmul.f32 -1.702, %v17689_v10 }
0x1095   : > { %v14178_v4 = vpop.eup %14177  ;;  %14197 = vrcp.f32 %v10301_v54  ;;  %v10304_v22 = vadd.f32 1.0, %v14176_v15  ;;  %v10212_v15 = vmul.f32 1.442695, %v12118_v1  ;;  %v12121_v9 = vmul.f32 -1.702, %v17696_v30 }
0x1096   : > { %v14180_v45 = vpop.eup %14179  ;;  %14199 = vrcp.f32 %v10302_v24  ;;  %v10303_v41 = vadd.f32 1.0, %v14178_v4  ;;  %v17712_v3 = vadd.f32 %v17584_v0, %v17490_v46  ;;  %v17716_v56 = vadd.f32 %v17609_v6, %v17480_v21 }
0x1097   : > { %v14182_v13 = vpop.eup %14181  ;;  %14201 = vrcp.f32 %v10304_v22  ;;  %v10305_v36 = vadd.f32 1.0, %v14180_v45  ;;  %v12120_v24 = vmul.f32 -1.702, %v17704_v63  ;;  %v17725_v0 = vadd.f32 %v17620_v57, %v17488_v60 }
0x1098   : > { %v14184_v49 = vpop.eup %14183  ;;  %14203 = vrcp.f32 %v10303_v41  ;;  %v10306_v8 = vadd.f32 1.0, %v14182_v13  ;;  %v10543_v13 = vpack.c.bf16 %v10483_v34, %v10479_v50  ;;  %v17729_v41 = vadd.f32 %v17633_v7, %v17480_v21 }
0x1099   : > { %v14186_v14 = vpop.eup %14185  ;;  %14205 = vrcp.f32 %v10305_v36  ;;  %v10308_v4 = vadd.f32 1.0, %v14184_v49  ;;  %v17721_v36 = vadd.f32 %v17611_v32, %v17484_v20  ;;  %v10545_v50 = vpack.c.bf16 %v10485_v12, %v10481_v29 }
0x109a   : > { %v14188_v51 = vpop.eup %14187  ;;  %14207 = vrcp.f32 %v10306_v8  ;;  %v10307_v54 = vadd.f32 1.0, %v14186_v14  ;;  %10869 = vmatprep.mubr.bf16.mxu1 %v10543_v13  ;;  %v17733_v49 = vmul.f32 %v17648_v27, %v17528_v33  ;;  %v10214_v32 = vmul.f32 1.442695, %v12119_v5 }
0x109b   : > { %v14190_v1 = vpop.eup %14189  ;;  %14209 = vrcp.f32 %v10308_v4  ;;  %v10309_v22 = vadd.f32 1.0, %v14188_v51  ;;  %v12122_v8 = vmul.f32 -1.702, %v17712_v3  ;;  %v18621_v57 = vpack.c.bf16 %v17617_v38, %v17614_v55  ;;  %10966 = vmatprep.mubr.bf16.mxu0 %v10545_v50 }
0x109c   : > { %v14192_v45 = vpop.eup %14191  ;;  %14211 = vrcp.f32 %v10307_v54  ;;  %v10310_v6 = vadd.f32 1.0, %v14190_v1  ;;  %v10218_v7 = vmul.f32 1.442695, %v12121_v9  ;;  %v10216_v51 = vmul.f32 1.442695, %v12120_v24 }
0x109d   : > { %v14194_v34 = vpop.eup %14193  ;;  %14213 = vrcp.f32 %v10309_v22  ;;  %10870 = vmatmul.mubr.bf16.vlgmr.msra.gmra.mrb[56].mxu1 %v18621_v57  ;;  %v12123_v29 = vmul.f32 -1.702, %v17716_v56  ;;  %v12125_v27 = vmul.f32 -1.702, %v17721_v36  ;;  %v17747_v12 = vadd.f32 %v17635_v58, %v17484_v20  ;;  %v18624_v57 = vld [vmem:[#allocation32_spill] sm:$0xff] }
0x109e   : > { %v14196_v14 = vpop.eup %14195  ;;  %v17740_v4 = vmul.f32 %v14194_v34, %v17545_v48  ;;  %13603 = vmatpush3.bf16.msra.mxu1 %v17390_v31  ;;  %14215 = vrcp.f32 %v10310_v6  ;;  %v17751_v55 = vadd.f32 %v17642_v19, %v17488_v60  ;;  %v18622_v48 = vpack.c.bf16 %v17630_v25, %v17627_v16 }
0x109f   : > { %v14198_v33 = vpop.eup %14197  ;;  %13596 = vmatprep.subr.bf16.mxu1 %v17407_v43  ;;  %14217 = vpow2.f32 %v10208_v2  ;;  %v12124_v5 = vmul.f32 -1.702, %v17725_v0  ;;  %v12127_v58 = vmul.f32 -1.702, %v17729_v41  ;;  %v10487_v19 = vmul.f32 %v17650_v26, %v17531_v37 }
0x10a0   : > { %10967 = vmatmul.mubr.bf16.vlgmr.msra.gmra.mrb[72].mxu0 %v18622_v48  ;;  %v14200_v38 = vpop.eup %14199  ;;  %v10548_v31 = vpack.c.bf16 %v17740_v4, %v17733_v49  ;;  %14219 = vpow2.f32 %v10212_v15  ;;  %v10220_v54 = vmul.f32 1.442695, %v12122_v8  ;;  %v10489_v25 = vmul.f32 %v17656_v62, %v17534_v11  ;;  %v18634_v4 = vld [vmem:[#allocation15_spill] sm:$0xff] }
0x10a1   : > { %v14202_v9 = vpop.eup %14201  ;;  %14221 = vpow2.f32 %v10214_v32  ;;  %v10222_v43 = vmul.f32 1.442695, %v12123_v29  ;;  %v17767_v16 = vadd.f32 %v17622_v17, %v17490_v46  ;;  %v10226_v13 = vmul.f32 1.442695, %v12125_v27  ;;  %v18623_v32 = vld [vmem:[#allocation37_spill] sm:$0xff]  ;;  %v18627_v29 = vld [vmem:[#allocation12_spill] sm:$0xff] }
0x10a2   : > { %v14204_v24 = vpop.eup %14203  ;;  %13604 = vmatpush3.bf16.msra.mxu1 %v17411_v47  ;;  %14223 = vpow2.f32 %v10218_v7  ;;  %v12129_v1 = vmul.f32 -1.702, %v17747_v12  ;;  %v12128_v26 = vmul.f32 -1.702, %v17751_v55  ;;  %v10312_v15 = vadd.f32 1.0, %v14192_v45  ;;  %v18626_v7 = vld [vmem:[#allocation22_spill] sm:$0xff] }
0x10a3   : > { %v14206_v2 = vpop.eup %14205  ;;  %13597 = vmatprep.subr.bf16.mxu1 %v17417_v35  ;;  %14225 = vpow2.f32 %v10216_v51  ;;  %v10224_v11 = vmul.f32 1.442695, %v12124_v5  ;;  %v10230_v62 = vmul.f32 1.442695, %v12127_v58  ;;  %v10491_v17 = vmul.f32 %v14196_v14, %v17548_v40 }
0x10a4   : > { %v14208_v37 = vpop.eup %14207  ;;  %v17775_v6 = vmul.f32 %v14200_v38, %v17556_v59  ;;  %14227 = vpow2.f32 %v10220_v54  ;;  %v10493_v34 = vmul.f32 %v14198_v33, %v17552_v53  ;;  %v17782_v35 = vmul.f32 %v14202_v9, %v17559_v61  ;;  %v18625_v61 = vld [vmem:[#allocation14_spill] sm:$0xff]  ;;  %v18628_v38 = vld [vmem:[#allocation17_spill] sm:$0xff]  ;;  %v18629_v54 = vld [vmem:[#allocation36_spill] sm:$0xff] }
0x10a5   : > { %v14210_v22 = vpop.eup %14209  ;;  %v17778_v47 = vmul.f32 %v14208_v37, %v17573_v28  ;;  %14229 = vpow2.f32 %v10222_v43  ;;  %v10234_v28 = vmul.f32 1.442695, %v12129_v1  ;;  %v10232_v8 = vmul.f32 1.442695, %v12128_v26  ;;  %v18630_v1 = vld [vmem:[#allocation38_spill] sm:$0xff] }
0x10a6   : > { %v14212_v50 = vpop.eup %14211  ;;  %v17785_v45 = vmul.f32 %v14210_v22, %v17588_v44  ;;  %13605 = vmatpush3.bf16.msra.mxu1 %v18623_v32  ;;  %14231 = vpow2.f32 %v10226_v13  ;;  %v10495_v33 = vmul.f32 %v14204_v24, %v18627_v29  ;;  %v12126_v27 = vmul.f32 -1.702, %v17767_v16 }
0x10a7   : > { %v14214_v40 = vpop.eup %14213  ;;  %v10550_v59 = vpack.c.bf16 %v17778_v47, %v17775_v6  ;;  %13598 = vmatprep.subr.bf16.mxu1 %v18624_v57  ;;  %v10499_v14 = vmul.f32 %v14212_v50, %v18625_v61  ;;  %14233 = vpow2.f32 %v10224_v11  ;;  %v10497_v5 = vmul.f32 %v14206_v2, %v18628_v38  ;;  %v18636_v61 = vld [vmem:[#allocation39_spill] sm:$0xff]  ;;  %v18642_v6 = vld [vmem:[#allocation28_spill] sm:$0xff] }
0x10a8   : > { %v10552_v53 = vpack.c.bf16 %v17785_v45, %v17782_v35  ;;  %v10501_v44 = vmul.f32 %v14214_v40, %v18626_v7  ;;  %v17795_v51 = vpop.eup %14215  ;;  %14235 = vrcp.f32 %v10312_v15  ;;  %v10547_v58 = vpack.c.bf16 %v10491_v17, %v10487_v19  ;;  %v18632_v17 = vld [vmem:[#allocation40_spill] sm:$0xff]  ;;  %v18637_v7 = vld [vmem:[#allocation11_spill] sm:$0xff] }
0x10a9   : > { %v14218_v48 = vpop.eup %14217  ;;  %14237 = vpow2.f32 %v10230_v62  ;;  %v10549_v9 = vpack.c.bf16 %v10493_v34, %v10489_v25  ;;  %v10551_v24 = vpack.c.bf16 %v10499_v14, %v10495_v33  ;;  %v18631_v19 = vpack.c.bf16 %v17666_v23, %v17663_v52  ;;  %v18633_v23 = vld [vmem:[#allocation42_spill] sm:$0xff] }
0x10aa   : > { %13606 = vmatpush3.bf16.msra.mxu1 %v18629_v54  ;;  %v14220_v43 = vpop.eup %14219  ;;  %v10311_v13 = vadd.f32 1.0, %v14218_v48  ;;  %14239 = vpow2.f32 %v10234_v28  ;;  %10877 = vmatprep.mubr.bf16.mxu1 %v10547_v58  ;;  %v10553_v15 = vpack.c.bf16 %v10501_v44, %v10497_v5  ;;  %v10228_v22 = vmul.f32 1.442695, %v12126_v27  ;;  %v18638_v58 = vld [vmem:[#allocation50_spill] sm:$0xff]  ;;  %v18639_v54 = vld [vmem:[#allocation13_spill] sm:$0xff] }
0x10ab   : > { %13599 = vmatprep.subr.bf16.mxu1 %v18630_v1  ;;  %v14222_v26 = vpop.eup %14221  ;;  %v10313_v37 = vadd.f32 1.0, %v14220_v43  ;;  %14241 = vpow2.f32 %v10232_v8  ;;  %10974 = vmatprep.mubr.bf16.mxu0 %v10549_v9  ;;  %v17810_v50 = vadd.f32 %v18632_v17, %v17490_v46  ;;  %v17814_v52 = vadd.f32 %v17658_v42, %v17480_v21  ;;  %v18635_v8 = vld [vmem:[#allocation44_spill] sm:$0xff] }
0x10ac   : > { %v14224_v11 = vpop.eup %14223  ;;  %14243 = vrcp.f32 %v10311_v13  ;;  %v10314_v2 = vadd.f32 1.0, %v14222_v26  ;;  %10878 = vmatmul.mubr.bf16.gmra.mrb[60].mxu1 %v18631_v19  ;;  %10975 = vmatmul.mubr.bf16.gmra.mrb[76].mxu0 %v10548_v31  ;;  %v17818_v49 = vadd.f32 %v18633_v23, %v17484_v20  ;;  %v17823_v28 = vadd.f32 %v17672_v18, %v17488_v60  ;;  %v18640_v26 = vld [vmem:[#allocation25_spill] sm:$0xff] }
0x10ad   : > { %v14226_v25 = vpop.eup %14225  ;;  %14245 = vrcp.f32 %v10313_v37  ;;  %v10316_v62 = vadd.f32 1.0, %v14224_v11  ;;  %10885 = vmatprep.mubr.bf16.mxu1 %v10551_v24  ;;  %10982 = vmatprep.mubr.bf16.mxu0 %v10553_v15  ;;  %v17827_v57 = vadd.f32 %v18635_v8, %v17490_v46  ;;  %v17832_v44 = vadd.f32 %v18637_v7, %v17480_v21 }
0x10ae   : > { %v14228_v34 = vpop.eup %14227  ;;  %14247 = vrcp.f32 %v10314_v2  ;;  %v10315_v32 = vadd.f32 1.0, %v14226_v25  ;;  %13607 = vmatpush3.bf16.msra.mxu1 %v18634_v4  ;;  %v17836_v29 = vadd.f32 %v17681_v39, %v17484_v20  ;;  %v12130_v27 = vmul.f32 -1.702, %v17810_v50 }
0x10af   : > { %v14230_v31 = vpop.eup %14229  ;;  %14249 = vrcp.f32 %v10316_v62  ;;  %v10317_v40 = vadd.f32 1.0, %v14228_v34  ;;  %13600 = vmatprep.subr.bf16.mxu1 %v18636_v61  ;;  %v12131_v5 = vmul.f32 -1.702, %v17814_v52  ;;  %v17842_v9 = vadd.f32 %v18638_v58, %v17488_v60  ;;  %v18641_v62 = vld [vmem:[#allocation51_spill] sm:$0xff]  ;;  %v18646_v58 = vld [vmem:[#allocation18_spill] sm:$0xff] }
0x10b0   : > { %v14232_v42 = vpop.eup %14231  ;;  %14251 = vrcp.f32 %v10315_v32  ;;  %v10318_v14 = vadd.f32 1.0, %v14230_v31  ;;  %v12133_v39 = vmul.f32 -1.702, %v17818_v49  ;;  %v12132_v13 = vmul.f32 -1.702, %v17823_v28  ;;  %v18644_v61 = vld [vmem:[#allocation23_spill] sm:$0xff] }
0x10b1   : > { %v14234_v33 = vpop.eup %14233  ;;  %14253 = vrcp.f32 %v10317_v40  ;;  %v10320_v18 = vadd.f32 1.0, %v14232_v42  ;;  %v12134_v1 = vmul.f32 -1.702, %v17827_v57  ;;  %v12135_v15 = vmul.f32 -1.702, %v17832_v44 }
0x10b2   : > { %v14236_v48 = vpop.eup %14235  ;;  %v10319_v38 = vadd.f32 1.0, %v14234_v33  ;;  %14255 = vpow2.f32 %v10228_v22  ;;  %13608 = vmatpush3.bf16.msra.mxu1 %v18639_v54  ;;  %v12137_v11 = vmul.f32 -1.702, %v17836_v29  ;;  %v10236_v25 = vmul.f32 1.442695, %v12130_v27 }
0x10b3   : > { %v14238_v43 = vpop.eup %14237  ;;  %14257 = vrcp.f32 %v10318_v14  ;;  %13601 = vmatprep.subr.bf16.mxu1 %v18640_v26  ;;  %v17859_v22 = vadd.f32 %v18641_v62, %v17490_v46  ;;  %v10238_v32 = vmul.f32 1.442695, %v12131_v5  ;;  %v12136_v23 = vmul.f32 -1.702, %v17842_v9 }
0x10b4   : > { %v14240_v37 = vpop.eup %14239  ;;  %14259 = vrcp.f32 %v10320_v18  ;;  %v10322_v24 = vadd.f32 1.0, %v14238_v43  ;;  %10886 = vmatmul.mubr.bf16.gmra.mrb[64].mxu1 %v10550_v59  ;;  %10983 = vmatmul.mubr.bf16.gmra.mrb[80].mxu0 %v10552_v53  ;;  %v10242_v35 = vmul.f32 1.442695, %v12133_v39  ;;  %v10240_v45 = vmul.f32 1.442695, %v12132_v13  ;;  %v18643_v59 = vld [vmem:[#allocation26_spill] sm:$0xff] }
0x10b5   : > { %v14242_v2 = vpop.eup %14241  ;;  %14261 = vrcp.f32 %v10319_v38  ;;  %v10324_v19 = vadd.f32 1.0, %v14240_v37  ;;  %v10244_v4 = vmul.f32 1.442695, %v12134_v1  ;;  %v10246_v31 = vmul.f32 1.442695, %v12135_v15  ;;  %v18645_v18 = vld [vmem:[#allocation41_spill] sm:$0xff] }
0x10b6   : > { %v14244_v17 = vpop.eup %14243  ;;  %14263 = vrcp.f32 %v10322_v24  ;;  %v10323_v34 = vadd.f32 1.0, %v14242_v2  ;;  %13609 = vmatpush3.bf16.msra.mxu1 %v18642_v6  ;;  %v10250_v40 = vmul.f32 1.442695, %v12137_v11  ;;  %v10502_v42 = vmul.f32 %v17795_v51, %v18644_v61  ;;  %v18647_v43 = vld [vmem:[#allocation43_spill] sm:$0xff]  ;;  %v18648_v1 = vld [vmem:[#allocation45_spill] sm:$0xff] }
0x10b7   : > { %v14246_v47 = vpop.eup %14245  ;;  %14265 = vrcp.f32 %v10324_v19  ;;  %13602 = vmatprep.subr.bf16.mxu1 %v18643_v59  ;;  %v12138_v7 = vmul.f32 -1.702, %v17859_v22  ;;  %v10504_v27 = vmul.f32 %v14236_v48, %v18645_v18  ;;  %v10248_v5 = vmul.f32 1.442695, %v12136_v23 }
0x10b8   : > { %v14248_v53 = vpop.eup %14247  ;;  %14267 = vrcp.f32 %v10323_v34  ;;  %v10503_v39 = vmul.f32 %v14244_v17, %v18647_v43  ;;  %v10505_v26 = vmul.f32 %v14246_v47, %v18648_v1 }
0x10b9   : > { %v14250_v8 = vpop.eup %14249  ;;  %v10506_v14 = vmul.f32 %v14248_v53, %v17689_v10  ;;  %14269 = vpow2.f32 %v10236_v25 }
0x10ba   : > { %v14252_v33 = vpop.eup %14251  ;;  %v10508_v38 = vmul.f32 %v14250_v8, %v17696_v30  ;;  %14271 = vpow2.f32 %v10238_v32  ;;  %13610 = vmatpush3.bf16.msra.mxu1 %v18646_v58  ;;  %v10252_v30 = vmul.f32 1.442695, %v12138_v7 }
0x10bb   : > { %v14254_v54 = vpop.eup %14253  ;;  %v10554_v13 = vpack.c.bf16 %v10506_v14, %v10502_v42  ;;  %v10507_v51 = vmul.f32 %v14252_v33, %v17704_v63  ;;  %14273 = vpow2.f32 %v10242_v35 }
0x10bc   : > { %v14256_v10 = vpop.eup %14255  ;;  %v10556_v37 = vpack.c.bf16 %v10508_v38, %v10504_v27  ;;  %v10509_v24 = vmul.f32 %v14254_v54, %v17712_v3  ;;  %14275 = vpow2.f32 %v10240_v45 }
0x10bd   : > { %v14258_v48 = vpop.eup %14257  ;;  %14277 = vpow2.f32 %v10244_v4  ;;  %v10555_v15 = vpack.c.bf16 %v10507_v51, %v10503_v39  ;;  %v10321_v25 = vadd.f32 1.0, %v14256_v10 }
0x10be   : > { %v14260_v11 = vpop.eup %14259  ;;  %14279 = vpow2.f32 %v10246_v31  ;;  %v10557_v2 = vpack.c.bf16 %v10509_v24, %v10505_v26  ;;  %v10510_v17 = vmul.f32 %v14258_v48, %v17716_v56 }
0x10bf   : > { %v14262_v19 = vpop.eup %14261  ;;  %14281 = vpow2.f32 %v10250_v40  ;;  %10893 = vmatprep.mubr.bf16.mxu1 %v10555_v15  ;;  %v17878_v32 = vmul.f32 %v14260_v11, %v17721_v36 }
0x10c0   : > { %v14264_v63 = vpop.eup %14263  ;;  %14283 = vpow2.f32 %v10248_v5  ;;  %10990 = vmatprep.mubr.bf16.mxu0 %v10557_v2  ;;  %10894 = vmatmul.mubr.bf16.gmra.mrb[68].mxu1 %v10554_v13  ;;  %v10511_v47 = vmul.f32 %v14262_v19, %v17725_v0 }
0x10c1   : > { %v14266_v62 = vpop.eup %14265  ;;  %v10514_v3 = vmul.f32 %v14264_v63, %v17729_v41  ;;  %14285 = vpow2.f32 %v10252_v30  ;;  %10991 = vmatmul.mubr.bf16.gmra.mrb[84].mxu0 %v10556_v37 }
0x10c2   : > { %v14268_v34 = vpop.eup %14267  ;;  %v17881_v23 = vmul.f32 %v14266_v62, %v17747_v12  ;;  %14287 = vrcp.f32 %v10321_v25 }
0x10c3   : > { %v14270_v6 = vpop.eup %14269  ;;  %v10558_v35 = vpack.c.bf16 %v10514_v3, %v10510_v17  ;;  %v10515_v45 = vmul.f32 %v14268_v34, %v17751_v55 }
0x10c4   : > { %v14272_v59 = vpop.eup %14271  ;;  %v10560_v56 = vpack.c.bf16 %v17881_v23, %v17878_v32  ;;  %v10325_v41 = vadd.f32 1.0, %v14270_v6 }
0x10c5   : > { %v14274_v53 = vpop.eup %14273  ;;  %v10326_v4 = vadd.f32 1.0, %v14272_v59  ;;  %v10559_v31 = vpack.c.bf16 %v10515_v45, %v10511_v47 }
0x10c6   : > { %v14276_v36 = vpop.eup %14275  ;;  %14289 = vrcp.f32 %v10325_v41  ;;  %v10328_v40 = vadd.f32 1.0, %v14274_v53 }
0x10c7   : > { %v14278_v12 = vpop.eup %14277  ;;  %14291 = vrcp.f32 %v10326_v4  ;;  %v10327_v8 = vadd.f32 1.0, %v14276_v36  ;;  %10901 = vmatprep.mubr.bf16.mxu1 %v10559_v31  ;;  %v9898_v14 = vpop.f32.mrb[48].mxu1 }
0x10c8   : > { %v14280_v0 = vpop.eup %14279  ;;  %14293 = vrcp.f32 %v10328_v40  ;;  %v10329_v61 = vadd.f32 1.0, %v14278_v12  ;;  %10902 = vmatmul.mubr.bf16.gmra.mrb[72].mxu1 %v10558_v35  ;;  %v10011_v7 = vpop.f32.mrb[64].mxu0  ;;  %v17888_v27 = vadd.f32 %v9898_v14, %v17480_v21 }
0x10c9   : > { %v14282_v55 = vpop.eup %14281  ;;  %14295 = vrcp.f32 %v10327_v8  ;;  %v10330_v42 = vadd.f32 1.0, %v14280_v0  ;;  %v17891_v38 = vadd.f32 %v10011_v7, %v17484_v20  ;;  %v9900_v5 = vpop.f32.mrb[49].mxu1 }
0x10ca   : > { %v14284_v33 = vpop.eup %14283  ;;  %14297 = vrcp.f32 %v10329_v61  ;;  %v10332_v18 = vadd.f32 1.0, %v14282_v55  ;;  %v10013_v58 = vpop.f32.mrb[65].mxu0  ;;  %v17894_v39 = vadd.f32 %v9900_v5, %v17488_v60  ;;  %v12139_v26 = vmul.f32 -1.702, %v17888_v27 }
0x10cb   : > { %v14286_v54 = vpop.eup %14285  ;;  %14299 = vrcp.f32 %v10330_v42  ;;  %v10331_v43 = vadd.f32 1.0, %v14284_v33  ;;  %v17897_v13 = vadd.f32 %v10013_v58, %v17490_v46  ;;  %v9902_v51 = vpop.f32.mrb[50].mxu1  ;;  %v12141_v37 = vmul.f32 -1.702, %v17891_v38 }
0x10cc   : > { %v10015_v10 = vpop.f32.mrb[66].mxu0  ;;  %14301 = vrcp.f32 %v10332_v18  ;;  %v10333_v1 = vadd.f32 1.0, %v14286_v54  ;;  %v9904_v24 = vpop.f32.mrb[51].mxu1  ;;  %v12140_v30 = vmul.f32 -1.702, %v17894_v39  ;;  %v17904_v11 = vadd.f32 %v9902_v51, %v17480_v21 }
0x10cd   : > { %v14288_v48 = vpop.eup %14287  ;;  %14303 = vrcp.f32 %v10331_v43  ;;  %v12142_v15 = vmul.f32 -1.702, %v17897_v13  ;;  %v10017_v2 = vpop.f32.mrb[67].mxu0  ;;  %v10254_v19 = vmul.f32 1.442695, %v12139_v26  ;;  %v17907_v63 = vadd.f32 %v10015_v10, %v17484_v20 }
0x10ce   : > { %14305 = vrcp.f32 %v10333_v1  ;;  %v10258_v25 = vmul.f32 1.442695, %v12141_v37  ;;  %v10256_v62 = vmul.f32 1.442695, %v12140_v30  ;;  %v12143_v3 = vmul.f32 -1.702, %v17904_v11 }
0x10cf   : > { %v10260_v17 = vmul.f32 1.442695, %v12142_v15  ;;  %v17911_v34 = vadd.f32 %v9904_v24, %v17488_v60  ;;  %v10513_v47 = vmul.f32 %v14288_v48, %v17767_v16  ;;  %14307 = vpow2.f32 %v10254_v19  ;;  %v9908_v31 = vpop.f32.mrb[52].mxu1  ;;  %v10021_v36 = vpop.f32.mrb[68].mxu0 }
0x10d0   : > { %v14290_v6 = vpop.eup %14289  ;;  %v12145_v35 = vmul.f32 -1.702, %v17907_v63  ;;  %v17916_v45 = vadd.f32 %v10017_v2, %v17490_v46  ;;  %14309 = vpow2.f32 %v10258_v25  ;;  %v10262_v53 = vmul.f32 1.442695, %v12143_v3  ;;  %v9910_v8 = vpop.f32.mrb[53].mxu1 }
0x10d1   : > { %v14292_v59 = vpop.eup %14291  ;;  %v10517_v41 = vmul.f32 %v14290_v6, %v17810_v50  ;;  %v12144_v4 = vmul.f32 -1.702, %v17911_v34  ;;  %14311 = vpow2.f32 %v10256_v62  ;;  %v10023_v0 = vpop.f32.mrb[69].mxu0  ;;  %v17924_v58 = vadd.f32 %v9908_v31, %v17480_v21 }
0x10d2   : > { %v14294_v40 = vpop.eup %14293  ;;  %v10266_v12 = vmul.f32 1.442695, %v12145_v35  ;;  %v12146_v16 = vmul.f32 -1.702, %v17916_v45  ;;  %v10518_v55 = vmul.f32 %v14292_v59, %v17814_v52  ;;  %14313 = vpow2.f32 %v10260_v17  ;;  %v9912_v50 = vpop.f32.mrb[54].mxu1 }
0x10d3   : > { %v14296_v61 = vpop.eup %14295  ;;  %v10561_v42 = vpack.c.bf16 %v10517_v41, %v10513_v47  ;;  %v10264_v14 = vmul.f32 1.442695, %v12144_v4  ;;  %v10025_v7 = vpop.f32.mrb[70].mxu0  ;;  %v10520_v18 = vmul.f32 %v14294_v40, %v17818_v49  ;;  %14315 = vpow2.f32 %v10262_v53 }
0x10d4   : > { %v14298_v33 = vpop.eup %14297  ;;  %v10268_v5 = vmul.f32 1.442695, %v12146_v16  ;;  %v9914_v54 = vpop.f32.mrb[55].mxu1  ;;  %v10519_v10 = vmul.f32 %v14296_v61, %v17823_v28  ;;  %14317 = vpow2.f32 %v10266_v12  ;;  %v17928_v52 = vadd.f32 %v10021_v36, %v17484_v20 }
0x10d5   : > { %v10027_v43 = vpop.f32.mrb[71].mxu0  ;;  %v14300_v51 = vpop.eup %14299  ;;  %10998 = vmatprep.mubr.bf16.mxu0 %v10561_v42  ;;  %v17931_v1 = vadd.f32 %v9910_v8, %v17488_v60  ;;  %v10521_v49 = vmul.f32 %v14298_v33, %v17827_v57  ;;  %14319 = vpow2.f32 %v10264_v14  ;;  %v12147_v28 = vmul.f32 -1.702, %v17924_v58 }
0x10d6   : > { %v14302_v26 = vpop.eup %14301  ;;  %v10522_v37 = vmul.f32 %v14300_v51, %v17832_v44  ;;  %10999 = vmatmul.mubr.bf16.gmra.mrb[88].mxu0 %v10560_v56  ;;  %14321 = vpow2.f32 %v10268_v5  ;;  %v12149_v30 = vmul.f32 -1.702, %v17928_v52  ;;  %v17944_v25 = vadd.f32 %v10023_v0, %v17490_v46 }
0x10d7   : > { %v14304_v24 = vpop.eup %14303  ;;  %v10524_v48 = vmul.f32 %v14302_v26, %v17836_v29  ;;  %v12148_v15 = vmul.f32 -1.702, %v17931_v1  ;;  %v10270_v44 = vmul.f32 1.442695, %v12147_v28  ;;  %v17948_v3 = vadd.f32 %v9912_v50, %v17480_v21 }
0x10d8   : > { %v14306_v2 = vpop.eup %14305  ;;  %v10562_v19 = vpack.c.bf16 %v10522_v37, %v10518_v55  ;;  %v10523_v57 = vmul.f32 %v14304_v24, %v17842_v9  ;;  %v10274_v56 = vmul.f32 1.442695, %v12149_v30  ;;  %v12150_v53 = vmul.f32 -1.702, %v17944_v25 }
0x10d9   : > { %v10564_v32 = vpack.c.bf16 %v10524_v48, %v10520_v18  ;;  %v10525_v23 = vmul.f32 %v14306_v2, %v17859_v22  ;;  %v10272_v62 = vmul.f32 1.442695, %v12148_v15  ;;  %v14308_v17 = vpop.eup %14307  ;;  %14323 = vpow2.f32 %v10270_v44 }
0x10da   : > { %v10563_v29 = vpack.c.bf16 %v10523_v57, %v10519_v10  ;;  %v14310_v6 = vpop.eup %14309  ;;  %v10334_v35 = vadd.f32 1.0, %v14308_v17  ;;  %14325 = vpow2.f32 %v10274_v56  ;;  %v12151_v31 = vmul.f32 -1.702, %v17948_v3 }
0x10db   : > { %v10565_v47 = vpack.c.bf16 %v10525_v23, %v10521_v49  ;;  %v14312_v9 = vpop.eup %14311  ;;  %v10336_v59 = vadd.f32 1.0, %v14310_v6  ;;  %14327 = vpow2.f32 %v10272_v62  ;;  %v17953_v36 = vadd.f32 %v10025_v7, %v17484_v20 }
0x10dc   : > { %10909 = vmatprep.mubr.bf16.mxu1 %v10563_v29  ;;  %v14314_v41 = vpop.eup %14313  ;;  %14329 = vrcp.f32 %v10334_v35  ;;  %v10335_v22 = vadd.f32 1.0, %v14312_v9  ;;  %v17956_v16 = vadd.f32 %v9914_v54, %v17488_v60  ;;  %v17959_v61 = vadd.f32 %v10027_v43, %v17490_v46 }
0x10dd   : > { %11006 = vmatprep.mubr.bf16.mxu0 %v10565_v47  ;;  %10910 = vmatmul.mubr.bf16.gmra.mrb[76].mxu1 %v10562_v19  ;;  %v14316_v4 = vpop.eup %14315  ;;  %14331 = vrcp.f32 %v10336_v59  ;;  %v10337_v21 = vadd.f32 1.0, %v14314_v41  ;;  %v10276_v14 = vmul.f32 1.442695, %v12150_v53  ;;  %v10278_v20 = vmul.f32 1.442695, %v12151_v31 }
0x10de   : > { %11007 = vmatmul.mubr.bf16.gmra.mrb[92].mxu0 %v10564_v32  ;;  %v14318_v40 = vpop.eup %14317  ;;  %14333 = vrcp.f32 %v10335_v22  ;;  %v10338_v12 = vadd.f32 1.0, %v14316_v4  ;;  %v12153_v7 = vmul.f32 -1.702, %v17953_v36  ;;  %v12152_v33 = vmul.f32 -1.702, %v17956_v16 }
0x10df   : > { %v14320_v8 = vpop.eup %14319  ;;  %14335 = vrcp.f32 %v10337_v21  ;;  %v10340_v0 = vadd.f32 1.0, %v14318_v40  ;;  %v12154_v18 = vmul.f32 -1.702, %v17959_v61 }
0x10e0   : > { %v14322_v55 = vpop.eup %14321  ;;  %14337 = vrcp.f32 %v10338_v12  ;;  %v10339_v42 = vadd.f32 1.0, %v14320_v8  ;;  %v10282_v54 = vmul.f32 1.442695, %v12153_v7  ;;  %v10280_v51 = vmul.f32 1.442695, %v12152_v33 }
0x10e1   : > { %14339 = vrcp.f32 %v10340_v0  ;;  %v10341_v50 = vadd.f32 1.0, %v14322_v55  ;;  %v10284_v26 = vmul.f32 1.442695, %v12154_v18 }
0x10e2   : > { %14341 = vrcp.f32 %v10339_v42 }
0x10e3   : > { %v14324_v60 = vpop.eup %14323  ;;  %14343 = vrcp.f32 %v10341_v50 }
0x10e4   : > { %v14326_v5 = vpop.eup %14325  ;;  %14345 = vpow2.f32 %v10276_v14  ;;  %v10342_v57 = vadd.f32 1.0, %v14324_v60 }
0x10e5   : > { %v14328_v46 = vpop.eup %14327  ;;  %14347 = vpow2.f32 %v10278_v20  ;;  %v10344_v6 = vadd.f32 1.0, %v14326_v5 }
0x10e6   : > { %v14330_v43 = vpop.eup %14329  ;;  %14349 = vpow2.f32 %v10282_v54 }
0x10e7   : > { %v14332_v10 = vpop.eup %14331  ;;  %14351 = vpow2.f32 %v10280_v51  ;;  %v10526_v48 = vmul.f32 %v14330_v43, %v17888_v27 }
0x10e8   : > { %v14334_v49 = vpop.eup %14333  ;;  %14353 = vpow2.f32 %v10284_v26  ;;  %v10528_v2 = vmul.f32 %v14332_v10, %v17891_v38  ;;  %v10343_v38 = vadd.f32 1.0, %v14328_v46 }
0x10e9   : > { %v14336_v37 = vpop.eup %14335  ;;  %v10527_v32 = vmul.f32 %v14334_v49, %v17894_v39  ;;  %14355 = vrcp.f32 %v10342_v57 }
0x10ea   : > { %v14338_v28 = vpop.eup %14337  ;;  %v10529_v17 = vmul.f32 %v14336_v37, %v17897_v13 }
0x10eb   : > { %v14340_v24 = vpop.eup %14339  ;;  %v10530_v30 = vmul.f32 %v14338_v28, %v17904_v11 }
0x10ec   : > { %v14342_v15 = vpop.eup %14341  ;;  %v10532_v19 = vmul.f32 %v14340_v24, %v17907_v63  ;;  %v18649_v24 = vld [vmem:[#allocation47_spill] sm:$0xff] }
0x10ed   : > { %v14344_v44 = vpop.eup %14343  ;;  %v10566_v23 = vpack.c.bf16 %v10530_v30, %v10526_v48  ;;  %v10531_v56 = vmul.f32 %v14342_v15, %v17911_v34  ;;  %v18650_v15 = vld [vmem:[#allocation16_spill] sm:$0xff] }
0x10ee   : > { %v14346_v62 = vpop.eup %14345  ;;  %v10568_v29 = vpack.c.bf16 %v10532_v19, %v10528_v2  ;;  %v10533_v27 = vmul.f32 %v14344_v44, %v17916_v45 }
0x10ef   : > { %v14348_v11 = vpop.eup %14347  ;;  %v10567_v47 = vpack.c.bf16 %v10531_v56, %v10527_v32  ;;  %v10345_v9 = vadd.f32 1.0, %v14346_v62 }
0x10f0   : > { %v10346_v35 = vadd.f32 1.0, %v14348_v11  ;;  %v10569_v63 = vpack.c.bf16 %v10533_v27, %v10529_v17  ;;  %v14350_v39 = vpop.eup %14349 }
0x10f1   : > { %10917 = vmatprep.mubr.bf16.mxu1 %v10567_v47  ;;  %v14352_v34 = vpop.eup %14351  ;;  %v10348_v59 = vadd.f32 1.0, %v14350_v39 }
0x10f2   : > { %14357 = vrcp.f32 %v10346_v35  ;;  %10918 = vmatmul.mubr.bf16.gmra.mrb[80].mxu1 %v10566_v23  ;;  %v14354_v13 = vpop.eup %14353  ;;  %v10347_v41 = vadd.f32 1.0, %v14352_v34 }
0x10f3   : > { %14359 = vrcp.f32 %v10344_v6  ;;  %v10349_v45 = vadd.f32 1.0, %v14354_v13  ;;  %v14356_v22 = vpop.eup %14355 }
0x10f4   : > { %14361 = vrcp.f32 %v10343_v38  ;;  %v10534_v21 = vmul.f32 %v14356_v22, %v17924_v58 }
0x10f5   : > { %14363 = vrcp.f32 %v10345_v9 }
0x10f6   : > { %14365 = vrcp.f32 %v10348_v59 }
0x10f7   : > { %14367 = vrcp.f32 %v10347_v41 }
0x10f8   : > { %14369 = vrcp.f32 %v10349_v45  ;;  %v18652_v45 = vld [vmem:[#allocation46_spill] sm:$0xff] }
0x10fc   : > { %v14358_v53 = vpop.eup %14357 }
0x10fd   : > { %v14360_v4 = vpop.eup %14359  ;;  %v10538_v31 = vmul.f32 %v14358_v53, %v17948_v3 }
0x10fe   : > { %v14362_v40 = vpop.eup %14361  ;;  %v10536_v42 = vmul.f32 %v14360_v4, %v17928_v52 }
0x10ff   : > { %v14364_v12 = vpop.eup %14363  ;;  %v10570_v8 = vpack.c.bf16 %v10538_v31, %v10534_v21  ;;  %v10535_v20 = vmul.f32 %v14362_v40, %v17931_v1  ;;  %v17985_v1 = vld [vmem:[%s755_s0] ss:$0 sm:$0xff] }
0x1100   : > { %v14366_v0 = vpop.eup %14365  ;;  %v10537_v33 = vmul.f32 %v14364_v12, %v17944_v25 }
0x1101   : > { %v14368_v55 = vpop.eup %14367  ;;  %v10540_v14 = vmul.f32 %v14366_v0, %v17953_v36 }
0x1102   : > { %v14370_v50 = vpop.eup %14369  ;;  %v10539_v7 = vmul.f32 %v14368_v55, %v17956_v16 }
0x1103   : > { %v10572_v58 = vpack.c.bf16 %v10540_v14, %v10536_v42  ;;  %v10541_v3 = vmul.f32 %v14370_v50, %v17959_v61  ;;  %v18653_v50 = vld [vmem:[#allocation19_spill] sm:$0xff] }
0x1104   : > { %v10571_v60 = vpack.c.bf16 %v10539_v7, %v10535_v20 }
0x1105   : > { %v10573_v18 = vpack.c.bf16 %v10541_v3, %v10537_v33  ;;  %v18654_v33 = vld [vmem:[#allocation33_spill] sm:$0xff] }
0x1106   : > { %10925 = vmatprep.mubr.bf16.mxu1 %v10571_v60 }
0x1107   : > { %10926 = vmatmul.mubr.bf16.gmra.mrb[84].mxu1 %v10570_v8 }
0x1108   : > { %11014 = vmatprep.mubr.bf16.mxu1 %v10569_v63  ;;  %v18651_v63 = vld [vmem:[#allocation27_spill] sm:$0xff] }
0x110f   : > { %11015 = vmatmul.mubr.bf16.vlgmr.msra.gmra.mrb[88].mxu1 %v10568_v29 }
0x1110   : > { %11022 = vmatprep.mubr.bf16.mxu1 %v10573_v18 }
0x1117   : > { %11023 = vmatmul.mubr.bf16.gmra.mrb[92].mxu1 %v10572_v58 }
0x1170   : > { %v12603_v52 = vpop.f32.mrb[56].mxu1 }
0x1171   : > { %v12604_v36 = vpop.f32.mrb[57].mxu1 }
0x1172   : > { %v12605_v16 = vadd.f32 %v12604_v36, %v12603_v52  ;;  %v12606_v5 = vpop.f32.mrb[58].mxu1 }
0x1173   : > { %v12667_v25 = vpop.f32.mrb[72].mxu0  ;;  %v12607_v46 = vpop.f32.mrb[59].mxu1 }
0x1174   : > { %v12668_v61 = vpop.f32.mrb[73].mxu0  ;;  %v10872_v54 = vadd.f32 %v12605_v16, %v17985_v1  ;;  %v12608_v10 = vadd.f32 %v12607_v46, %v12606_v5 }
0x1175   : > { %v12669_v43 = vadd.f32 %v12668_v61, %v12667_v25  ;;  %v12670_v51 = vpop.f32.mrb[74].mxu0 }
0x1176   : > { %v12671_v26 = vpop.f32.mrb[75].mxu0  ;;  %v10875_v37 = vadd.f32 %v12608_v10, %v17985_v1 }
0x1177   : > { %v10969_v49 = vadd.f32 %v12669_v43, %v10872_v54  ;;  %v12672_v28 = vadd.f32 %v12671_v26, %v12670_v51 }
0x1179   : > { %v17990_v48 = vadd.f32 %v10969_v49, %v18649_v24  ;;  %v10972_v30 = vadd.f32 %v12672_v28, %v10875_v37  ;;  %v18655_v49 = vld [vmem:[#allocation20_spill] sm:$0xff] }
0x117b   : > { %11047 = vst [vmem:[#allocation2] sm:$0xff] %v17990_v48  ;;  %v17994_v2 = vadd.f32 %v10972_v30, %v18650_v15  ;;  %v18656_v15 = vld [vmem:[#allocation34_spill] sm:$0xff]  ;;  %11069 = vadd.xlane.f32.xlu0 (!%p12188_p8), %v17990_v48 }
0x117d   : > { %11048 = vst [vmem:[#allocation2 + $0x8] sm:$0xff] %v17994_v2 }
0x117f   : > { %v12609_v19 = vpop.f32.mrb[60].mxu1  ;;  %v12673_v57 = vpop.f32.mrb[76].mxu0  ;;  %11071 = vadd.xlane.f32.xlu0 (!%p12188_p8), %v17994_v2 }
0x1180   : > { %v12610_v44 = vpop.f32.mrb[61].mxu1  ;;  %v12674_v32 = vpop.f32.mrb[77].mxu0 }
0x1181   : > { %v12611_v23 = vadd.f32 %v12610_v44, %v12609_v19  ;;  %v12675_v56 = vadd.f32 %v12674_v32, %v12673_v57  ;;  %v12612_v62 = vpop.f32.mrb[62].mxu1  ;;  %v12676_v17 = vpop.f32.mrb[78].mxu0 }
0x1182   : > { %v12613_v29 = vpop.f32.mrb[63].mxu1  ;;  %v12677_v27 = vpop.f32.mrb[79].mxu0 }
0x1183   : > { %v10880_v11 = vadd.f32 %v12611_v23, %v17985_v1  ;;  %v12614_v6 = vadd.f32 %v12613_v29, %v12612_v62  ;;  %v12678_v47 = vadd.f32 %v12677_v27, %v12676_v17 }
0x1185   : > { %v10977_v38 = vadd.f32 %v12675_v56, %v10880_v11  ;;  %v10883_v35 = vadd.f32 %v12614_v6, %v17985_v1 }
0x1187   : > { %v18000_v9 = vadd.f32 %v10977_v38, %v18651_v63  ;;  %v10980_v39 = vadd.f32 %v12678_v47, %v10883_v35  ;;  %v12615_v34 = vpop.f32.mrb[64].mxu1  ;;  %v12679_v59 = vpop.f32.mrb[80].mxu0  ;;  %v18657_v35 = vld [vmem:[#allocation48_spill] sm:$0xff] }
0x1188   : > { %v12616_v13 = vpop.f32.mrb[65].mxu1  ;;  %v12680_v41 = vpop.f32.mrb[81].mxu0 }
0x1189   : > { %11049 = vst [vmem:[#allocation2 + $0x10] sm:$0xff] %v18000_v9  ;;  %v18004_v22 = vadd.f32 %v10980_v39, %v18652_v45  ;;  %v12617_v53 = vadd.f32 %v12616_v13, %v12615_v34  ;;  %v12681_v4 = vadd.f32 %v12680_v41, %v12679_v59  ;;  %v12618_v21 = vpop.f32.mrb[66].mxu1  ;;  %v12682_v31 = vpop.f32.mrb[82].mxu0  ;;  %v18658_v59 = vld [vmem:[#allocation24_spill] sm:$0xff]  ;;  %11073 = vadd.xlane.f32.xlu0 (!%p12188_p8), %v18000_v9 }
0x118a   : > { %v12619_v40 = vpop.f32.mrb[67].mxu1  ;;  %v12683_v12 = vpop.f32.mrb[83].mxu0 }
0x118b   : > { %11050 = vst [vmem:[#allocation2 + $0x18] sm:$0xff] %v18004_v22  ;;  %v10888_v8 = vadd.f32 %v12617_v53, %v17985_v1  ;;  %v12620_v0 = vadd.f32 %v12619_v40, %v12618_v21  ;;  %v12684_v55 = vadd.f32 %v12683_v12, %v12682_v31 }
0x118d   : > { %v10985_v42 = vadd.f32 %v12681_v4, %v10888_v8  ;;  %v10891_v14 = vadd.f32 %v12620_v0, %v17985_v1 }
0x118f   : > { %v18010_v20 = vadd.f32 %v10985_v42, %v18653_v50  ;;  %v10988_v7 = vadd.f32 %v12684_v55, %v10891_v14 }
0x1191   : > { %11051 = vst [vmem:[#allocation2 + $0x20] sm:$0xff] %v18010_v20  ;;  %v18014_v58 = vadd.f32 %v10988_v7, %v18654_v33  ;;  %v18659_v7 = vld [vmem:[#allocation35_spill] sm:$0xff] }
0x1193   : > { %11052 = vst [vmem:[#allocation2 + $0x28] sm:$0xff] %v18014_v58  ;;  %v12621_v3 = vpop.f32.mrb[68].mxu1 }
0x1194   : > { %v12685_v60 = vpop.f32.mrb[84].mxu0  ;;  %v12622_v18 = vpop.f32.mrb[69].mxu1 }
0x1195   : > { %v12623_v52 = vadd.f32 %v12622_v18, %v12621_v3  ;;  %v12686_v36 = vpop.f32.mrb[85].mxu0  ;;  %v12624_v25 = vpop.f32.mrb[70].mxu1 }
0x1196   : > { %v12687_v16 = vadd.f32 %v12686_v36, %v12685_v60  ;;  %v12688_v5 = vpop.f32.mrb[86].mxu0  ;;  %v12625_v61 = vpop.f32.mrb[71].mxu1  ;;  %v18660_v60 = vld [vmem:[#allocation49_spill] sm:$0xff] }
0x1197   : > { %v10896_v46 = vadd.f32 %v12623_v52, %v17985_v1  ;;  %v12626_v54 = vadd.f32 %v12625_v61, %v12624_v25  ;;  %v12689_v43 = vpop.f32.mrb[87].mxu0 }
0x1198   : > { %v12690_v51 = vadd.f32 %v12689_v43, %v12688_v5 }
0x1199   : > { %v10993_v10 = vadd.f32 %v12687_v16, %v10896_v46  ;;  %v10899_v26 = vadd.f32 %v12626_v54, %v17985_v1 }
0x119b   : > { %v18020_v37 = vadd.f32 %v10993_v10, %v18655_v49  ;;  %v10996_v28 = vadd.f32 %v12690_v51, %v10899_v26  ;;  %v12627_v24 = vpop.f32.mrb[72].mxu1 }
0x119c   : > { %v12628_v30 = vpop.f32.mrb[73].mxu1 }
0x119d   : > { %11053 = vst [vmem:[#allocation2 + $0x30] sm:$0xff] %v18020_v37  ;;  %v18024_v19 = vadd.f32 %v10996_v28, %v18656_v15  ;;  %v12629_v57 = vadd.f32 %v12628_v30, %v12627_v24  ;;  %v12630_v44 = vpop.f32.mrb[74].mxu1 }
0x119e   : > { %v12631_v32 = vpop.f32.mrb[75].mxu1 }
0x119f   : > { %11054 = vst [vmem:[#allocation2 + $0x38] sm:$0xff] %v18024_v19  ;;  %v12632_v23 = vadd.f32 %v12631_v32, %v12630_v44  ;;  %v10904_v62 = vadd.f32 %v12629_v57, %v17985_v1 }
0x11a1   : > { %v10907_v11 = vadd.f32 %v12632_v23, %v17985_v1 }
0x11a9   : > { %v12691_v56 = vpop.f32.mrb[88].mxu0 }
0x11aa   : > { %v12692_v17 = vpop.f32.mrb[89].mxu0 }
0x11ab   : > { %v12693_v29 = vadd.f32 %v12692_v17, %v12691_v56  ;;  %v12694_v27 = vpop.f32.mrb[90].mxu0  ;;  %v18661_v56 = vld [vmem:[#allocation21_spill] sm:$0xff] }
0x11ac   : > { %v12695_v6 = vpop.f32.mrb[91].mxu0 }
0x11ad   : > { %v11001_v47 = vadd.f32 %v12693_v29, %v10904_v62  ;;  %v12696_v38 = vadd.f32 %v12695_v6, %v12694_v27  ;;  %v18662_v29 = vld [vmem:[#allocation29_spill] sm:$0xff] }
0x11af   : > { %v18030_v63 = vadd.f32 %v11001_v47, %v18657_v35  ;;  %v11004_v39 = vadd.f32 %v12696_v38, %v10907_v11 }
0x11b0   : > { %v12633_v34 = vpop.f32.mrb[76].mxu1 }
0x11b1   : > { %11055 = vst [vmem:[#allocation2 + $0x40] sm:$0xff] %v18030_v63  ;;  %v18034_v13 = vadd.f32 %v11004_v39, %v18658_v59  ;;  %v12697_v41 = vpop.f32.mrb[92].mxu0  ;;  %v12634_v45 = vpop.f32.mrb[77].mxu1  ;;  %11085 = vadd.xlane.f32.xlu1 (!%p12188_p8), %v18030_v63 }
0x11b2   : > { %v12635_v53 = vadd.f32 %v12634_v45, %v12633_v34  ;;  %v12698_v4 = vpop.f32.mrb[93].mxu0  ;;  %v12636_v21 = vpop.f32.mrb[78].mxu1  ;;  %v18663_v45 = vld [vmem:[#allocation30_spill] sm:$0xff] }
0x11b3   : > { %11056 = vst [vmem:[#allocation2 + $0x48] sm:$0xff] %v18034_v13  ;;  %v12699_v31 = vadd.f32 %v12698_v4, %v12697_v41  ;;  %v12700_v40 = vpop.f32.mrb[94].mxu0  ;;  %v12637_v12 = vpop.f32.mrb[79].mxu1 }
0x11b4   : > { %v10912_v8 = vadd.f32 %v12635_v53, %v17985_v1  ;;  %v12638_v0 = vadd.f32 %v12637_v12, %v12636_v21  ;;  %v12701_v55 = vpop.f32.mrb[95].mxu0  ;;  %v18664_v21 = vld [vmem:[#allocation31_spill] sm:$0xff] }
0x11b5   : > { %v12702_v42 = vadd.f32 %v12701_v55, %v12700_v40  ;;  %11087 = vadd.xlane.f32.xlu1 (!%p12188_p8), %v18034_v13 }
0x11b6   : > { %v11009_v14 = vadd.f32 %v12699_v31, %v10912_v8  ;;  %v10915_v50 = vadd.f32 %v12638_v0, %v17985_v1 }
0x11b8   : > { %v18040_v33 = vadd.f32 %v11009_v14, %v18659_v7  ;;  %v11012_v3 = vadd.f32 %v12702_v42, %v10915_v50 }
0x11b9   : > { %11075 = vadd.xlane.f32.xlu1 (!%p12188_p8), %v18004_v22 }
0x11ba   : > { %11057 = vst [vmem:[#allocation2 + $0x50] sm:$0xff] %v18040_v33  ;;  %v18044_v18 = vadd.f32 %v11012_v3, %v18660_v60  ;;  %11089 = vadd.xlane.f32.xlu0 (!%p12188_p8), %v18040_v33 }
0x11bc   : > { %11058 = vst [vmem:[#allocation2 + $0x58] sm:$0xff] %v18044_v18 }
0x11bd   : > { %11091 = vadd.xlane.f32.xlu1 (!%p12188_p8), %v18044_v18 }
0x11be   : > { %11077 = vadd.xlane.f32.xlu0 (!%p12188_p8), %v18010_v20 }
0x11c1   : > { %11079 = vadd.xlane.f32.xlu1 (!%p12188_p8), %v18014_v58 }
0x11c5   : > { %v12639_v52 = vpop.f32.mrb[80].mxu1 }
0x11c6   : > { %v12640_v36 = vpop.f32.mrb[81].mxu1 }
0x11c7   : > { %v12641_v25 = vadd.f32 %v12640_v36, %v12639_v52  ;;  %v12642_v16 = vpop.f32.mrb[82].mxu1 }
0x11c8   : > { %v12643_v5 = vpop.f32.mrb[83].mxu1 }
0x11c9   : > { %v12644_v61 = vadd.f32 %v12643_v5, %v12642_v16  ;;  %v10920_v24 = vadd.f32 %v12641_v25, %v17985_v1 }
0x11cb   : > { %v10923_v44 = vadd.f32 %v12644_v61, %v17985_v1 }
0x11da   : > { %v12645_v46 = vpop.f32.mrb[84].mxu1 }
0x11db   : > { %v12646_v54 = vpop.f32.mrb[85].mxu1 }
0x11dc   : > { %v12647_v43 = vadd.f32 %v12646_v54, %v12645_v46  ;;  %v12648_v51 = vpop.f32.mrb[86].mxu1 }
0x11dd   : > { %v12649_v10 = vpop.f32.mrb[87].mxu1 }
0x11de   : > { %v12650_v26 = vadd.f32 %v12649_v10, %v12648_v51  ;;  %v10928_v47 = vadd.f32 %v12647_v43, %v17985_v1 }
0x11e0   : > { %v10931_v34 = vadd.f32 %v12650_v26, %v17985_v1 }
0x11e2   : > { %v12703_v49 = vpop.f32.mrb[88].mxu1 }
0x11e3   : > { %v12704_v28 = vpop.f32.mrb[89].mxu1 }
0x11e4   : > { %v12705_v30 = vadd.f32 %v12704_v28, %v12703_v49  ;;  %v12706_v15 = vpop.f32.mrb[90].mxu1 }
0x11e5   : > { %v12707_v57 = vpop.f32.mrb[91].mxu1 }
0x11e6   : > { %v11017_v32 = vadd.f32 %v12705_v30, %v10920_v24  ;;  %v12708_v23 = vadd.f32 %v12707_v57, %v12706_v15 }
0x11e8   : > { %v18050_v62 = vadd.f32 %v11017_v32, %v18661_v56  ;;  %v11020_v17 = vadd.f32 %v12708_v23, %v10923_v44 }
0x11ea   : > { %11059 = vst [vmem:[#allocation2 + $0x60] sm:$0xff] %v18050_v62  ;;  %v18054_v27 = vadd.f32 %v11020_v17, %v18662_v29  ;;  %v12709_v11 = vpop.f32.mrb[92].mxu1  ;;  %11093 = vadd.xlane.f32.xlu0 (!%p12188_p8), %v18050_v62 }
0x11eb   : > { %v12710_v6 = vpop.f32.mrb[93].mxu1 }
0x11ec   : > { %11060 = vst [vmem:[#allocation2 + $0x68] sm:$0xff] %v18054_v27  ;;  %v12711_v38 = vadd.f32 %v12710_v6, %v12709_v11  ;;  %v12712_v35 = vpop.f32.mrb[94].mxu1  ;;  %11095 = vadd.xlane.f32.xlu1 (!%p12188_p8), %v18054_v27  ;;  %v14390_v11 = vld [vmem:[%s18666_s25] sm:$0xff] (!%p12188_p8)   ;;  %s18669_s25 = sld [smem:[#allocation60_spill]] (!%p12188_p8) }
0x11ed   : > { %v12713_v39 = vpop.f32.mrb[95].mxu1  ;;  %13563 = vmatprep.subr.bf16.mxu0 (!%p12188_p8), %v14390_v11  ;;  %13611 = vmatprep.subr.bf16.mxu1 (!%p12188_p8), %v14390_v11 }
0x11ee   : > { %v11025_v59 = vadd.f32 %v12711_v38, %v10928_v47  ;;  %v12714_v41 = vadd.f32 %v12713_v39, %v12712_v35  ;;  %11066 = sbr.rel (%p12188_p8) target bundleno = 5127 (0x1407), region = 96  ;;  %11081 = vadd.xlane.f32.xlu0 (!%p12188_p8), %v18020_v37  ;;  %13564 = vmatpush3.bf16.msra.mxu0 (!%p12188_p8), %v14390_v11 }
0x11ef   : > { %13619 = vmatpush3.bf16.msra.mxu1 (!%p12188_p8), %v14390_v11 }
0x11f0   : > { %v18060_v53 = vadd.f32 %v11025_v59, %v18663_v45  ;;  %v11028_v4 = vadd.f32 %v12714_v41, %v10931_v34  ;;  %11083 = vadd.xlane.f32.xlu1 (!%p12188_p8), %v18024_v19  ;;  %v14391_v59 = vld [vmem:[%s18667_s16 + $0x8] sm:$0xff] (!%p12188_p8)  }
0x11f1   : > { %13565 = vmatprep.subr.bf16.mxu0 (!%p12188_p8), %v14391_v59  ;;  %13612 = vmatprep.subr.bf16.mxu1 (!%p12188_p8), %v14391_v59 }
0x11f2   : > { %11061 = vst [vmem:[#allocation2 + $0x70] sm:$0xff] %v18060_v53  ;;  %v18064_v31 = vadd.f32 %v11028_v4, %v18664_v21  ;;  %11097 = vadd.xlane.f32.xlu0 (!%p12188_p8), %v18060_v53  ;;  %13566 = vmatpush3.bf16.msra.mxu0 (!%p12188_p8), %v14391_v59 }
0x11f3   : > { %13620 = vmatpush3.bf16.msra.mxu1 (!%p12188_p8), %v14391_v59 }
0x11f4   : > { %11062 = vst [vmem:[#allocation2 + $0x78] sm:$0xff] %v18064_v31  ;;  %11099 = vadd.xlane.f32.xlu1 (!%p12188_p8), %v18064_v31 }
0x1208   : > { %v11070_v1 = vpop.xlane.xlu0 %11069 }
0x1209   : > { %v11101_v12 = vmul.f32 0.0078125, %v11070_v1 }
0x120b   : > { %v18085_v0 = vsub.f32 %v17990_v48, %v11101_v12  ;;  %v14392_v12 = vld [vmem:[%s18667_s16 + $0x10] sm:$0xff]  }
0x120c   : > { %v11072_v42 = vpop.xlane.xlu0 %11071  ;;  %13567 = vmatprep.subr.bf16.mxu0 %v14392_v12  ;;  %13613 = vmatprep.subr.bf16.mxu1 %v14392_v12 }
0x120d   : > { %v11102_v50 = vmul.f32 0.0078125, %v11072_v42  ;;  %v11133_v7 = vmul.f32 %v18085_v0, %v18085_v0  ;;  %13568 = vmatpush3.bf16.msra.mxu0 %v14392_v12  ;;  %13621 = vmatpush3.bf16.msra.mxu1 %v14392_v12  ;;  %v14394_v42 = vld [vmem:[%s18667_s16 + $0x20] sm:$0xff]  }
0x120f   : > { %v18093_v60 = vsub.f32 %v17994_v2, %v11102_v50  ;;  %11149 = vadd.xlane.f32.xlu0 %v11133_v7  ;;  %v14396_v50 = vld [vmem:[%s18667_s16 + $0x30] sm:$0xff]   ;;  %v14397_v7 = vld [vmem:[%s18667_s16 + $0x38] sm:$0xff]  }
0x1211   : > { %v11134_v16 = vmul.f32 %v18093_v60, %v18093_v60 }
0x1213   : > { %11151 = vadd.xlane.f32.xlu1 %v11134_v16 }
0x1216   : > { %v11074_v36 = vpop.xlane.xlu0 %11073 }
0x1217   : > { %v11103_v25 = vmul.f32 0.0078125, %v11074_v36 }
0x1219   : > { %v18103_v61 = vsub.f32 %v18000_v9, %v11103_v25 }
0x121b   : > { %v11135_v51 = vmul.f32 %v18103_v61, %v18103_v61 }
0x123e   : > { %v11086_v40 = vpop.xlane.xlu1 %11085 }
0x123f   : > { %v11109_v8 = vmul.f32 0.0078125, %v11086_v40 }
0x1241   : > { %v18088_v55 = vsub.f32 %v18030_v63, %v11109_v8 }
0x1242   : > { %v11088_v14 = vpop.xlane.xlu1 %11087 }
0x1243   : > { %v11110_v3 = vmul.f32 0.0078125, %v11088_v14  ;;  %v11141_v48 = vmul.f32 %v18088_v55, %v18088_v55  ;;  %v14395_v14 = vld [vmem:[%s18667_s16 + $0x28] sm:$0xff]  }
0x1245   : > { %v18096_v52 = vsub.f32 %v18034_v13, %v11110_v3  ;;  %11165 = vadd.xlane.f32.xlu0 %v11141_v48 }
0x1246   : > { %v11076_v63 = vpop.xlane.xlu1 %11075 }
0x1247   : > { %v11104_v5 = vmul.f32 0.0078125, %v11076_v63  ;;  %v11142_v13 = vmul.f32 %v18096_v52, %v18096_v52  ;;  %v11090_v46 = vpop.xlane.xlu0 %11089 }
0x1248   : > { %v11111_v43 = vmul.f32 0.0078125, %v11090_v46 }
0x1249   : > { %v18106_v2 = vsub.f32 %v18004_v22, %v11104_v5  ;;  %11167 = vadd.xlane.f32.xlu1 %v11142_v13  ;;  %11153 = vadd.xlane.f32.xlu0 %v11135_v51 }
0x124a   : > { %v11092_v54 = vpop.xlane.xlu1 %11091  ;;  %v18113_v26 = vsub.f32 %v18040_v33, %v11111_v43 }
0x124b   : > { %v11112_v10 = vmul.f32 0.0078125, %v11092_v54  ;;  %v11136_v22 = vmul.f32 %v18106_v2, %v18106_v2  ;;  %v11078_v49 = vpop.xlane.xlu0 %11077 }
0x124c   : > { %v11105_v24 = vmul.f32 0.0078125, %v11078_v49  ;;  %v11143_v30 = vmul.f32 %v18113_v26, %v18113_v26 }
0x124d   : > { %v18116_v9 = vsub.f32 %v18044_v18, %v11112_v10  ;;  %11155 = vadd.xlane.f32.xlu1 %v11136_v22 }
0x124e   : > { %v11080_v28 = vpop.xlane.xlu1 %11079  ;;  %v18123_v57 = vsub.f32 %v18010_v20, %v11105_v24  ;;  %11169 = vadd.xlane.f32.xlu0 %v11143_v30 }
0x124f   : > { %v11106_v15 = vmul.f32 0.0078125, %v11080_v28  ;;  %v11144_v18 = vmul.f32 %v18116_v9, %v18116_v9 }
0x1250   : > { %v11137_v56 = vmul.f32 %v18123_v57, %v18123_v57 }
0x1251   : > { %v18126_v33 = vsub.f32 %v18014_v58, %v11106_v15  ;;  %11171 = vadd.xlane.f32.xlu1 %v11144_v18 }
0x1252   : > { %11157 = vadd.xlane.f32.xlu0 %v11137_v56 }
0x1253   : > { %v11138_v58 = vmul.f32 %v18126_v33, %v18126_v33 }
0x1255   : > { %11159 = vadd.xlane.f32.xlu1 %v11138_v58 }
0x1277   : > { %v11094_v44 = vpop.xlane.xlu0 %11093 }
0x1278   : > { %v11113_v23 = vmul.f32 0.0078125, %v11094_v44 }
0x1279   : > { %v11096_v32 = vpop.xlane.xlu1 %11095 }
0x127a   : > { %v11114_v17 = vmul.f32 0.0078125, %v11096_v32  ;;  %v18133_v29 = vsub.f32 %v18050_v62, %v11113_v23 }
0x127b   : > { %v11082_v6 = vpop.xlane.xlu0 %11081 }
0x127c   : > { %v18136_v20 = vsub.f32 %v18054_v27, %v11114_v17  ;;  %v11107_v38 = vmul.f32 0.0078125, %v11082_v6  ;;  %v11145_v35 = vmul.f32 %v18133_v29, %v18133_v29  ;;  %v18192_v6 = vld [vmem:[%s18668_s18] ss:$0 sm:$0xff] }
0x127d   : > { %v11084_v47 = vpop.xlane.xlu1 %11083 }
0x127e   : > { %v11108_v62 = vmul.f32 0.0078125, %v11084_v47  ;;  %v18146_v27 = vsub.f32 %v18020_v37, %v11107_v38  ;;  %11173 = vadd.xlane.f32.xlu0 %v11145_v35  ;;  %v11146_v34 = vmul.f32 %v18136_v20, %v18136_v20 }
0x127f   : > { %v11098_v41 = vpop.xlane.xlu0 %11097 }
0x1280   : > { %v18149_v39 = vsub.f32 %v18024_v19, %v11108_v62  ;;  %v11115_v4 = vmul.f32 0.0078125, %v11098_v41  ;;  %v11139_v21 = vmul.f32 %v18146_v27, %v18146_v27  ;;  %11175 = vadd.xlane.f32.xlu1 %v11146_v34 }
0x1281   : > { %v11100_v45 = vpop.xlane.xlu1 %11099 }
0x1282   : > { %v11116_v37 = vmul.f32 0.0078125, %v11100_v45  ;;  %v18159_v19 = vsub.f32 %v18060_v53, %v11115_v4  ;;  %11161 = vadd.xlane.f32.xlu0 %v11139_v21  ;;  %v11140_v40 = vmul.f32 %v18149_v39, %v18149_v39  ;;  %v18199_v21 = vld [vmem:[%s18669_s25] ss:$0 sm:$0xff] }
0x1284   : > { %v18162_v1 = vsub.f32 %v18064_v31, %v11116_v37  ;;  %v11147_v8 = vmul.f32 %v18159_v19, %v18159_v19  ;;  %11163 = vadd.xlane.f32.xlu1 %v11140_v40  ;;  %v14393_v31 = vld [vmem:[%s18667_s16 + $0x18] sm:$0xff]  }
0x1285   : > { %13569 = vmatprep.subr.bf16.mxu0 %v14393_v31  ;;  %13614 = vmatprep.subr.bf16.mxu1 %v14393_v31 }
0x1286   : > { %11177 = vadd.xlane.f32.xlu0 %v11147_v8  ;;  %v11148_v53 = vmul.f32 %v18162_v1, %v18162_v1  ;;  %13570 = vmatpush3.bf16.msra.mxu0 %v14393_v31 }
0x1287   : > { %13622 = vmatpush3.bf16.msra.mxu1 %v14393_v31  ;;  %13571 = vmatprep.subr.bf16.mxu0 %v14394_v42 }
0x1288   : > { %11179 = vadd.xlane.f32.xlu1 %v11148_v53  ;;  %13615 = vmatprep.subr.bf16.mxu1 %v14394_v42 }
0x128a   : > { %13572 = vmatpush3.bf16.msra.mxu0 %v14394_v42 }
0x128b   : > { %13623 = vmatpush3.bf16.msra.mxu1 %v14394_v42  ;;  %13573 = vmatprep.subr.bf16.mxu0 %v14395_v14 }
0x128c   : > { %13616 = vmatprep.subr.bf16.mxu1 %v14395_v14 }
0x128e   : > { %13574 = vmatpush3.bf16.msra.mxu0 %v14395_v14 }
0x128f   : > { %13624 = vmatpush3.bf16.msra.mxu1 %v14395_v14  ;;  %13575 = vmatprep.subr.bf16.mxu0 %v14396_v50 }
0x1290   : > { %13617 = vmatprep.subr.bf16.mxu1 %v14396_v50 }
0x1292   : > { %13576 = vmatpush3.bf16.msra.mxu0 %v14396_v50 }
0x1293   : > { %13625 = vmatpush3.bf16.msra.mxu1 %v14396_v50  ;;  %13577 = vmatprep.subr.bf16.mxu0 %v14397_v7 }
0x1294   : > { %13618 = vmatprep.subr.bf16.mxu1 %v14397_v7 }
0x1296   : > { %13578 = vmatpush3.bf16.msra.mxu0 %v14397_v7 }
0x1297   : > { %13626 = vmatpush3.bf16.msra.mxu1 %v14397_v7 }
0x129c   : > { %v11150_v3 = vpop.xlane.xlu0 %11149 }
0x129d   : > { %v11181_v48 = vmul.f32 0.0078125, %v11150_v3 }
0x129f   : > { %v11197_v36 = vadd.f32 1e-05, %v11181_v48 }
0x12a0   : > { %v11152_v63 = vpop.xlane.xlu1 %11151 }
0x12a1   : > { %14398 = vrsqrt.f32 %v11197_v36  ;;  %v11182_v16 = vmul.f32 0.0078125, %v11152_v63 }
0x12a3   : > { %v11198_v13 = vadd.f32 1e-05, %v11182_v16 }
0x12a5   : > { %14400 = vrsqrt.f32 %v11198_v13 }
0x12ab   : > { %v14399_v18 = vpop.eup %14398 }
0x12ac   : > { %v11229_v17 = vmul.f32 %v14399_v18, %v18085_v0 }
0x12ae   : > { %v11251_v45 = vmul.f32 %v18192_v6, %v11229_v17 }
0x12af   : > { %v14401_v47 = vpop.eup %14400 }
0x12b0   : > { %v11230_v41 = vmul.f32 %v14401_v47, %v18093_v60  ;;  %v11273_v14 = vadd.f32 %v18199_v21, %v11251_v45 }
0x12b2   : > { %v11252_v40 = vmul.f32 %v18192_v6, %v11230_v41 }
0x12b4   : > { %v11274_v50 = vadd.f32 %v18199_v21, %v11252_v40 }
0x12b6   : > { %v11289_v36 = vpack.c.bf16 %v11274_v50, %v11273_v14 }
0x12b8   : > { %13579 = vmatprep.mubr.bf16.mxu0 %v11289_v36 }
0x12d2   : > { %v11166_v25 = vpop.xlane.xlu0 %11165 }
0x12d3   : > { %v11189_v5 = vmul.f32 0.0078125, %v11166_v25 }
0x12d5   : > { %v11205_v46 = vadd.f32 1e-05, %v11189_v5 }
0x12d6   : > { %v11168_v54 = vpop.xlane.xlu1 %11167  ;;  %v11154_v43 = vpop.xlane.xlu0 %11153 }
0x12d7   : > { %v11190_v51 = vmul.f32 0.0078125, %v11168_v54  ;;  %v11183_v10 = vmul.f32 0.0078125, %v11154_v43  ;;  %14402 = vrsqrt.f32 %v11205_v46 }
0x12d9   : > { %v11206_v22 = vadd.f32 1e-05, %v11190_v51  ;;  %v11199_v49 = vadd.f32 1e-05, %v11183_v10 }
0x12da   : > { %v11156_v28 = vpop.xlane.xlu1 %11155 }
0x12db   : > { %v11170_v24 = vpop.xlane.xlu0 %11169  ;;  %14404 = vrsqrt.f32 %v11206_v22  ;;  %v11184_v30 = vmul.f32 0.0078125, %v11156_v28 }
0x12dc   : > { %v11191_v15 = vmul.f32 0.0078125, %v11170_v24  ;;  %14406 = vrsqrt.f32 %v11199_v49 }
0x12dd   : > { %v11200_v44 = vadd.f32 1e-05, %v11184_v30 }
0x12de   : > { %v11207_v32 = vadd.f32 1e-05, %v11191_v15  ;;  %v11172_v23 = vpop.xlane.xlu1 %11171 }
0x12df   : > { %v11158_v56 = vpop.xlane.xlu0 %11157  ;;  %14408 = vrsqrt.f32 %v11200_v44  ;;  %v11192_v58 = vmul.f32 0.0078125, %v11172_v23 }
0x12e0   : > { %v11185_v11 = vmul.f32 0.0078125, %v11158_v56  ;;  %14410 = vrsqrt.f32 %v11207_v32 }
0x12e1   : > { %v11208_v38 = vadd.f32 1e-05, %v11192_v58  ;;  %v14403_v62 = vpop.eup %14402 }
0x12e2   : > { %v11201_v35 = vadd.f32 1e-05, %v11185_v11  ;;  %v11160_v34 = vpop.xlane.xlu1 %11159  ;;  %v11237_v37 = vmul.f32 %v14403_v62, %v18088_v55 }
0x12e3   : > { %14412 = vrsqrt.f32 %v11208_v38  ;;  %v11186_v0 = vmul.f32 0.0078125, %v11160_v34 }
0x12e4   : > { %14414 = vrsqrt.f32 %v11201_v35  ;;  %v11259_v3 = vmul.f32 %v18192_v6, %v11237_v37 }
0x12e5   : > { %v14405_v12 = vpop.eup %14404  ;;  %v11202_v8 = vadd.f32 1e-05, %v11186_v0 }
0x12e6   : > { %v14407_v31 = vpop.eup %14406  ;;  %v11238_v7 = vmul.f32 %v14405_v12, %v18096_v52  ;;  %v11281_v52 = vadd.f32 %v18199_v21, %v11259_v3 }
0x12e7   : > { %14416 = vrsqrt.f32 %v11202_v8  ;;  %v11231_v25 = vmul.f32 %v14407_v31, %v18103_v61 }
0x12e8   : > { %v11260_v63 = vmul.f32 %v18192_v6, %v11238_v7 }
0x12e9   : > { %v14409_v16 = vpop.eup %14408  ;;  %v11253_v22 = vmul.f32 %v18192_v6, %v11231_v25 }
0x12ea   : > { %v14411_v46 = vpop.eup %14410  ;;  %v11282_v51 = vadd.f32 %v18199_v21, %v11260_v63  ;;  %v11232_v10 = vmul.f32 %v14409_v16, %v18106_v2 }
0x12eb   : > { %v11239_v61 = vmul.f32 %v14411_v46, %v18113_v26  ;;  %v11275_v56 = vadd.f32 %v18199_v21, %v11253_v22 }
0x12ec   : > { %v11293_v24 = vpack.c.bf16 %v11282_v51, %v11281_v52  ;;  %v11254_v30 = vmul.f32 %v18192_v6, %v11232_v10 }
0x12ed   : > { %v14413_v15 = vpop.eup %14412  ;;  %v11261_v58 = vmul.f32 %v18192_v6, %v11239_v61 }
0x12ee   : > { %v14415_v32 = vpop.eup %14414  ;;  %13587 = vmatprep.mubr.bf16.mxu1 %v11293_v24  ;;  %v11276_v2 = vadd.f32 %v18199_v21, %v11254_v30  ;;  %v11240_v17 = vmul.f32 %v14413_v15, %v18116_v9 }
0x12ef   : > { %v11233_v11 = vmul.f32 %v14415_v32, %v18123_v57 }
0x12f0   : > { %v11290_v47 = vpack.c.bf16 %v11276_v2, %v11275_v56  ;;  %v11262_v38 = vmul.f32 %v18192_v6, %v11240_v17 }
0x12f1   : > { %v14417_v35 = vpop.eup %14416  ;;  %v11255_v45 = vmul.f32 %v18192_v6, %v11233_v11 }
0x12f2   : > { %13580 = vmatmul.mubr.bf16.vlgmr.msra.gmra.mrb[0].mxu0 %v11290_v47  ;;  %v11284_v41 = vadd.f32 %v18199_v21, %v11262_v38  ;;  %v11234_v9 = vmul.f32 %v14417_v35, %v18126_v33 }
0x12f3   : > { %v11277_v12 = vadd.f32 %v18199_v21, %v11255_v45 }
0x130b   : > { %v11174_v59 = vpop.xlane.xlu0 %11173 }
0x130c   : > { %v11193_v4 = vmul.f32 0.0078125, %v11174_v59  ;;  %v11283_v59 = vadd.f32 %v18199_v21, %v11261_v58 }
0x130d   : > { %v11176_v60 = vpop.xlane.xlu1 %11175 }
0x130e   : > { %v11209_v53 = vadd.f32 1e-05, %v11193_v4  ;;  %v11194_v48 = vmul.f32 0.0078125, %v11176_v60  ;;  %v11294_v57 = vpack.c.bf16 %v11284_v41, %v11283_v59  ;;  %v11256_v4 = vmul.f32 %v18192_v6, %v11234_v9 }
0x130f   : > { %v11162_v42 = vpop.xlane.xlu0 %11161 }
0x1310   : > { %v11187_v55 = vmul.f32 0.0078125, %v11162_v42  ;;  %14418 = vrsqrt.f32 %v11209_v53  ;;  %v11210_v5 = vadd.f32 1e-05, %v11194_v48  ;;  %13588 = vmatmul.mubr.bf16.vlgmr.msra.gmra.mrb[0].mxu1 %v11294_v57  ;;  %v11278_v8 = vadd.f32 %v18199_v21, %v11256_v4 }
0x1311   : > { %v11164_v54 = vpop.xlane.xlu1 %11163 }
0x1312   : > { %v11203_v13 = vadd.f32 1e-05, %v11187_v55  ;;  %14420 = vrsqrt.f32 %v11210_v5  ;;  %v11188_v49 = vmul.f32 0.0078125, %v11164_v54  ;;  %v11291_v60 = vpack.c.bf16 %v11278_v8, %v11277_v12 }
0x1313   : > { %v11178_v43 = vpop.xlane.xlu0 %11177 }
0x1314   : > { %v11195_v28 = vmul.f32 0.0078125, %v11178_v43  ;;  %14422 = vrsqrt.f32 %v11203_v13  ;;  %v11204_v18 = vadd.f32 1e-05, %v11188_v49  ;;  %13583 = vmatprep.mubr.bf16.mxu0 %v11291_v60 }
0x1315   : > { %v11180_v23 = vpop.xlane.xlu1 %11179 }
0x1316   : > { %v11211_v44 = vadd.f32 1e-05, %v11195_v28  ;;  %14424 = vrsqrt.f32 %v11204_v18  ;;  %v11196_v26 = vmul.f32 0.0078125, %v11180_v23 }
0x1318   : > { %14426 = vrsqrt.f32 %v11211_v44  ;;  %v11212_v62 = vadd.f32 1e-05, %v11196_v26 }
0x131a   : > { %v14419_v34 = vpop.eup %14418  ;;  %14428 = vrsqrt.f32 %v11212_v62 }
0x131b   : > { %v11241_v0 = vmul.f32 %v14419_v34, %v18133_v29 }
0x131c   : > { %v14421_v37 = vpop.eup %14420 }
0x131d   : > { %v11242_v53 = vmul.f32 %v14421_v37, %v18136_v20  ;;  %v11263_v31 = vmul.f32 %v18192_v6, %v11241_v0 }
0x131e   : > { %v14423_v40 = vpop.eup %14422 }
0x131f   : > { %v11235_v33 = vmul.f32 %v14423_v40, %v18146_v27  ;;  %v11264_v42 = vmul.f32 %v18192_v6, %v11242_v53  ;;  %v11285_v50 = vadd.f32 %v18199_v21, %v11263_v31 }
0x1320   : > { %v14425_v29 = vpop.eup %14424 }
0x1321   : > { %v11286_v7 = vadd.f32 %v18199_v21, %v11264_v42  ;;  %v11236_v3 = vmul.f32 %v14425_v29, %v18149_v39  ;;  %v11257_v48 = vmul.f32 %v18192_v6, %v11235_v33 }
0x1322   : > { %v14427_v14 = vpop.eup %14426 }
0x1323   : > { %v11243_v20 = vmul.f32 %v14427_v14, %v18159_v19  ;;  %v11295_v55 = vpack.c.bf16 %v11286_v7, %v11285_v50  ;;  %v11258_v36 = vmul.f32 %v18192_v6, %v11236_v3  ;;  %v11279_v63 = vadd.f32 %v18199_v21, %v11257_v48 }
0x1324   : > { %v14429_v27 = vpop.eup %14428 }
0x1325   : > { %13591 = vmatprep.mubr.bf16.mxu1 %v11295_v55  ;;  %v11280_v25 = vadd.f32 %v18199_v21, %v11258_v36  ;;  %v11244_v16 = vmul.f32 %v14429_v27, %v18162_v1  ;;  %v11265_v5 = vmul.f32 %v18192_v6, %v11243_v20 }
0x1327   : > { %v11292_v13 = vpack.c.bf16 %v11280_v25, %v11279_v63  ;;  %v11266_v39 = vmul.f32 %v18192_v6, %v11244_v16  ;;  %v11287_v19 = vadd.f32 %v18199_v21, %v11265_v5 }
0x1329   : > { %13584 = vmatmul.mubr.bf16.gmra.mrb[4].mxu0 %v11292_v13  ;;  %v11288_v46 = vadd.f32 %v18199_v21, %v11266_v39 }
0x132b   : > { %v11296_v54 = vpack.c.bf16 %v11288_v46, %v11287_v19 }
0x132d   : > { %13592 = vmatmul.mubr.bf16.gmra.mrb[4].mxu1 %v11296_v54 }
0x13c5   : > { %v13581_v43 = vpop.f32.mrb[0].mxu0 }
0x13c6   : > { %v11395_v52 = vpop.f32.mrb[1].mxu0 }
0x13c7   : > { %v13582_v51 = vpop.f32.mrb[2].mxu0 }
0x13c8   : > { %v12212_v1 = vpack.c.bf16 %v13582_v51, %v13581_v43  ;;  %v11398_v10 = vpop.f32.mrb[3].mxu0 }
0x13c9   : > { %v12207_v22 = vpack.c.bf16 %v11398_v10, %v11395_v52 }
0x13ca   : > { %12244 = vst [vmem:[%s14669_s1 + $0x8] sm:$0xff] %v12212_v1  }
0x13cb   : > { %12208 = vst [vmem:[%s14669_s1] sm:$0xff] %v12207_v22  }
0x13e3   : > { %v13589_v49 = vpop.f32.mrb[0].mxu1 }
0x13e4   : > { %v11427_v28 = vpop.f32.mrb[1].mxu1 }
0x13e5   : > { %v13590_v6 = vpop.f32.mrb[2].mxu1 }
0x13e6   : > { %v12232_v61 = vpack.c.bf16 %v13590_v6, %v13589_v49  ;;  %v11430_v24 = vpop.f32.mrb[3].mxu1 }
0x13e7   : > { %v12227_v21 = vpack.c.bf16 %v11430_v24, %v11427_v28 }
0x13e8   : > { %12248 = vst [vmem:[%s14669_s1 + $0x28] sm:$0xff] %v12232_v61  }
0x13e9   : > { %12247 = vst [vmem:[%s14669_s1 + $0x20] sm:$0xff] %v12227_v21  }
0x13fc   : > { %v13585_v30 = vpop.f32.mrb[4].mxu0 }
0x13fd   : > { %v11411_v15 = vpop.f32.mrb[5].mxu0 }
0x13fe   : > { %v13586_v18 = vpop.f32.mrb[6].mxu0 }
0x13ff   : > { %v12222_v44 = vpack.c.bf16 %v13586_v18, %v13585_v30  ;;  %v11414_v32 = vpop.f32.mrb[7].mxu0 }
0x1400   : > { %v12217_v23 = vpack.c.bf16 %v11414_v32, %v11411_v15  ;;  %v13593_v56 = vpop.f32.mrb[4].mxu1 }
0x1401   : > { %12246 = vst [vmem:[%s14669_s1 + $0x18] sm:$0xff] %v12222_v44   ;;  %v11443_v2 = vpop.f32.mrb[5].mxu1 }
0x1402   : > { %12245 = vst [vmem:[%s14669_s1 + $0x10] sm:$0xff] %v12217_v23   ;;  %v13594_v17 = vpop.f32.mrb[6].mxu1 }
0x1403   : > { %v12242_v58 = vpack.c.bf16 %v13594_v17, %v13593_v56  ;;  %v11446_v26 = vpop.f32.mrb[7].mxu1 }
0x1404   : > { %v12237_v11 = vpack.c.bf16 %v11446_v26, %v11443_v2 }
0x1405   : > { %12250 = vst [vmem:[%s14669_s1 + $0x38] sm:$0xff] %v12242_v58  }
0x1406   : > { %12249 = vst [vmem:[%s14669_s1 + $0x30] sm:$0xff] %v12237_v11  }
0x1407 PF: > { %s18670_s15 = sld [smem:[#allocation8_spill]]  ;;  %s18671_s24 = sld [smem:[#allocation6_spill]] }
0x1408   : > { %s18672_s25 = sld [smem:[#allocation7_spill]]  ;;  %s18673_s26 = sld [smem:[#allocation9_spill]] }
0x1409   : > { %s18674_s27 = sld [smem:[#allocation10_spill]] }
0x140d   : > { %s27_s28 = sadd.s32 1, %s18670_s15  }
0x140e   : > { %p24_p9 = scmp.ge.s32.totalorder %s27_s28, 6  }
0x1410   :  { %26 = sbr.rel (!%p24_p9) target bundleno = 11 (0xb), region = 162 }

</bundles_post_ra>
